<compile_context>
chip_gen: v5e
topology: v5e:2x2
jax: 0.10.0
libtpu: 0.0.40
codegen_flags: <defaults>
</compile_context>

<pallas_src>
import functools

import jax
import jax.numpy as jnp
from jax.experimental import pallas as pl
from jax.experimental.pallas import tpu as pltpu


def _round_up(x, m):
    return (x + m - 1) // m * m


# ---------------------------------------------------------------------------
# Pallas kernel: single-shot matmul (full K) with fused bias + optional ReLU
# ---------------------------------------------------------------------------
def _matmul_bias_act_kernel(x_ref, w_ref, b_ref, o_ref, *, relu):
    r = jnp.dot(x_ref[...], w_ref[...], preferred_element_type=jnp.float32)
    r = r + b_ref[...]                      # (tm, N) + (1, N) broadcast
    if relu:
        r = jnp.maximum(r, 0.0)
    o_ref[...] = r.astype(o_ref.dtype)


def pallas_matmul_bias(x, w, b2d, *, relu, tm=512):
    """y = act(x @ w + b).  x:(M,K) w:(K,N) b2d:(1,N) -> (M,N), float32.

    Full-K / full-N blocks (no k-loop, no accumulator); only M is tiled.
    Weight and bias block indices are constant across the grid, so they are
    DMA'd into VMEM once and stay resident across all M tiles.
    """
    M, K = x.shape
    K2, N = w.shape
    assert K == K2 and b2d.shape == (1, N)

    tm = min(tm, _round_up(M, 8))
    Mp = _round_up(M, tm)
    xp = x if Mp == M else jnp.pad(x, ((0, Mp - M), (0, 0)))

    out = pl.pallas_call(
        functools.partial(_matmul_bias_act_kernel, relu=relu),
        out_shape=jax.ShapeDtypeStruct((Mp, N), jnp.float32),
        grid_spec=pltpu.PrefetchScalarGridSpec(
            num_scalar_prefetch=0,
            grid=(Mp // tm,),
            in_specs=[
                pl.BlockSpec((tm, K), lambda i: (i, 0)),
                pl.BlockSpec((K, N), lambda i: (0, 0)),   # resident weight
                pl.BlockSpec((1, N), lambda i: (0, 0)),   # resident bias
            ],
            out_specs=pl.BlockSpec((tm, N), lambda i: (i, 0)),
        ),
        compiler_params=pltpu.CompilerParams(
            dimension_semantics=("parallel",)
        ),
    )(xp, w, b2d)
    return out[:M] if Mp != M else out


# ---------------------------------------------------------------------------
# Pallas kernel: fused fc1 (+ReLU) + fc2 in a single grid step
# ---------------------------------------------------------------------------
def _fc_fused_kernel(z_ref, w1_ref, b1_ref, w2_ref, b2_ref, o_ref):
    h = jnp.dot(z_ref[...], w1_ref[...], preferred_element_type=jnp.float32)
    h = jnp.maximum(h + b1_ref[...], 0.0)
    q = jnp.dot(h, w2_ref[...], preferred_element_type=jnp.float32)
    o_ref[...] = (q + b2_ref[...]).astype(o_ref.dtype)


def fc_fused_pallas(z, w1, b1, w2, b2):
    """q = (relu(z @ w1 + b1)) @ w2 + b2, one pallas_call, one grid step."""
    M, K = z.shape
    K1, H = w1.shape
    H2, A = w2.shape
    assert K == K1 and H == H2

    Mp = _round_up(M, 8)                    # min f32 sublane tile
    zp = z if Mp == M else jnp.pad(z, ((0, Mp - M), (0, 0)))

    out = pl.pallas_call(
        _fc_fused_kernel,
        out_shape=jax.ShapeDtypeStruct((Mp, A), jnp.float32),
        grid_spec=pltpu.PrefetchScalarGridSpec(
            num_scalar_prefetch=0,
            grid=(1,),
            in_specs=[
                pl.BlockSpec((Mp, K), lambda i: (0, 0)),
                pl.BlockSpec((K, H), lambda i: (0, 0)),
                pl.BlockSpec((1, H), lambda i: (0, 0)),
                pl.BlockSpec((H, A), lambda i: (0, 0)),
                pl.BlockSpec((1, A), lambda i: (0, 0)),
            ],
            out_specs=pl.BlockSpec((Mp, A), lambda i: (0, 0)),
        ),
        compiler_params=pltpu.CompilerParams(
            dimension_semantics=("arbitrary",)
        ),
    )(zp, w1, b1, w2, b2)
    return out[:M] if Mp != M else out


# ---------------------------------------------------------------------------
# Conv2d (valid padding, square stride) in NHWC = im2col + Pallas matmul
# ---------------------------------------------------------------------------
def _im2col_nhwc(x, kh, kw, stride):
    """x:(N,H,W,C) -> patches:(N*OH*OW, C*kh*kw) with (c, i, j) column order
    (matches the PyTorch weight flattening order)."""
    N, H, W, C = x.shape
    OH = (H - kh) // stride + 1
    OW = (W - kw) // stride + 1
    cols = []
    for i in range(kh):
        for j in range(kw):
            cols.append(
                x[:,
                  i:i + stride * (OH - 1) + 1:stride,
                  j:j + stride * (OW - 1) + 1:stride,
                  :]
            )  # each (N, OH, OW, C)
    p = jnp.stack(cols, axis=-1)                       # (N, OH, OW, C, kh*kw)
    p = p.reshape(N * OH * OW, C * kh * kw)            # column = c*(kh*kw)+i*kw+j
    return p, OH, OW


def conv2d_pallas_nhwc(x, wmat, b2d, kh, kw, stride, *, relu, tm):
    """x:(N,H,W,C), wmat:(C*kh*kw, Cout), b2d:(1,Cout) -> (N,OH,OW,Cout)."""
    N = x.shape[0]
    p, OH, OW = _im2col_nhwc(x, kh, kw, stride)
    out = pallas_matmul_bias(p, wmat, b2d, relu=relu, tm=tm)   # (N*OH*OW, Cout)
    return out.reshape(N, OH, OW, -1)                          # stays NHWC


# ---------------------------------------------------------------------------
# DQN parameters (PyTorch layout) + one-time matmul-layout preparation
# ---------------------------------------------------------------------------
IH, IW, IC = 210, 160, 3        # fixed by the module (fc1 expects 8960 = 64*14*10)
C3_OH, C3_OW, C3_C = 14, 10, 64  # conv3 output geometry


def init_dqn_params(key, hidden_dim, naction):
    def uniform_init(k, shape, fan_in):
        bound = 1.0 / jnp.sqrt(jnp.float32(fan_in))
        return jax.random.uniform(k, shape, jnp.float32, -bound, bound)

    ks = jax.random.split(key, 10)
    p = {}
    p["conv1_w"] = uniform_init(ks[0], (32, IC, 8, 8), IC * 8 * 8)
    p["conv1_b"] = uniform_init(ks[1], (32,), IC * 8 * 8)
    p["conv2_w"] = uniform_init(ks[2], (64, 32, 4, 4), 32 * 4 * 4)
    p["conv2_b"] = uniform_init(ks[3], (64,), 32 * 4 * 4)
    p["conv3_w"] = uniform_init(ks[4], (64, 64, 3, 3), 64 * 3 * 3)
    p["conv3_b"] = uniform_init(ks[5], (64,), 64 * 3 * 3)
    p["fc1_w"] = uniform_init(ks[6], (hidden_dim, 8960), 8960)   # torch (out,in)
    p["fc1_b"] = uniform_init(ks[7], (hidden_dim,), 8960)
    p["fc2_w"] = uniform_init(ks[8], (naction, hidden_dim), hidden_dim)
    p["fc2_b"] = uniform_init(ks[9], (naction,), hidden_dim)
    return p


def prepare_params(p):
    """One-time reshape/transpose into matmul layout (hoisted out of forward).

    fc1 weight columns are additionally permuted from PyTorch's NCHW flatten
    order (c, oh, ow) to the NHWC flatten order (oh, ow, c) produced by the
    conv3 Pallas matmul, so the forward pass needs no activation transpose.
    """
    hidden_dim = p["fc1_w"].shape[0]
    q = {}
    q["conv1_w"] = p["conv1_w"].reshape(32, -1).T            # (192, 32)
    q["conv1_b"] = p["conv1_b"].reshape(1, -1)
    q["conv2_w"] = p["conv2_w"].reshape(64, -1).T             # (512, 64)
    q["conv2_b"] = p["conv2_b"].reshape(1, -1)
    q["conv3_w"] = p["conv3_w"].reshape(64, -1).T             # (576, 64)
    q["conv3_b"] = p["conv3_b"].reshape(1, -1)
    # (hidden, 8960) in (c, oh, ow) order -> (8960, hidden) in (oh, ow, c) order
    q["fc1_w"] = (p["fc1_w"]
                  .reshape(hidden_dim, C3_C, C3_OH, C3_OW)
                  .transpose(0, 2, 3, 1)
                  .reshape(hidden_dim, C3_OH * C3_OW * C3_C)
                  .T)                                         # (8960, hidden)
    q["fc1_b"] = p["fc1_b"].reshape(1, -1)
    q["fc2_w"] = p["fc2_w"].T                                 # (hidden, naction)
    q["fc2_b"] = p["fc2_b"].reshape(1, -1)
    return jax.tree_util.tree_map(lambda a: a.astype(jnp.float32), q)


# ---------------------------------------------------------------------------
# Forward
# ---------------------------------------------------------------------------
def dqn_forward(params, X):
    """X: (bsz, T, iC, iH, iW) float32 -> (bsz, T, naction) q-values."""
    bsz, T = X.shape[:2]
    M = bsz * T
    # single NCHW -> NHWC conversion at the input; stay NHWC through the convs
    Z = X.reshape(M, IC, IH, IW).transpose(0, 2, 3, 1)          # (M,210,160,3)
    Z = conv2d_pallas_nhwc(Z, params["conv1_w"], params["conv1_b"],
                           8, 8, 4, relu=True, tm=512)          # (M,51,39,32)
    Z = conv2d_pallas_nhwc(Z, params["conv2_w"], params["conv2_b"],
                           4, 4, 3, relu=True, tm=256)          # (M,16,12,64)
    Z = conv2d_pallas_nhwc(Z, params["conv3_w"], params["conv3_b"],
                           3, 3, 1, relu=True, tm=280)          # (M,14,10,64)
    # fc1 weight was pre-permuted to NHWC flatten order, so this reshape is a
    # free contiguous view — no activation transpose needed.
    Z = Z.reshape(M, -1)                                        # (M, 8960)
    Q = fc_fused_pallas(Z, params["fc1_w"], params["fc1_b"],
                        params["fc2_w"], params["fc2_b"])       # (M, naction)
    return Q.reshape(bsz, T, -1)


if __name__ == "__main__":
    bsz, T = 2, 2
    hidden_dim, naction = 32, 4

    key = jax.random.PRNGKey(0)
    k_params, k_x = jax.random.split(key)
    raw_params = init_dqn_params(k_params, hidden_dim, naction)
    params = prepare_params(raw_params)          # hoisted out of the jit
    # Spatial/channel dims are fixed by the module (fc1 expects 8960 features).
    X = jax.random.normal(k_x, (bsz, T, IC, IH, IW), dtype=jnp.float32)

    fwd = jax.jit(dqn_forward)
    q_values = fwd(params, X)
    jax.block_until_ready(q_values)
    assert q_values.shape == (bsz, T, naction)
    print("KERNEL_OK")
</pallas_src>

<mosaic_0001>
module attributes {stable_mosaic.version = 11 : i64} {
  func.func @_matmul_bias_act_kernel(%arg0: i32, %arg1: memref<512x192xf32, #tpu.memory_space<vmem>>, %arg2: memref<192x32xf32, #tpu.memory_space<vmem>>, %arg3: memref<1x32xf32, #tpu.memory_space<vmem>>, %arg4: memref<512x32xf32, #tpu.memory_space<vmem>>) attributes {dimension_semantics = [#tpu.dimension_semantics<parallel>], iteration_bounds = array<i64: 16>, scalar_prefetch = 0 : i64, scratch_operands = 0 : i64, tpu.core_type = #tpu.core_type<tc>, window_params = [{transform_indices = @transform_0, window_bounds = array<i64: 512, 192>}, {pipeline_mode = #tpu.pipeline_mode<synchronous>, transform_indices = @transform_1, window_bounds = array<i64: 192, 32>}, {pipeline_mode = #tpu.pipeline_mode<synchronous>, transform_indices = @transform_2, window_bounds = array<i64: 1, 32>}, {transform_indices = @transform_3, window_bounds = array<i64: 512, 32>}]} {
    %c0 = arith.constant 0 : index
    %c0_0 = arith.constant 0 : index
    %0 = vector.load %arg1[%c0, %c0_0] : memref<512x192xf32, #tpu.memory_space<vmem>>, vector<512x192xf32>
    %c0_1 = arith.constant 0 : index
    %c0_2 = arith.constant 0 : index
    %1 = vector.load %arg2[%c0_1, %c0_2] : memref<192x32xf32, #tpu.memory_space<vmem>>, vector<192x32xf32>
    %cst = arith.constant dense<0.000000e+00> : vector<512x32xf32>
    %2 = tpu.matmul %0, %1, %cst {dimension_numbers = #tpu.dot_dimension_numbers<[1], [0], [0], [1], [0, 0, 1, 1], [], []>} : vector<512x192xf32>, vector<192x32xf32>, vector<512x32xf32> -> vector<512x32xf32>
    %c0_3 = arith.constant 0 : index
    %c0_4 = arith.constant 0 : index
    %3 = vector.load %arg3[%c0_3, %c0_4] : memref<1x32xf32, #tpu.memory_space<vmem>>, vector<1x32xf32>
    %4 = vector.broadcast %3 : vector<1x32xf32> to vector<512x32xf32>
    %5 = arith.addf %2, %4 : vector<512x32xf32>
    %cst_5 = arith.constant 0.000000e+00 : f32
    %6 = vector.broadcast %cst_5 : f32 to vector<512x32xf32>
    %7 = arith.maximumf %5, %6 : vector<512x32xf32>
    %c0_6 = arith.constant 0 : index
    %c0_7 = arith.constant 0 : index
    %8 = vector.load %arg4[%c0_6, %c0_7] : memref<512x32xf32, #tpu.memory_space<vmem>>, vector<512x32xf32>
    tpu.vector_store %arg4[%c0_6, %c0_7], %7 {strides = array<i32>} : memref<512x32xf32, #tpu.memory_space<vmem>>, vector<512x32xf32>,
    return
  }
  func.func @transform_0(%arg0: i32) -> (i32, i32) {
    %c0_i32 = arith.constant 0 : i32
    %c0_i32_0 = arith.constant 0 : i32
    return %arg0, %c0_i32 : i32, i32
  }
  func.func @transform_1(%arg0: i32) -> (i32, i32) {
    %c0_i32 = arith.constant 0 : i32
    %c0_i32_0 = arith.constant 0 : i32
    %c0_i32_1 = arith.constant 0 : i32
    return %c0_i32, %c0_i32_0 : i32, i32
  }
  func.func @transform_2(%arg0: i32) -> (i32, i32) {
    %c0_i32 = arith.constant 0 : i32
    %c0_i32_0 = arith.constant 0 : i32
    %c0_i32_1 = arith.constant 0 : i32
    return %c0_i32, %c0_i32_0 : i32, i32
  }
  func.func @transform_3(%arg0: i32) -> (i32, i32) {
    %c0_i32 = arith.constant 0 : i32
    %c0_i32_0 = arith.constant 0 : i32
    return %arg0, %c0_i32 : i32, i32
  }
}

module attributes {stable_mosaic.version = 11 : i64} {
  func.func @_matmul_bias_act_kernel(%arg0: i32, %arg1: memref<256x512xf32, #tpu.memory_space<vmem>>, %arg2: memref<512x64xf32, #tpu.memory_space<vmem>>, %arg3: memref<1x64xf32, #tpu.memory_space<vmem>>, %arg4: memref<256x64xf32, #tpu.memory_space<vmem>>) attributes {dimension_semantics = [#tpu.dimension_semantics<parallel>], iteration_bounds = array<i64: 3>, scalar_prefetch = 0 : i64, scratch_operands = 0 : i64, tpu.core_type = #tpu.core_type<tc>, window_params = [{transform_indices = @transform_0, window_bounds = array<i64: 256, 512>}, {pipeline_mode = #tpu.pipeline_mode<synchronous>, transform_indices = @transform_1, window_bounds = array<i64: 512, 64>}, {pipeline_mode = #tpu.pipeline_mode<synchronous>, transform_indices = @transform_2, window_bounds = array<i64: 1, 64>}, {transform_indices = @transform_3, window_bounds = array<i64: 256, 64>}]} {
    %c0 = arith.constant 0 : index
    %c0_0 = arith.constant 0 : index
    %0 = vector.load %arg1[%c0, %c0_0] : memref<256x512xf32, #tpu.memory_space<vmem>>, vector<256x512xf32>
    %c0_1 = arith.constant 0 : index
    %c0_2 = arith.constant 0 : index
    %1 = vector.load %arg2[%c0_1, %c0_2] : memref<512x64xf32, #tpu.memory_space<vmem>>, vector<512x64xf32>
    %cst = arith.constant dense<0.000000e+00> : vector<256x64xf32>
    %2 = tpu.matmul %0, %1, %cst {dimension_numbers = #tpu.dot_dimension_numbers<[1], [0], [0], [1], [0, 0, 1, 1], [], []>} : vector<256x512xf32>, vector<512x64xf32>, vector<256x64xf32> -> vector<256x64xf32>
    %c0_3 = arith.constant 0 : index
    %c0_4 = arith.constant 0 : index
    %3 = vector.load %arg3[%c0_3, %c0_4] : memref<1x64xf32, #tpu.memory_space<vmem>>, vector<1x64xf32>
    %4 = vector.broadcast %3 : vector<1x64xf32> to vector<256x64xf32>
    %5 = arith.addf %2, %4 : vector<256x64xf32>
    %cst_5 = arith.constant 0.000000e+00 : f32
    %6 = vector.broadcast %cst_5 : f32 to vector<256x64xf32>
    %7 = arith.maximumf %5, %6 : vector<256x64xf32>
    %c0_6 = arith.constant 0 : index
    %c0_7 = arith.constant 0 : index
    %8 = vector.load %arg4[%c0_6, %c0_7] : memref<256x64xf32, #tpu.memory_space<vmem>>, vector<256x64xf32>
    tpu.vector_store %arg4[%c0_6, %c0_7], %7 {strides = array<i32>} : memref<256x64xf32, #tpu.memory_space<vmem>>, vector<256x64xf32>,
    return
  }
  func.func @transform_0(%arg0: i32) -> (i32, i32) {
    %c0_i32 = arith.constant 0 : i32
    %c0_i32_0 = arith.constant 0 : i32
    return %arg0, %c0_i32 : i32, i32
  }
  func.func @transform_1(%arg0: i32) -> (i32, i32) {
    %c0_i32 = arith.constant 0 : i32
    %c0_i32_0 = arith.constant 0 : i32
    %c0_i32_1 = arith.constant 0 : i32
    return %c0_i32, %c0_i32_0 : i32, i32
  }
  func.func @transform_2(%arg0: i32) -> (i32, i32) {
    %c0_i32 = arith.constant 0 : i32
    %c0_i32_0 = arith.constant 0 : i32
    %c0_i32_1 = arith.constant 0 : i32
    return %c0_i32, %c0_i32_0 : i32, i32
  }
  func.func @transform_3(%arg0: i32) -> (i32, i32) {
    %c0_i32 = arith.constant 0 : i32
    %c0_i32_0 = arith.constant 0 : i32
    return %arg0, %c0_i32 : i32, i32
  }
}

module attributes {stable_mosaic.version = 11 : i64} {
  func.func @_matmul_bias_act_kernel(%arg0: i32, %arg1: memref<280x576xf32, #tpu.memory_space<vmem>>, %arg2: memref<576x64xf32, #tpu.memory_space<vmem>>, %arg3: memref<1x64xf32, #tpu.memory_space<vmem>>, %arg4: memref<280x64xf32, #tpu.memory_space<vmem>>) attributes {dimension_semantics = [#tpu.dimension_semantics<parallel>], iteration_bounds = array<i64: 2>, scalar_prefetch = 0 : i64, scratch_operands = 0 : i64, tpu.core_type = #tpu.core_type<tc>, window_params = [{transform_indices = @transform_0, window_bounds = array<i64: 280, 576>}, {pipeline_mode = #tpu.pipeline_mode<synchronous>, transform_indices = @transform_1, window_bounds = array<i64: 576, 64>}, {pipeline_mode = #tpu.pipeline_mode<synchronous>, transform_indices = @transform_2, window_bounds = array<i64: 1, 64>}, {transform_indices = @transform_3, window_bounds = array<i64: 280, 64>}]} {
    %c0 = arith.constant 0 : index
    %c0_0 = arith.constant 0 : index
    %0 = vector.load %arg1[%c0, %c0_0] : memref<280x576xf32, #tpu.memory_space<vmem>>, vector<280x576xf32>
    %c0_1 = arith.constant 0 : index
    %c0_2 = arith.constant 0 : index
    %1 = vector.load %arg2[%c0_1, %c0_2] : memref<576x64xf32, #tpu.memory_space<vmem>>, vector<576x64xf32>
    %cst = arith.constant dense<0.000000e+00> : vector<280x64xf32>
    %2 = tpu.matmul %0, %1, %cst {dimension_numbers = #tpu.dot_dimension_numbers<[1], [0], [0], [1], [0, 0, 1, 1], [], []>} : vector<280x576xf32>, vector<576x64xf32>, vector<280x64xf32> -> vector<280x64xf32>
    %c0_3 = arith.constant 0 : index
    %c0_4 = arith.constant 0 : index
    %3 = vector.load %arg3[%c0_3, %c0_4] : memref<1x64xf32, #tpu.memory_space<vmem>>, vector<1x64xf32>
    %4 = vector.broadcast %3 : vector<1x64xf32> to vector<280x64xf32>
    %5 = arith.addf %2, %4 : vector<280x64xf32>
    %cst_5 = arith.constant 0.000000e+00 : f32
    %6 = vector.broadcast %cst_5 : f32 to vector<280x64xf32>
    %7 = arith.maximumf %5, %6 : vector<280x64xf32>
    %c0_6 = arith.constant 0 : index
    %c0_7 = arith.constant 0 : index
    %8 = vector.load %arg4[%c0_6, %c0_7] : memref<280x64xf32, #tpu.memory_space<vmem>>, vector<280x64xf32>
    tpu.vector_store %arg4[%c0_6, %c0_7], %7 {strides = array<i32>} : memref<280x64xf32, #tpu.memory_space<vmem>>, vector<280x64xf32>,
    return
  }
  func.func @transform_0(%arg0: i32) -> (i32, i32) {
    %c0_i32 = arith.constant 0 : i32
    %c0_i32_0 = arith.constant 0 : i32
    return %arg0, %c0_i32 : i32, i32
  }
  func.func @transform_1(%arg0: i32) -> (i32, i32) {
    %c0_i32 = arith.constant 0 : i32
    %c0_i32_0 = arith.constant 0 : i32
    %c0_i32_1 = arith.constant 0 : i32
    return %c0_i32, %c0_i32_0 : i32, i32
  }
  func.func @transform_2(%arg0: i32) -> (i32, i32) {
    %c0_i32 = arith.constant 0 : i32
    %c0_i32_0 = arith.constant 0 : i32
    %c0_i32_1 = arith.constant 0 : i32
    return %c0_i32, %c0_i32_0 : i32, i32
  }
  func.func @transform_3(%arg0: i32) -> (i32, i32) {
    %c0_i32 = arith.constant 0 : i32
    %c0_i32_0 = arith.constant 0 : i32
    return %arg0, %c0_i32 : i32, i32
  }
}

module attributes {stable_mosaic.version = 11 : i64} {
  func.func @_fc_fused_kernel(%arg0: i32, %arg1: memref<8x8960xf32, #tpu.memory_space<vmem>>, %arg2: memref<8960x32xf32, #tpu.memory_space<vmem>>, %arg3: memref<1x32xf32, #tpu.memory_space<vmem>>, %arg4: memref<32x4xf32, #tpu.memory_space<vmem>>, %arg5: memref<1x4xf32, #tpu.memory_space<vmem>>, %arg6: memref<8x4xf32, #tpu.memory_space<vmem>>) attributes {dimension_semantics = [#tpu.dimension_semantics<arbitrary>], iteration_bounds = array<i64: 1>, scalar_prefetch = 0 : i64, scratch_operands = 0 : i64, tpu.core_type = #tpu.core_type<tc>, window_params = [{pipeline_mode = #tpu.pipeline_mode<synchronous>, transform_indices = @transform_0, window_bounds = array<i64: 8, 8960>}, {pipeline_mode = #tpu.pipeline_mode<synchronous>, transform_indices = @transform_1, window_bounds = array<i64: 8960, 32>}, {pipeline_mode = #tpu.pipeline_mode<synchronous>, transform_indices = @transform_2, window_bounds = array<i64: 1, 32>}, {pipeline_mode = #tpu.pipeline_mode<synchronous>, transform_indices = @transform_3, window_bounds = array<i64: 32, 4>}, {pipeline_mode = #tpu.pipeline_mode<synchronous>, transform_indices = @transform_4, window_bounds = array<i64: 1, 4>}, {pipeline_mode = #tpu.pipeline_mode<synchronous>, transform_indices = @transform_5, window_bounds = array<i64: 8, 4>}]} {
    %c0 = arith.constant 0 : index
    %c0_0 = arith.constant 0 : index
    %0 = vector.load %arg1[%c0, %c0_0] : memref<8x8960xf32, #tpu.memory_space<vmem>>, vector<8x8960xf32>
    %c0_1 = arith.constant 0 : index
    %c0_2 = arith.constant 0 : index
    %1 = vector.load %arg2[%c0_1, %c0_2] : memref<8960x32xf32, #tpu.memory_space<vmem>>, vector<8960x32xf32>
    %cst = arith.constant dense<0.000000e+00> : vector<8x32xf32>
    %2 = tpu.matmul %0, %1, %cst {dimension_numbers = #tpu.dot_dimension_numbers<[1], [0], [0], [1], [0, 0, 1, 1], [], []>} : vector<8x8960xf32>, vector<8960x32xf32>, vector<8x32xf32> -> vector<8x32xf32>
    %c0_3 = arith.constant 0 : index
    %c0_4 = arith.constant 0 : index
    %3 = vector.load %arg3[%c0_3, %c0_4] : memref<1x32xf32, #tpu.memory_space<vmem>>, vector<1x32xf32>
    %4 = vector.broadcast %3 : vector<1x32xf32> to vector<8x32xf32>
    %5 = arith.addf %2, %4 : vector<8x32xf32>
    %cst_5 = arith.constant 0.000000e+00 : f32
    %6 = vector.broadcast %cst_5 : f32 to vector<8x32xf32>
    %7 = arith.maximumf %5, %6 : vector<8x32xf32>
    %c0_6 = arith.constant 0 : index
    %c0_7 = arith.constant 0 : index
    %8 = vector.load %arg4[%c0_6, %c0_7] : memref<32x4xf32, #tpu.memory_space<vmem>>, vector<32x4xf32>
    %cst_8 = arith.constant dense<0.000000e+00> : vector<8x4xf32>
    %9 = tpu.matmul %7, %8, %cst_8 {dimension_numbers = #tpu.dot_dimension_numbers<[1], [0], [0], [1], [0, 0, 1, 1], [], []>} : vector<8x32xf32>, vector<32x4xf32>, vector<8x4xf32> -> vector<8x4xf32>
    %c0_9 = arith.constant 0 : index
    %c0_10 = arith.constant 0 : index
    %10 = vector.load %arg5[%c0_9, %c0_10] : memref<1x4xf32, #tpu.memory_space<vmem>>, vector<1x4xf32>
    %11 = vector.broadcast %10 : vector<1x4xf32> to vector<8x4xf32>
    %12 = arith.addf %9, %11 : vector<8x4xf32>
    %c0_11 = arith.constant 0 : index
    %c0_12 = arith.constant 0 : index
    %13 = vector.load %arg6[%c0_11, %c0_12] : memref<8x4xf32, #tpu.memory_space<vmem>>, vector<8x4xf32>
    tpu.vector_store %arg6[%c0_11, %c0_12], %12 {strides = array<i32>} : memref<8x4xf32, #tpu.memory_space<vmem>>, vector<8x4xf32>,
    return
  }
  func.func @transform_0(%arg0: i32) -> (i32, i32) {
    %c0_i32 = arith.constant 0 : i32
    %c0_i32_0 = arith.constant 0 : i32
    %c0_i32_1 = arith.constant 0 : i32
    return %c0_i32, %c0_i32_0 : i32, i32
  }
  func.func @transform_1(%arg0: i32) -> (i32, i32) {
    %c0_i32 = arith.constant 0 : i32
    %c0_i32_0 = arith.constant 0 : i32
    %c0_i32_1 = arith.constant 0 : i32
    return %c0_i32, %c0_i32_0 : i32, i32
  }
  func.func @transform_2(%arg0: i32) -> (i32, i32) {
    %c0_i32 = arith.constant 0 : i32
    %c0_i32_0 = arith.constant 0 : i32
    %c0_i32_1 = arith.constant 0 : i32
    return %c0_i32, %c0_i32_0 : i32, i32
  }
  func.func @transform_3(%arg0: i32) -> (i32, i32) {
    %c0_i32 = arith.constant 0 : i32
    %c0_i32_0 = arith.constant 0 : i32
    %c0_i32_1 = arith.constant 0 : i32
    return %c0_i32, %c0_i32_0 : i32, i32
  }
  func.func @transform_4(%arg0: i32) -> (i32, i32) {
    %c0_i32 = arith.constant 0 : i32
    %c0_i32_0 = arith.constant 0 : i32
    %c0_i32_1 = arith.constant 0 : i32
    return %c0_i32, %c0_i32_0 : i32, i32
  }
  func.func @transform_5(%arg0: i32) -> (i32, i32) {
    %c0_i32 = arith.constant 0 : i32
    %c0_i32_0 = arith.constant 0 : i32
    %c0_i32_1 = arith.constant 0 : i32
    return %c0_i32, %c0_i32_0 : i32, i32
  }
}

</mosaic_0001>

<bundles_post_ra>
// kernel: dqn_forward.4
= control target key start
LH: loop header
LB: loop body
LE: loop exit
PB: predicated region body
PF: predicated region fallthrough
CT: control target
= control target key end

     0   :  { %s1267_s12 = smov 0   ;;  %s1804_s0 = inlined_call_operand.vmem [shape: f32[8192,192], index: 0, kind: input, shape index: {}]   ;;  %s1805_s1 = inlined_call_operand.vmem [shape: f32[192,32], index: 1, kind: input, shape index: {}]   ;;  %s1806_s2 = inlined_call_operand.vmem [shape: f32[1,32], index: 2, kind: input, shape index: {}]   ;;  %s1807_s3 = inlined_call_operand.vmem [shape: f32[8192,32], index: 3, kind: output, shape index: {}]  }
   0x1 LB: > { %s1129_s13 = sadd.s32 4294967295, %s1245_s12   ;;  %p1133_p0 = scmp.ge.s32.totalorder %s1245_s12, 1  ;;  %s1245_s12 = sphi %s1267_s12, %s13_s12  }
   0x2   : > { %p139_p1 = scmp.lt.s32.totalorder %s1245_s12, 17 }
   0x4   : > { %p140_p2 = pnand %p1133_p0, %p139_p1 }
   0x5   : > { %s1134_s20 = sshll.u32 (!%p140_p2), %s1129_s13, 6 }
   0x6   : > { %143 = sbr.rel (%p140_p2) target bundleno = 438 (0x1b6), region = 32  ;;  %p165_p3 = scmp.lt.s32.totalorder (!%p140_p2), %s1134_s20, 1023 }
   0xb   : > { %v320_v0 = vld [vmem:[%s1805_s1 + $0x78] sm:$0xff]  ;;  %v319_v2 = vld [vmem:[%s1805_s1 + $0x70] sm:$0xff]  ;;  %v318_v4 = vld [vmem:[%s1805_s1 + $0x68] sm:$0xff]  ;;  %s1809_s20 = smov (!%p165_p3, %s1134_s20), 1023  ;;  %vm333_vm0 = vcmask 523264   ;;  %vm1008_vm1 = vcmask 261120  }
   0xc   : > { %v328_v1 = vld [vmem:[%s1805_s1 + $0xb8] sm:$0xff]  ;;  %1206 = vmatpush.msra.mxu2 %v320_v0  ;;  %v327_v3 = vld [vmem:[%s1805_s1 + $0xb0] sm:$0xff]  ;;  %v326_v5 = vld [vmem:[%s1805_s1 + $0xa8] sm:$0xff]  ;;  %526 = vmatpush.msra.mxu0 %v320_v0  ;;  %s1205_s8 = sshll.u32 %s1809_s20, 4  ;;  %s1138_s18 = sshll.u32 %s1809_s20, 3 }
   0xd   : > { %743 = vmatpush.msra.mxu1 %v328_v1  ;;  %1222 = vmatpush.msra.mxu3 %v328_v1  ;;  %v317_v6 = vld [vmem:[%s1805_s1 + $0x60] sm:$0xff]  ;;  %v316_v8 = vld [vmem:[%s1805_s1 + $0x58] sm:$0xff]  ;;  %v315_v10 = vld [vmem:[%s1805_s1 + $0x50] sm:$0xff]  ;;  %s1323_s21 = scalar_lea.vmem %s1804_s0, %s1205_s8  ;;  %s1479_s23 = scalar_lea.vmem %s1807_s3, %s1138_s18 }
   0xe   : > { %1207 = vmatpush.msra.mxu2 %v319_v2  ;;  %v325_v7 = vld [vmem:[%s1805_s1 + $0xa0] sm:$0xff]  ;;  %527 = vmatpush.msra.mxu0 %v319_v2  ;;  %v324_v9 = vld [vmem:[%s1805_s1 + $0x98] sm:$0xff]  ;;  %v323_v11 = vld [vmem:[%s1805_s1 + $0x90] sm:$0xff] }
   0xf   : > { %744 = vmatpush.msra.mxu1 %v327_v3  ;;  %1223 = vmatpush.msra.mxu3 %v327_v3  ;;  %v314_v12 = vld [vmem:[%s1805_s1 + $0x48] sm:$0xff]  ;;  %v313_v14 = vld [vmem:[%s1805_s1 + $0x40] sm:$0xff]  ;;  %v312_v17 = vld [vmem:[%s1805_s1 + $0x38] sm:$0xff] }
  0x10   : > { %1208 = vmatpush.msra.mxu2 %v318_v4  ;;  %528 = vmatpush.msra.mxu0 %v318_v4  ;;  %v322_v13 = vld [vmem:[%s1805_s1 + $0x88] sm:$0xff]  ;;  %v321_v15 = vld [vmem:[%s1805_s1 + $0x80] sm:$0xff]  ;;  %v311_v18 = vld [vmem:[%s1805_s1 + $0x30] sm:$0xff] }
  0x11   : > { %745 = vmatpush.msra.mxu1 %v326_v5  ;;  %1224 = vmatpush.msra.mxu3 %v326_v5  ;;  %v178_v16 = vld [vmem:[%s1323_s21 + $0x8] sm:$0xff]  ;;  %v244_v19 = vld [vmem:[%s1323_s21 + $0x218] sm:$0xff]  ;;  %v309_v21 = vld [vmem:[%s1805_s1 + $0x20] sm:$0xff] }
  0x12   : > { %1209 = vmatpush.msra.mxu2 %v317_v6  ;;  %529 = vmatpush.msra.mxu0 %v317_v6  ;;  %v310_v20 = vld [vmem:[%s1805_s1 + $0x28] sm:$0xff]  ;;  %v180_v22 = vld [vmem:[%s1323_s21 + $0x18] sm:$0xff]  ;;  %v307_v24 = vld [vmem:[%s1805_s1 + $0x10] sm:$0xff] }
  0x13   : > { %746 = vmatpush.msra.mxu1 %v325_v7  ;;  %1225 = vmatpush.msra.mxu3 %v325_v7  ;;  %v308_v23 = vld [vmem:[%s1805_s1 + $0x18] sm:$0xff]  ;;  %v246_v25 = vld [vmem:[%s1323_s21 + $0x228] sm:$0xff]  ;;  %v305_v27 = vld [vmem:[%s1805_s1] sm:$0xff] }
  0x14   : > { %1210 = vmatpush.msra.mxu2 %v316_v8  ;;  %530 = vmatpush.msra.mxu0 %v316_v8  ;;  %v306_v26 = vld [vmem:[%s1805_s1 + $0x8] sm:$0xff]  ;;  %v239_v28 = vld [vmem:[%s1323_s21 + $0x1f0] sm:$0xff]  ;;  %v177_v30 = vld [vmem:[%s1323_s21] sm:$0xff] }
  0x15   : > { %747 = vmatpush.msra.mxu1 %v324_v9  ;;  %1226 = vmatpush.msra.mxu3 %v324_v9  ;;  %v182_v29 = vld [vmem:[%s1323_s21 + $0x28] sm:$0xff]  ;;  %v248_v31 = vld [vmem:[%s1323_s21 + $0x238] sm:$0xff]  ;;  %v241_v32 = vld [vmem:[%s1323_s21 + $0x200] sm:$0xff] }
  0x16   : > { %1211 = vmatpush.msra.mxu2 %v315_v10  ;;  %531 = vmatpush.msra.mxu0 %v315_v10  ;;  %v184_v33 = vld [vmem:[%s1323_s21 + $0x38] sm:$0xff]  ;;  %v179_v34 = vld [vmem:[%s1323_s21 + $0x10] sm:$0xff]  ;;  %v250_v35 = vld [vmem:[%s1323_s21 + $0x248] sm:$0xff] }
  0x17   : > { %748 = vmatpush.msra.mxu1 %v323_v11  ;;  %1227 = vmatpush.msra.mxu3 %v323_v11  ;;  %v243_v36 = vld [vmem:[%s1323_s21 + $0x210] sm:$0xff]  ;;  %v186_v37 = vld [vmem:[%s1323_s21 + $0x48] sm:$0xff]  ;;  %v181_v38 = vld [vmem:[%s1323_s21 + $0x20] sm:$0xff] }
  0x18   : > { %1212 = vmatpush.msra.mxu2 %v314_v12  ;;  %532 = vmatpush.msra.mxu0 %v314_v12  ;;  %v252_v39 = vld [vmem:[%s1323_s21 + $0x258] sm:$0xff]  ;;  %v245_v40 = vld [vmem:[%s1323_s21 + $0x220] sm:$0xff]  ;;  %v183_v42 = vld [vmem:[%s1323_s21 + $0x30] sm:$0xff] }
  0x19   : > { %749 = vmatpush.msra.mxu1 %v322_v13  ;;  %1228 = vmatpush.msra.mxu3 %v322_v13  ;;  %v188_v41 = vld [vmem:[%s1323_s21 + $0x58] sm:$0xff]  ;;  %v254_v43 = vld [vmem:[%s1323_s21 + $0x268] sm:$0xff]  ;;  %v247_v44 = vld [vmem:[%s1323_s21 + $0x230] sm:$0xff] }
  0x1a   : > { %1213 = vmatpush.msra.mxu2 %v313_v14  ;;  %533 = vmatpush.msra.mxu0 %v313_v14  ;;  %v190_v45 = vld [vmem:[%s1323_s21 + $0x68] sm:$0xff]  ;;  %v185_v46 = vld [vmem:[%s1323_s21 + $0x40] sm:$0xff]  ;;  %v256_v47 = vld [vmem:[%s1323_s21 + $0x278] sm:$0xff] }
  0x1b   : > { %750 = vmatpush.msra.mxu1 %v321_v15  ;;  %1229 = vmatpush.msra.mxu3 %v321_v15  ;;  %v249_v48 = vld [vmem:[%s1323_s21 + $0x240] sm:$0xff]  ;;  %v192_v49 = vld [vmem:[%s1323_s21 + $0x78] sm:$0xff]  ;;  %v187_v50 = vld [vmem:[%s1323_s21 + $0x50] sm:$0xff] }
  0x1c   : > { %1139 = vmatmul.msk.f32.vlgmr.msra.gmra.mxu1 %vm333_vm0, %v178_v16  ;;  %1214 = vmatpush.msra.mxu2 %v312_v17  ;;  %v258_v51 = vld [vmem:[%s1323_s21 + $0x288] sm:$0xff]  ;;  %v251_v52 = vld [vmem:[%s1323_s21 + $0x250] sm:$0xff]  ;;  %v189_v54 = vld [vmem:[%s1323_s21 + $0x60] sm:$0xff] }
  0x1d   : > { %534 = vmatpush.msra.mxu0 %v312_v17  ;;  %1172 = vmatmul.msk.f32.vlgmr.msra.gmra.mxu3 %vm333_vm0, %v244_v19  ;;  %v194_v53 = vld [vmem:[%s1323_s21 + $0x88] sm:$0xff]  ;;  %v260_v55 = vld [vmem:[%s1323_s21 + $0x298] sm:$0xff]  ;;  %v253_v56 = vld [vmem:[%s1323_s21 + $0x260] sm:$0xff] }
  0x1e   : > { %1215 = vmatpush.msra.mxu2 %v311_v18  ;;  %v196_v57 = vld [vmem:[%s1323_s21 + $0x98] sm:$0xff]  ;;  %v191_v58 = vld [vmem:[%s1323_s21 + $0x70] sm:$0xff]  ;;  %v262_v59 = vld [vmem:[%s1323_s21 + $0x2a8] sm:$0xff] }
  0x1f   : > { %535 = vmatpush.msra.mxu0 %v311_v18  ;;  %v255_v60 = vld [vmem:[%s1323_s21 + $0x270] sm:$0xff]  ;;  %v198_v61 = vld [vmem:[%s1323_s21 + $0xa8] sm:$0xff]  ;;  %v193_v62 = vld [vmem:[%s1323_s21 + $0x80] sm:$0xff] }
  0x20   : > { %1216 = vmatpush.msra.mxu2 %v310_v20  ;;  %v264_v63 = vld [vmem:[%s1323_s21 + $0x2b8] sm:$0xff]  ;;  %v257_v0 = vld [vmem:[%s1323_s21 + $0x280] sm:$0xff]  ;;  %v195_v2 = vld [vmem:[%s1323_s21 + $0x90] sm:$0xff] }
  0x21   : > { %536 = vmatpush.msra.mxu0 %v310_v20  ;;  %v200_v1 = vld [vmem:[%s1323_s21 + $0xb8] sm:$0xff]  ;;  %v266_v3 = vld [vmem:[%s1323_s21 + $0x2c8] sm:$0xff]  ;;  %v259_v4 = vld [vmem:[%s1323_s21 + $0x290] sm:$0xff] }
  0x22   : > { %1217 = vmatpush.msra.mxu2 %v309_v21  ;;  %v202_v5 = vld [vmem:[%s1323_s21 + $0xc8] sm:$0xff]  ;;  %v197_v6 = vld [vmem:[%s1323_s21 + $0xa0] sm:$0xff]  ;;  %v268_v7 = vld [vmem:[%s1323_s21 + $0x2d8] sm:$0xff] }
  0x23   : > { %537 = vmatpush.msra.mxu0 %v309_v21  ;;  %v261_v8 = vld [vmem:[%s1323_s21 + $0x2a0] sm:$0xff]  ;;  %v204_v9 = vld [vmem:[%s1323_s21 + $0xd8] sm:$0xff]  ;;  %v199_v10 = vld [vmem:[%s1323_s21 + $0xb0] sm:$0xff] }
  0x24   : > { %1140 = vmatmul.msk.f32.gmra.mxu1 %vm333_vm0, %v180_v22  ;;  %1218 = vmatpush.msra.mxu2 %v308_v23  ;;  %v270_v11 = vld [vmem:[%s1323_s21 + $0x2e8] sm:$0xff]  ;;  %v263_v12 = vld [vmem:[%s1323_s21 + $0x2b0] sm:$0xff]  ;;  %v201_v14 = vld [vmem:[%s1323_s21 + $0xc0] sm:$0xff] }
  0x25   : > { %538 = vmatpush.msra.mxu0 %v308_v23  ;;  %1173 = vmatmul.msk.f32.gmra.mxu3 %vm333_vm0, %v246_v25  ;;  %v206_v13 = vld [vmem:[%s1323_s21 + $0xe8] sm:$0xff]  ;;  %v272_v15 = vld [vmem:[%s1323_s21 + $0x2f8] sm:$0xff]  ;;  %v265_v16 = vld [vmem:[%s1323_s21 + $0x2c0] sm:$0xff] }
  0x26   : > { %1219 = vmatpush.msra.mxu2 %v307_v24  ;;  %v208_v17 = vld [vmem:[%s1323_s21 + $0xf8] sm:$0xff]  ;;  %v203_v18 = vld [vmem:[%s1323_s21 + $0xd0] sm:$0xff]  ;;  %v274_v19 = vld [vmem:[%s1323_s21 + $0x308] sm:$0xff] }
  0x27   : > { %539 = vmatpush.msra.mxu0 %v307_v24  ;;  %v267_v21 = vld [vmem:[%s1323_s21 + $0x2d0] sm:$0xff]  ;;  %v210_v22 = vld [vmem:[%s1323_s21 + $0x108] sm:$0xff]  ;;  %v205_v23 = vld [vmem:[%s1323_s21 + $0xe0] sm:$0xff] }
  0x28   : > { %1220 = vmatpush.msra.mxu2 %v306_v26  ;;  %v276_v24 = vld [vmem:[%s1323_s21 + $0x318] sm:$0xff] }
  0x29   : > { %540 = vmatpush.msra.mxu0 %v306_v26  ;;  %v269_v26 = vld [vmem:[%s1323_s21 + $0x2e0] sm:$0xff] }
  0x2a   : > { %1221 = vmatpush.msra.mxu2 %v305_v27 }
  0x2b   : > { %635 = vmatmul.f32.vlgmr.msra.gmra.mxu2 %v239_v28  ;;  %541 = vmatpush.msra.mxu0 %v305_v27  ;;  %v212_v27 = vld [vmem:[%s1323_s21 + $0x118] sm:$0xff] }
  0x2c   : > { %1141 = vmatmul.msk.f32.gmra.mxu1 %vm333_vm0, %v182_v29  ;;  %542 = vmatmul.f32.vlgmr.msra.gmra.mxu0 %v177_v30  ;;  %v207_v29 = vld [vmem:[%s1323_s21 + $0xf0] sm:$0xff]  ;;  %v278_v30 = vld [vmem:[%s1323_s21 + $0x328] sm:$0xff] }
  0x2d   : > { %1174 = vmatmul.msk.f32.gmra.mxu3 %vm333_vm0, %v248_v31  ;;  %v1464_v31 = vld [vmem:[%s1806_s2] ss:$0 sm:$0xff] }
  0x33   : > { %638 = vmatmul.f32.gmra.mxu2 %v241_v32 }
  0x34   : > { %1142 = vmatmul.msk.f32.gmra.mxu1 %vm333_vm0, %v184_v33  ;;  %545 = vmatmul.f32.gmra.mxu0 %v179_v34  ;;  %v271_v33 = vld [vmem:[%s1323_s21 + $0x2f0] sm:$0xff]  ;;  %v214_v34 = vld [vmem:[%s1323_s21 + $0x128] sm:$0xff] }
  0x35   : > { %1175 = vmatmul.msk.f32.gmra.mxu3 %vm333_vm0, %v250_v35 }
  0x3b   : > { %641 = vmatmul.f32.gmra.mxu2 %v243_v36 }
  0x3c   : > { %1143 = vmatmul.msk.f32.gmra.mxu1 %vm333_vm0, %v186_v37  ;;  %548 = vmatmul.f32.gmra.mxu0 %v181_v38  ;;  %v209_v37 = vld [vmem:[%s1323_s21 + $0x100] sm:$0xff] }
  0x3d   : > { %1176 = vmatmul.msk.f32.gmra.mxu3 %vm333_vm0, %v252_v39  ;;  %v280_v39 = vld [vmem:[%s1323_s21 + $0x338] sm:$0xff] }
  0x43   : > { %644 = vmatmul.f32.gmra.mxu2 %v245_v40 }
  0x44   : > { %1144 = vmatmul.msk.f32.gmra.mxu1 %vm333_vm0, %v188_v41  ;;  %551 = vmatmul.f32.gmra.mxu0 %v183_v42 }
  0x45   : > { %1177 = vmatmul.msk.f32.gmra.mxu3 %vm333_vm0, %v254_v43 }
  0x4b   : > { %647 = vmatmul.f32.gmra.mxu2 %v247_v44  ;;  %v273_v44 = vld [vmem:[%s1323_s21 + $0x300] sm:$0xff] }
  0x4c   : > { %1145 = vmatmul.msk.f32.gmra.mxu1 %vm333_vm0, %v190_v45  ;;  %554 = vmatmul.f32.gmra.mxu0 %v185_v46  ;;  %v216_v45 = vld [vmem:[%s1323_s21 + $0x138] sm:$0xff] }
  0x4d   : > { %1178 = vmatmul.msk.f32.gmra.mxu3 %vm333_vm0, %v256_v47 }
  0x53   : > { %650 = vmatmul.f32.gmra.mxu2 %v249_v48  ;;  %v211_v48 = vld [vmem:[%s1323_s21 + $0x110] sm:$0xff] }
  0x54   : > { %1146 = vmatmul.msk.f32.gmra.mxu1 %vm333_vm0, %v192_v49  ;;  %557 = vmatmul.f32.gmra.mxu0 %v187_v50  ;;  %v282_v50 = vld [vmem:[%s1323_s21 + $0x348] sm:$0xff] }
  0x55   : > { %1179 = vmatmul.msk.f32.gmra.mxu3 %vm333_vm0, %v258_v51 }
  0x5b   : > { %653 = vmatmul.f32.gmra.mxu2 %v251_v52 }
  0x5c   : > { %1147 = vmatmul.msk.f32.gmra.mxu1 %vm333_vm0, %v194_v53  ;;  %560 = vmatmul.f32.gmra.mxu0 %v189_v54 }
  0x5d   : > { %1180 = vmatmul.msk.f32.gmra.mxu3 %vm333_vm0, %v260_v55  ;;  %v275_v55 = vld [vmem:[%s1323_s21 + $0x310] sm:$0xff] }
  0x63   : > { %656 = vmatmul.f32.gmra.mxu2 %v253_v56  ;;  %v218_v56 = vld [vmem:[%s1323_s21 + $0x148] sm:$0xff] }
  0x64   : > { %1148 = vmatmul.msk.f32.gmra.mxu1 %vm333_vm0, %v196_v57  ;;  %563 = vmatmul.f32.gmra.mxu0 %v191_v58 }
  0x65   : > { %1181 = vmatmul.msk.f32.gmra.mxu3 %vm333_vm0, %v262_v59  ;;  %v213_v59 = vld [vmem:[%s1323_s21 + $0x120] sm:$0xff] }
  0x6b   : > { %659 = vmatmul.f32.gmra.mxu2 %v255_v60 }
  0x6c   : > { %1149 = vmatmul.msk.f32.gmra.mxu1 %vm333_vm0, %v198_v61  ;;  %566 = vmatmul.f32.gmra.mxu0 %v193_v62  ;;  %v284_v61 = vld [vmem:[%s1323_s21 + $0x358] sm:$0xff] }
  0x6d   : > { %1182 = vmatmul.msk.f32.gmra.mxu3 %vm333_vm0, %v264_v63 }
  0x73   : > { %662 = vmatmul.f32.gmra.mxu2 %v257_v0 }
  0x74   : > { %1150 = vmatmul.msk.f32.gmra.mxu1 %vm333_vm0, %v200_v1  ;;  %569 = vmatmul.f32.gmra.mxu0 %v195_v2 }
  0x75   : > { %1183 = vmatmul.msk.f32.gmra.mxu3 %vm333_vm0, %v266_v3  ;;  %v277_v3 = vld [vmem:[%s1323_s21 + $0x320] sm:$0xff] }
  0x7b   : > { %665 = vmatmul.f32.gmra.mxu2 %v259_v4  ;;  %v220_v4 = vld [vmem:[%s1323_s21 + $0x158] sm:$0xff] }
  0x7c   : > { %1151 = vmatmul.msk.f32.gmra.mxu1 %vm333_vm0, %v202_v5  ;;  %572 = vmatmul.f32.gmra.mxu0 %v197_v6 }
  0x7d   : > { %1184 = vmatmul.msk.f32.gmra.mxu3 %vm333_vm0, %v268_v7 }
  0x83   : > { %668 = vmatmul.f32.gmra.mxu2 %v261_v8  ;;  %v215_v8 = vld [vmem:[%s1323_s21 + $0x130] sm:$0xff] }
  0x84   : > { %1152 = vmatmul.msk.f32.gmra.mxu1 %vm333_vm0, %v204_v9  ;;  %575 = vmatmul.f32.gmra.mxu0 %v199_v10 }
  0x85   : > { %1185 = vmatmul.msk.f32.gmra.mxu3 %vm333_vm0, %v270_v11  ;;  %v286_v11 = vld [vmem:[%s1323_s21 + $0x368] sm:$0xff] }
  0x8b   : > { %671 = vmatmul.f32.gmra.mxu2 %v263_v12 }
  0x8c   : > { %1153 = vmatmul.msk.f32.gmra.mxu1 %vm333_vm0, %v206_v13  ;;  %578 = vmatmul.f32.gmra.mxu0 %v201_v14 }
  0x8d   : > { %1186 = vmatmul.msk.f32.gmra.mxu3 %vm333_vm0, %v272_v15 }
  0x93   : > { %674 = vmatmul.f32.gmra.mxu2 %v265_v16 }
  0x94   : > { %1154 = vmatmul.msk.f32.gmra.mxu1 %vm333_vm0, %v208_v17  ;;  %581 = vmatmul.f32.gmra.mxu0 %v203_v18  ;;  %v279_v17 = vld [vmem:[%s1323_s21 + $0x330] sm:$0xff]  ;;  %v222_v18 = vld [vmem:[%s1323_s21 + $0x168] sm:$0xff] }
  0x95   : > { %1187 = vmatmul.msk.f32.gmra.mxu3 %vm333_vm0, %v274_v19 }
  0x99   : > { %v752_v20 = vpop.f32.mrf.mxu1 }
  0x9b   : > { %677 = vmatmul.f32.gmra.mxu2 %v267_v21 }
  0x9c   : > { %1155 = vmatmul.msk.f32.gmra.mxu1 %vm333_vm0, %v210_v22  ;;  %584 = vmatmul.f32.gmra.mxu0 %v205_v23  ;;  %v217_v22 = vld [vmem:[%s1323_s21 + $0x140] sm:$0xff] }
  0x9d   : > { %1188 = vmatmul.msk.f32.gmra.mxu3 %vm333_vm0, %v276_v24 }
  0xa0   : > { %v1455_v28 = vpop.f32.mrf.mxu3 }
  0xa1   : > { %v755_v25 = vpop.f32.mrf.mxu1 }
  0xa3   : > { %680 = vmatmul.f32.gmra.mxu2 %v269_v26 }
  0xa4   : > { %1156 = vmatmul.msk.f32.gmra.mxu1 %vm333_vm0, %v212_v27  ;;  %587 = vmatmul.f32.gmra.mxu0 %v207_v29 }
  0xa5   : > { %1189 = vmatmul.msk.f32.gmra.mxu3 %vm333_vm0, %v278_v30 }
  0xa8   : > { %v1468_v35 = vpop.f32.mrf.mxu3 }
  0xa9   : > { %v758_v32 = vpop.f32.mrf.mxu1  ;;  %v543_v36 = vpop.f32.mrf.mxu0 }
  0xaa   : > { %v544_v38 = vadd.f32 %v1464_v31, %v543_v36 }
  0xab   : > { %683 = vmatmul.f32.gmra.mxu2 %v271_v33  ;;  %v224_v33 = vld [vmem:[%s1323_s21 + $0x178] sm:$0xff] }
  0xac   : > { %1157 = vmatmul.msk.f32.gmra.mxu1 %vm333_vm0, %v214_v34  ;;  %v753_v40 = vadd.f32 %v752_v20, %v544_v38  ;;  %590 = vmatmul.f32.gmra.mxu0 %v209_v37  ;;  %v219_v37 = vld [vmem:[%s1323_s21 + $0x150] sm:$0xff] }
  0xad   : > { %1190 = vmatmul.msk.f32.gmra.mxu3 %vm333_vm0, %v280_v39 }
  0xae   : > { %v1481_v41 = vpop.f32.mrf.mxu2  ;;  %v944_v42 = vmax.f32 %v753_v40, 0.0  ;;  %v290_v40 = vld [vmem:[%s1323_s21 + $0x388] sm:$0xff] }
  0xb0   : > { %v1485_v46 = vpop.f32.mrf.mxu3  ;;  %1009 = vst.msk [vmem:[%s1479_s23] sm:$0xff] %vm1008_vm1, %v944_v42 }
  0xb1   : > { %v761_v43 = vpop.f32.mrf.mxu1  ;;  %v546_v47 = vpop.f32.mrf.mxu0 }
  0xb2   : > { %v547_v49 = vadd.f32 %v1464_v31, %v546_v47  ;;  %v283_v47 = vld [vmem:[%s1323_s21 + $0x350] sm:$0xff] }
  0xb3   : > { %686 = vmatmul.f32.gmra.mxu2 %v273_v44 }
  0xb4   : > { %1158 = vmatmul.msk.f32.gmra.mxu1 %vm333_vm0, %v216_v45  ;;  %v756_v51 = vadd.f32 %v755_v25, %v547_v49  ;;  %593 = vmatmul.f32.gmra.mxu0 %v211_v48  ;;  %v288_v25 = vld [vmem:[%s1323_s21 + $0x378] sm:$0xff]  ;;  %v226_v48 = vld [vmem:[%s1323_s21 + $0x188] sm:$0xff] }
  0xb5   : > { %1191 = vmatmul.msk.f32.gmra.mxu3 %vm333_vm0, %v282_v50 }
  0xb6   : > { %v1494_v52 = vpop.f32.mrf.mxu2  ;;  %v945_v53 = vmax.f32 %v756_v51, 0.0 }
  0xb8   : > { %v1498_v57 = vpop.f32.mrf.mxu3  ;;  %1010 = vst.msk [vmem:[%s1479_s23 + $0x8] sm:$0xff] %vm1008_vm1, %v945_v53  ;;  %v221_v53 = vld [vmem:[%s1323_s21 + $0x160] sm:$0xff] }
  0xb9   : > { %v764_v54 = vpop.f32.mrf.mxu1  ;;  %v549_v58 = vpop.f32.mrf.mxu0 }
  0xba   : > { %v550_v60 = vadd.f32 %v1464_v31, %v549_v58 }
  0xbb   : > { %689 = vmatmul.f32.gmra.mxu2 %v275_v55 }
  0xbc   : > { %1159 = vmatmul.msk.f32.gmra.mxu1 %vm333_vm0, %v218_v56  ;;  %v759_v62 = vadd.f32 %v758_v32, %v550_v60  ;;  %596 = vmatmul.f32.gmra.mxu0 %v213_v59  ;;  %v281_v32 = vld [vmem:[%s1323_s21 + $0x340] sm:$0xff]  ;;  %v292_v56 = vld [vmem:[%s1323_s21 + $0x398] sm:$0xff] }
  0xbd   : > { %1192 = vmatmul.msk.f32.gmra.mxu3 %vm333_vm0, %v284_v61 }
  0xbe   : > { %v642_v63 = vpop.f32.mrf.mxu2  ;;  %v946_v0 = vmax.f32 %v759_v62, 0.0  ;;  %v285_v62 = vld [vmem:[%s1323_s21 + $0x360] sm:$0xff] }
  0xbf   : > { %v643_v1 = vadd.f32 %v1464_v31, %v642_v63  ;;  %v228_v63 = vld [vmem:[%s1323_s21 + $0x198] sm:$0xff] }
  0xc0   : > { %v1510_v5 = vpop.f32.mrf.mxu3  ;;  %1011 = vst.msk [vmem:[%s1479_s23 + $0x10] sm:$0xff] %vm1008_vm1, %v946_v0 }
  0xc1   : > { %v767_v2 = vpop.f32.mrf.mxu1  ;;  %v852_v6 = vadd.f32 %v1455_v28, %v643_v1  ;;  %v552_v7 = vpop.f32.mrf.mxu0 }
  0xc2   : > { %v553_v10 = vadd.f32 %v1464_v31, %v552_v7  ;;  %v294_v7 = vld [vmem:[%s1323_s21 + $0x3a8] sm:$0xff] }
  0xc3   : > { %v977_v9 = vmax.f32 %v852_v6, 0.0  ;;  %692 = vmatmul.f32.gmra.mxu2 %v277_v3  ;;  %v223_v3 = vld [vmem:[%s1323_s21 + $0x170] sm:$0xff] }
  0xc4   : > { %1160 = vmatmul.msk.f32.gmra.mxu1 %vm333_vm0, %v220_v4  ;;  %v762_v12 = vadd.f32 %v761_v43, %v553_v10  ;;  %599 = vmatmul.f32.gmra.mxu0 %v215_v8 }
  0xc5   : > { %1042 = vst.msk [vmem:[%s1479_s23 + $0x108] sm:$0xff] %vm1008_vm1, %v977_v9  ;;  %1193 = vmatmul.msk.f32.gmra.mxu3 %vm333_vm0, %v286_v11 }
  0xc6   : > { %v645_v13 = vpop.f32.mrf.mxu2  ;;  %v947_v14 = vmax.f32 %v762_v12, 0.0  ;;  %v287_v12 = vld [vmem:[%s1323_s21 + $0x370] sm:$0xff] }
  0xc7   : > { %v646_v15 = vadd.f32 %v1464_v31, %v645_v13  ;;  %v230_v13 = vld [vmem:[%s1323_s21 + $0x1a8] sm:$0xff] }
  0xc8   : > { %v1525_v19 = vpop.f32.mrf.mxu3  ;;  %1012 = vst.msk [vmem:[%s1479_s23 + $0x18] sm:$0xff] %vm1008_vm1, %v947_v14 }
  0xc9   : > { %v770_v16 = vpop.f32.mrf.mxu1  ;;  %v855_v20 = vadd.f32 %v1468_v35, %v646_v15  ;;  %v555_v21 = vpop.f32.mrf.mxu0 }
  0xca   : > { %v556_v24 = vadd.f32 %v1464_v31, %v555_v21  ;;  %v296_v21 = vld [vmem:[%s1323_s21 + $0x3b8] sm:$0xff] }
  0xcb   : > { %v978_v23 = vmax.f32 %v855_v20, 0.0  ;;  %695 = vmatmul.f32.gmra.mxu2 %v279_v17  ;;  %v225_v17 = vld [vmem:[%s1323_s21 + $0x180] sm:$0xff] }
  0xcc   : > { %1161 = vmatmul.msk.f32.gmra.mxu1 %vm333_vm0, %v222_v18  ;;  %v765_v26 = vadd.f32 %v764_v54, %v556_v24  ;;  %602 = vmatmul.f32.gmra.mxu0 %v217_v22 }
  0xcd   : > { %1043 = vst.msk [vmem:[%s1479_s23 + $0x110] sm:$0xff] %vm1008_vm1, %v978_v23  ;;  %1194 = vmatmul.msk.f32.gmra.mxu3 %vm333_vm0, %v288_v25 }
  0xce   : > { %v648_v27 = vpop.f32.mrf.mxu2  ;;  %v948_v28 = vmax.f32 %v765_v26, 0.0  ;;  %v289_v26 = vld [vmem:[%s1323_s21 + $0x380] sm:$0xff] }
  0xcf   : > { %v649_v29 = vadd.f32 %v1464_v31, %v648_v27  ;;  %v232_v27 = vld [vmem:[%s1323_s21 + $0x1b8] sm:$0xff] }
  0xd0   : > { %v1540_v34 = vpop.f32.mrf.mxu3  ;;  %1013 = vst.msk [vmem:[%s1479_s23 + $0x20] sm:$0xff] %vm1008_vm1, %v948_v28 }
  0xd1   : > { %v773_v30 = vpop.f32.mrf.mxu1  ;;  %v858_v35 = vadd.f32 %v1485_v46, %v649_v29  ;;  %v558_v36 = vpop.f32.mrf.mxu0 }
  0xd2   : > { %v559_v39 = vadd.f32 %v1464_v31, %v558_v36  ;;  %v298_v36 = vld [vmem:[%s1323_s21 + $0x3c8] sm:$0xff] }
  0xd3   : > { %v979_v38 = vmax.f32 %v858_v35, 0.0  ;;  %698 = vmatmul.f32.gmra.mxu2 %v281_v32  ;;  %v227_v32 = vld [vmem:[%s1323_s21 + $0x190] sm:$0xff] }
  0xd4   : > { %1162 = vmatmul.msk.f32.gmra.mxu1 %vm333_vm0, %v224_v33  ;;  %v768_v42 = vadd.f32 %v767_v2, %v559_v39  ;;  %605 = vmatmul.f32.gmra.mxu0 %v219_v37 }
  0xd5   : > { %1044 = vst.msk [vmem:[%s1479_s23 + $0x118] sm:$0xff] %vm1008_vm1, %v979_v38  ;;  %1195 = vmatmul.msk.f32.gmra.mxu3 %vm333_vm0, %v290_v40 }
  0xd6   : > { %v651_v43 = vpop.f32.mrf.mxu2  ;;  %v949_v44 = vmax.f32 %v768_v42, 0.0  ;;  %v291_v42 = vld [vmem:[%s1323_s21 + $0x390] sm:$0xff] }
  0xd7   : > { %v652_v45 = vadd.f32 %v1464_v31, %v651_v43  ;;  %v234_v43 = vld [vmem:[%s1323_s21 + $0x1c8] sm:$0xff] }
  0xd8   : > { %v1555_v49 = vpop.f32.mrf.mxu3  ;;  %1014 = vst.msk [vmem:[%s1479_s23 + $0x28] sm:$0xff] %vm1008_vm1, %v949_v44 }
  0xd9   : > { %v776_v46 = vpop.f32.mrf.mxu1  ;;  %v861_v50 = vadd.f32 %v1498_v57, %v652_v45  ;;  %v561_v51 = vpop.f32.mrf.mxu0 }
  0xda   : > { %v562_v55 = vadd.f32 %v1464_v31, %v561_v51  ;;  %v300_v51 = vld [vmem:[%s1323_s21 + $0x3d8] sm:$0xff] }
  0xdb   : > { %v980_v54 = vmax.f32 %v861_v50, 0.0  ;;  %701 = vmatmul.f32.gmra.mxu2 %v283_v47  ;;  %v229_v47 = vld [vmem:[%s1323_s21 + $0x1a0] sm:$0xff] }
  0xdc   : > { %1163 = vmatmul.msk.f32.gmra.mxu1 %vm333_vm0, %v226_v48  ;;  %v771_v58 = vadd.f32 %v770_v16, %v562_v55  ;;  %608 = vmatmul.f32.gmra.mxu0 %v221_v53 }
  0xdd   : > { %1045 = vst.msk [vmem:[%s1479_s23 + $0x120] sm:$0xff] %vm1008_vm1, %v980_v54  ;;  %1196 = vmatmul.msk.f32.gmra.mxu3 %vm333_vm0, %v292_v56 }
  0xde   : > { %v654_v57 = vpop.f32.mrf.mxu2  ;;  %v950_v59 = vmax.f32 %v771_v58, 0.0  ;;  %v293_v58 = vld [vmem:[%s1323_s21 + $0x3a0] sm:$0xff] }
  0xdf   : > { %v655_v60 = vadd.f32 %v1464_v31, %v654_v57  ;;  %v236_v57 = vld [vmem:[%s1323_s21 + $0x1d8] sm:$0xff] }
  0xe0   : > { %v1570_v0 = vpop.f32.mrf.mxu3  ;;  %1015 = vst.msk [vmem:[%s1479_s23 + $0x30] sm:$0xff] %vm1008_vm1, %v950_v59 }
  0xe1   : > { %v779_v61 = vpop.f32.mrf.mxu1  ;;  %v864_v1 = vadd.f32 %v1510_v5, %v655_v60  ;;  %v564_v2 = vpop.f32.mrf.mxu0 }
  0xe2   : > { %v565_v6 = vadd.f32 %v1464_v31, %v564_v2  ;;  %v302_v2 = vld [vmem:[%s1323_s21 + $0x3e8] sm:$0xff] }
  0xe3   : > { %v981_v4 = vmax.f32 %v864_v1, 0.0  ;;  %704 = vmatmul.f32.gmra.mxu2 %v285_v62  ;;  %v231_v62 = vld [vmem:[%s1323_s21 + $0x1b0] sm:$0xff] }
  0xe4   : > { %1164 = vmatmul.msk.f32.gmra.mxu1 %vm333_vm0, %v228_v63  ;;  %v774_v8 = vadd.f32 %v773_v30, %v565_v6  ;;  %611 = vmatmul.f32.gmra.mxu0 %v223_v3 }
  0xe5   : > { %1046 = vst.msk [vmem:[%s1479_s23 + $0x128] sm:$0xff] %vm1008_vm1, %v981_v4  ;;  %1197 = vmatmul.msk.f32.gmra.mxu3 %vm333_vm0, %v294_v7 }
  0xe6   : > { %v657_v5 = vpop.f32.mrf.mxu2  ;;  %v951_v9 = vmax.f32 %v774_v8, 0.0  ;;  %v295_v8 = vld [vmem:[%s1323_s21 + $0x3b0] sm:$0xff] }
  0xe7   : > { %v658_v10 = vadd.f32 %v1464_v31, %v657_v5  ;;  %v238_v5 = vld [vmem:[%s1323_s21 + $0x1e8] sm:$0xff] }
  0xe8   : > { %v1585_v14 = vpop.f32.mrf.mxu3  ;;  %1016 = vst.msk [vmem:[%s1479_s23 + $0x38] sm:$0xff] %vm1008_vm1, %v951_v9 }
  0xe9   : > { %v782_v11 = vpop.f32.mrf.mxu1  ;;  %v867_v15 = vadd.f32 %v1525_v19, %v658_v10  ;;  %v567_v16 = vpop.f32.mrf.mxu0 }
  0xea   : > { %v568_v20 = vadd.f32 %v1464_v31, %v567_v16  ;;  %v304_v16 = vld [vmem:[%s1323_s21 + $0x3f8] sm:$0xff] }
  0xeb   : > { %v982_v18 = vmax.f32 %v867_v15, 0.0  ;;  %707 = vmatmul.f32.gmra.mxu2 %v287_v12  ;;  %v233_v12 = vld [vmem:[%s1323_s21 + $0x1c0] sm:$0xff] }
  0xec   : > { %1165 = vmatmul.msk.f32.gmra.mxu1 %vm333_vm0, %v230_v13  ;;  %v777_v22 = vadd.f32 %v776_v46, %v568_v20  ;;  %614 = vmatmul.f32.gmra.mxu0 %v225_v17 }
  0xed   : > { %1047 = vst.msk [vmem:[%s1479_s23 + $0x130] sm:$0xff] %vm1008_vm1, %v982_v18  ;;  %1198 = vmatmul.msk.f32.gmra.mxu3 %vm333_vm0, %v296_v21 }
  0xee   : > { %v660_v19 = vpop.f32.mrf.mxu2  ;;  %v952_v23 = vmax.f32 %v777_v22, 0.0  ;;  %v297_v22 = vld [vmem:[%s1323_s21 + $0x3c0] sm:$0xff] }
  0xef   : > { %v661_v24 = vadd.f32 %v1464_v31, %v660_v19  ;;  %v240_v19 = vld [vmem:[%s1323_s21 + $0x1f8] sm:$0xff] }
  0xf0   : > { %v1600_v28 = vpop.f32.mrf.mxu3  ;;  %1017 = vst.msk [vmem:[%s1479_s23 + $0x40] sm:$0xff] %vm1008_vm1, %v952_v23 }
  0xf1   : > { %v785_v25 = vpop.f32.mrf.mxu1  ;;  %v870_v29 = vadd.f32 %v1540_v34, %v661_v24  ;;  %v570_v30 = vpop.f32.mrf.mxu0 }
  0xf2   : > { %v571_v35 = vadd.f32 %v1464_v31, %v570_v30 }
  0xf3   : > { %v983_v33 = vmax.f32 %v870_v29, 0.0  ;;  %710 = vmatmul.f32.gmra.mxu2 %v289_v26  ;;  %v235_v26 = vld [vmem:[%s1323_s21 + $0x1d0] sm:$0xff] }
  0xf4   : > { %1166 = vmatmul.msk.f32.gmra.mxu1 %vm333_vm0, %v232_v27  ;;  %v780_v37 = vadd.f32 %v779_v61, %v571_v35  ;;  %617 = vmatmul.f32.gmra.mxu0 %v227_v32 }
  0xf5   : > { %1048 = vst.msk [vmem:[%s1479_s23 + $0x138] sm:$0xff] %vm1008_vm1, %v983_v33  ;;  %1199 = vmatmul.msk.f32.gmra.mxu3 %vm333_vm0, %v298_v36  ;;  %v299_v36 = vld [vmem:[%s1323_s21 + $0x3d0] sm:$0xff] }
  0xf6   : > { %v663_v34 = vpop.f32.mrf.mxu2  ;;  %v953_v38 = vmax.f32 %v780_v37, 0.0  ;;  %v242_v37 = vld [vmem:[%s1323_s21 + $0x208] sm:$0xff] }
  0xf7   : > { %v664_v39 = vadd.f32 %v1464_v31, %v663_v34 }
  0xf8   : > { %v1615_v44 = vpop.f32.mrf.mxu3  ;;  %1018 = vst.msk [vmem:[%s1479_s23 + $0x48] sm:$0xff] %vm1008_vm1, %v953_v38 }
  0xf9   : > { %v788_v40 = vpop.f32.mrf.mxu1  ;;  %v873_v45 = vadd.f32 %v1555_v49, %v664_v39  ;;  %v573_v46 = vpop.f32.mrf.mxu0 }
  0xfa   : > { %v574_v50 = vadd.f32 %v1464_v31, %v573_v46 }
  0xfb   : > { %v984_v48 = vmax.f32 %v873_v45, 0.0  ;;  %713 = vmatmul.f32.gmra.mxu2 %v291_v42 }
  0xfc   : > { %1167 = vmatmul.msk.f32.gmra.mxu1 %vm333_vm0, %v234_v43  ;;  %v783_v53 = vadd.f32 %v782_v11, %v574_v50  ;;  %620 = vmatmul.f32.gmra.mxu0 %v229_v47 }
  0xfd   : > { %1049 = vst.msk [vmem:[%s1479_s23 + $0x140] sm:$0xff] %vm1008_vm1, %v984_v48  ;;  %1200 = vmatmul.msk.f32.gmra.mxu3 %vm333_vm0, %v300_v51 }
  0xfe   : > { %v666_v49 = vpop.f32.mrf.mxu2  ;;  %v954_v54 = vmax.f32 %v783_v53, 0.0 }
  0xff   : > { %v667_v55 = vadd.f32 %v1464_v31, %v666_v49 }
 0x100   : > { %v1630_v59 = vpop.f32.mrf.mxu3  ;;  %1019 = vst.msk [vmem:[%s1479_s23 + $0x50] sm:$0xff] %vm1008_vm1, %v954_v54 }
 0x101   : > { %v791_v56 = vpop.f32.mrf.mxu1  ;;  %v876_v60 = vadd.f32 %v1570_v0, %v667_v55  ;;  %v576_v61 = vpop.f32.mrf.mxu0 }
 0x102   : > { %v577_v1 = vadd.f32 %v1464_v31, %v576_v61 }
 0x103   : > { %v985_v63 = vmax.f32 %v876_v60, 0.0  ;;  %716 = vmatmul.f32.gmra.mxu2 %v293_v58 }
 0x104   : > { %1168 = vmatmul.msk.f32.gmra.mxu1 %vm333_vm0, %v236_v57  ;;  %v786_v3 = vadd.f32 %v785_v25, %v577_v1  ;;  %623 = vmatmul.f32.gmra.mxu0 %v231_v62  ;;  %v303_v62 = vld [vmem:[%s1323_s21 + $0x3f0] sm:$0xff] }
 0x105   : > { %1050 = vst.msk [vmem:[%s1479_s23 + $0x148] sm:$0xff] %vm1008_vm1, %v985_v63  ;;  %1201 = vmatmul.msk.f32.gmra.mxu3 %vm333_vm0, %v302_v2 }
 0x106   : > { %v669_v0 = vpop.f32.mrf.mxu2  ;;  %v955_v4 = vmax.f32 %v786_v3, 0.0 }
 0x107   : > { %v670_v6 = vadd.f32 %v1464_v31, %v669_v0 }
 0x108   : > { %v1645_v9 = vpop.f32.mrf.mxu3  ;;  %1020 = vst.msk [vmem:[%s1479_s23 + $0x58] sm:$0xff] %vm1008_vm1, %v955_v4 }
 0x109   : > { %v794_v7 = vpop.f32.mrf.mxu1  ;;  %v879_v10 = vadd.f32 %v1585_v14, %v670_v6  ;;  %v579_v11 = vpop.f32.mrf.mxu0 }
 0x10a   : > { %v580_v15 = vadd.f32 %v1464_v31, %v579_v11 }
 0x10b   : > { %v986_v13 = vmax.f32 %v879_v10, 0.0  ;;  %719 = vmatmul.f32.gmra.mxu2 %v295_v8 }
 0x10c   : > { %1169 = vmatmul.msk.f32.gmra.mxu1 %vm333_vm0, %v238_v5  ;;  %v789_v17 = vadd.f32 %v788_v40, %v580_v15  ;;  %626 = vmatmul.f32.gmra.mxu0 %v233_v12  ;;  %v237_v40 = vld [vmem:[%s1323_s21 + $0x1e0] sm:$0xff] }
 0x10d   : > { %1051 = vst.msk [vmem:[%s1479_s23 + $0x150] sm:$0xff] %vm1008_vm1, %v986_v13  ;;  %1202 = vmatmul.msk.f32.gmra.mxu3 %vm333_vm0, %v304_v16 }
 0x10e   : > { %v672_v14 = vpop.f32.mrf.mxu2  ;;  %v956_v18 = vmax.f32 %v789_v17, 0.0 }
 0x10f   : > { %v673_v20 = vadd.f32 %v1464_v31, %v672_v14 }
 0x110   : > { %v1660_v23 = vpop.f32.mrf.mxu3  ;;  %1021 = vst.msk [vmem:[%s1479_s23 + $0x60] sm:$0xff] %vm1008_vm1, %v956_v18 }
 0x111   : > { %v797_v21 = vpop.f32.mrf.mxu1  ;;  %v882_v24 = vadd.f32 %v1600_v28, %v673_v20  ;;  %v582_v25 = vpop.f32.mrf.mxu0 }
 0x112   : > { %v583_v29 = vadd.f32 %v1464_v31, %v582_v25 }
 0x113   : > { %v987_v27 = vmax.f32 %v882_v24, 0.0  ;;  %722 = vmatmul.f32.gmra.mxu2 %v297_v22 }
 0x114   : > { %1170 = vmatmul.msk.f32.gmra.mxu1 %vm333_vm0, %v240_v19  ;;  %v792_v30 = vadd.f32 %v791_v56, %v583_v29  ;;  %629 = vmatmul.f32.gmra.mxu0 %v235_v26 }
 0x115   : > { %1052 = vst.msk [vmem:[%s1479_s23 + $0x158] sm:$0xff] %vm1008_vm1, %v987_v27 }
 0x116   : > { %v675_v32 = vpop.f32.mrf.mxu2  ;;  %v957_v33 = vmax.f32 %v792_v30, 0.0 }
 0x117   : > { %v676_v35 = vadd.f32 %v1464_v31, %v675_v32 }
 0x118   : > { %v896_v34 = vpop.f32.mrf.mxu3  ;;  %1022 = vst.msk [vmem:[%s1479_s23 + $0x68] sm:$0xff] %vm1008_vm1, %v957_v33 }
 0x119   : > { %v800_v28 = vpop.f32.mrf.mxu1  ;;  %v885_v38 = vadd.f32 %v1615_v44, %v676_v35  ;;  %v585_v39 = vpop.f32.mrf.mxu0  ;;  %v301_v44 = vld [vmem:[%s1323_s21 + $0x3e0] sm:$0xff] }
 0x11a   : > { %v586_v43 = vadd.f32 %v1464_v31, %v585_v39 }
 0x11b   : > { %v988_v42 = vmax.f32 %v885_v38, 0.0  ;;  %725 = vmatmul.f32.gmra.mxu2 %v299_v36 }
 0x11c   : > { %1171 = vmatmul.msk.f32.gmra.mxu1 %vm333_vm0, %v242_v37  ;;  %v795_v45 = vadd.f32 %v794_v7, %v586_v43  ;;  %632 = vmatmul.f32.gmra.mxu0 %v237_v40 }
 0x11d   : > { %1053 = vst.msk [vmem:[%s1479_s23 + $0x160] sm:$0xff] %vm1008_vm1, %v988_v42 }
 0x11e   : > { %v678_v46 = vpop.f32.mrf.mxu2  ;;  %v958_v47 = vmax.f32 %v795_v45, 0.0 }
 0x11f   : > { %v679_v48 = vadd.f32 %v1464_v31, %v678_v46 }
 0x120   : > { %1023 = vst.msk [vmem:[%s1479_s23 + $0x70] sm:$0xff] %vm1008_vm1, %v958_v47  ;;  %v899_v49 = vpop.f32.mrf.mxu3 }
 0x121   : > { %v803_v50 = vpop.f32.mrf.mxu1  ;;  %v888_v51 = vadd.f32 %v1630_v59, %v679_v48  ;;  %v588_v53 = vpop.f32.mrf.mxu0 }
 0x122   : > { %v589_v55 = vadd.f32 %v1464_v31, %v588_v53 }
 0x123   : > { %v989_v54 = vmax.f32 %v888_v51, 0.0  ;;  %728 = vmatmul.f32.gmra.mxu2 %v301_v44 }
 0x124   : > { %v798_v56 = vadd.f32 %v797_v21, %v589_v55 }
 0x125   : > { %1054 = vst.msk [vmem:[%s1479_s23 + $0x168] sm:$0xff] %vm1008_vm1, %v989_v54 }
 0x126   : > { %v681_v58 = vpop.f32.mrf.mxu2  ;;  %v959_v57 = vmax.f32 %v798_v56, 0.0 }
 0x127   : > { %v682_v60 = vadd.f32 %v1464_v31, %v681_v58 }
 0x128   : > { %1024 = vst.msk [vmem:[%s1479_s23 + $0x78] sm:$0xff] %vm1008_vm1, %v959_v57  ;;  %v902_v3 = vpop.f32.mrf.mxu3 }
 0x129   : > { %v806_v61 = vpop.f32.mrf.mxu1  ;;  %v891_v59 = vadd.f32 %v1645_v9, %v682_v60  ;;  %v591_v63 = vpop.f32.mrf.mxu0 }
 0x12a   : > { %v592_v2 = vadd.f32 %v1464_v31, %v591_v63 }
 0x12b   : > { %v990_v1 = vmax.f32 %v891_v59, 0.0  ;;  %731 = vmatmul.f32.gmra.mxu2 %v303_v62 }
 0x12c   : > { %v801_v0 = vadd.f32 %v800_v28, %v592_v2 }
 0x12d   : > { %1055 = vst.msk [vmem:[%s1479_s23 + $0x170] sm:$0xff] %vm1008_vm1, %v990_v1 }
 0x12e   : > { %v684_v4 = vpop.f32.mrf.mxu2  ;;  %v960_v6 = vmax.f32 %v801_v0, 0.0 }
 0x12f   : > { %v685_v7 = vadd.f32 %v1464_v31, %v684_v4 }
 0x130   : > { %1025 = vst.msk [vmem:[%s1479_s23 + $0x80] sm:$0xff] %vm1008_vm1, %v960_v6  ;;  %v905_v15 = vpop.f32.mrf.mxu3 }
 0x131   : > { %v809_v8 = vpop.f32.mrf.mxu1  ;;  %v894_v5 = vadd.f32 %v1660_v23, %v685_v7  ;;  %v594_v9 = vpop.f32.mrf.mxu0 }
 0x132   : > { %v595_v11 = vadd.f32 %v1464_v31, %v594_v9 }
 0x133   : > { %v991_v10 = vmax.f32 %v894_v5, 0.0 }
 0x134   : > { %v804_v12 = vadd.f32 %v803_v50, %v595_v11 }
 0x135   : > { %1056 = vst.msk [vmem:[%s1479_s23 + $0x178] sm:$0xff] %vm1008_vm1, %v991_v10 }
 0x136   : > { %v687_v13 = vpop.f32.mrf.mxu2  ;;  %v961_v16 = vmax.f32 %v804_v12, 0.0 }
 0x137   : > { %v688_v17 = vadd.f32 %v1464_v31, %v687_v13 }
 0x138   : > { %1026 = vst.msk [vmem:[%s1479_s23 + $0x88] sm:$0xff] %vm1008_vm1, %v961_v16  ;;  %v908_v27 = vpop.f32.mrf.mxu3 }
 0x139   : > { %v812_v14 = vpop.f32.mrf.mxu1  ;;  %v897_v18 = vadd.f32 %v896_v34, %v688_v17  ;;  %v597_v20 = vpop.f32.mrf.mxu0 }
 0x13a   : > { %v598_v22 = vadd.f32 %v1464_v31, %v597_v20 }
 0x13b   : > { %v992_v21 = vmax.f32 %v897_v18, 0.0 }
 0x13c   : > { %v807_v19 = vadd.f32 %v806_v61, %v598_v22 }
 0x13d   : > { %1057 = vst.msk [vmem:[%s1479_s23 + $0x180] sm:$0xff] %vm1008_vm1, %v992_v21 }
 0x13e   : > { %v690_v23 = vpop.f32.mrf.mxu2  ;;  %v962_v24 = vmax.f32 %v807_v19, 0.0 }
 0x13f   : > { %v691_v25 = vadd.f32 %v1464_v31, %v690_v23 }
 0x140   : > { %1027 = vst.msk [vmem:[%s1479_s23 + $0x90] sm:$0xff] %vm1008_vm1, %v962_v24  ;;  %v911_v40 = vpop.f32.mrf.mxu3 }
 0x141   : > { %v815_v26 = vpop.f32.mrf.mxu1  ;;  %v900_v29 = vadd.f32 %v899_v49, %v691_v25  ;;  %v600_v30 = vpop.f32.mrf.mxu0 }
 0x142   : > { %v601_v33 = vadd.f32 %v1464_v31, %v600_v30 }
 0x143   : > { %v993_v32 = vmax.f32 %v900_v29, 0.0 }
 0x144   : > { %v810_v35 = vadd.f32 %v809_v8, %v601_v33 }
 0x145   : > { %1058 = vst.msk [vmem:[%s1479_s23 + $0x188] sm:$0xff] %vm1008_vm1, %v993_v32 }
 0x146   : > { %v693_v28 = vpop.f32.mrf.mxu2  ;;  %v963_v36 = vmax.f32 %v810_v35, 0.0 }
 0x147   : > { %v694_v37 = vadd.f32 %v1464_v31, %v693_v28 }
 0x148   : > { %1028 = vst.msk [vmem:[%s1479_s23 + $0x98] sm:$0xff] %vm1008_vm1, %v963_v36  ;;  %v914_v54 = vpop.f32.mrf.mxu3 }
 0x149   : > { %v818_v34 = vpop.f32.mrf.mxu1  ;;  %v903_v38 = vadd.f32 %v902_v3, %v694_v37  ;;  %v603_v39 = vpop.f32.mrf.mxu0 }
 0x14a   : > { %v604_v43 = vadd.f32 %v1464_v31, %v603_v39 }
 0x14b   : > { %v994_v42 = vmax.f32 %v903_v38, 0.0 }
 0x14c   : > { %v813_v45 = vadd.f32 %v812_v14, %v604_v43 }
 0x14d   : > { %1059 = vst.msk [vmem:[%s1479_s23 + $0x190] sm:$0xff] %vm1008_vm1, %v994_v42 }
 0x14e   : > { %v696_v46 = vpop.f32.mrf.mxu2  ;;  %v964_v47 = vmax.f32 %v813_v45, 0.0 }
 0x14f   : > { %v697_v48 = vadd.f32 %v1464_v31, %v696_v46 }
 0x150   : > { %1029 = vst.msk [vmem:[%s1479_s23 + $0xa0] sm:$0xff] %vm1008_vm1, %v964_v47  ;;  %v917_v3 = vpop.f32.mrf.mxu3 }
 0x151   : > { %v821_v50 = vpop.f32.mrf.mxu1  ;;  %v906_v44 = vadd.f32 %v905_v15, %v697_v48  ;;  %v606_v51 = vpop.f32.mrf.mxu0 }
 0x152   : > { %v607_v49 = vadd.f32 %v1464_v31, %v606_v51 }
 0x153   : > { %v995_v53 = vmax.f32 %v906_v44, 0.0 }
 0x154   : > { %v816_v55 = vadd.f32 %v815_v26, %v607_v49 }
 0x155   : > { %1060 = vst.msk [vmem:[%s1479_s23 + $0x198] sm:$0xff] %vm1008_vm1, %v995_v53 }
 0x156   : > { %v699_v56 = vpop.f32.mrf.mxu2  ;;  %v965_v58 = vmax.f32 %v816_v55, 0.0 }
 0x157   : > { %v700_v57 = vadd.f32 %v1464_v31, %v699_v56 }
 0x158   : > { %1030 = vst.msk [vmem:[%s1479_s23 + $0xa8] sm:$0xff] %vm1008_vm1, %v965_v58  ;;  %v920_v16 = vpop.f32.mrf.mxu3 }
 0x159   : > { %v824_v60 = vpop.f32.mrf.mxu1  ;;  %v909_v61 = vadd.f32 %v908_v27, %v700_v57  ;;  %v609_v62 = vpop.f32.mrf.mxu0 }
 0x15a   : > { %v610_v63 = vadd.f32 %v1464_v31, %v609_v62 }
 0x15b   : > { %v996_v59 = vmax.f32 %v909_v61, 0.0 }
 0x15c   : > { %v819_v1 = vadd.f32 %v818_v34, %v610_v63 }
 0x15d   : > { %1061 = vst.msk [vmem:[%s1479_s23 + $0x1a0] sm:$0xff] %vm1008_vm1, %v996_v59 }
 0x15e   : > { %v702_v2 = vpop.f32.mrf.mxu2  ;;  %v966_v0 = vmax.f32 %v819_v1, 0.0  ;;  %v637_v1 = vadd.f32 %v1464_v31, %v1481_v41 }
 0x15f   : > { %v703_v4 = vadd.f32 %v1464_v31, %v702_v2 }
 0x160   : > { %1031 = vst.msk [vmem:[%s1479_s23 + $0xb0] sm:$0xff] %vm1008_vm1, %v966_v0  ;;  %v923_v27 = vpop.f32.mrf.mxu3 }
 0x161   : > { %v827_v6 = vpop.f32.mrf.mxu1  ;;  %v912_v7 = vadd.f32 %v911_v40, %v703_v4  ;;  %v612_v8 = vpop.f32.mrf.mxu0 }
 0x162   : > { %v613_v9 = vadd.f32 %v1464_v31, %v612_v8 }
 0x163   : > { %v997_v5 = vmax.f32 %v912_v7, 0.0 }
 0x164   : > { %v822_v10 = vadd.f32 %v821_v50, %v613_v9 }
 0x165   : > { %1062 = vst.msk [vmem:[%s1479_s23 + $0x1a8] sm:$0xff] %vm1008_vm1, %v997_v5 }
 0x166   : > { %v705_v11 = vpop.f32.mrf.mxu2  ;;  %v967_v12 = vmax.f32 %v822_v10, 0.0 }
 0x167   : > { %v706_v13 = vadd.f32 %v1464_v31, %v705_v11 }
 0x168   : > { %1032 = vst.msk [vmem:[%s1479_s23 + $0xb8] sm:$0xff] %vm1008_vm1, %v967_v12  ;;  %v926_v40 = vpop.f32.mrf.mxu3  ;;  %v640_v12 = vadd.f32 %v1464_v31, %v1494_v52 }
 0x169   : > { %v830_v15 = vpop.f32.mrf.mxu1  ;;  %v915_v17 = vadd.f32 %v914_v54, %v706_v13  ;;  %v615_v14 = vpop.f32.mrf.mxu0 }
 0x16a   : > { %v616_v20 = vadd.f32 %v1464_v31, %v615_v14 }
 0x16b   : > { %v998_v18 = vmax.f32 %v915_v17, 0.0 }
 0x16c   : > { %v825_v21 = vadd.f32 %v824_v60, %v616_v20 }
 0x16d   : > { %1063 = vst.msk [vmem:[%s1479_s23 + $0x1b0] sm:$0xff] %vm1008_vm1, %v998_v18 }
 0x16e   : > { %v708_v22 = vpop.f32.mrf.mxu2  ;;  %v968_v19 = vmax.f32 %v825_v21, 0.0 }
 0x16f   : > { %v709_v23 = vadd.f32 %v1464_v31, %v708_v22 }
 0x170   : > { %1033 = vst.msk [vmem:[%s1479_s23 + $0xc0] sm:$0xff] %vm1008_vm1, %v968_v19  ;;  %v929_v54 = vpop.f32.mrf.mxu3 }
 0x171   : > { %v833_v24 = vpop.f32.mrf.mxu1  ;;  %v918_v25 = vadd.f32 %v917_v3, %v709_v23  ;;  %v618_v26 = vpop.f32.mrf.mxu0 }
 0x172   : > { %v619_v30 = vadd.f32 %v1464_v31, %v618_v26 }
 0x173   : > { %v999_v29 = vmax.f32 %v918_v25, 0.0 }
 0x174   : > { %v828_v32 = vadd.f32 %v827_v6, %v619_v30 }
 0x175   : > { %1064 = vst.msk [vmem:[%s1479_s23 + $0x1b8] sm:$0xff] %vm1008_vm1, %v999_v29 }
 0x176   : > { %v711_v33 = vpop.f32.mrf.mxu2  ;;  %v969_v35 = vmax.f32 %v828_v32, 0.0 }
 0x177   : > { %v712_v28 = vadd.f32 %v1464_v31, %v711_v33 }
 0x178   : > { %1034 = vst.msk [vmem:[%s1479_s23 + $0xc8] sm:$0xff] %vm1008_vm1, %v969_v35  ;;  %v932_v4 = vpop.f32.mrf.mxu3 }
 0x179   : > { %v836_v36 = vpop.f32.mrf.mxu1  ;;  %v921_v37 = vadd.f32 %v920_v16, %v712_v28  ;;  %v621_v34 = vpop.f32.mrf.mxu0 }
 0x17a   : > { %v622_v39 = vadd.f32 %v1464_v31, %v621_v34 }
 0x17b   : > { %v1000_v38 = vmax.f32 %v921_v37, 0.0 }
 0x17c   : > { %v831_v42 = vadd.f32 %v830_v15, %v622_v39 }
 0x17d   : > { %1065 = vst.msk [vmem:[%s1479_s23 + $0x1c0] sm:$0xff] %vm1008_vm1, %v1000_v38 }
 0x17e   : > { %v714_v43 = vpop.f32.mrf.mxu2  ;;  %v970_v45 = vmax.f32 %v831_v42, 0.0 }
 0x17f   : > { %v715_v46 = vadd.f32 %v1464_v31, %v714_v43 }
 0x180   : > { %1035 = vst.msk [vmem:[%s1479_s23 + $0xd0] sm:$0xff] %vm1008_vm1, %v970_v45  ;;  %v935_v20 = vpop.f32.mrf.mxu3 }
 0x181   : > { %v839_v47 = vpop.f32.mrf.mxu1  ;;  %v924_v48 = vadd.f32 %v923_v27, %v715_v46  ;;  %v624_v50 = vpop.f32.mrf.mxu0 }
 0x182   : > { %v625_v51 = vadd.f32 %v1464_v31, %v624_v50 }
 0x183   : > { %v1001_v44 = vmax.f32 %v924_v48, 0.0 }
 0x184   : > { %v834_v53 = vadd.f32 %v833_v24, %v625_v51 }
 0x185   : > { %1066 = vst.msk [vmem:[%s1479_s23 + $0x1c8] sm:$0xff] %vm1008_vm1, %v1001_v44 }
 0x186   : > { %v717_v49 = vpop.f32.mrf.mxu2  ;;  %v971_v55 = vmax.f32 %v834_v53, 0.0 }
 0x187   : > { %v718_v56 = vadd.f32 %v1464_v31, %v717_v49 }
 0x188   : > { %1036 = vst.msk [vmem:[%s1479_s23 + $0xd8] sm:$0xff] %vm1008_vm1, %v971_v55  ;;  %v938_v29 = vpop.f32.mrf.mxu3 }
 0x189   : > { %v842_v58 = vpop.f32.mrf.mxu1  ;;  %v927_v57 = vadd.f32 %v926_v40, %v718_v56  ;;  %v627_v60 = vpop.f32.mrf.mxu0 }
 0x18a   : > { %v628_v62 = vadd.f32 %v1464_v31, %v627_v60 }
 0x18b   : > { %v1002_v61 = vmax.f32 %v927_v57, 0.0 }
 0x18c   : > { %v837_v59 = vadd.f32 %v836_v36, %v628_v62 }
 0x18d   : > { %1067 = vst.msk [vmem:[%s1479_s23 + $0x1d0] sm:$0xff] %vm1008_vm1, %v1002_v61 }
 0x18e   : > { %v720_v63 = vpop.f32.mrf.mxu2  ;;  %v972_v2 = vmax.f32 %v837_v59, 0.0 }
 0x18f   : > { %v721_v3 = vadd.f32 %v1464_v31, %v720_v63 }
 0x190   : > { %1037 = vst.msk [vmem:[%s1479_s23 + $0xe0] sm:$0xff] %vm1008_vm1, %v972_v2  ;;  %v941_v36 = vpop.f32.mrf.mxu3 }
 0x191   : > { %v845_v0 = vpop.f32.mrf.mxu1  ;;  %v930_v7 = vadd.f32 %v929_v54, %v721_v3  ;;  %v630_v8 = vpop.f32.mrf.mxu0 }
 0x192   : > { %v846_v6 = vadd.f32 %v845_v0, %v637_v1  ;;  %v631_v10 = vadd.f32 %v1464_v31, %v630_v8 }
 0x193   : > { %v1003_v9 = vmax.f32 %v930_v7, 0.0 }
 0x194   : > { %v975_v5 = vmax.f32 %v846_v6, 0.0  ;;  %v840_v11 = vadd.f32 %v839_v47, %v631_v10 }
 0x195   : > { %1068 = vst.msk [vmem:[%s1479_s23 + $0x1d8] sm:$0xff] %vm1008_vm1, %v1003_v9 }
 0x196   : > { %1040 = vst.msk [vmem:[%s1479_s23 + $0xf8] sm:$0xff] %vm1008_vm1, %v975_v5  ;;  %v723_v41 = vpop.f32.mrf.mxu2  ;;  %v973_v13 = vmax.f32 %v840_v11, 0.0 }
 0x197   : > { %v724_v15 = vadd.f32 %v1464_v31, %v723_v41 }
 0x198   : > { %1038 = vst.msk [vmem:[%s1479_s23 + $0xe8] sm:$0xff] %vm1008_vm1, %v973_v13 }
 0x199   : > { %v848_v16 = vpop.f32.mrf.mxu1  ;;  %v933_v14 = vadd.f32 %v932_v4, %v724_v15  ;;  %v633_v18 = vpop.f32.mrf.mxu0 }
 0x19a   : > { %v849_v17 = vadd.f32 %v848_v16, %v640_v12  ;;  %v634_v19 = vadd.f32 %v1464_v31, %v633_v18 }
 0x19b   : > { %v1004_v22 = vmax.f32 %v933_v14, 0.0 }
 0x19c   : > { %v976_v21 = vmax.f32 %v849_v17, 0.0  ;;  %v843_v52 = vadd.f32 %v842_v58, %v634_v19 }
 0x19d   : > { %1069 = vst.msk [vmem:[%s1479_s23 + $0x1e0] sm:$0xff] %vm1008_vm1, %v1004_v22 }
 0x19e   : > { %1041 = vst.msk [vmem:[%s1479_s23 + $0x100] sm:$0xff] %vm1008_vm1, %v976_v21  ;;  %v726_v23 = vpop.f32.mrf.mxu2  ;;  %v974_v24 = vmax.f32 %v843_v52, 0.0 }
 0x19f   : > { %v727_v25 = vadd.f32 %v1464_v31, %v726_v23 }
 0x1a0   : > { %1039 = vst.msk [vmem:[%s1479_s23 + $0xf0] sm:$0xff] %vm1008_vm1, %v974_v24 }
 0x1a1   : > { %v936_v26 = vadd.f32 %v935_v20, %v727_v25 }
 0x1a3   : > { %v1005_v27 = vmax.f32 %v936_v26, 0.0 }
 0x1a5   : > { %1070 = vst.msk [vmem:[%s1479_s23 + $0x1e8] sm:$0xff] %vm1008_vm1, %v1005_v27 }
 0x1a6   : > { %v729_v30 = vpop.f32.mrf.mxu2 }
 0x1a7   : > { %v730_v32 = vadd.f32 %v1464_v31, %v729_v30 }
 0x1a9   : > { %v939_v33 = vadd.f32 %v938_v29, %v730_v32 }
 0x1ab   : > { %v1006_v35 = vmax.f32 %v939_v33, 0.0 }
 0x1ad   : > { %1071 = vst.msk [vmem:[%s1479_s23 + $0x1f0] sm:$0xff] %vm1008_vm1, %v1006_v35 }
 0x1ae   : > { %v732_v28 = vpop.f32.mrf.mxu2 }
 0x1af   : > { %v733_v37 = vadd.f32 %v1464_v31, %v732_v28 }
 0x1b1   : > { %v942_v34 = vadd.f32 %v941_v36, %v733_v37 }
 0x1b3   : > { %v1007_v38 = vmax.f32 %v942_v34, 0.0 }
 0x1b5   : > { %1072 = vst.msk [vmem:[%s1479_s23 + $0x1f8] sm:$0xff] %vm1008_vm1, %v1007_v38 }
 0x1b6 PF: > { %s13_s12 = sadd.s32 1, %s1245_s12  }
 0x1b7   : > { %p10_p4 = scmp.ge.s32.totalorder %s13_s12, 18  }
 0x1b9   :  { %12 = sbr.rel (!%p10_p4) target bundleno = 1 (0x1), region = 62 }

// kernel: dqn_forward.5
= control target key start
LH: loop header
LB: loop body
LE: loop exit
PB: predicated region body
PF: predicated region fallthrough
CT: control target
= control target key end

     0   :  { %s996_s12 = smov 0   ;;  %s1450_s0 = inlined_call_operand.vmem [shape: f32[768,512], index: 0, kind: input, shape index: {}]   ;;  %s1451_s1 = inlined_call_operand.vmem [shape: f32[512,64], index: 1, kind: input, shape index: {}]   ;;  %s1452_s2 = inlined_call_operand.vmem [shape: f32[1,64], index: 2, kind: input, shape index: {}]   ;;  %s1453_s3 = inlined_call_operand.vmem [shape: f32[768,64], index: 3, kind: output, shape index: {}]  }
   0x1 LB: > { %s946_s13 = sadd.s32 4294967295, %s974_s12   ;;  %p950_p0 = scmp.ge.s32.totalorder %s974_s12, 1  ;;  %s974_s12 = sphi %s996_s12, %s13_s12  }
   0x2   : > { %p139_p1 = scmp.lt.s32.totalorder %s974_s12, 4 }
   0x4   : > { %p140_p2 = pnand %p950_p0, %p139_p1 }
   0x5   : > { %s1096_s24 = sshll.u32 (!%p140_p2), %s946_s13, 5 }
   0x6   : > { %143 = sbr.rel (%p140_p2) target bundleno = 431 (0x1af), region = 32  ;;  %p165_p3 = scmp.lt.s32.totalorder (!%p140_p2), %s1096_s24, 95 }
   0xb   : > { %v352_v0 = vld [vmem:[%s1451_s1 + $0x178] sm:$0xff]  ;;  %v351_v2 = vld [vmem:[%s1451_s1 + $0x170] sm:$0xff]  ;;  %v350_v6 = vld [vmem:[%s1451_s1 + $0x168] sm:$0xff]  ;;  %s1455_s24 = smov (!%p165_p3, %s1096_s24), 95  ;;  %vm857_vm0 = vcmask 523264  }
   0xc   : > { %v320_v1 = vld [vmem:[%s1451_s1 + $0x78] sm:$0xff]  ;;  %599 = vmatpush.msra.mxu2 %v352_v0  ;;  %v319_v4 = vld [vmem:[%s1451_s1 + $0x70] sm:$0xff]  ;;  %v318_v8 = vld [vmem:[%s1451_s1 + $0x68] sm:$0xff]  ;;  %s958_s18 = sshll.u32 %s1455_s24, 5  ;;  %s955_s23 = sshll.u32 %s1455_s24, 3 }
   0xd   : > { %373 = vmatpush.msra.mxu0 %v320_v1  ;;  %v368_v3 = vld [vmem:[%s1451_s1 + $0x1f8] sm:$0xff]  ;;  %v367_v7 = vld [vmem:[%s1451_s1 + $0x1f0] sm:$0xff]  ;;  %v366_v10 = vld [vmem:[%s1451_s1 + $0x1e8] sm:$0xff]  ;;  %s1192_s6 = scalar_lea.vmem %s1450_s0, %s958_s18  ;;  %s1293_s27 = scalar_lea.vmem %s1453_s3, %s955_s23 }
   0xe   : > { %v336_v5 = vld [vmem:[%s1451_s1 + $0xf8] sm:$0xff]  ;;  %712 = vmatpush.msra.mxu3 %v368_v3  ;;  %600 = vmatpush.msra.mxu2 %v351_v2  ;;  %v335_v9 = vld [vmem:[%s1451_s1 + $0xf0] sm:$0xff]  ;;  %v349_v11 = vld [vmem:[%s1451_s1 + $0x160] sm:$0xff] }
   0xf   : > { %486 = vmatpush.msra.mxu1 %v336_v5  ;;  %374 = vmatpush.msra.mxu0 %v319_v4  ;;  %v317_v12 = vld [vmem:[%s1451_s1 + $0x60] sm:$0xff]  ;;  %v334_v13 = vld [vmem:[%s1451_s1 + $0xe8] sm:$0xff]  ;;  %v348_v16 = vld [vmem:[%s1451_s1 + $0x158] sm:$0xff] }
  0x10   : > { %713 = vmatpush.msra.mxu3 %v367_v7  ;;  %601 = vmatpush.msra.mxu2 %v350_v6  ;;  %v365_v14 = vld [vmem:[%s1451_s1 + $0x1e0] sm:$0xff]  ;;  %v316_v17 = vld [vmem:[%s1451_s1 + $0x58] sm:$0xff]  ;;  %v347_v20 = vld [vmem:[%s1451_s1 + $0x150] sm:$0xff] }
  0x11   : > { %487 = vmatpush.msra.mxu1 %v335_v9  ;;  %375 = vmatpush.msra.mxu0 %v318_v8  ;;  %v333_v15 = vld [vmem:[%s1451_s1 + $0xe0] sm:$0xff]  ;;  %v364_v18 = vld [vmem:[%s1451_s1 + $0x1d8] sm:$0xff]  ;;  %v315_v21 = vld [vmem:[%s1451_s1 + $0x50] sm:$0xff] }
  0x12   : > { %714 = vmatpush.msra.mxu3 %v366_v10  ;;  %602 = vmatpush.msra.mxu2 %v349_v11  ;;  %v332_v19 = vld [vmem:[%s1451_s1 + $0xd8] sm:$0xff]  ;;  %v363_v22 = vld [vmem:[%s1451_s1 + $0x1d0] sm:$0xff]  ;;  %v346_v24 = vld [vmem:[%s1451_s1 + $0x148] sm:$0xff] }
  0x13   : > { %488 = vmatpush.msra.mxu1 %v334_v13  ;;  %376 = vmatpush.msra.mxu0 %v317_v12  ;;  %v331_v23 = vld [vmem:[%s1451_s1 + $0xd0] sm:$0xff]  ;;  %v314_v25 = vld [vmem:[%s1451_s1 + $0x48] sm:$0xff]  ;;  %v345_v28 = vld [vmem:[%s1451_s1 + $0x140] sm:$0xff] }
  0x14   : > { %715 = vmatpush.msra.mxu3 %v365_v14  ;;  %603 = vmatpush.msra.mxu2 %v348_v16  ;;  %v362_v26 = vld [vmem:[%s1451_s1 + $0x1c8] sm:$0xff]  ;;  %v313_v29 = vld [vmem:[%s1451_s1 + $0x40] sm:$0xff]  ;;  %v344_v32 = vld [vmem:[%s1451_s1 + $0x138] sm:$0xff] }
  0x15   : > { %489 = vmatpush.msra.mxu1 %v333_v15  ;;  %377 = vmatpush.msra.mxu0 %v316_v17  ;;  %v330_v27 = vld [vmem:[%s1451_s1 + $0xc8] sm:$0xff]  ;;  %v361_v30 = vld [vmem:[%s1451_s1 + $0x1c0] sm:$0xff]  ;;  %v312_v33 = vld [vmem:[%s1451_s1 + $0x38] sm:$0xff] }
  0x16   : > { %716 = vmatpush.msra.mxu3 %v364_v18  ;;  %604 = vmatpush.msra.mxu2 %v347_v20  ;;  %v329_v31 = vld [vmem:[%s1451_s1 + $0xc0] sm:$0xff]  ;;  %v360_v34 = vld [vmem:[%s1451_s1 + $0x1b8] sm:$0xff]  ;;  %v343_v36 = vld [vmem:[%s1451_s1 + $0x130] sm:$0xff] }
  0x17   : > { %490 = vmatpush.msra.mxu1 %v332_v19  ;;  %378 = vmatpush.msra.mxu0 %v315_v21  ;;  %v328_v35 = vld [vmem:[%s1451_s1 + $0xb8] sm:$0xff]  ;;  %v311_v37 = vld [vmem:[%s1451_s1 + $0x30] sm:$0xff]  ;;  %v342_v40 = vld [vmem:[%s1451_s1 + $0x128] sm:$0xff] }
  0x18   : > { %717 = vmatpush.msra.mxu3 %v363_v22  ;;  %605 = vmatpush.msra.mxu2 %v346_v24  ;;  %v359_v38 = vld [vmem:[%s1451_s1 + $0x1b0] sm:$0xff]  ;;  %v310_v41 = vld [vmem:[%s1451_s1 + $0x28] sm:$0xff]  ;;  %v341_v44 = vld [vmem:[%s1451_s1 + $0x120] sm:$0xff] }
  0x19   : > { %491 = vmatpush.msra.mxu1 %v331_v23  ;;  %379 = vmatpush.msra.mxu0 %v314_v25  ;;  %v327_v39 = vld [vmem:[%s1451_s1 + $0xb0] sm:$0xff]  ;;  %v358_v42 = vld [vmem:[%s1451_s1 + $0x1a8] sm:$0xff]  ;;  %v309_v45 = vld [vmem:[%s1451_s1 + $0x20] sm:$0xff] }
  0x1a   : > { %718 = vmatpush.msra.mxu3 %v362_v26  ;;  %606 = vmatpush.msra.mxu2 %v345_v28  ;;  %v326_v43 = vld [vmem:[%s1451_s1 + $0xa8] sm:$0xff]  ;;  %v357_v46 = vld [vmem:[%s1451_s1 + $0x1a0] sm:$0xff]  ;;  %v340_v48 = vld [vmem:[%s1451_s1 + $0x118] sm:$0xff] }
  0x1b   : > { %492 = vmatpush.msra.mxu1 %v330_v27  ;;  %380 = vmatpush.msra.mxu0 %v313_v29  ;;  %v325_v47 = vld [vmem:[%s1451_s1 + $0xa0] sm:$0xff]  ;;  %v308_v49 = vld [vmem:[%s1451_s1 + $0x18] sm:$0xff]  ;;  %v339_v52 = vld [vmem:[%s1451_s1 + $0x110] sm:$0xff] }
  0x1c   : > { %719 = vmatpush.msra.mxu3 %v361_v30  ;;  %607 = vmatpush.msra.mxu2 %v344_v32  ;;  %v356_v50 = vld [vmem:[%s1451_s1 + $0x198] sm:$0xff]  ;;  %v307_v53 = vld [vmem:[%s1451_s1 + $0x10] sm:$0xff]  ;;  %v338_v56 = vld [vmem:[%s1451_s1 + $0x108] sm:$0xff] }
  0x1d   : > { %493 = vmatpush.msra.mxu1 %v329_v31  ;;  %381 = vmatpush.msra.mxu0 %v312_v33  ;;  %v324_v51 = vld [vmem:[%s1451_s1 + $0x98] sm:$0xff]  ;;  %v355_v54 = vld [vmem:[%s1451_s1 + $0x190] sm:$0xff]  ;;  %v306_v57 = vld [vmem:[%s1451_s1 + $0x8] sm:$0xff] }
  0x1e   : > { %720 = vmatpush.msra.mxu3 %v360_v34  ;;  %608 = vmatpush.msra.mxu2 %v343_v36  ;;  %v323_v55 = vld [vmem:[%s1451_s1 + $0x90] sm:$0xff]  ;;  %v354_v58 = vld [vmem:[%s1451_s1 + $0x188] sm:$0xff]  ;;  %v337_v60 = vld [vmem:[%s1451_s1 + $0x100] sm:$0xff] }
  0x1f   : > { %494 = vmatpush.msra.mxu1 %v328_v35  ;;  %382 = vmatpush.msra.mxu0 %v311_v37  ;;  %v322_v59 = vld [vmem:[%s1451_s1 + $0x88] sm:$0xff]  ;;  %v305_v61 = vld [vmem:[%s1451_s1] sm:$0xff]  ;;  %v179_v62 = vld [vmem:[%s1192_s6 + $0x10] sm:$0xff] }
  0x20   : > { %721 = vmatpush.msra.mxu3 %v359_v38  ;;  %609 = vmatpush.msra.mxu2 %v342_v40  ;;  %v353_v63 = vld [vmem:[%s1451_s1 + $0x180] sm:$0xff]  ;;  %v180_v1 = vld [vmem:[%s1192_s6 + $0x18] sm:$0xff]  ;;  %v178_v3 = vld [vmem:[%s1192_s6 + $0x8] sm:$0xff] }
  0x21   : > { %495 = vmatpush.msra.mxu1 %v327_v39  ;;  %383 = vmatpush.msra.mxu0 %v310_v41  ;;  %v177_v0 = vld [vmem:[%s1192_s6] sm:$0xff]  ;;  %v183_v4 = vld [vmem:[%s1192_s6 + $0x30] sm:$0xff]  ;;  %v184_v6 = vld [vmem:[%s1192_s6 + $0x38] sm:$0xff] }
  0x22   : > { %722 = vmatpush.msra.mxu3 %v358_v42  ;;  %610 = vmatpush.msra.mxu2 %v341_v44  ;;  %v321_v2 = vld [vmem:[%s1451_s1 + $0x80] sm:$0xff]  ;;  %v182_v7 = vld [vmem:[%s1192_s6 + $0x28] sm:$0xff]  ;;  %v187_v8 = vld [vmem:[%s1192_s6 + $0x50] sm:$0xff] }
  0x23   : > { %496 = vmatpush.msra.mxu1 %v326_v43  ;;  %384 = vmatpush.msra.mxu0 %v309_v45  ;;  %v181_v5 = vld [vmem:[%s1192_s6 + $0x20] sm:$0xff]  ;;  %v188_v10 = vld [vmem:[%s1192_s6 + $0x58] sm:$0xff]  ;;  %v186_v11 = vld [vmem:[%s1192_s6 + $0x48] sm:$0xff] }
  0x24   : > { %723 = vmatpush.msra.mxu3 %v357_v46  ;;  %611 = vmatpush.msra.mxu2 %v340_v48  ;;  %v185_v9 = vld [vmem:[%s1192_s6 + $0x40] sm:$0xff]  ;;  %v191_v12 = vld [vmem:[%s1192_s6 + $0x70] sm:$0xff]  ;;  %v192_v14 = vld [vmem:[%s1192_s6 + $0x78] sm:$0xff] }
  0x25   : > { %497 = vmatpush.msra.mxu1 %v325_v47  ;;  %385 = vmatpush.msra.mxu0 %v308_v49  ;;  %v189_v13 = vld [vmem:[%s1192_s6 + $0x60] sm:$0xff]  ;;  %v190_v15 = vld [vmem:[%s1192_s6 + $0x68] sm:$0xff]  ;;  %v195_v16 = vld [vmem:[%s1192_s6 + $0x90] sm:$0xff] }
  0x26   : > { %724 = vmatpush.msra.mxu3 %v356_v50  ;;  %612 = vmatpush.msra.mxu2 %v339_v52  ;;  %v193_v17 = vld [vmem:[%s1192_s6 + $0x80] sm:$0xff]  ;;  %v196_v18 = vld [vmem:[%s1192_s6 + $0x98] sm:$0xff]  ;;  %v194_v19 = vld [vmem:[%s1192_s6 + $0x88] sm:$0xff] }
  0x27   : > { %498 = vmatpush.msra.mxu1 %v324_v51  ;;  %386 = vmatpush.msra.mxu0 %v307_v53  ;;  %v199_v20 = vld [vmem:[%s1192_s6 + $0xb0] sm:$0xff]  ;;  %v197_v21 = vld [vmem:[%s1192_s6 + $0xa0] sm:$0xff]  ;;  %v200_v22 = vld [vmem:[%s1192_s6 + $0xb8] sm:$0xff] }
  0x28   : > { %725 = vmatpush.msra.mxu3 %v355_v54  ;;  %613 = vmatpush.msra.mxu2 %v338_v56  ;;  %v198_v23 = vld [vmem:[%s1192_s6 + $0xa8] sm:$0xff]  ;;  %v203_v24 = vld [vmem:[%s1192_s6 + $0xd0] sm:$0xff]  ;;  %v201_v25 = vld [vmem:[%s1192_s6 + $0xc0] sm:$0xff] }
  0x29   : > { %499 = vmatpush.msra.mxu1 %v323_v55  ;;  %387 = vmatpush.msra.mxu0 %v306_v57  ;;  %v204_v26 = vld [vmem:[%s1192_s6 + $0xd8] sm:$0xff]  ;;  %v202_v27 = vld [vmem:[%s1192_s6 + $0xc8] sm:$0xff]  ;;  %v207_v28 = vld [vmem:[%s1192_s6 + $0xf0] sm:$0xff] }
  0x2a   : > { %726 = vmatpush.msra.mxu3 %v354_v58  ;;  %614 = vmatpush.msra.mxu2 %v337_v60  ;;  %v205_v29 = vld [vmem:[%s1192_s6 + $0xe0] sm:$0xff]  ;;  %v208_v30 = vld [vmem:[%s1192_s6 + $0xf8] sm:$0xff]  ;;  %v206_v31 = vld [vmem:[%s1192_s6 + $0xe8] sm:$0xff] }
  0x2b   : > { %500 = vmatpush.msra.mxu1 %v322_v59  ;;  %388 = vmatpush.msra.mxu0 %v305_v61  ;;  %v211_v32 = vld [vmem:[%s1192_s6 + $0x110] sm:$0xff]  ;;  %v209_v33 = vld [vmem:[%s1192_s6 + $0x100] sm:$0xff]  ;;  %v212_v34 = vld [vmem:[%s1192_s6 + $0x118] sm:$0xff] }
  0x2c   : > { %615 = vmatmul.f32.vlgmr.msra.gmra.mxu2 %v179_v62  ;;  %727 = vmatpush.msra.mxu3 %v353_v63  ;;  %v210_v35 = vld [vmem:[%s1192_s6 + $0x108] sm:$0xff]  ;;  %v215_v36 = vld [vmem:[%s1192_s6 + $0x130] sm:$0xff]  ;;  %v213_v37 = vld [vmem:[%s1192_s6 + $0x120] sm:$0xff] }
  0x2d   : > { %389 = vmatmul.f32.vlgmr.msra.gmra.mxu0 %v177_v0  ;;  %728 = vmatmul.f32.vlgmr.msra.gmra.mxu3 %v180_v1  ;;  %v216_v38 = vld [vmem:[%s1192_s6 + $0x138] sm:$0xff]  ;;  %v214_v39 = vld [vmem:[%s1192_s6 + $0x128] sm:$0xff]  ;;  %v219_v40 = vld [vmem:[%s1192_s6 + $0x150] sm:$0xff] }
  0x2e   : > { %501 = vmatpush.msra.mxu1 %v321_v2  ;;  %v217_v41 = vld [vmem:[%s1192_s6 + $0x140] sm:$0xff]  ;;  %v220_v42 = vld [vmem:[%s1192_s6 + $0x158] sm:$0xff]  ;;  %v218_v43 = vld [vmem:[%s1192_s6 + $0x148] sm:$0xff] }
  0x2f   : > { %502 = vmatmul.f32.vlgmr.msra.gmra.mxu1 %v178_v3  ;;  %v223_v44 = vld [vmem:[%s1192_s6 + $0x170] sm:$0xff]  ;;  %v221_v45 = vld [vmem:[%s1192_s6 + $0x160] sm:$0xff]  ;;  %v224_v46 = vld [vmem:[%s1192_s6 + $0x178] sm:$0xff] }
  0x30   : > { %v222_v47 = vld [vmem:[%s1192_s6 + $0x168] sm:$0xff]  ;;  %v227_v48 = vld [vmem:[%s1192_s6 + $0x190] sm:$0xff]  ;;  %v225_v49 = vld [vmem:[%s1192_s6 + $0x180] sm:$0xff] }
  0x31   : > { %v228_v50 = vld [vmem:[%s1192_s6 + $0x198] sm:$0xff]  ;;  %v226_v51 = vld [vmem:[%s1192_s6 + $0x188] sm:$0xff]  ;;  %v231_v52 = vld [vmem:[%s1192_s6 + $0x1b0] sm:$0xff] }
  0x32   : > { %v229_v53 = vld [vmem:[%s1192_s6 + $0x1a0] sm:$0xff]  ;;  %v232_v54 = vld [vmem:[%s1192_s6 + $0x1b8] sm:$0xff]  ;;  %v230_v55 = vld [vmem:[%s1192_s6 + $0x1a8] sm:$0xff] }
  0x33   : > { %v235_v56 = vld [vmem:[%s1192_s6 + $0x1d0] sm:$0xff]  ;;  %v233_v57 = vld [vmem:[%s1192_s6 + $0x1c0] sm:$0xff]  ;;  %v236_v58 = vld [vmem:[%s1192_s6 + $0x1d8] sm:$0xff] }
  0x34   : > { %618 = vmatmul.f32.gmra.mxu2 %v183_v4  ;;  %v234_v59 = vld [vmem:[%s1192_s6 + $0x1c8] sm:$0xff]  ;;  %v239_v60 = vld [vmem:[%s1192_s6 + $0x1f0] sm:$0xff]  ;;  %v237_v61 = vld [vmem:[%s1192_s6 + $0x1e0] sm:$0xff] }
  0x35   : > { %392 = vmatmul.f32.gmra.mxu0 %v181_v5  ;;  %731 = vmatmul.f32.gmra.mxu3 %v184_v6  ;;  %v240_v62 = vld [vmem:[%s1192_s6 + $0x1f8] sm:$0xff]  ;;  %v238_v63 = vld [vmem:[%s1192_s6 + $0x1e8] sm:$0xff]  ;;  %v1279_v0 = vld [vmem:[%s1452_s2] ss:$0 sm:$0xff] }
  0x36   : > { %v243_v1 = vld [vmem:[%s1192_s6 + $0x210] sm:$0xff]  ;;  %v241_v3 = vld [vmem:[%s1192_s6 + $0x200] sm:$0xff]  ;;  %v244_v4 = vld [vmem:[%s1192_s6 + $0x218] sm:$0xff] }
  0x37   : > { %505 = vmatmul.f32.gmra.mxu1 %v182_v7  ;;  %v242_v7 = vld [vmem:[%s1192_s6 + $0x208] sm:$0xff] }
  0x3c   : > { %621 = vmatmul.f32.gmra.mxu2 %v187_v8 }
  0x3d   : > { %395 = vmatmul.f32.gmra.mxu0 %v185_v9  ;;  %734 = vmatmul.f32.gmra.mxu3 %v188_v10 }
  0x3f   : > { %508 = vmatmul.f32.gmra.mxu1 %v186_v11 }
  0x44   : > { %624 = vmatmul.f32.gmra.mxu2 %v191_v12  ;;  %v247_v12 = vld [vmem:[%s1192_s6 + $0x230] sm:$0xff] }
  0x45   : > { %398 = vmatmul.f32.gmra.mxu0 %v189_v13  ;;  %737 = vmatmul.f32.gmra.mxu3 %v192_v14 }
  0x47   : > { %511 = vmatmul.f32.gmra.mxu1 %v190_v15  ;;  %v245_v15 = vld [vmem:[%s1192_s6 + $0x220] sm:$0xff] }
  0x4c   : > { %627 = vmatmul.f32.gmra.mxu2 %v195_v16  ;;  %v248_v16 = vld [vmem:[%s1192_s6 + $0x238] sm:$0xff] }
  0x4d   : > { %401 = vmatmul.f32.gmra.mxu0 %v193_v17  ;;  %740 = vmatmul.f32.gmra.mxu3 %v196_v18 }
  0x4f   : > { %514 = vmatmul.f32.gmra.mxu1 %v194_v19 }
  0x54   : > { %630 = vmatmul.f32.gmra.mxu2 %v199_v20  ;;  %v246_v20 = vld [vmem:[%s1192_s6 + $0x228] sm:$0xff] }
  0x55   : > { %404 = vmatmul.f32.gmra.mxu0 %v197_v21  ;;  %743 = vmatmul.f32.gmra.mxu3 %v200_v22 }
  0x57   : > { %517 = vmatmul.f32.gmra.mxu1 %v198_v23 }
  0x5c   : > { %633 = vmatmul.f32.gmra.mxu2 %v203_v24 }
  0x5d   : > { %407 = vmatmul.f32.gmra.mxu0 %v201_v25  ;;  %746 = vmatmul.f32.gmra.mxu3 %v204_v26  ;;  %v251_v25 = vld [vmem:[%s1192_s6 + $0x250] sm:$0xff] }
  0x5f   : > { %520 = vmatmul.f32.gmra.mxu1 %v202_v27 }
  0x64   : > { %636 = vmatmul.f32.gmra.mxu2 %v207_v28  ;;  %v249_v28 = vld [vmem:[%s1192_s6 + $0x240] sm:$0xff] }
  0x65   : > { %410 = vmatmul.f32.gmra.mxu0 %v205_v29  ;;  %749 = vmatmul.f32.gmra.mxu3 %v208_v30  ;;  %v252_v29 = vld [vmem:[%s1192_s6 + $0x258] sm:$0xff] }
  0x67   : > { %523 = vmatmul.f32.gmra.mxu1 %v206_v31 }
  0x6c   : > { %639 = vmatmul.f32.gmra.mxu2 %v211_v32 }
  0x6d   : > { %413 = vmatmul.f32.gmra.mxu0 %v209_v33  ;;  %752 = vmatmul.f32.gmra.mxu3 %v212_v34  ;;  %v250_v33 = vld [vmem:[%s1192_s6 + $0x248] sm:$0xff] }
  0x6f   : > { %526 = vmatmul.f32.gmra.mxu1 %v210_v35 }
  0x74   : > { %642 = vmatmul.f32.gmra.mxu2 %v215_v36 }
  0x75   : > { %416 = vmatmul.f32.gmra.mxu0 %v213_v37  ;;  %755 = vmatmul.f32.gmra.mxu3 %v216_v38  ;;  %v255_v38 = vld [vmem:[%s1192_s6 + $0x270] sm:$0xff] }
  0x77   : > { %529 = vmatmul.f32.gmra.mxu1 %v214_v39 }
  0x7c   : > { %645 = vmatmul.f32.gmra.mxu2 %v219_v40 }
  0x7d   : > { %419 = vmatmul.f32.gmra.mxu0 %v217_v41  ;;  %758 = vmatmul.f32.gmra.mxu3 %v220_v42  ;;  %v253_v41 = vld [vmem:[%s1192_s6 + $0x260] sm:$0xff]  ;;  %v256_v42 = vld [vmem:[%s1192_s6 + $0x278] sm:$0xff] }
  0x7f   : > { %532 = vmatmul.f32.gmra.mxu1 %v218_v43 }
  0x84   : > { %648 = vmatmul.f32.gmra.mxu2 %v223_v44 }
  0x85   : > { %422 = vmatmul.f32.gmra.mxu0 %v221_v45  ;;  %761 = vmatmul.f32.gmra.mxu3 %v224_v46  ;;  %v254_v46 = vld [vmem:[%s1192_s6 + $0x268] sm:$0xff] }
  0x87   : > { %535 = vmatmul.f32.gmra.mxu1 %v222_v47 }
  0x8c   : > { %651 = vmatmul.f32.gmra.mxu2 %v227_v48 }
  0x8d   : > { %425 = vmatmul.f32.gmra.mxu0 %v225_v49  ;;  %764 = vmatmul.f32.gmra.mxu3 %v228_v50 }
  0x8f   : > { %538 = vmatmul.f32.gmra.mxu1 %v226_v51  ;;  %v259_v51 = vld [vmem:[%s1192_s6 + $0x290] sm:$0xff] }
  0x94   : > { %654 = vmatmul.f32.gmra.mxu2 %v231_v52 }
  0x95   : > { %428 = vmatmul.f32.gmra.mxu0 %v229_v53  ;;  %767 = vmatmul.f32.gmra.mxu3 %v232_v54  ;;  %v257_v54 = vld [vmem:[%s1192_s6 + $0x280] sm:$0xff] }
  0x97   : > { %541 = vmatmul.f32.gmra.mxu1 %v230_v55  ;;  %v260_v55 = vld [vmem:[%s1192_s6 + $0x298] sm:$0xff] }
  0x9c   : > { %657 = vmatmul.f32.gmra.mxu2 %v235_v56 }
  0x9d   : > { %431 = vmatmul.f32.gmra.mxu0 %v233_v57  ;;  %770 = vmatmul.f32.gmra.mxu3 %v236_v58 }
  0x9f   : > { %544 = vmatmul.f32.gmra.mxu1 %v234_v59  ;;  %v258_v59 = vld [vmem:[%s1192_s6 + $0x288] sm:$0xff] }
  0xa4   : > { %660 = vmatmul.f32.gmra.mxu2 %v239_v60 }
  0xa5   : > { %434 = vmatmul.f32.gmra.mxu0 %v237_v61  ;;  %773 = vmatmul.f32.gmra.mxu3 %v240_v62 }
  0xa7   : > { %547 = vmatmul.f32.gmra.mxu1 %v238_v63 }
  0xaa   : > { %v390_v2 = vpop.f32.mrf.mxu0 }
  0xab   : > { %v391_v5 = vadd.f32 %v1279_v0, %v390_v2 }
  0xac   : > { %663 = vmatmul.f32.gmra.mxu2 %v243_v1  ;;  %v503_v6 = vpop.f32.mrf.mxu1  ;;  %v263_v1 = vld [vmem:[%s1192_s6 + $0x2b0] sm:$0xff] }
  0xad   : > { %v504_v8 = vadd.f32 %v503_v6, %v391_v5  ;;  %437 = vmatmul.f32.gmra.mxu0 %v241_v3  ;;  %776 = vmatmul.f32.gmra.mxu3 %v244_v4  ;;  %v261_v4 = vld [vmem:[%s1192_s6 + $0x2a0] sm:$0xff]  ;;  %v264_v5 = vld [vmem:[%s1192_s6 + $0x2b8] sm:$0xff] }
  0xaf   : > { %v616_v9 = vpop.f32.mrf.mxu2  ;;  %550 = vmatmul.f32.gmra.mxu1 %v242_v7 }
  0xb0   : > { %v617_v10 = vadd.f32 %v616_v9, %v504_v8  ;;  %v729_v11 = vpop.f32.mrf.mxu3  ;;  %v262_v9 = vld [vmem:[%s1192_s6 + $0x2a8] sm:$0xff] }
  0xb2   : > { %v730_v13 = vadd.f32 %v729_v11, %v617_v10  ;;  %v393_v14 = vpop.f32.mrf.mxu0 }
  0xb3   : > { %v394_v17 = vadd.f32 %v1279_v0, %v393_v14  ;;  %v267_v14 = vld [vmem:[%s1192_s6 + $0x2d0] sm:$0xff] }
  0xb4   : > { %v825_v18 = vmax.f32 %v730_v13, 0.0  ;;  %666 = vmatmul.f32.gmra.mxu2 %v247_v12  ;;  %v506_v19 = vpop.f32.mrf.mxu1 }
  0xb5   : > { %v507_v21 = vadd.f32 %v506_v19, %v394_v17  ;;  %440 = vmatmul.f32.gmra.mxu0 %v245_v15  ;;  %779 = vmatmul.f32.gmra.mxu3 %v248_v16  ;;  %v265_v17 = vld [vmem:[%s1192_s6 + $0x2c0] sm:$0xff] }
  0xb6   : > { %858 = vst.msk [vmem:[%s1293_s27] sm:$0xff] %vm857_vm0, %v825_v18  ;;  %v268_v18 = vld [vmem:[%s1192_s6 + $0x2d8] sm:$0xff] }
  0xb7   : > { %v619_v22 = vpop.f32.mrf.mxu2  ;;  %553 = vmatmul.f32.gmra.mxu1 %v246_v20 }
  0xb8   : > { %v620_v23 = vadd.f32 %v619_v22, %v507_v21  ;;  %v732_v24 = vpop.f32.mrf.mxu3  ;;  %v266_v22 = vld [vmem:[%s1192_s6 + $0x2c8] sm:$0xff] }
  0xba   : > { %v733_v26 = vadd.f32 %v732_v24, %v620_v23  ;;  %v396_v27 = vpop.f32.mrf.mxu0 }
  0xbb   : > { %v397_v30 = vadd.f32 %v1279_v0, %v396_v27  ;;  %v271_v27 = vld [vmem:[%s1192_s6 + $0x2f0] sm:$0xff] }
  0xbc   : > { %v826_v31 = vmax.f32 %v733_v26, 0.0  ;;  %669 = vmatmul.f32.gmra.mxu2 %v251_v25  ;;  %v509_v32 = vpop.f32.mrf.mxu1 }
  0xbd   : > { %v510_v34 = vadd.f32 %v509_v32, %v397_v30  ;;  %443 = vmatmul.f32.gmra.mxu0 %v249_v28  ;;  %782 = vmatmul.f32.gmra.mxu3 %v252_v29  ;;  %v269_v30 = vld [vmem:[%s1192_s6 + $0x2e0] sm:$0xff] }
  0xbe   : > { %859 = vst.msk [vmem:[%s1293_s27 + $0x8] sm:$0xff] %vm857_vm0, %v826_v31  ;;  %v272_v31 = vld [vmem:[%s1192_s6 + $0x2f8] sm:$0xff] }
  0xbf   : > { %v622_v35 = vpop.f32.mrf.mxu2  ;;  %556 = vmatmul.f32.gmra.mxu1 %v250_v33 }
  0xc0   : > { %v623_v36 = vadd.f32 %v622_v35, %v510_v34  ;;  %v735_v37 = vpop.f32.mrf.mxu3  ;;  %v270_v35 = vld [vmem:[%s1192_s6 + $0x2e8] sm:$0xff] }
  0xc2   : > { %v736_v39 = vadd.f32 %v735_v37, %v623_v36  ;;  %v399_v40 = vpop.f32.mrf.mxu0 }
  0xc3   : > { %v400_v43 = vadd.f32 %v1279_v0, %v399_v40  ;;  %v275_v40 = vld [vmem:[%s1192_s6 + $0x310] sm:$0xff] }
  0xc4   : > { %v827_v44 = vmax.f32 %v736_v39, 0.0  ;;  %672 = vmatmul.f32.gmra.mxu2 %v255_v38  ;;  %v512_v45 = vpop.f32.mrf.mxu1 }
  0xc5   : > { %v513_v47 = vadd.f32 %v512_v45, %v400_v43  ;;  %446 = vmatmul.f32.gmra.mxu0 %v253_v41  ;;  %785 = vmatmul.f32.gmra.mxu3 %v256_v42  ;;  %v273_v43 = vld [vmem:[%s1192_s6 + $0x300] sm:$0xff] }
  0xc6   : > { %860 = vst.msk [vmem:[%s1293_s27 + $0x10] sm:$0xff] %vm857_vm0, %v827_v44  ;;  %v276_v44 = vld [vmem:[%s1192_s6 + $0x318] sm:$0xff] }
  0xc7   : > { %v625_v48 = vpop.f32.mrf.mxu2  ;;  %559 = vmatmul.f32.gmra.mxu1 %v254_v46 }
  0xc8   : > { %v626_v49 = vadd.f32 %v625_v48, %v513_v47  ;;  %v738_v50 = vpop.f32.mrf.mxu3  ;;  %v274_v48 = vld [vmem:[%s1192_s6 + $0x308] sm:$0xff] }
  0xca   : > { %v739_v52 = vadd.f32 %v738_v50, %v626_v49  ;;  %v402_v53 = vpop.f32.mrf.mxu0 }
  0xcb   : > { %v403_v56 = vadd.f32 %v1279_v0, %v402_v53  ;;  %v279_v53 = vld [vmem:[%s1192_s6 + $0x330] sm:$0xff] }
  0xcc   : > { %v828_v57 = vmax.f32 %v739_v52, 0.0  ;;  %675 = vmatmul.f32.gmra.mxu2 %v259_v51  ;;  %v515_v58 = vpop.f32.mrf.mxu1 }
  0xcd   : > { %v516_v60 = vadd.f32 %v515_v58, %v403_v56  ;;  %449 = vmatmul.f32.gmra.mxu0 %v257_v54  ;;  %788 = vmatmul.f32.gmra.mxu3 %v260_v55  ;;  %v277_v56 = vld [vmem:[%s1192_s6 + $0x320] sm:$0xff] }
  0xce   : > { %861 = vst.msk [vmem:[%s1293_s27 + $0x18] sm:$0xff] %vm857_vm0, %v828_v57  ;;  %v280_v57 = vld [vmem:[%s1192_s6 + $0x338] sm:$0xff] }
  0xcf   : > { %v628_v61 = vpop.f32.mrf.mxu2  ;;  %562 = vmatmul.f32.gmra.mxu1 %v258_v59 }
  0xd0   : > { %v629_v62 = vadd.f32 %v628_v61, %v516_v60  ;;  %v741_v63 = vpop.f32.mrf.mxu3  ;;  %v278_v61 = vld [vmem:[%s1192_s6 + $0x328] sm:$0xff] }
  0xd2   : > { %v742_v2 = vadd.f32 %v741_v63, %v629_v62  ;;  %v405_v3 = vpop.f32.mrf.mxu0 }
  0xd3   : > { %v406_v6 = vadd.f32 %v1279_v0, %v405_v3  ;;  %v283_v3 = vld [vmem:[%s1192_s6 + $0x350] sm:$0xff] }
  0xd4   : > { %v829_v7 = vmax.f32 %v742_v2, 0.0  ;;  %678 = vmatmul.f32.gmra.mxu2 %v263_v1  ;;  %v518_v8 = vpop.f32.mrf.mxu1 }
  0xd5   : > { %v519_v10 = vadd.f32 %v518_v8, %v406_v6  ;;  %452 = vmatmul.f32.gmra.mxu0 %v261_v4  ;;  %791 = vmatmul.f32.gmra.mxu3 %v264_v5  ;;  %v281_v6 = vld [vmem:[%s1192_s6 + $0x340] sm:$0xff] }
  0xd6   : > { %862 = vst.msk [vmem:[%s1293_s27 + $0x20] sm:$0xff] %vm857_vm0, %v829_v7  ;;  %v284_v7 = vld [vmem:[%s1192_s6 + $0x358] sm:$0xff] }
  0xd7   : > { %v631_v11 = vpop.f32.mrf.mxu2  ;;  %565 = vmatmul.f32.gmra.mxu1 %v262_v9 }
  0xd8   : > { %v632_v12 = vadd.f32 %v631_v11, %v519_v10  ;;  %v744_v13 = vpop.f32.mrf.mxu3  ;;  %v282_v11 = vld [vmem:[%s1192_s6 + $0x348] sm:$0xff] }
  0xda   : > { %v745_v15 = vadd.f32 %v744_v13, %v632_v12  ;;  %v408_v16 = vpop.f32.mrf.mxu0 }
  0xdb   : > { %v409_v19 = vadd.f32 %v1279_v0, %v408_v16  ;;  %v287_v16 = vld [vmem:[%s1192_s6 + $0x370] sm:$0xff] }
  0xdc   : > { %v830_v20 = vmax.f32 %v745_v15, 0.0  ;;  %681 = vmatmul.f32.gmra.mxu2 %v267_v14  ;;  %v521_v21 = vpop.f32.mrf.mxu1 }
  0xdd   : > { %v522_v23 = vadd.f32 %v521_v21, %v409_v19  ;;  %455 = vmatmul.f32.gmra.mxu0 %v265_v17  ;;  %794 = vmatmul.f32.gmra.mxu3 %v268_v18  ;;  %v285_v19 = vld [vmem:[%s1192_s6 + $0x360] sm:$0xff] }
  0xde   : > { %863 = vst.msk [vmem:[%s1293_s27 + $0x28] sm:$0xff] %vm857_vm0, %v830_v20  ;;  %v288_v20 = vld [vmem:[%s1192_s6 + $0x378] sm:$0xff] }
  0xdf   : > { %v634_v24 = vpop.f32.mrf.mxu2  ;;  %568 = vmatmul.f32.gmra.mxu1 %v266_v22 }
  0xe0   : > { %v635_v25 = vadd.f32 %v634_v24, %v522_v23  ;;  %v747_v26 = vpop.f32.mrf.mxu3  ;;  %v286_v24 = vld [vmem:[%s1192_s6 + $0x368] sm:$0xff] }
  0xe2   : > { %v748_v28 = vadd.f32 %v747_v26, %v635_v25  ;;  %v411_v29 = vpop.f32.mrf.mxu0 }
  0xe3   : > { %v412_v32 = vadd.f32 %v1279_v0, %v411_v29  ;;  %v291_v29 = vld [vmem:[%s1192_s6 + $0x390] sm:$0xff] }
  0xe4   : > { %v831_v33 = vmax.f32 %v748_v28, 0.0  ;;  %684 = vmatmul.f32.gmra.mxu2 %v271_v27  ;;  %v524_v34 = vpop.f32.mrf.mxu1 }
  0xe5   : > { %v525_v36 = vadd.f32 %v524_v34, %v412_v32  ;;  %458 = vmatmul.f32.gmra.mxu0 %v269_v30  ;;  %797 = vmatmul.f32.gmra.mxu3 %v272_v31  ;;  %v289_v32 = vld [vmem:[%s1192_s6 + $0x380] sm:$0xff] }
  0xe6   : > { %864 = vst.msk [vmem:[%s1293_s27 + $0x30] sm:$0xff] %vm857_vm0, %v831_v33  ;;  %v292_v33 = vld [vmem:[%s1192_s6 + $0x398] sm:$0xff] }
  0xe7   : > { %v637_v37 = vpop.f32.mrf.mxu2  ;;  %571 = vmatmul.f32.gmra.mxu1 %v270_v35 }
  0xe8   : > { %v638_v38 = vadd.f32 %v637_v37, %v525_v36  ;;  %v750_v39 = vpop.f32.mrf.mxu3  ;;  %v290_v37 = vld [vmem:[%s1192_s6 + $0x388] sm:$0xff] }
  0xea   : > { %v751_v41 = vadd.f32 %v750_v39, %v638_v38  ;;  %v414_v42 = vpop.f32.mrf.mxu0 }
  0xeb   : > { %v415_v45 = vadd.f32 %v1279_v0, %v414_v42  ;;  %v295_v42 = vld [vmem:[%s1192_s6 + $0x3b0] sm:$0xff] }
  0xec   : > { %v832_v46 = vmax.f32 %v751_v41, 0.0  ;;  %687 = vmatmul.f32.gmra.mxu2 %v275_v40  ;;  %v527_v47 = vpop.f32.mrf.mxu1 }
  0xed   : > { %v528_v49 = vadd.f32 %v527_v47, %v415_v45  ;;  %461 = vmatmul.f32.gmra.mxu0 %v273_v43  ;;  %800 = vmatmul.f32.gmra.mxu3 %v276_v44  ;;  %v293_v45 = vld [vmem:[%s1192_s6 + $0x3a0] sm:$0xff] }
  0xee   : > { %865 = vst.msk [vmem:[%s1293_s27 + $0x38] sm:$0xff] %vm857_vm0, %v832_v46  ;;  %v296_v46 = vld [vmem:[%s1192_s6 + $0x3b8] sm:$0xff] }
  0xef   : > { %v640_v50 = vpop.f32.mrf.mxu2  ;;  %574 = vmatmul.f32.gmra.mxu1 %v274_v48 }
  0xf0   : > { %v641_v51 = vadd.f32 %v640_v50, %v528_v49  ;;  %v753_v52 = vpop.f32.mrf.mxu3  ;;  %v294_v50 = vld [vmem:[%s1192_s6 + $0x3a8] sm:$0xff] }
  0xf2   : > { %v754_v54 = vadd.f32 %v753_v52, %v641_v51  ;;  %v417_v55 = vpop.f32.mrf.mxu0 }
  0xf3   : > { %v418_v58 = vadd.f32 %v1279_v0, %v417_v55  ;;  %v299_v55 = vld [vmem:[%s1192_s6 + $0x3d0] sm:$0xff] }
  0xf4   : > { %v833_v59 = vmax.f32 %v754_v54, 0.0  ;;  %690 = vmatmul.f32.gmra.mxu2 %v279_v53  ;;  %v530_v60 = vpop.f32.mrf.mxu1 }
  0xf5   : > { %v531_v62 = vadd.f32 %v530_v60, %v418_v58  ;;  %464 = vmatmul.f32.gmra.mxu0 %v277_v56  ;;  %803 = vmatmul.f32.gmra.mxu3 %v280_v57  ;;  %v297_v58 = vld [vmem:[%s1192_s6 + $0x3c0] sm:$0xff] }
  0xf6   : > { %866 = vst.msk [vmem:[%s1293_s27 + $0x40] sm:$0xff] %vm857_vm0, %v833_v59  ;;  %v300_v59 = vld [vmem:[%s1192_s6 + $0x3d8] sm:$0xff] }
  0xf7   : > { %v643_v63 = vpop.f32.mrf.mxu2  ;;  %577 = vmatmul.f32.gmra.mxu1 %v278_v61 }
  0xf8   : > { %v644_v1 = vadd.f32 %v643_v63, %v531_v62  ;;  %v756_v2 = vpop.f32.mrf.mxu3  ;;  %v298_v63 = vld [vmem:[%s1192_s6 + $0x3c8] sm:$0xff] }
  0xfa   : > { %v757_v4 = vadd.f32 %v756_v2, %v644_v1  ;;  %v420_v5 = vpop.f32.mrf.mxu0 }
  0xfb   : > { %v421_v8 = vadd.f32 %v1279_v0, %v420_v5  ;;  %v303_v5 = vld [vmem:[%s1192_s6 + $0x3f0] sm:$0xff] }
  0xfc   : > { %v834_v9 = vmax.f32 %v757_v4, 0.0  ;;  %693 = vmatmul.f32.gmra.mxu2 %v283_v3  ;;  %v533_v10 = vpop.f32.mrf.mxu1 }
  0xfd   : > { %v534_v12 = vadd.f32 %v533_v10, %v421_v8  ;;  %467 = vmatmul.f32.gmra.mxu0 %v281_v6  ;;  %806 = vmatmul.f32.gmra.mxu3 %v284_v7  ;;  %v301_v8 = vld [vmem:[%s1192_s6 + $0x3e0] sm:$0xff] }
  0xfe   : > { %867 = vst.msk [vmem:[%s1293_s27 + $0x48] sm:$0xff] %vm857_vm0, %v834_v9  ;;  %v304_v9 = vld [vmem:[%s1192_s6 + $0x3f8] sm:$0xff] }
  0xff   : > { %v646_v13 = vpop.f32.mrf.mxu2  ;;  %580 = vmatmul.f32.gmra.mxu1 %v282_v11 }
 0x100   : > { %v647_v14 = vadd.f32 %v646_v13, %v534_v12  ;;  %v759_v15 = vpop.f32.mrf.mxu3  ;;  %v302_v13 = vld [vmem:[%s1192_s6 + $0x3e8] sm:$0xff] }
 0x102   : > { %v760_v17 = vadd.f32 %v759_v15, %v647_v14  ;;  %v423_v18 = vpop.f32.mrf.mxu0 }
 0x103   : > { %v424_v21 = vadd.f32 %v1279_v0, %v423_v18 }
 0x104   : > { %v835_v22 = vmax.f32 %v760_v17, 0.0  ;;  %696 = vmatmul.f32.gmra.mxu2 %v287_v16  ;;  %v536_v23 = vpop.f32.mrf.mxu1 }
 0x105   : > { %v537_v25 = vadd.f32 %v536_v23, %v424_v21  ;;  %470 = vmatmul.f32.gmra.mxu0 %v285_v19  ;;  %809 = vmatmul.f32.gmra.mxu3 %v288_v20 }
 0x106   : > { %868 = vst.msk [vmem:[%s1293_s27 + $0x50] sm:$0xff] %vm857_vm0, %v835_v22 }
 0x107   : > { %v649_v26 = vpop.f32.mrf.mxu2  ;;  %583 = vmatmul.f32.gmra.mxu1 %v286_v24 }
 0x108   : > { %v650_v27 = vadd.f32 %v649_v26, %v537_v25  ;;  %v762_v28 = vpop.f32.mrf.mxu3 }
 0x10a   : > { %v763_v30 = vadd.f32 %v762_v28, %v650_v27  ;;  %v426_v31 = vpop.f32.mrf.mxu0 }
 0x10b   : > { %v427_v34 = vadd.f32 %v1279_v0, %v426_v31 }
 0x10c   : > { %v836_v35 = vmax.f32 %v763_v30, 0.0  ;;  %699 = vmatmul.f32.gmra.mxu2 %v291_v29  ;;  %v539_v36 = vpop.f32.mrf.mxu1 }
 0x10d   : > { %v540_v38 = vadd.f32 %v539_v36, %v427_v34  ;;  %473 = vmatmul.f32.gmra.mxu0 %v289_v32  ;;  %812 = vmatmul.f32.gmra.mxu3 %v292_v33 }
 0x10e   : > { %869 = vst.msk [vmem:[%s1293_s27 + $0x58] sm:$0xff] %vm857_vm0, %v836_v35 }
 0x10f   : > { %v652_v39 = vpop.f32.mrf.mxu2  ;;  %586 = vmatmul.f32.gmra.mxu1 %v290_v37 }
 0x110   : > { %v653_v40 = vadd.f32 %v652_v39, %v540_v38  ;;  %v765_v41 = vpop.f32.mrf.mxu3 }
 0x112   : > { %v766_v43 = vadd.f32 %v765_v41, %v653_v40  ;;  %v429_v44 = vpop.f32.mrf.mxu0 }
 0x113   : > { %v430_v47 = vadd.f32 %v1279_v0, %v429_v44 }
 0x114   : > { %v837_v48 = vmax.f32 %v766_v43, 0.0  ;;  %702 = vmatmul.f32.gmra.mxu2 %v295_v42  ;;  %v542_v49 = vpop.f32.mrf.mxu1 }
 0x115   : > { %v543_v51 = vadd.f32 %v542_v49, %v430_v47  ;;  %476 = vmatmul.f32.gmra.mxu0 %v293_v45  ;;  %815 = vmatmul.f32.gmra.mxu3 %v296_v46 }
 0x116   : > { %870 = vst.msk [vmem:[%s1293_s27 + $0x60] sm:$0xff] %vm857_vm0, %v837_v48 }
 0x117   : > { %v655_v52 = vpop.f32.mrf.mxu2  ;;  %589 = vmatmul.f32.gmra.mxu1 %v294_v50 }
 0x118   : > { %v656_v53 = vadd.f32 %v655_v52, %v543_v51  ;;  %v768_v54 = vpop.f32.mrf.mxu3 }
 0x11a   : > { %v769_v56 = vadd.f32 %v768_v54, %v656_v53  ;;  %v432_v57 = vpop.f32.mrf.mxu0 }
 0x11b   : > { %v433_v60 = vadd.f32 %v1279_v0, %v432_v57 }
 0x11c   : > { %v838_v61 = vmax.f32 %v769_v56, 0.0  ;;  %705 = vmatmul.f32.gmra.mxu2 %v299_v55  ;;  %v545_v62 = vpop.f32.mrf.mxu1 }
 0x11d   : > { %v546_v1 = vadd.f32 %v545_v62, %v433_v60  ;;  %479 = vmatmul.f32.gmra.mxu0 %v297_v58  ;;  %818 = vmatmul.f32.gmra.mxu3 %v300_v59 }
 0x11e   : > { %871 = vst.msk [vmem:[%s1293_s27 + $0x68] sm:$0xff] %vm857_vm0, %v838_v61 }
 0x11f   : > { %v658_v2 = vpop.f32.mrf.mxu2  ;;  %592 = vmatmul.f32.gmra.mxu1 %v298_v63 }
 0x120   : > { %v659_v3 = vadd.f32 %v658_v2, %v546_v1  ;;  %v771_v4 = vpop.f32.mrf.mxu3 }
 0x122   : > { %v772_v6 = vadd.f32 %v771_v4, %v659_v3  ;;  %v435_v7 = vpop.f32.mrf.mxu0 }
 0x123   : > { %v436_v10 = vadd.f32 %v1279_v0, %v435_v7 }
 0x124   : > { %v839_v11 = vmax.f32 %v772_v6, 0.0  ;;  %708 = vmatmul.f32.gmra.mxu2 %v303_v5  ;;  %v548_v12 = vpop.f32.mrf.mxu1 }
 0x125   : > { %v549_v14 = vadd.f32 %v548_v12, %v436_v10  ;;  %482 = vmatmul.f32.gmra.mxu0 %v301_v8  ;;  %821 = vmatmul.f32.gmra.mxu3 %v304_v9 }
 0x126   : > { %872 = vst.msk [vmem:[%s1293_s27 + $0x70] sm:$0xff] %vm857_vm0, %v839_v11 }
 0x127   : > { %v661_v15 = vpop.f32.mrf.mxu2  ;;  %595 = vmatmul.f32.gmra.mxu1 %v302_v13 }
 0x128   : > { %v662_v16 = vadd.f32 %v661_v15, %v549_v14  ;;  %v774_v17 = vpop.f32.mrf.mxu3 }
 0x12a   : > { %v775_v18 = vadd.f32 %v774_v17, %v662_v16  ;;  %v438_v19 = vpop.f32.mrf.mxu0 }
 0x12b   : > { %v439_v20 = vadd.f32 %v1279_v0, %v438_v19 }
 0x12c   : > { %v840_v21 = vmax.f32 %v775_v18, 0.0  ;;  %v551_v22 = vpop.f32.mrf.mxu1 }
 0x12d   : > { %v552_v23 = vadd.f32 %v551_v22, %v439_v20 }
 0x12e   : > { %873 = vst.msk [vmem:[%s1293_s27 + $0x78] sm:$0xff] %vm857_vm0, %v840_v21 }
 0x12f   : > { %v664_v24 = vpop.f32.mrf.mxu2 }
 0x130   : > { %v665_v25 = vadd.f32 %v664_v24, %v552_v23  ;;  %v777_v26 = vpop.f32.mrf.mxu3 }
 0x132   : > { %v778_v27 = vadd.f32 %v777_v26, %v665_v25  ;;  %v441_v28 = vpop.f32.mrf.mxu0 }
 0x133   : > { %v442_v29 = vadd.f32 %v1279_v0, %v441_v28 }
 0x134   : > { %v841_v30 = vmax.f32 %v778_v27, 0.0  ;;  %v554_v31 = vpop.f32.mrf.mxu1 }
 0x135   : > { %v555_v32 = vadd.f32 %v554_v31, %v442_v29 }
 0x136   : > { %874 = vst.msk [vmem:[%s1293_s27 + $0x80] sm:$0xff] %vm857_vm0, %v841_v30 }
 0x137   : > { %v667_v33 = vpop.f32.mrf.mxu2 }
 0x138   : > { %v668_v34 = vadd.f32 %v667_v33, %v555_v32  ;;  %v780_v35 = vpop.f32.mrf.mxu3 }
 0x13a   : > { %v781_v36 = vadd.f32 %v780_v35, %v668_v34  ;;  %v444_v37 = vpop.f32.mrf.mxu0 }
 0x13b   : > { %v445_v38 = vadd.f32 %v1279_v0, %v444_v37 }
 0x13c   : > { %v842_v39 = vmax.f32 %v781_v36, 0.0  ;;  %v557_v40 = vpop.f32.mrf.mxu1 }
 0x13d   : > { %v558_v41 = vadd.f32 %v557_v40, %v445_v38 }
 0x13e   : > { %875 = vst.msk [vmem:[%s1293_s27 + $0x88] sm:$0xff] %vm857_vm0, %v842_v39 }
 0x13f   : > { %v670_v42 = vpop.f32.mrf.mxu2 }
 0x140   : > { %v671_v43 = vadd.f32 %v670_v42, %v558_v41  ;;  %v783_v44 = vpop.f32.mrf.mxu3 }
 0x142   : > { %v784_v45 = vadd.f32 %v783_v44, %v671_v43  ;;  %v447_v46 = vpop.f32.mrf.mxu0 }
 0x143   : > { %v448_v47 = vadd.f32 %v1279_v0, %v447_v46 }
 0x144   : > { %v843_v48 = vmax.f32 %v784_v45, 0.0  ;;  %v560_v49 = vpop.f32.mrf.mxu1 }
 0x145   : > { %v561_v50 = vadd.f32 %v560_v49, %v448_v47 }
 0x146   : > { %876 = vst.msk [vmem:[%s1293_s27 + $0x90] sm:$0xff] %vm857_vm0, %v843_v48 }
 0x147   : > { %v673_v51 = vpop.f32.mrf.mxu2 }
 0x148   : > { %v674_v52 = vadd.f32 %v673_v51, %v561_v50  ;;  %v786_v53 = vpop.f32.mrf.mxu3 }
 0x14a   : > { %v787_v54 = vadd.f32 %v786_v53, %v674_v52  ;;  %v450_v55 = vpop.f32.mrf.mxu0 }
 0x14b   : > { %v451_v56 = vadd.f32 %v1279_v0, %v450_v55 }
 0x14c   : > { %v844_v57 = vmax.f32 %v787_v54, 0.0  ;;  %v563_v58 = vpop.f32.mrf.mxu1 }
 0x14d   : > { %v564_v59 = vadd.f32 %v563_v58, %v451_v56 }
 0x14e   : > { %877 = vst.msk [vmem:[%s1293_s27 + $0x98] sm:$0xff] %vm857_vm0, %v844_v57 }
 0x14f   : > { %v676_v60 = vpop.f32.mrf.mxu2 }
 0x150   : > { %v677_v61 = vadd.f32 %v676_v60, %v564_v59  ;;  %v789_v62 = vpop.f32.mrf.mxu3 }
 0x152   : > { %v790_v63 = vadd.f32 %v789_v62, %v677_v61  ;;  %v453_v1 = vpop.f32.mrf.mxu0 }
 0x153   : > { %v454_v2 = vadd.f32 %v1279_v0, %v453_v1 }
 0x154   : > { %v845_v3 = vmax.f32 %v790_v63, 0.0  ;;  %v566_v4 = vpop.f32.mrf.mxu1 }
 0x155   : > { %v567_v5 = vadd.f32 %v566_v4, %v454_v2 }
 0x156   : > { %878 = vst.msk [vmem:[%s1293_s27 + $0xa0] sm:$0xff] %vm857_vm0, %v845_v3 }
 0x157   : > { %v679_v6 = vpop.f32.mrf.mxu2 }
 0x158   : > { %v680_v7 = vadd.f32 %v679_v6, %v567_v5  ;;  %v792_v8 = vpop.f32.mrf.mxu3 }
 0x15a   : > { %v793_v9 = vadd.f32 %v792_v8, %v680_v7  ;;  %v456_v10 = vpop.f32.mrf.mxu0 }
 0x15b   : > { %v457_v11 = vadd.f32 %v1279_v0, %v456_v10 }
 0x15c   : > { %v846_v12 = vmax.f32 %v793_v9, 0.0  ;;  %v569_v13 = vpop.f32.mrf.mxu1 }
 0x15d   : > { %v570_v14 = vadd.f32 %v569_v13, %v457_v11 }
 0x15e   : > { %879 = vst.msk [vmem:[%s1293_s27 + $0xa8] sm:$0xff] %vm857_vm0, %v846_v12 }
 0x15f   : > { %v682_v15 = vpop.f32.mrf.mxu2 }
 0x160   : > { %v683_v16 = vadd.f32 %v682_v15, %v570_v14  ;;  %v795_v17 = vpop.f32.mrf.mxu3 }
 0x162   : > { %v796_v18 = vadd.f32 %v795_v17, %v683_v16  ;;  %v459_v19 = vpop.f32.mrf.mxu0 }
 0x163   : > { %v460_v20 = vadd.f32 %v1279_v0, %v459_v19 }
 0x164   : > { %v847_v21 = vmax.f32 %v796_v18, 0.0  ;;  %v572_v22 = vpop.f32.mrf.mxu1 }
 0x165   : > { %v573_v23 = vadd.f32 %v572_v22, %v460_v20 }
 0x166   : > { %880 = vst.msk [vmem:[%s1293_s27 + $0xb0] sm:$0xff] %vm857_vm0, %v847_v21 }
 0x167   : > { %v685_v24 = vpop.f32.mrf.mxu2 }
 0x168   : > { %v686_v25 = vadd.f32 %v685_v24, %v573_v23  ;;  %v798_v26 = vpop.f32.mrf.mxu3 }
 0x16a   : > { %v799_v27 = vadd.f32 %v798_v26, %v686_v25  ;;  %v462_v28 = vpop.f32.mrf.mxu0 }
 0x16b   : > { %v463_v29 = vadd.f32 %v1279_v0, %v462_v28 }
 0x16c   : > { %v848_v30 = vmax.f32 %v799_v27, 0.0  ;;  %v575_v31 = vpop.f32.mrf.mxu1 }
 0x16d   : > { %v576_v32 = vadd.f32 %v575_v31, %v463_v29 }
 0x16e   : > { %881 = vst.msk [vmem:[%s1293_s27 + $0xb8] sm:$0xff] %vm857_vm0, %v848_v30 }
 0x16f   : > { %v688_v33 = vpop.f32.mrf.mxu2 }
 0x170   : > { %v689_v34 = vadd.f32 %v688_v33, %v576_v32  ;;  %v801_v35 = vpop.f32.mrf.mxu3 }
 0x172   : > { %v802_v36 = vadd.f32 %v801_v35, %v689_v34  ;;  %v465_v37 = vpop.f32.mrf.mxu0 }
 0x173   : > { %v466_v38 = vadd.f32 %v1279_v0, %v465_v37 }
 0x174   : > { %v849_v39 = vmax.f32 %v802_v36, 0.0  ;;  %v578_v40 = vpop.f32.mrf.mxu1 }
 0x175   : > { %v579_v41 = vadd.f32 %v578_v40, %v466_v38 }
 0x176   : > { %882 = vst.msk [vmem:[%s1293_s27 + $0xc0] sm:$0xff] %vm857_vm0, %v849_v39 }
 0x177   : > { %v691_v42 = vpop.f32.mrf.mxu2 }
 0x178   : > { %v692_v43 = vadd.f32 %v691_v42, %v579_v41  ;;  %v804_v44 = vpop.f32.mrf.mxu3 }
 0x17a   : > { %v805_v45 = vadd.f32 %v804_v44, %v692_v43  ;;  %v468_v46 = vpop.f32.mrf.mxu0 }
 0x17b   : > { %v469_v47 = vadd.f32 %v1279_v0, %v468_v46 }
 0x17c   : > { %v850_v48 = vmax.f32 %v805_v45, 0.0  ;;  %v581_v49 = vpop.f32.mrf.mxu1 }
 0x17d   : > { %v582_v50 = vadd.f32 %v581_v49, %v469_v47 }
 0x17e   : > { %883 = vst.msk [vmem:[%s1293_s27 + $0xc8] sm:$0xff] %vm857_vm0, %v850_v48 }
 0x17f   : > { %v694_v51 = vpop.f32.mrf.mxu2 }
 0x180   : > { %v695_v52 = vadd.f32 %v694_v51, %v582_v50  ;;  %v807_v53 = vpop.f32.mrf.mxu3 }
 0x182   : > { %v808_v54 = vadd.f32 %v807_v53, %v695_v52  ;;  %v471_v55 = vpop.f32.mrf.mxu0 }
 0x183   : > { %v472_v56 = vadd.f32 %v1279_v0, %v471_v55 }
 0x184   : > { %v851_v57 = vmax.f32 %v808_v54, 0.0  ;;  %v584_v58 = vpop.f32.mrf.mxu1 }
 0x185   : > { %v585_v59 = vadd.f32 %v584_v58, %v472_v56 }
 0x186   : > { %884 = vst.msk [vmem:[%s1293_s27 + $0xd0] sm:$0xff] %vm857_vm0, %v851_v57 }
 0x187   : > { %v697_v60 = vpop.f32.mrf.mxu2 }
 0x188   : > { %v698_v61 = vadd.f32 %v697_v60, %v585_v59  ;;  %v810_v62 = vpop.f32.mrf.mxu3 }
 0x18a   : > { %v811_v63 = vadd.f32 %v810_v62, %v698_v61  ;;  %v474_v1 = vpop.f32.mrf.mxu0 }
 0x18b   : > { %v475_v2 = vadd.f32 %v1279_v0, %v474_v1 }
 0x18c   : > { %v852_v3 = vmax.f32 %v811_v63, 0.0  ;;  %v587_v4 = vpop.f32.mrf.mxu1 }
 0x18d   : > { %v588_v5 = vadd.f32 %v587_v4, %v475_v2 }
 0x18e   : > { %885 = vst.msk [vmem:[%s1293_s27 + $0xd8] sm:$0xff] %vm857_vm0, %v852_v3 }
 0x18f   : > { %v700_v6 = vpop.f32.mrf.mxu2 }
 0x190   : > { %v701_v7 = vadd.f32 %v700_v6, %v588_v5  ;;  %v813_v8 = vpop.f32.mrf.mxu3 }
 0x192   : > { %v814_v9 = vadd.f32 %v813_v8, %v701_v7  ;;  %v477_v10 = vpop.f32.mrf.mxu0 }
 0x193   : > { %v478_v11 = vadd.f32 %v1279_v0, %v477_v10 }
 0x194   : > { %v853_v12 = vmax.f32 %v814_v9, 0.0  ;;  %v590_v13 = vpop.f32.mrf.mxu1 }
 0x195   : > { %v591_v14 = vadd.f32 %v590_v13, %v478_v11 }
 0x196   : > { %886 = vst.msk [vmem:[%s1293_s27 + $0xe0] sm:$0xff] %vm857_vm0, %v853_v12 }
 0x197   : > { %v703_v15 = vpop.f32.mrf.mxu2 }
 0x198   : > { %v704_v16 = vadd.f32 %v703_v15, %v591_v14  ;;  %v816_v17 = vpop.f32.mrf.mxu3 }
 0x19a   : > { %v817_v18 = vadd.f32 %v816_v17, %v704_v16  ;;  %v480_v19 = vpop.f32.mrf.mxu0 }
 0x19b   : > { %v481_v20 = vadd.f32 %v1279_v0, %v480_v19 }
 0x19c   : > { %v854_v21 = vmax.f32 %v817_v18, 0.0  ;;  %v593_v22 = vpop.f32.mrf.mxu1 }
 0x19d   : > { %v594_v23 = vadd.f32 %v593_v22, %v481_v20 }
 0x19e   : > { %887 = vst.msk [vmem:[%s1293_s27 + $0xe8] sm:$0xff] %vm857_vm0, %v854_v21 }
 0x19f   : > { %v706_v24 = vpop.f32.mrf.mxu2 }
 0x1a0   : > { %v707_v25 = vadd.f32 %v706_v24, %v594_v23  ;;  %v819_v26 = vpop.f32.mrf.mxu3 }
 0x1a2   : > { %v820_v27 = vadd.f32 %v819_v26, %v707_v25  ;;  %v483_v28 = vpop.f32.mrf.mxu0 }
 0x1a3   : > { %v484_v29 = vadd.f32 %v1279_v0, %v483_v28 }
 0x1a4   : > { %v855_v30 = vmax.f32 %v820_v27, 0.0  ;;  %v596_v31 = vpop.f32.mrf.mxu1 }
 0x1a5   : > { %v597_v32 = vadd.f32 %v596_v31, %v484_v29 }
 0x1a6   : > { %888 = vst.msk [vmem:[%s1293_s27 + $0xf0] sm:$0xff] %vm857_vm0, %v855_v30 }
 0x1a7   : > { %v709_v33 = vpop.f32.mrf.mxu2 }
 0x1a8   : > { %v710_v34 = vadd.f32 %v709_v33, %v597_v32  ;;  %v822_v35 = vpop.f32.mrf.mxu3 }
 0x1aa   : > { %v823_v36 = vadd.f32 %v822_v35, %v710_v34 }
 0x1ac   : > { %v856_v37 = vmax.f32 %v823_v36, 0.0 }
 0x1ae   : > { %889 = vst.msk [vmem:[%s1293_s27 + $0xf8] sm:$0xff] %vm857_vm0, %v856_v37 }
 0x1af PF: > { %s13_s12 = sadd.s32 1, %s974_s12  }
 0x1b0   : > { %p10_p4 = scmp.ge.s32.totalorder %s13_s12, 5  }
 0x1b2   :  { %12 = sbr.rel (!%p10_p4) target bundleno = 1 (0x1), region = 62 }

// kernel: dqn_forward.6
= control target key start
LH: loop header
LB: loop body
LE: loop exit
PB: predicated region body
PF: predicated region fallthrough
CT: control target
= control target key end

     0   :  { %s1401_s12 = smov 0   ;;  %s2071_s0 = inlined_call_operand.vmem [shape: f32[560,576], index: 0, kind: input, shape index: {}]   ;;  %s2072_s1 = inlined_call_operand.vmem [shape: f32[576,64], index: 1, kind: input, shape index: {}]   ;;  %s2073_s2 = inlined_call_operand.vmem [shape: f32[1,64], index: 2, kind: input, shape index: {}]   ;;  %s2074_s3 = inlined_call_operand.vmem [shape: f32[560,64], index: 3, kind: output, shape index: {}]  }
   0x1 LB: > { %s1270_s13 = sadd.s32 4294967295, %s1379_s12   ;;  %p1274_p0 = scmp.ge.s32.totalorder %s1379_s12, 1  ;;  %s1379_s12 = sphi %s1401_s12, %s13_s12  }
   0x2   : > { %p139_p1 = scmp.lt.s32.totalorder %s1379_s12, 3 }
   0x4   : > { %p140_p2 = pnand %p1274_p0, %p139_p1 }
   0x5   : > { %s164_s28 = smul.u32 (!%p140_p2), 35, %s1270_s13 }
   0x6   : > { %143 = sbr.rel (%p140_p2) target bundleno = 528 (0x210), region = 32 }
   0x7   : > { %p165_p3 = scmp.lt.s32.totalorder (!%p140_p2), %s164_s28, 69 }
   0xb   : > { %v367_v0 = vld [vmem:[%s2072_s1 + $0x78] sm:$0xff]  ;;  %v366_v1 = vld [vmem:[%s2072_s1 + $0x70] sm:$0xff]  ;;  %v365_v2 = vld [vmem:[%s2072_s1 + $0x68] sm:$0xff]  ;;  %s2076_s28 = smov (!%p165_p3, %s164_s28), 69  ;;  %vm428_vm0 = vcmask 523264  }
   0xc   : > { %1314 = vmatpush.msra.mxu1 %v367_v0  ;;  %1315 = vmatpush.msra.mxu2 %v367_v0  ;;  %v364_v3 = vld [vmem:[%s2072_s1 + $0x60] sm:$0xff]  ;;  %v363_v4 = vld [vmem:[%s2072_s1 + $0x58] sm:$0xff]  ;;  %v362_v5 = vld [vmem:[%s2072_s1 + $0x50] sm:$0xff]  ;;  %s1362_s15 = smul.u32 40, %s2076_s28  ;;  %s1276_s18 = sshll.u32 %s2076_s28, 3 }
   0xd   : > { %534 = vmatpush.msra.mxu0 %v367_v0  ;;  %1316 = vmatpush.msra.mxu3 %v367_v0  ;;  %v361_v6 = vld [vmem:[%s2072_s1 + $0x48] sm:$0xff]  ;;  %v360_v7 = vld [vmem:[%s2072_s1 + $0x40] sm:$0xff]  ;;  %v359_v8 = vld [vmem:[%s2072_s1 + $0x38] sm:$0xff]  ;;  %s1841_s21 = scalar_lea.vmem %s2074_s3, %s1276_s18 }
   0xe   : > { %1317 = vmatpush.msra.mxu1 %v366_v1  ;;  %1318 = vmatpush.msra.mxu2 %v366_v1  ;;  %v358_v9 = vld [vmem:[%s2072_s1 + $0x30] sm:$0xff]  ;;  %v357_v10 = vld [vmem:[%s2072_s1 + $0x28] sm:$0xff]  ;;  %v356_v11 = vld [vmem:[%s2072_s1 + $0x20] sm:$0xff]  ;;  %s1462_s22 = scalar_lea.vmem %s2071_s0, %s1362_s15 }
   0xf   : > { %535 = vmatpush.msra.mxu0 %v366_v1  ;;  %1319 = vmatpush.msra.mxu3 %v366_v1  ;;  %v355_v12 = vld [vmem:[%s2072_s1 + $0x18] sm:$0xff]  ;;  %v354_v13 = vld [vmem:[%s2072_s1 + $0x10] sm:$0xff]  ;;  %v353_v14 = vld [vmem:[%s2072_s1 + $0x8] sm:$0xff] }
  0x10   : > { %1320 = vmatpush.msra.mxu1 %v365_v2  ;;  %1321 = vmatpush.msra.mxu2 %v365_v2  ;;  %v352_v15 = vld [vmem:[%s2072_s1] sm:$0xff]  ;;  %v222_v16 = vld [vmem:[%s1462_s22 + $0x168] sm:$0xff]  ;;  %v267_v17 = vld [vmem:[%s1462_s22 + $0x2d0] sm:$0xff] }
  0x11   : > { %536 = vmatpush.msra.mxu0 %v365_v2  ;;  %1322 = vmatpush.msra.mxu3 %v365_v2  ;;  %v399_v18 = vld [vmem:[%s2072_s1 + $0x178] sm:$0xff]  ;;  %v398_v20 = vld [vmem:[%s2072_s1 + $0x170] sm:$0xff]  ;;  %v177_v22 = vld [vmem:[%s1462_s22] sm:$0xff] }
  0x12   : > { %1323 = vmatpush.msra.mxu1 %v364_v3  ;;  %1324 = vmatpush.msra.mxu2 %v364_v3  ;;  %v383_v19 = vld [vmem:[%s2072_s1 + $0xf8] sm:$0xff]  ;;  %v382_v21 = vld [vmem:[%s2072_s1 + $0xf0] sm:$0xff]  ;;  %v397_v24 = vld [vmem:[%s2072_s1 + $0x168] sm:$0xff] }
  0x13   : > { %537 = vmatpush.msra.mxu0 %v364_v3  ;;  %1325 = vmatpush.msra.mxu3 %v364_v3  ;;  %v312_v23 = vld [vmem:[%s1462_s22 + $0x438] sm:$0xff]  ;;  %v381_v27 = vld [vmem:[%s2072_s1 + $0xe8] sm:$0xff]  ;;  %v396_v28 = vld [vmem:[%s2072_s1 + $0x160] sm:$0xff] }
  0x14   : > { %1326 = vmatpush.msra.mxu1 %v363_v4  ;;  %1327 = vmatpush.msra.mxu2 %v363_v4  ;;  %v415_v25 = vld [vmem:[%s2072_s1 + $0x1f8] sm:$0xff]  ;;  %v414_v29 = vld [vmem:[%s2072_s1 + $0x1f0] sm:$0xff]  ;;  %v380_v32 = vld [vmem:[%s2072_s1 + $0xe0] sm:$0xff] }
  0x15   : > { %538 = vmatpush.msra.mxu0 %v363_v4  ;;  %1328 = vmatpush.msra.mxu3 %v363_v4  ;;  %v423_v26 = vld [vmem:[%s2072_s1 + $0x238] sm:$0xff]  ;;  %v227_v30 = vld [vmem:[%s1462_s22 + $0x190] sm:$0xff]  ;;  %v413_v34 = vld [vmem:[%s2072_s1 + $0x1e8] sm:$0xff] }
  0x16   : > { %1329 = vmatpush.msra.mxu1 %v362_v5  ;;  %1330 = vmatpush.msra.mxu2 %v362_v5  ;;  %v272_v31 = vld [vmem:[%s1462_s22 + $0x2f8] sm:$0xff]  ;;  %v422_v35 = vld [vmem:[%s2072_s1 + $0x230] sm:$0xff]  ;;  %v182_v38 = vld [vmem:[%s1462_s22 + $0x28] sm:$0xff] }
  0x17   : > { %539 = vmatpush.msra.mxu0 %v362_v5  ;;  %1331 = vmatpush.msra.mxu3 %v362_v5  ;;  %v395_v33 = vld [vmem:[%s2072_s1 + $0x158] sm:$0xff]  ;;  %v394_v37 = vld [vmem:[%s2072_s1 + $0x150] sm:$0xff]  ;;  %v317_v39 = vld [vmem:[%s1462_s22 + $0x460] sm:$0xff] }
  0x18   : > { %1332 = vmatpush.msra.mxu1 %v361_v6  ;;  %1333 = vmatpush.msra.mxu2 %v361_v6  ;;  %v379_v36 = vld [vmem:[%s2072_s1 + $0xd8] sm:$0xff]  ;;  %v412_v40 = vld [vmem:[%s2072_s1 + $0x1e0] sm:$0xff]  ;;  %v378_v41 = vld [vmem:[%s2072_s1 + $0xd0] sm:$0xff] }
  0x19   : > { %540 = vmatpush.msra.mxu0 %v361_v6  ;;  %1334 = vmatpush.msra.mxu3 %v361_v6  ;;  %v393_v42 = vld [vmem:[%s2072_s1 + $0x148] sm:$0xff]  ;;  %v411_v44 = vld [vmem:[%s2072_s1 + $0x1d8] sm:$0xff]  ;;  %v277_v47 = vld [vmem:[%s1462_s22 + $0x320] sm:$0xff] }
  0x1a   : > { %1335 = vmatpush.msra.mxu1 %v360_v7  ;;  %1336 = vmatpush.msra.mxu2 %v360_v7  ;;  %v421_v43 = vld [vmem:[%s2072_s1 + $0x228] sm:$0xff]  ;;  %v232_v46 = vld [vmem:[%s1462_s22 + $0x1b8] sm:$0xff]  ;;  %v410_v48 = vld [vmem:[%s2072_s1 + $0x1d0] sm:$0xff] }
  0x1b   : > { %541 = vmatpush.msra.mxu0 %v360_v7  ;;  %1337 = vmatpush.msra.mxu3 %v360_v7  ;;  %v377_v45 = vld [vmem:[%s2072_s1 + $0xc8] sm:$0xff]  ;;  %v392_v49 = vld [vmem:[%s2072_s1 + $0x140] sm:$0xff]  ;;  %v391_v53 = vld [vmem:[%s2072_s1 + $0x138] sm:$0xff] }
  0x1c   : > { %1338 = vmatpush.msra.mxu1 %v359_v8  ;;  %1339 = vmatpush.msra.mxu2 %v359_v8  ;;  %v376_v50 = vld [vmem:[%s2072_s1 + $0xc0] sm:$0xff]  ;;  %v409_v52 = vld [vmem:[%s2072_s1 + $0x1c8] sm:$0xff]  ;;  %v187_v54 = vld [vmem:[%s1462_s22 + $0x50] sm:$0xff] }
  0x1d   : > { %542 = vmatpush.msra.mxu0 %v359_v8  ;;  %1340 = vmatpush.msra.mxu3 %v359_v8  ;;  %v420_v51 = vld [vmem:[%s2072_s1 + $0x220] sm:$0xff]  ;;  %v322_v55 = vld [vmem:[%s1462_s22 + $0x488] sm:$0xff]  ;;  %v375_v57 = vld [vmem:[%s2072_s1 + $0xb8] sm:$0xff] }
  0x1e   : > { %1341 = vmatpush.msra.mxu1 %v358_v9  ;;  %1342 = vmatpush.msra.mxu2 %v358_v9  ;;  %v408_v56 = vld [vmem:[%s2072_s1 + $0x1c0] sm:$0xff]  ;;  %v390_v58 = vld [vmem:[%s2072_s1 + $0x130] sm:$0xff]  ;;  %v419_v59 = vld [vmem:[%s2072_s1 + $0x218] sm:$0xff] }
  0x1f   : > { %543 = vmatpush.msra.mxu0 %v358_v9  ;;  %1343 = vmatpush.msra.mxu3 %v358_v9  ;;  %v407_v60 = vld [vmem:[%s2072_s1 + $0x1b8] sm:$0xff]  ;;  %v374_v61 = vld [vmem:[%s2072_s1 + $0xb0] sm:$0xff]  ;;  %v237_v62 = vld [vmem:[%s1462_s22 + $0x1e0] sm:$0xff] }
  0x20   : > { %1344 = vmatpush.msra.mxu1 %v357_v10  ;;  %1345 = vmatpush.msra.mxu2 %v357_v10  ;;  %v282_v63 = vld [vmem:[%s1462_s22 + $0x348] sm:$0xff]  ;;  %v406_v1 = vld [vmem:[%s2072_s1 + $0x1b0] sm:$0xff]  ;;  %v388_v4 = vld [vmem:[%s2072_s1 + $0x120] sm:$0xff] }
  0x21   : > { %544 = vmatpush.msra.mxu0 %v357_v10  ;;  %1346 = vmatpush.msra.mxu3 %v357_v10  ;;  %v389_v0 = vld [vmem:[%s2072_s1 + $0x128] sm:$0xff]  ;;  %v418_v3 = vld [vmem:[%s2072_s1 + $0x210] sm:$0xff]  ;;  %v192_v6 = vld [vmem:[%s1462_s22 + $0x78] sm:$0xff] }
  0x22   : > { %1347 = vmatpush.msra.mxu1 %v356_v11  ;;  %1348 = vmatpush.msra.mxu2 %v356_v11  ;;  %v373_v2 = vld [vmem:[%s2072_s1 + $0xa8] sm:$0xff]  ;;  %v327_v7 = vld [vmem:[%s1462_s22 + $0x4b0] sm:$0xff]  ;;  %v372_v8 = vld [vmem:[%s2072_s1 + $0xa0] sm:$0xff] }
  0x23   : > { %545 = vmatpush.msra.mxu0 %v356_v11  ;;  %1349 = vmatpush.msra.mxu3 %v356_v11  ;;  %v405_v5 = vld [vmem:[%s2072_s1 + $0x1a8] sm:$0xff]  ;;  %v387_v9 = vld [vmem:[%s2072_s1 + $0x118] sm:$0xff]  ;;  %v404_v10 = vld [vmem:[%s2072_s1 + $0x1a0] sm:$0xff] }
  0x24   : > { %1350 = vmatpush.msra.mxu1 %v355_v12  ;;  %1351 = vmatpush.msra.mxu2 %v355_v12  ;;  %v371_v11 = vld [vmem:[%s2072_s1 + $0x98] sm:$0xff] }
  0x25   : > { %546 = vmatpush.msra.mxu0 %v355_v12  ;;  %1352 = vmatpush.msra.mxu3 %v355_v12  ;;  %v386_v12 = vld [vmem:[%s2072_s1 + $0x110] sm:$0xff] }
  0x26   : > { %1353 = vmatpush.msra.mxu1 %v354_v13  ;;  %1354 = vmatpush.msra.mxu2 %v354_v13 }
  0x27   : > { %547 = vmatpush.msra.mxu0 %v354_v13  ;;  %1355 = vmatpush.msra.mxu3 %v354_v13  ;;  %v242_v13 = vld [vmem:[%s1462_s22 + $0x208] sm:$0xff] }
  0x28   : > { %1356 = vmatpush.msra.mxu1 %v353_v14  ;;  %1357 = vmatpush.msra.mxu2 %v353_v14 }
  0x29   : > { %548 = vmatpush.msra.mxu0 %v353_v14  ;;  %1358 = vmatpush.msra.mxu3 %v353_v14  ;;  %v287_v14 = vld [vmem:[%s1462_s22 + $0x370] sm:$0xff] }
  0x2a   : > { %1359 = vmatpush.msra.mxu1 %v352_v15  ;;  %1360 = vmatpush.msra.mxu2 %v352_v15 }
  0x2b   : > { %577 = vmatmul.f32.vlgmr.msra.gmra.mxu1 %v222_v16  ;;  %604 = vmatmul.f32.vlgmr.msra.gmra.mxu2 %v267_v17  ;;  %v370_v16 = vld [vmem:[%s2072_s1 + $0x90] sm:$0xff]  ;;  %v385_v17 = vld [vmem:[%s2072_s1 + $0x108] sm:$0xff] }
  0x2c   : > { %778 = vmatpush.msrb.mxu2 %v399_v18  ;;  %656 = vmatpush.msrb.mxu1 %v383_v19  ;;  %v402_v18 = vld [vmem:[%s2072_s1 + $0x190] sm:$0xff]  ;;  %v417_v19 = vld [vmem:[%s2072_s1 + $0x208] sm:$0xff] }
  0x2d   : > { %549 = vmatpush.msra.mxu0 %v352_v15  ;;  %1361 = vmatpush.msra.mxu3 %v352_v15  ;;  %v403_v15 = vld [vmem:[%s2072_s1 + $0x198] sm:$0xff] }
  0x2e   : > { %779 = vmatpush.msrb.mxu2 %v398_v20  ;;  %657 = vmatpush.msrb.mxu1 %v382_v21  ;;  %v197_v20 = vld [vmem:[%s1462_s22 + $0xa0] sm:$0xff]  ;;  %v332_v21 = vld [vmem:[%s1462_s22 + $0x4d8] sm:$0xff] }
  0x2f   : > { %550 = vmatmul.f32.vlgmr.msra.gmra.mxu0 %v177_v22  ;;  %631 = vmatmul.f32.vlgmr.msra.gmra.mxu3 %v312_v23  ;;  %v369_v22 = vld [vmem:[%s2072_s1 + $0x88] sm:$0xff] }
  0x30   : > { %780 = vmatpush.msrb.mxu2 %v397_v24  ;;  %900 = vmatpush.msrb.mxu3 %v415_v25  ;;  %v401_v23 = vld [vmem:[%s2072_s1 + $0x188] sm:$0xff]  ;;  %v384_v24 = vld [vmem:[%s2072_s1 + $0x100] sm:$0xff] }
  0x31   : > { %1030 = vmatpush.msrb.mxu0 %v423_v26  ;;  %658 = vmatpush.msrb.mxu1 %v381_v27  ;;  %v368_v25 = vld [vmem:[%s2072_s1 + $0x80] sm:$0xff]  ;;  %v247_v27 = vld [vmem:[%s1462_s22 + $0x230] sm:$0xff] }
  0x32   : > { %781 = vmatpush.msrb.mxu2 %v396_v28  ;;  %901 = vmatpush.msrb.mxu3 %v414_v29  ;;  %v400_v26 = vld [vmem:[%s2072_s1 + $0x180] sm:$0xff]  ;;  %v292_v28 = vld [vmem:[%s1462_s22 + $0x398] sm:$0xff] }
  0x33   : > { %580 = vmatmul.f32.gmra.mxu1 %v227_v30  ;;  %607 = vmatmul.f32.gmra.mxu2 %v272_v31  ;;  %v416_v29 = vld [vmem:[%s2072_s1 + $0x200] sm:$0xff]  ;;  %v202_v30 = vld [vmem:[%s1462_s22 + $0xc8] sm:$0xff] }
  0x34   : > { %659 = vmatpush.msrb.mxu1 %v380_v32  ;;  %782 = vmatpush.msrb.mxu2 %v395_v33  ;;  %v337_v31 = vld [vmem:[%s1462_s22 + $0x500] sm:$0xff]  ;;  %v252_v32 = vld [vmem:[%s1462_s22 + $0x258] sm:$0xff] }
  0x35   : > { %902 = vmatpush.msrb.mxu3 %v413_v34  ;;  %1031 = vmatpush.msrb.mxu0 %v422_v35  ;;  %v297_v33 = vld [vmem:[%s1462_s22 + $0x3c0] sm:$0xff]  ;;  %v207_v34 = vld [vmem:[%s1462_s22 + $0xf0] sm:$0xff]  ;;  %v342_v35 = vld [vmem:[%s1462_s22 + $0x528] sm:$0xff] }
  0x36   : > { %660 = vmatpush.msrb.mxu1 %v379_v36  ;;  %783 = vmatpush.msrb.mxu2 %v394_v37  ;;  %v257_v36 = vld [vmem:[%s1462_s22 + $0x280] sm:$0xff]  ;;  %v302_v37 = vld [vmem:[%s1462_s22 + $0x3e8] sm:$0xff] }
  0x37   : > { %553 = vmatmul.f32.gmra.mxu0 %v182_v38  ;;  %634 = vmatmul.f32.gmra.mxu3 %v317_v39  ;;  %v212_v38 = vld [vmem:[%s1462_s22 + $0x118] sm:$0xff]  ;;  %v347_v39 = vld [vmem:[%s1462_s22 + $0x550] sm:$0xff] }
  0x38   : > { %903 = vmatpush.msrb.mxu3 %v412_v40  ;;  %661 = vmatpush.msrb.mxu1 %v378_v41  ;;  %v262_v40 = vld [vmem:[%s1462_s22 + $0x2a8] sm:$0xff]  ;;  %v307_v41 = vld [vmem:[%s1462_s22 + $0x410] sm:$0xff] }
  0x39   : > { %784 = vmatpush.msrb.mxu2 %v393_v42  ;;  %1032 = vmatpush.msrb.mxu0 %v421_v43  ;;  %v217_v42 = vld [vmem:[%s1462_s22 + $0x140] sm:$0xff]  ;;  %v180_v43 = vld [vmem:[%s1462_s22 + $0x18] sm:$0xff] }
  0x3a   : > { %904 = vmatpush.msrb.mxu3 %v411_v44  ;;  %662 = vmatpush.msrb.mxu1 %v377_v45  ;;  %v178_v44 = vld [vmem:[%s1462_s22 + $0x8] sm:$0xff]  ;;  %v179_v45 = vld [vmem:[%s1462_s22 + $0x10] sm:$0xff] }
  0x3b   : > { %583 = vmatmul.f32.gmra.mxu1 %v232_v46  ;;  %610 = vmatmul.f32.gmra.mxu2 %v277_v47  ;;  %v185_v46 = vld [vmem:[%s1462_s22 + $0x40] sm:$0xff] }
  0x3c   : > { %905 = vmatpush.msrb.mxu3 %v410_v48  ;;  %785 = vmatpush.msrb.mxu2 %v392_v49  ;;  %v181_v47 = vld [vmem:[%s1462_s22 + $0x20] sm:$0xff]  ;;  %v183_v48 = vld [vmem:[%s1462_s22 + $0x30] sm:$0xff]  ;;  %v184_v49 = vld [vmem:[%s1462_s22 + $0x38] sm:$0xff] }
  0x3d   : > { %663 = vmatpush.msrb.mxu1 %v376_v50  ;;  %1033 = vmatpush.msrb.mxu0 %v420_v51  ;;  %v190_v50 = vld [vmem:[%s1462_s22 + $0x68] sm:$0xff] }
  0x3e   : > { %906 = vmatpush.msrb.mxu3 %v409_v52  ;;  %786 = vmatpush.msrb.mxu2 %v391_v53  ;;  %v186_v51 = vld [vmem:[%s1462_s22 + $0x48] sm:$0xff]  ;;  %v188_v52 = vld [vmem:[%s1462_s22 + $0x58] sm:$0xff]  ;;  %v189_v53 = vld [vmem:[%s1462_s22 + $0x60] sm:$0xff] }
  0x3f   : > { %556 = vmatmul.f32.gmra.mxu0 %v187_v54  ;;  %637 = vmatmul.f32.gmra.mxu3 %v322_v55  ;;  %v195_v54 = vld [vmem:[%s1462_s22 + $0x90] sm:$0xff] }
  0x40   : > { %907 = vmatpush.msrb.mxu3 %v408_v56  ;;  %664 = vmatpush.msrb.mxu1 %v375_v57  ;;  %v191_v55 = vld [vmem:[%s1462_s22 + $0x70] sm:$0xff]  ;;  %v193_v56 = vld [vmem:[%s1462_s22 + $0x80] sm:$0xff]  ;;  %v194_v57 = vld [vmem:[%s1462_s22 + $0x88] sm:$0xff] }
  0x41   : > { %787 = vmatpush.msrb.mxu2 %v390_v58  ;;  %1034 = vmatpush.msrb.mxu0 %v419_v59  ;;  %v200_v58 = vld [vmem:[%s1462_s22 + $0xb8] sm:$0xff] }
  0x42   : > { %908 = vmatpush.msrb.mxu3 %v407_v60  ;;  %665 = vmatpush.msrb.mxu1 %v374_v61  ;;  %v196_v59 = vld [vmem:[%s1462_s22 + $0x98] sm:$0xff]  ;;  %v198_v60 = vld [vmem:[%s1462_s22 + $0xa8] sm:$0xff]  ;;  %v199_v61 = vld [vmem:[%s1462_s22 + $0xb0] sm:$0xff] }
  0x43   : > { %586 = vmatmul.f32.gmra.mxu1 %v237_v62  ;;  %613 = vmatmul.f32.gmra.mxu2 %v282_v63  ;;  %v205_v62 = vld [vmem:[%s1462_s22 + $0xe0] sm:$0xff] }
  0x44   : > { %788 = vmatpush.msrb.mxu2 %v389_v0  ;;  %909 = vmatpush.msrb.mxu3 %v406_v1  ;;  %v201_v63 = vld [vmem:[%s1462_s22 + $0xc0] sm:$0xff]  ;;  %v203_v0 = vld [vmem:[%s1462_s22 + $0xd0] sm:$0xff]  ;;  %v204_v1 = vld [vmem:[%s1462_s22 + $0xd8] sm:$0xff] }
  0x45   : > { %666 = vmatpush.msrb.mxu1 %v373_v2  ;;  %1035 = vmatpush.msrb.mxu0 %v418_v3  ;;  %v210_v2 = vld [vmem:[%s1462_s22 + $0x108] sm:$0xff] }
  0x46   : > { %789 = vmatpush.msrb.mxu2 %v388_v4  ;;  %910 = vmatpush.msrb.mxu3 %v405_v5  ;;  %v206_v3 = vld [vmem:[%s1462_s22 + $0xe8] sm:$0xff]  ;;  %v208_v4 = vld [vmem:[%s1462_s22 + $0xf8] sm:$0xff]  ;;  %v209_v5 = vld [vmem:[%s1462_s22 + $0x100] sm:$0xff] }
  0x47   : > { %559 = vmatmul.f32.gmra.mxu0 %v192_v6  ;;  %640 = vmatmul.f32.gmra.mxu3 %v327_v7  ;;  %v215_v6 = vld [vmem:[%s1462_s22 + $0x130] sm:$0xff] }
  0x48   : > { %667 = vmatpush.msrb.mxu1 %v372_v8  ;;  %790 = vmatpush.msrb.mxu2 %v387_v9  ;;  %v211_v7 = vld [vmem:[%s1462_s22 + $0x110] sm:$0xff]  ;;  %v213_v9 = vld [vmem:[%s1462_s22 + $0x120] sm:$0xff] }
  0x49   : > { %911 = vmatpush.msrb.mxu3 %v404_v10  ;;  %1036 = vmatpush.msrb.mxu0 %v417_v19  ;;  %v214_v10 = vld [vmem:[%s1462_s22 + $0x128] sm:$0xff] }
  0x4a   : > { %668 = vmatpush.msrb.mxu1 %v371_v11  ;;  %791 = vmatpush.msrb.mxu2 %v386_v12  ;;  %v220_v12 = vld [vmem:[%s1462_s22 + $0x158] sm:$0xff] }
  0x4b   : > { %589 = vmatmul.f32.gmra.mxu1 %v242_v13  ;;  %616 = vmatmul.f32.gmra.mxu2 %v287_v14  ;;  %v216_v13 = vld [vmem:[%s1462_s22 + $0x138] sm:$0xff] }
  0x4c   : > { %912 = vmatpush.msrb.mxu3 %v403_v15  ;;  %669 = vmatpush.msrb.mxu1 %v370_v16  ;;  %v218_v16 = vld [vmem:[%s1462_s22 + $0x148] sm:$0xff] }
  0x4d   : > { %792 = vmatpush.msrb.mxu2 %v385_v17  ;;  %1037 = vmatpush.msrb.mxu0 %v416_v29  ;;  %v219_v17 = vld [vmem:[%s1462_s22 + $0x150] sm:$0xff]  ;;  %v226_v29 = vld [vmem:[%s1462_s22 + $0x188] sm:$0xff] }
  0x4e   : > { %913 = vmatpush.msrb.mxu3 %v402_v18  ;;  %670 = vmatpush.msrb.mxu1 %v369_v22 }
  0x4f   : > { %562 = vmatmul.f32.gmra.mxu0 %v197_v20  ;;  %643 = vmatmul.f32.gmra.mxu3 %v332_v21  ;;  %v225_v20 = vld [vmem:[%s1462_s22 + $0x180] sm:$0xff] }
  0x50   : > { %914 = vmatpush.msrb.mxu3 %v401_v23  ;;  %793 = vmatpush.msrb.mxu2 %v384_v24  ;;  %v221_v21 = vld [vmem:[%s1462_s22 + $0x160] sm:$0xff]  ;;  %v223_v24 = vld [vmem:[%s1462_s22 + $0x170] sm:$0xff] }
  0x51   : > { %671 = vmatpush.msrb.mxu1 %v368_v25  ;;  %v224_v25 = vld [vmem:[%s1462_s22 + $0x178] sm:$0xff] }
  0x52   : > { %915 = vmatpush.msrb.mxu3 %v400_v26 }
  0x53   : > { %592 = vmatmul.f32.gmra.mxu1 %v247_v27  ;;  %619 = vmatmul.f32.gmra.mxu2 %v292_v28  ;;  %v230_v28 = vld [vmem:[%s1462_s22 + $0x1a8] sm:$0xff] }
  0x57   : > { %565 = vmatmul.f32.gmra.mxu0 %v202_v30  ;;  %646 = vmatmul.f32.gmra.mxu3 %v337_v31 }
  0x5b   : > { %595 = vmatmul.f32.gmra.mxu1 %v252_v32  ;;  %622 = vmatmul.f32.gmra.mxu2 %v297_v33  ;;  %v228_v32 = vld [vmem:[%s1462_s22 + $0x198] sm:$0xff]  ;;  %v229_v33 = vld [vmem:[%s1462_s22 + $0x1a0] sm:$0xff] }
  0x5f   : > { %568 = vmatmul.f32.gmra.mxu0 %v207_v34  ;;  %649 = vmatmul.f32.gmra.mxu3 %v342_v35 }
  0x63   : > { %598 = vmatmul.f32.gmra.mxu1 %v257_v36  ;;  %625 = vmatmul.f32.gmra.mxu2 %v302_v37  ;;  %v235_v36 = vld [vmem:[%s1462_s22 + $0x1d0] sm:$0xff] }
  0x64   : > { %v231_v37 = vld [vmem:[%s1462_s22 + $0x1b0] sm:$0xff] }
  0x67   : > { %571 = vmatmul.f32.gmra.mxu0 %v212_v38  ;;  %652 = vmatmul.f32.gmra.mxu3 %v347_v39 }
  0x6b   : > { %601 = vmatmul.f32.gmra.mxu1 %v262_v40  ;;  %628 = vmatmul.f32.gmra.mxu2 %v307_v41  ;;  %v233_v40 = vld [vmem:[%s1462_s22 + $0x1c0] sm:$0xff]  ;;  %v234_v41 = vld [vmem:[%s1462_s22 + $0x1c8] sm:$0xff] }
  0x6f   : > { %574 = vmatmul.f32.gmra.mxu0 %v217_v42  ;;  %916 = vmatmul.f32.vlgmr.msrb.gmra.mxu3 %v180_v43 }
  0x73   : > { %672 = vmatmul.f32.vlgmr.msrb.gmra.mxu1 %v178_v44  ;;  %794 = vmatmul.f32.vlgmr.msrb.gmra.mxu2 %v179_v45  ;;  %v240_v44 = vld [vmem:[%s1462_s22 + $0x1f8] sm:$0xff] }
  0x74   : > { %v236_v45 = vld [vmem:[%s1462_s22 + $0x1d8] sm:$0xff] }
  0x77   : > { %919 = vmatmul.f32.gmra.mxu3 %v185_v46  ;;  %1277 = vmatmul.msk.f32.vlgmr.msrb.gmra.mxu0 %vm428_vm0, %v181_v47 }
  0x7b   : > { %675 = vmatmul.f32.gmra.mxu1 %v183_v48  ;;  %797 = vmatmul.f32.gmra.mxu2 %v184_v49  ;;  %v238_v48 = vld [vmem:[%s1462_s22 + $0x1e8] sm:$0xff]  ;;  %v239_v49 = vld [vmem:[%s1462_s22 + $0x1f0] sm:$0xff] }
  0x7f   : > { %922 = vmatmul.f32.gmra.mxu3 %v190_v50  ;;  %1278 = vmatmul.msk.f32.gmra.mxu0 %vm428_vm0, %v186_v51 }
  0x83   : > { %678 = vmatmul.f32.gmra.mxu1 %v188_v52  ;;  %800 = vmatmul.f32.gmra.mxu2 %v189_v53  ;;  %v245_v52 = vld [vmem:[%s1462_s22 + $0x220] sm:$0xff] }
  0x84   : > { %v241_v53 = vld [vmem:[%s1462_s22 + $0x200] sm:$0xff] }
  0x87   : > { %925 = vmatmul.f32.gmra.mxu3 %v195_v54  ;;  %1279 = vmatmul.msk.f32.gmra.mxu0 %vm428_vm0, %v191_v55 }
  0x8b   : > { %681 = vmatmul.f32.gmra.mxu1 %v193_v56  ;;  %803 = vmatmul.f32.gmra.mxu2 %v194_v57  ;;  %v243_v56 = vld [vmem:[%s1462_s22 + $0x210] sm:$0xff]  ;;  %v244_v57 = vld [vmem:[%s1462_s22 + $0x218] sm:$0xff] }
  0x8f   : > { %928 = vmatmul.f32.gmra.mxu3 %v200_v58  ;;  %1280 = vmatmul.msk.f32.gmra.mxu0 %vm428_vm0, %v196_v59 }
  0x93   : > { %684 = vmatmul.f32.gmra.mxu1 %v198_v60  ;;  %806 = vmatmul.f32.gmra.mxu2 %v199_v61  ;;  %v250_v60 = vld [vmem:[%s1462_s22 + $0x248] sm:$0xff] }
  0x94   : > { %v246_v61 = vld [vmem:[%s1462_s22 + $0x228] sm:$0xff] }
  0x97   : > { %931 = vmatmul.f32.gmra.mxu3 %v205_v62  ;;  %1281 = vmatmul.msk.f32.gmra.mxu0 %vm428_vm0, %v201_v63 }
  0x9b   : > { %687 = vmatmul.f32.gmra.mxu1 %v203_v0  ;;  %809 = vmatmul.f32.gmra.mxu2 %v204_v1  ;;  %v248_v0 = vld [vmem:[%s1462_s22 + $0x238] sm:$0xff]  ;;  %v249_v1 = vld [vmem:[%s1462_s22 + $0x240] sm:$0xff] }
  0x9f   : > { %934 = vmatmul.f32.gmra.mxu3 %v210_v2  ;;  %1282 = vmatmul.msk.f32.gmra.mxu0 %vm428_vm0, %v206_v3 }
  0xa3   : > { %690 = vmatmul.f32.gmra.mxu1 %v208_v4  ;;  %812 = vmatmul.f32.gmra.mxu2 %v209_v5  ;;  %v255_v4 = vld [vmem:[%s1462_s22 + $0x270] sm:$0xff] }
  0xa4   : > { %v251_v5 = vld [vmem:[%s1462_s22 + $0x250] sm:$0xff] }
  0xa7   : > { %937 = vmatmul.f32.gmra.mxu3 %v215_v6  ;;  %1283 = vmatmul.msk.f32.gmra.mxu0 %vm428_vm0, %v211_v7 }
  0xa8   : > { %v1706_v8 = vpop.f32.mrf.mxu1 }
  0xab   : > { %693 = vmatmul.f32.gmra.mxu1 %v213_v9  ;;  %815 = vmatmul.f32.gmra.mxu2 %v214_v10  ;;  %v253_v9 = vld [vmem:[%s1462_s22 + $0x260] sm:$0xff]  ;;  %v254_v10 = vld [vmem:[%s1462_s22 + $0x268] sm:$0xff] }
  0xac   : > { %v1710_v11 = vpop.f32.mrf.mxu0 }
  0xae   : > { %v1714_v14 = vpop.f32.mrf.mxu2 }
  0xaf   : > { %940 = vmatmul.f32.gmra.mxu3 %v220_v12  ;;  %1284 = vmatmul.msk.f32.gmra.mxu0 %vm428_vm0, %v216_v13 }
  0xb0   : > { %v1717_v15 = vpop.f32.mrf.mxu1 }
  0xb2   : > { %v1721_v18 = vpop.f32.mrf.mxu3 }
  0xb3   : > { %696 = vmatmul.f32.gmra.mxu1 %v218_v16  ;;  %818 = vmatmul.f32.gmra.mxu2 %v219_v17  ;;  %v260_v16 = vld [vmem:[%s1462_s22 + $0x298] sm:$0xff] }
  0xb4   : > { %v1723_v19 = vpop.f32.mrf.mxu0  ;;  %v256_v17 = vld [vmem:[%s1462_s22 + $0x278] sm:$0xff] }
  0xb6   : > { %v1727_v22 = vpop.f32.mrf.mxu2 }
  0xb7   : > { %943 = vmatmul.f32.gmra.mxu3 %v225_v20  ;;  %1285 = vmatmul.msk.f32.gmra.mxu0 %vm428_vm0, %v221_v21 }
  0xb8   : > { %v1730_v23 = vpop.f32.mrf.mxu1 }
  0xba   : > { %v1734_v26 = vpop.f32.mrf.mxu3 }
  0xbb   : > { %699 = vmatmul.f32.gmra.mxu1 %v223_v24  ;;  %821 = vmatmul.f32.gmra.mxu2 %v224_v25  ;;  %v258_v24 = vld [vmem:[%s1462_s22 + $0x288] sm:$0xff]  ;;  %v259_v25 = vld [vmem:[%s1462_s22 + $0x290] sm:$0xff] }
  0xbc   : > { %v1736_v27 = vpop.f32.mrf.mxu0 }
  0xbe   : > { %v1740_v30 = vpop.f32.mrf.mxu2 }
  0xbf   : > { %946 = vmatmul.f32.gmra.mxu3 %v230_v28  ;;  %1286 = vmatmul.msk.f32.gmra.mxu0 %vm428_vm0, %v226_v29  ;;  %v1826_v28 = vld [vmem:[%s2073_s2] ss:$0 sm:$0xff] }
  0xc0   : > { %v1743_v31 = vpop.f32.mrf.mxu1 }
  0xc2   : > { %v1747_v34 = vpop.f32.mrf.mxu3 }
  0xc3   : > { %702 = vmatmul.f32.gmra.mxu1 %v228_v32  ;;  %824 = vmatmul.f32.gmra.mxu2 %v229_v33  ;;  %v552_v32 = vadd.f32 %v1826_v28, %v1710_v11  ;;  %v555_v11 = vadd.f32 %v1826_v28, %v1723_v19 }
  0xc4   : > { %v1749_v35 = vpop.f32.mrf.mxu0 }
  0xc6   : > { %v1753_v38 = vpop.f32.mrf.mxu2 }
  0xc7   : > { %949 = vmatmul.f32.gmra.mxu3 %v235_v36  ;;  %1287 = vmatmul.msk.f32.gmra.mxu0 %vm428_vm0, %v231_v37  ;;  %v265_v36 = vld [vmem:[%s1462_s22 + $0x2c0] sm:$0xff] }
  0xc8   : > { %v1756_v39 = vpop.f32.mrf.mxu1  ;;  %v261_v37 = vld [vmem:[%s1462_s22 + $0x2a0] sm:$0xff] }
  0xca   : > { %v1760_v42 = vpop.f32.mrf.mxu3 }
  0xcb   : > { %705 = vmatmul.f32.gmra.mxu1 %v233_v40  ;;  %827 = vmatmul.f32.gmra.mxu2 %v234_v41 }
  0xcc   : > { %v1762_v43 = vpop.f32.mrf.mxu0 }
  0xce   : > { %v1766_v46 = vpop.f32.mrf.mxu2 }
  0xcf   : > { %952 = vmatmul.f32.gmra.mxu3 %v240_v44  ;;  %1288 = vmatmul.msk.f32.gmra.mxu0 %vm428_vm0, %v236_v45 }
  0xd0   : > { %v1769_v47 = vpop.f32.mrf.mxu1 }
  0xd2   : > { %v1773_v50 = vpop.f32.mrf.mxu3 }
  0xd3   : > { %708 = vmatmul.f32.gmra.mxu1 %v238_v48  ;;  %830 = vmatmul.f32.gmra.mxu2 %v239_v49  ;;  %v263_v48 = vld [vmem:[%s1462_s22 + $0x2b0] sm:$0xff]  ;;  %v264_v49 = vld [vmem:[%s1462_s22 + $0x2b8] sm:$0xff] }
  0xd4   : > { %v1775_v51 = vpop.f32.mrf.mxu0 }
  0xd6   : > { %v1779_v54 = vpop.f32.mrf.mxu2 }
  0xd7   : > { %955 = vmatmul.f32.gmra.mxu3 %v245_v52  ;;  %1289 = vmatmul.msk.f32.gmra.mxu0 %vm428_vm0, %v241_v53 }
  0xd8   : > { %v1782_v55 = vpop.f32.mrf.mxu1 }
  0xda   : > { %v1786_v58 = vpop.f32.mrf.mxu3 }
  0xdb   : > { %711 = vmatmul.f32.gmra.mxu1 %v243_v56  ;;  %833 = vmatmul.f32.gmra.mxu2 %v244_v57 }
  0xdc   : > { %v1788_v59 = vpop.f32.mrf.mxu0 }
  0xde   : > { %v1792_v62 = vpop.f32.mrf.mxu2 }
  0xdf   : > { %958 = vmatmul.f32.gmra.mxu3 %v250_v60  ;;  %1290 = vmatmul.msk.f32.gmra.mxu0 %vm428_vm0, %v246_v61  ;;  %v270_v60 = vld [vmem:[%s1462_s22 + $0x2e8] sm:$0xff] }
  0xe0   : > { %v1795_v63 = vpop.f32.mrf.mxu1  ;;  %v266_v61 = vld [vmem:[%s1462_s22 + $0x2c8] sm:$0xff] }
  0xe2   : > { %v1799_v2 = vpop.f32.mrf.mxu3 }
  0xe3   : > { %714 = vmatmul.f32.gmra.mxu1 %v248_v0  ;;  %836 = vmatmul.f32.gmra.mxu2 %v249_v1 }
  0xe4   : > { %v1801_v3 = vpop.f32.mrf.mxu0 }
  0xe6   : > { %v1805_v6 = vpop.f32.mrf.mxu2 }
  0xe7   : > { %961 = vmatmul.f32.gmra.mxu3 %v255_v4  ;;  %1291 = vmatmul.msk.f32.gmra.mxu0 %vm428_vm0, %v251_v5 }
  0xe8   : > { %v1808_v7 = vpop.f32.mrf.mxu1 }
  0xea   : > { %v1812_v12 = vpop.f32.mrf.mxu3 }
  0xeb   : > { %717 = vmatmul.f32.gmra.mxu1 %v253_v9  ;;  %839 = vmatmul.f32.gmra.mxu2 %v254_v10  ;;  %v268_v9 = vld [vmem:[%s1462_s22 + $0x2d8] sm:$0xff]  ;;  %v269_v10 = vld [vmem:[%s1462_s22 + $0x2e0] sm:$0xff] }
  0xec   : > { %v1814_v13 = vpop.f32.mrf.mxu0 }
  0xee   : > { %v1818_v20 = vpop.f32.mrf.mxu2 }
  0xef   : > { %964 = vmatmul.f32.gmra.mxu3 %v260_v16  ;;  %1292 = vmatmul.msk.f32.gmra.mxu0 %vm428_vm0, %v256_v17 }
  0xf0   : > { %v673_v21 = vpop.f32.mrf.mxu1 }
  0xf1   : > { %v674_v40 = vadd.f32 %v673_v21, %v552_v32  ;;  %v558_v21 = vadd.f32 %v1826_v28, %v1736_v27  ;;  %v271_v32 = vld [vmem:[%s1462_s22 + $0x2f0] sm:$0xff] }
  0xf2   : > { %v917_v29 = vpop.f32.mrf.mxu3 }
  0xf3   : > { %720 = vmatmul.f32.gmra.mxu1 %v258_v24  ;;  %842 = vmatmul.f32.gmra.mxu2 %v259_v25 }
  0xf4   : > { %v1039_v33 = vpop.f32.mrf.mxu0 }
  0xf6   : > { %v795_v41 = vpop.f32.mrf.mxu2 }
  0xf7   : > { %v796_v44 = vadd.f32 %v795_v41, %v674_v40  ;;  %967 = vmatmul.f32.gmra.mxu3 %v265_v36  ;;  %1293 = vmatmul.msk.f32.gmra.mxu0 %vm428_vm0, %v261_v37  ;;  %v273_v41 = vld [vmem:[%s1462_s22 + $0x300] sm:$0xff] }
  0xf8   : > { %v676_v45 = vpop.f32.mrf.mxu1 }
  0xf9   : > { %v918_v52 = vadd.f32 %v917_v29, %v796_v44  ;;  %v677_v0 = vadd.f32 %v676_v45, %v555_v11  ;;  %v275_v29 = vld [vmem:[%s1462_s22 + $0x310] sm:$0xff]  ;;  %v274_v44 = vld [vmem:[%s1462_s22 + $0x308] sm:$0xff]  ;;  %v280_v11 = vld [vmem:[%s1462_s22 + $0x338] sm:$0xff] }
  0xfa   : > { %v920_v53 = vpop.f32.mrf.mxu3 }
  0xfb   : > { %v1040_v56 = vadd.f32 %v1039_v33, %v918_v52  ;;  %723 = vmatmul.f32.gmra.mxu1 %v263_v48  ;;  %845 = vmatmul.f32.gmra.mxu2 %v264_v49  ;;  %v561_v49 = vadd.f32 %v1826_v28, %v1749_v35 }
  0xfc   : > { %v1042_v57 = vpop.f32.mrf.mxu0 }
  0xfd   : > { %v1144_v1 = vmax.f32 %v1040_v56, 0.0  ;;  %v276_v56 = vld [vmem:[%s1462_s22 + $0x318] sm:$0xff] }
  0xfe   : > { %v798_v4 = vpop.f32.mrf.mxu2 }
  0xff   : > { %1179 = vst.msk [vmem:[%s1841_s21] sm:$0xff] %vm428_vm0, %v1144_v1  ;;  %v799_v19 = vadd.f32 %v798_v4, %v677_v0  ;;  %970 = vmatmul.f32.gmra.mxu3 %v270_v60  ;;  %1294 = vmatmul.msk.f32.gmra.mxu0 %vm428_vm0, %v266_v61  ;;  %v278_v1 = vld [vmem:[%s1462_s22 + $0x328] sm:$0xff]  ;;  %v279_v4 = vld [vmem:[%s1462_s22 + $0x330] sm:$0xff] }
 0x100   : > { %v679_v5 = vpop.f32.mrf.mxu1 }
 0x101   : > { %v921_v16 = vadd.f32 %v920_v53, %v799_v19  ;;  %v680_v33 = vadd.f32 %v679_v5, %v558_v21  ;;  %v281_v21 = vld [vmem:[%s1462_s22 + $0x340] sm:$0xff] }
 0x102   : > { %v923_v17 = vpop.f32.mrf.mxu3 }
 0x103   : > { %v1043_v24 = vadd.f32 %v1042_v57, %v921_v16  ;;  %726 = vmatmul.f32.gmra.mxu1 %v268_v9  ;;  %848 = vmatmul.f32.gmra.mxu2 %v269_v10  ;;  %v564_v9 = vadd.f32 %v1826_v28, %v1762_v43 }
 0x104   : > { %v1045_v25 = vpop.f32.mrf.mxu0 }
 0x105   : > { %v1145_v36 = vmax.f32 %v1043_v24, 0.0 }
 0x106   : > { %v801_v37 = vpop.f32.mrf.mxu2 }
 0x107   : > { %1180 = vst.msk [vmem:[%s1841_s21 + $0x8] sm:$0xff] %vm428_vm0, %v1145_v36  ;;  %v802_v40 = vadd.f32 %v801_v37, %v680_v33  ;;  %973 = vmatmul.f32.gmra.mxu3 %v275_v29  ;;  %1295 = vmatmul.msk.f32.gmra.mxu0 %vm428_vm0, %v271_v32  ;;  %v283_v33 = vld [vmem:[%s1462_s22 + $0x350] sm:$0xff]  ;;  %v284_v36 = vld [vmem:[%s1462_s22 + $0x358] sm:$0xff] }
 0x108   : > { %v682_v27 = vpop.f32.mrf.mxu1 }
 0x109   : > { %v924_v45 = vadd.f32 %v923_v17, %v802_v40  ;;  %v683_v57 = vadd.f32 %v682_v27, %v561_v49  ;;  %v285_v17 = vld [vmem:[%s1462_s22 + $0x360] sm:$0xff]  ;;  %v567_v27 = vadd.f32 %v1826_v28, %v1775_v51 }
 0x10a   : > { %v926_v48 = vpop.f32.mrf.mxu3 }
 0x10b   : > { %v1046_v52 = vadd.f32 %v1045_v25, %v924_v45  ;;  %729 = vmatmul.f32.gmra.mxu1 %v273_v41  ;;  %851 = vmatmul.f32.gmra.mxu2 %v274_v44  ;;  %v290_v45 = vld [vmem:[%s1462_s22 + $0x388] sm:$0xff] }
 0x10c   : > { %v1048_v53 = vpop.f32.mrf.mxu0 }
 0x10d   : > { %v1146_v60 = vmax.f32 %v1046_v52, 0.0 }
 0x10e   : > { %v804_v61 = vpop.f32.mrf.mxu2 }
 0x10f   : > { %1181 = vst.msk [vmem:[%s1841_s21 + $0x10] sm:$0xff] %vm428_vm0, %v1146_v60  ;;  %v805_v0 = vadd.f32 %v804_v61, %v683_v57  ;;  %976 = vmatmul.f32.gmra.mxu3 %v280_v11  ;;  %1296 = vmatmul.msk.f32.gmra.mxu0 %vm428_vm0, %v276_v56  ;;  %v288_v56 = vld [vmem:[%s1462_s22 + $0x378] sm:$0xff]  ;;  %v289_v57 = vld [vmem:[%s1462_s22 + $0x380] sm:$0xff] }
 0x110   : > { %v685_v35 = vpop.f32.mrf.mxu1 }
 0x111   : > { %v927_v19 = vadd.f32 %v926_v48, %v805_v0  ;;  %v686_v24 = vadd.f32 %v685_v35, %v564_v9  ;;  %v286_v48 = vld [vmem:[%s1462_s22 + $0x368] sm:$0xff]  ;;  %v570_v0 = vadd.f32 %v1826_v28, %v1788_v59 }
 0x112   : > { %v929_v5 = vpop.f32.mrf.mxu3 }
 0x113   : > { %v1049_v10 = vadd.f32 %v1048_v53, %v927_v19  ;;  %732 = vmatmul.f32.gmra.mxu1 %v278_v1  ;;  %854 = vmatmul.f32.gmra.mxu2 %v279_v4  ;;  %v295_v4 = vld [vmem:[%s1462_s22 + $0x3b0] sm:$0xff] }
 0x114   : > { %v1051_v16 = vpop.f32.mrf.mxu0  ;;  %v291_v19 = vld [vmem:[%s1462_s22 + $0x390] sm:$0xff] }
 0x115   : > { %v1147_v25 = vmax.f32 %v1049_v10, 0.0 }
 0x116   : > { %v807_v29 = vpop.f32.mrf.mxu2 }
 0x117   : > { %1182 = vst.msk [vmem:[%s1841_s21 + $0x18] sm:$0xff] %vm428_vm0, %v1147_v25  ;;  %v808_v32 = vadd.f32 %v807_v29, %v686_v24  ;;  %979 = vmatmul.f32.gmra.mxu3 %v285_v17  ;;  %1297 = vmatmul.msk.f32.gmra.mxu0 %vm428_vm0, %v281_v21  ;;  %v293_v17 = vld [vmem:[%s1462_s22 + $0x3a0] sm:$0xff]  ;;  %v294_v21 = vld [vmem:[%s1462_s22 + $0x3a8] sm:$0xff]  ;;  %v573_v29 = vadd.f32 %v1826_v28, %v1801_v3 }
 0x118   : > { %v688_v43 = vpop.f32.mrf.mxu1 }
 0x119   : > { %v930_v37 = vadd.f32 %v929_v5, %v808_v32  ;;  %v689_v49 = vadd.f32 %v688_v43, %v567_v27 }
 0x11a   : > { %v932_v40 = vpop.f32.mrf.mxu3 }
 0x11b   : > { %v1052_v41 = vadd.f32 %v1051_v16, %v930_v37  ;;  %735 = vmatmul.f32.gmra.mxu1 %v283_v33  ;;  %857 = vmatmul.f32.gmra.mxu2 %v284_v36  ;;  %v300_v33 = vld [vmem:[%s1462_s22 + $0x3d8] sm:$0xff] }
 0x11c   : > { %v1054_v44 = vpop.f32.mrf.mxu0  ;;  %v296_v36 = vld [vmem:[%s1462_s22 + $0x3b8] sm:$0xff] }
 0x11d   : > { %v1148_v52 = vmax.f32 %v1052_v41, 0.0 }
 0x11e   : > { %v810_v53 = vpop.f32.mrf.mxu2 }
 0x11f   : > { %1183 = vst.msk [vmem:[%s1841_s21 + $0x20] sm:$0xff] %vm428_vm0, %v1148_v52  ;;  %v811_v11 = vadd.f32 %v810_v53, %v689_v49  ;;  %982 = vmatmul.f32.gmra.mxu3 %v290_v45  ;;  %1298 = vmatmul.msk.f32.gmra.mxu0 %vm428_vm0, %v286_v48  ;;  %v299_v45 = vld [vmem:[%s1462_s22 + $0x3d0] sm:$0xff]  ;;  %v576_v52 = vadd.f32 %v1826_v28, %v1814_v13 }
 0x120   : > { %v691_v51 = vpop.f32.mrf.mxu1 }
 0x121   : > { %v933_v60 = vadd.f32 %v932_v40, %v811_v11  ;;  %v692_v5 = vadd.f32 %v691_v51, %v570_v0  ;;  %v305_v51 = vld [vmem:[%s1462_s22 + $0x400] sm:$0xff] }
 0x122   : > { %v935_v61 = vpop.f32.mrf.mxu3 }
 0x123   : > { %v1055_v35 = vadd.f32 %v1054_v44, %v933_v60  ;;  %738 = vmatmul.f32.gmra.mxu1 %v288_v56  ;;  %860 = vmatmul.f32.gmra.mxu2 %v289_v57  ;;  %v298_v44 = vld [vmem:[%s1462_s22 + $0x3c8] sm:$0xff]  ;;  %v301_v56 = vld [vmem:[%s1462_s22 + $0x3e0] sm:$0xff] }
 0x124   : > { %v1057_v1 = vpop.f32.mrf.mxu0 }
 0x125   : > { %v1149_v9 = vmax.f32 %v1055_v35, 0.0  ;;  %v303_v35 = vld [vmem:[%s1462_s22 + $0x3f0] sm:$0xff] }
 0x126   : > { %v813_v10 = vpop.f32.mrf.mxu2 }
 0x127   : > { %1184 = vst.msk [vmem:[%s1841_s21 + $0x28] sm:$0xff] %vm428_vm0, %v1149_v9  ;;  %v814_v16 = vadd.f32 %v813_v10, %v692_v5  ;;  %985 = vmatmul.f32.gmra.mxu3 %v295_v4  ;;  %1299 = vmatmul.msk.f32.gmra.mxu0 %vm428_vm0, %v291_v19  ;;  %v579_v5 = vadd.f32 %v1826_v28, %v1706_v8 }
 0x128   : > { %v694_v59 = vpop.f32.mrf.mxu1 }
 0x129   : > { %v936_v24 = vadd.f32 %v935_v61, %v814_v16  ;;  %v695_v37 = vadd.f32 %v694_v59, %v573_v29  ;;  %v310_v16 = vld [vmem:[%s1462_s22 + $0x428] sm:$0xff]  ;;  %v308_v29 = vld [vmem:[%s1462_s22 + $0x418] sm:$0xff] }
 0x12a   : > { %v938_v25 = vpop.f32.mrf.mxu3  ;;  %v306_v59 = vld [vmem:[%s1462_s22 + $0x408] sm:$0xff] }
 0x12b   : > { %v1058_v32 = vadd.f32 %v1057_v1, %v936_v24  ;;  %741 = vmatmul.f32.gmra.mxu1 %v293_v17  ;;  %863 = vmatmul.f32.gmra.mxu2 %v294_v21  ;;  %v304_v1 = vld [vmem:[%s1462_s22 + $0x3f8] sm:$0xff] }
 0x12c   : > { %v1060_v43 = vpop.f32.mrf.mxu0 }
 0x12d   : > { %v1150_v40 = vmax.f32 %v1058_v32, 0.0  ;;  %v309_v32 = vld [vmem:[%s1462_s22 + $0x420] sm:$0xff] }
 0x12e   : > { %v816_v27 = vpop.f32.mrf.mxu2 }
 0x12f   : > { %1185 = vst.msk [vmem:[%s1841_s21 + $0x30] sm:$0xff] %vm428_vm0, %v1150_v40  ;;  %v817_v41 = vadd.f32 %v816_v27, %v695_v37  ;;  %988 = vmatmul.f32.gmra.mxu3 %v300_v33  ;;  %1300 = vmatmul.msk.f32.gmra.mxu0 %vm428_vm0, %v296_v36  ;;  %v582_v36 = vadd.f32 %v1826_v28, %v1717_v15  ;;  %v315_v27 = vld [vmem:[%s1462_s22 + $0x450] sm:$0xff] }
 0x130   : > { %v697_v3 = vpop.f32.mrf.mxu1 }
 0x131   : > { %v939_v48 = vadd.f32 %v938_v25, %v817_v41  ;;  %v698_v57 = vadd.f32 %v697_v3, %v576_v52  ;;  %v311_v41 = vld [vmem:[%s1462_s22 + $0x430] sm:$0xff]  ;;  %v314_v52 = vld [vmem:[%s1462_s22 + $0x448] sm:$0xff] }
 0x132   : > { %v941_v49 = vpop.f32.mrf.mxu3 }
 0x133   : > { %v1061_v53 = vadd.f32 %v1060_v43, %v939_v48  ;;  %744 = vmatmul.f32.gmra.mxu1 %v298_v44  ;;  %866 = vmatmul.f32.gmra.mxu2 %v299_v45 }
 0x134   : > { %v1063_v11 = vpop.f32.mrf.mxu0 }
 0x135   : > { %v1151_v60 = vmax.f32 %v1061_v53, 0.0 }
 0x136   : > { %v819_v61 = vpop.f32.mrf.mxu2 }
 0x137   : > { %1186 = vst.msk [vmem:[%s1841_s21 + $0x38] sm:$0xff] %vm428_vm0, %v1151_v60  ;;  %v820_v0 = vadd.f32 %v819_v61, %v698_v57  ;;  %991 = vmatmul.f32.gmra.mxu3 %v305_v51  ;;  %1301 = vmatmul.msk.f32.gmra.mxu0 %vm428_vm0, %v301_v56  ;;  %v585_v51 = vadd.f32 %v1826_v28, %v1730_v23  ;;  %v320_v60 = vld [vmem:[%s1462_s22 + $0x478] sm:$0xff] }
 0x138   : > { %v700_v13 = vpop.f32.mrf.mxu1  ;;  %v316_v61 = vld [vmem:[%s1462_s22 + $0x458] sm:$0xff] }
 0x139   : > { %v942_v4 = vadd.f32 %v941_v49, %v820_v0  ;;  %v701_v17 = vadd.f32 %v700_v13, %v579_v5  ;;  %v313_v49 = vld [vmem:[%s1462_s22 + $0x440] sm:$0xff] }
 0x13a   : > { %v944_v19 = vpop.f32.mrf.mxu3 }
 0x13b   : > { %v1064_v9 = vadd.f32 %v1063_v11, %v942_v4  ;;  %747 = vmatmul.f32.gmra.mxu1 %v303_v35  ;;  %869 = vmatmul.f32.gmra.mxu2 %v304_v1  ;;  %v318_v4 = vld [vmem:[%s1462_s22 + $0x468] sm:$0xff] }
 0x13c   : > { %v1066_v10 = vpop.f32.mrf.mxu0 }
 0x13d   : > { %v1152_v21 = vmax.f32 %v1064_v9, 0.0 }
 0x13e   : > { %v822_v24 = vpop.f32.mrf.mxu2 }
 0x13f   : > { %1187 = vst.msk [vmem:[%s1841_s21 + $0x40] sm:$0xff] %vm428_vm0, %v1152_v21  ;;  %v823_v25 = vadd.f32 %v822_v24, %v701_v17  ;;  %994 = vmatmul.f32.gmra.mxu3 %v310_v16  ;;  %1302 = vmatmul.msk.f32.gmra.mxu0 %vm428_vm0, %v306_v59  ;;  %v325_v17 = vld [vmem:[%s1462_s22 + $0x4a0] sm:$0xff] }
 0x140   : > { %v703_v8 = vpop.f32.mrf.mxu1  ;;  %v321_v21 = vld [vmem:[%s1462_s22 + $0x480] sm:$0xff] }
 0x141   : > { %v945_v43 = vadd.f32 %v944_v19, %v823_v25  ;;  %v704_v3 = vadd.f32 %v703_v8, %v582_v36  ;;  %v319_v19 = vld [vmem:[%s1462_s22 + $0x470] sm:$0xff] }
 0x142   : > { %v947_v33 = vpop.f32.mrf.mxu3 }
 0x143   : > { %v1067_v37 = vadd.f32 %v1066_v10, %v945_v43  ;;  %750 = vmatmul.f32.gmra.mxu1 %v308_v29  ;;  %872 = vmatmul.f32.gmra.mxu2 %v309_v32  ;;  %v588_v10 = vadd.f32 %v1826_v28, %v1743_v31  ;;  %v323_v32 = vld [vmem:[%s1462_s22 + $0x490] sm:$0xff]  ;;  %v324_v43 = vld [vmem:[%s1462_s22 + $0x498] sm:$0xff] }
 0x144   : > { %v1069_v40 = vpop.f32.mrf.mxu0 }
 0x145   : > { %v1153_v44 = vmax.f32 %v1067_v37, 0.0  ;;  %v591_v37 = vadd.f32 %v1826_v28, %v1756_v39 }
 0x146   : > { %v825_v45 = vpop.f32.mrf.mxu2 }
 0x147   : > { %1188 = vst.msk [vmem:[%s1841_s21 + $0x48] sm:$0xff] %vm428_vm0, %v1153_v44  ;;  %v826_v48 = vadd.f32 %v825_v45, %v704_v3  ;;  %997 = vmatmul.f32.gmra.mxu3 %v315_v27  ;;  %1303 = vmatmul.msk.f32.gmra.mxu0 %vm428_vm0, %v311_v41  ;;  %v330_v41 = vld [vmem:[%s1462_s22 + $0x4c8] sm:$0xff] }
 0x148   : > { %v706_v15 = vpop.f32.mrf.mxu1  ;;  %v326_v3 = vld [vmem:[%s1462_s22 + $0x4a8] sm:$0xff] }
 0x149   : > { %v948_v53 = vadd.f32 %v947_v33, %v826_v48  ;;  %v707_v0 = vadd.f32 %v706_v15, %v585_v51  ;;  %v594_v51 = vadd.f32 %v1826_v28, %v1769_v47 }
 0x14a   : > { %v950_v11 = vpop.f32.mrf.mxu3 }
 0x14b   : > { %v1070_v56 = vadd.f32 %v1069_v40, %v948_v53  ;;  %753 = vmatmul.f32.gmra.mxu1 %v313_v49  ;;  %875 = vmatmul.f32.gmra.mxu2 %v314_v52  ;;  %v328_v49 = vld [vmem:[%s1462_s22 + $0x4b8] sm:$0xff]  ;;  %v329_v52 = vld [vmem:[%s1462_s22 + $0x4c0] sm:$0xff] }
 0x14c   : > { %v1072_v57 = vpop.f32.mrf.mxu0 }
 0x14d   : > { %v1154_v13 = vmax.f32 %v1070_v56, 0.0 }
 0x14e   : > { %v828_v35 = vpop.f32.mrf.mxu2 }
 0x14f   : > { %1189 = vst.msk [vmem:[%s1841_s21 + $0x50] sm:$0xff] %vm428_vm0, %v1154_v13  ;;  %v829_v1 = vadd.f32 %v828_v35, %v707_v0  ;;  %1000 = vmatmul.f32.gmra.mxu3 %v320_v60  ;;  %1304 = vmatmul.msk.f32.gmra.mxu0 %vm428_vm0, %v316_v61  ;;  %v335_v60 = vld [vmem:[%s1462_s22 + $0x4f0] sm:$0xff] }
 0x150   : > { %v709_v23 = vpop.f32.mrf.mxu1  ;;  %v331_v61 = vld [vmem:[%s1462_s22 + $0x4d0] sm:$0xff] }
 0x151   : > { %v951_v5 = vadd.f32 %v950_v11, %v829_v1  ;;  %v710_v24 = vadd.f32 %v709_v23, %v588_v10  ;;  %v333_v23 = vld [vmem:[%s1462_s22 + $0x4e0] sm:$0xff] }
 0x152   : > { %v953_v9 = vpop.f32.mrf.mxu3 }
 0x153   : > { %v1073_v16 = vadd.f32 %v1072_v57, %v951_v5  ;;  %756 = vmatmul.f32.gmra.mxu1 %v318_v4  ;;  %878 = vmatmul.f32.gmra.mxu2 %v319_v19  ;;  %v334_v4 = vld [vmem:[%s1462_s22 + $0x4e8] sm:$0xff] }
 0x154   : > { %v1075_v59 = vpop.f32.mrf.mxu0 }
 0x155   : > { %v1155_v25 = vmax.f32 %v1073_v16, 0.0 }
 0x156   : > { %v831_v8 = vpop.f32.mrf.mxu2 }
 0x157   : > { %1190 = vst.msk [vmem:[%s1841_s21 + $0x58] sm:$0xff] %vm428_vm0, %v1155_v25  ;;  %v832_v29 = vadd.f32 %v831_v8, %v710_v24  ;;  %1003 = vmatmul.f32.gmra.mxu3 %v325_v17  ;;  %1305 = vmatmul.msk.f32.gmra.mxu0 %vm428_vm0, %v321_v21  ;;  %v336_v17 = vld [vmem:[%s1462_s22 + $0x4f8] sm:$0xff] }
 0x158   : > { %v712_v31 = vpop.f32.mrf.mxu1 }
 0x159   : > { %v954_v33 = vadd.f32 %v953_v9, %v832_v29  ;;  %v713_v44 = vadd.f32 %v712_v31, %v591_v37  ;;  %v597_v9 = vadd.f32 %v1826_v28, %v1782_v55  ;;  %v338_v29 = vld [vmem:[%s1462_s22 + $0x508] sm:$0xff]  ;;  %v339_v31 = vld [vmem:[%s1462_s22 + $0x510] sm:$0xff] }
 0x15a   : > { %v956_v36 = vpop.f32.mrf.mxu3 }
 0x15b   : > { %v1076_v40 = vadd.f32 %v1075_v59, %v954_v33  ;;  %759 = vmatmul.f32.gmra.mxu1 %v323_v32  ;;  %881 = vmatmul.f32.gmra.mxu2 %v324_v43  ;;  %v340_v59 = vld [vmem:[%s1462_s22 + $0x518] sm:$0xff]  ;;  %v600_v33 = vadd.f32 %v1826_v28, %v1795_v63 }
 0x15c   : > { %v1078_v27 = vpop.f32.mrf.mxu0 }
 0x15d   : > { %v1156_v45 = vmax.f32 %v1076_v40, 0.0  ;;  %v345_v40 = vld [vmem:[%s1462_s22 + $0x540] sm:$0xff] }
 0x15e   : > { %v834_v48 = vpop.f32.mrf.mxu2 }
 0x15f   : > { %1191 = vst.msk [vmem:[%s1841_s21 + $0x60] sm:$0xff] %vm428_vm0, %v1156_v45  ;;  %v835_v15 = vadd.f32 %v834_v48, %v713_v44  ;;  %1006 = vmatmul.f32.gmra.mxu3 %v330_v41  ;;  %1306 = vmatmul.msk.f32.gmra.mxu0 %vm428_vm0, %v326_v3  ;;  %v343_v48 = vld [vmem:[%s1462_s22 + $0x530] sm:$0xff] }
 0x160   : > { %v715_v39 = vpop.f32.mrf.mxu1 }
 0x161   : > { %v957_v53 = vadd.f32 %v956_v36, %v835_v15  ;;  %v716_v0 = vadd.f32 %v715_v39, %v594_v51  ;;  %v344_v15 = vld [vmem:[%s1462_s22 + $0x538] sm:$0xff]  ;;  %v350_v51 = vld [vmem:[%s1462_s22 + $0x568] sm:$0xff] }
 0x162   : > { %v959_v11 = vpop.f32.mrf.mxu3 }
 0x163   : > { %v1079_v56 = vadd.f32 %v1078_v27, %v957_v53  ;;  %762 = vmatmul.f32.gmra.mxu1 %v328_v49  ;;  %884 = vmatmul.f32.gmra.mxu2 %v329_v52  ;;  %v341_v27 = vld [vmem:[%s1462_s22 + $0x520] sm:$0xff]  ;;  %v603_v52 = vadd.f32 %v1826_v28, %v1808_v7  ;;  %v348_v7 = vld [vmem:[%s1462_s22 + $0x558] sm:$0xff] }
 0x164   : > { %v1081_v57 = vpop.f32.mrf.mxu0 }
 0x165   : > { %v1157_v13 = vmax.f32 %v1079_v56, 0.0  ;;  %v346_v56 = vld [vmem:[%s1462_s22 + $0x548] sm:$0xff] }
 0x166   : > { %v837_v35 = vpop.f32.mrf.mxu2 }
 0x167   : > { %1192 = vst.msk [vmem:[%s1841_s21 + $0x68] sm:$0xff] %vm428_vm0, %v1157_v13  ;;  %v838_v1 = vadd.f32 %v837_v35, %v716_v0  ;;  %1009 = vmatmul.f32.gmra.mxu3 %v335_v60  ;;  %1307 = vmatmul.msk.f32.gmra.mxu0 %vm428_vm0, %v331_v61  ;;  %v349_v35 = vld [vmem:[%s1462_s22 + $0x560] sm:$0xff] }
 0x168   : > { %v718_v47 = vpop.f32.mrf.mxu1 }
 0x169   : > { %v960_v19 = vadd.f32 %v959_v11, %v838_v1  ;;  %v719_v21 = vadd.f32 %v718_v47, %v597_v9 }
 0x16a   : > { %v962_v5 = vpop.f32.mrf.mxu3 }
 0x16b   : > { %v1082_v10 = vadd.f32 %v1081_v57, %v960_v19  ;;  %765 = vmatmul.f32.gmra.mxu1 %v333_v23  ;;  %887 = vmatmul.f32.gmra.mxu2 %v334_v4  ;;  %v606_v23 = vadd.f32 %v1826_v28, %v1714_v14  ;;  %v609_v14 = vadd.f32 %v1826_v28, %v1727_v22 }
 0x16c   : > { %v1084_v16 = vpop.f32.mrf.mxu0 }
 0x16d   : > { %v1158_v24 = vmax.f32 %v1082_v10, 0.0 }
 0x16e   : > { %v840_v25 = vpop.f32.mrf.mxu2 }
 0x16f   : > { %1193 = vst.msk [vmem:[%s1841_s21 + $0x70] sm:$0xff] %vm428_vm0, %v1158_v24  ;;  %v841_v8 = vadd.f32 %v840_v25, %v719_v21  ;;  %1012 = vmatmul.f32.gmra.mxu3 %v340_v59  ;;  %1308 = vmatmul.msk.f32.gmra.mxu0 %vm428_vm0, %v336_v17 }
 0x170   : > { %v721_v55 = vpop.f32.mrf.mxu1 }
 0x171   : > { %v963_v32 = vadd.f32 %v962_v5, %v841_v8  ;;  %v722_v41 = vadd.f32 %v721_v55, %v600_v33  ;;  %v351_v5 = vld [vmem:[%s1462_s22 + $0x570] sm:$0xff] }
 0x172   : > { %v965_v43 = vpop.f32.mrf.mxu3 }
 0x173   : > { %v1085_v36 = vadd.f32 %v1084_v16, %v963_v32  ;;  %768 = vmatmul.f32.gmra.mxu1 %v338_v29  ;;  %890 = vmatmul.f32.gmra.mxu2 %v339_v31 }
 0x174   : > { %v1087_v37 = vpop.f32.mrf.mxu0 }
 0x175   : > { %v1159_v3 = vmax.f32 %v1085_v36, 0.0 }
 0x176   : > { %v843_v44 = vpop.f32.mrf.mxu2 }
 0x177   : > { %1194 = vst.msk [vmem:[%s1841_s21 + $0x78] sm:$0xff] %vm428_vm0, %v1159_v3  ;;  %v844_v45 = vadd.f32 %v843_v44, %v722_v41  ;;  %1015 = vmatmul.f32.gmra.mxu3 %v345_v40  ;;  %1309 = vmatmul.msk.f32.gmra.mxu0 %vm428_vm0, %v341_v27 }
 0x178   : > { %v724_v63 = vpop.f32.mrf.mxu1 }
 0x179   : > { %v966_v39 = vadd.f32 %v965_v43, %v844_v45  ;;  %v725_v57 = vadd.f32 %v724_v63, %v603_v52 }
 0x17a   : > { %v968_v49 = vpop.f32.mrf.mxu3 }
 0x17b   : > { %v1088_v53 = vadd.f32 %v1087_v37, %v966_v39  ;;  %771 = vmatmul.f32.gmra.mxu1 %v343_v48  ;;  %893 = vmatmul.f32.gmra.mxu2 %v344_v15  ;;  %v612_v37 = vadd.f32 %v1826_v28, %v1740_v30  ;;  %v615_v15 = vadd.f32 %v1826_v28, %v1753_v38 }
 0x17c   : > { %v1090_v11 = vpop.f32.mrf.mxu0 }
 0x17d   : > { %v1160_v60 = vmax.f32 %v1088_v53, 0.0 }
 0x17e   : > { %v846_v61 = vpop.f32.mrf.mxu2 }
 0x17f   : > { %1195 = vst.msk [vmem:[%s1841_s21 + $0x80] sm:$0xff] %vm428_vm0, %v1160_v60  ;;  %v847_v0 = vadd.f32 %v846_v61, %v725_v57  ;;  %1018 = vmatmul.f32.gmra.mxu3 %v350_v51  ;;  %1310 = vmatmul.msk.f32.gmra.mxu0 %vm428_vm0, %v346_v56  ;;  %v618_v60 = vadd.f32 %v1826_v28, %v1766_v46 }
 0x180   : > { %v727_v13 = vpop.f32.mrf.mxu1 }
 0x181   : > { %v969_v1 = vadd.f32 %v968_v49, %v847_v0  ;;  %v728_v9 = vadd.f32 %v727_v13, %v606_v23 }
 0x182   : > { %v971_v47 = vpop.f32.mrf.mxu3 }
 0x183   : > { %v1091_v4 = vadd.f32 %v1090_v11, %v969_v1  ;;  %774 = vmatmul.f32.gmra.mxu1 %v348_v7  ;;  %896 = vmatmul.f32.gmra.mxu2 %v349_v35 }
 0x184   : > { %v1093_v19 = vpop.f32.mrf.mxu0 }
 0x185   : > { %v1161_v10 = vmax.f32 %v1091_v4, 0.0  ;;  %v621_v4 = vadd.f32 %v1826_v28, %v1779_v54 }
 0x186   : > { %v849_v16 = vpop.f32.mrf.mxu2 }
 0x187   : > { %1196 = vst.msk [vmem:[%s1841_s21 + $0x88] sm:$0xff] %vm428_vm0, %v1161_v10  ;;  %v850_v59 = vadd.f32 %v849_v16, %v728_v9  ;;  %1311 = vmatmul.msk.f32.gmra.mxu0 %vm428_vm0, %v351_v5 }
 0x188   : > { %v730_v17 = vpop.f32.mrf.mxu1 }
 0x189   : > { %v972_v21 = vadd.f32 %v971_v47, %v850_v59  ;;  %v731_v55 = vadd.f32 %v730_v17, %v609_v14 }
 0x18a   : > { %v974_v24 = vpop.f32.mrf.mxu3 }
 0x18b   : > { %v1094_v25 = vadd.f32 %v1093_v19, %v972_v21 }
 0x18c   : > { %v1096_v8 = vpop.f32.mrf.mxu0 }
 0x18d   : > { %v1162_v29 = vmax.f32 %v1094_v25, 0.0 }
 0x18e   : > { %v852_v31 = vpop.f32.mrf.mxu2 }
 0x18f   : > { %1197 = vst.msk [vmem:[%s1841_s21 + $0x90] sm:$0xff] %vm428_vm0, %v1162_v29  ;;  %v853_v32 = vadd.f32 %v852_v31, %v731_v55 }
 0x190   : > { %v733_v43 = vpop.f32.mrf.mxu1 }
 0x191   : > { %v975_v33 = vadd.f32 %v974_v24, %v853_v32  ;;  %v734_v41 = vadd.f32 %v733_v43, %v612_v37  ;;  %v624_v24 = vadd.f32 %v1826_v28, %v1792_v62 }
 0x192   : > { %v977_v36 = vpop.f32.mrf.mxu3 }
 0x193   : > { %v1097_v40 = vadd.f32 %v1096_v8, %v975_v33  ;;  %v627_v33 = vadd.f32 %v1826_v28, %v1805_v6 }
 0x194   : > { %v1099_v27 = vpop.f32.mrf.mxu0 }
 0x195   : > { %v1163_v22 = vmax.f32 %v1097_v40, 0.0 }
 0x196   : > { %v855_v3 = vpop.f32.mrf.mxu2 }
 0x197   : > { %1198 = vst.msk [vmem:[%s1841_s21 + $0x98] sm:$0xff] %vm428_vm0, %v1163_v22  ;;  %v856_v44 = vadd.f32 %v855_v3, %v734_v41 }
 0x198   : > { %v736_v45 = vpop.f32.mrf.mxu1 }
 0x199   : > { %v978_v63 = vadd.f32 %v977_v36, %v856_v44  ;;  %v737_v52 = vadd.f32 %v736_v45, %v615_v15  ;;  %v630_v45 = vadd.f32 %v1826_v28, %v1818_v20 }
 0x19a   : > { %v980_v48 = vpop.f32.mrf.mxu3 }
 0x19b   : > { %v1100_v39 = vadd.f32 %v1099_v27, %v978_v63 }
 0x19c   : > { %v1102_v49 = vpop.f32.mrf.mxu0 }
 0x19d   : > { %v1164_v30 = vmax.f32 %v1100_v39, 0.0 }
 0x19e   : > { %v858_v53 = vpop.f32.mrf.mxu2 }
 0x19f   : > { %1199 = vst.msk [vmem:[%s1841_s21 + $0xa0] sm:$0xff] %vm428_vm0, %v1164_v30  ;;  %v859_v11 = vadd.f32 %v858_v53, %v737_v52 }
 0x1a0   : > { %v739_v51 = vpop.f32.mrf.mxu1 }
 0x1a1   : > { %v981_v56 = vadd.f32 %v980_v48, %v859_v11  ;;  %v740_v13 = vadd.f32 %v739_v51, %v618_v60  ;;  %v633_v11 = vadd.f32 %v1826_v28, %v1721_v18 }
 0x1a2   : > { %v983_v57 = vpop.f32.mrf.mxu3 }
 0x1a3   : > { %v1103_v61 = vadd.f32 %v1102_v49, %v981_v56 }
 0x1a4   : > { %v1105_v0 = vpop.f32.mrf.mxu0 }
 0x1a5   : > { %v1165_v38 = vmax.f32 %v1103_v61, 0.0 }
 0x1a6   : > { %v861_v7 = vpop.f32.mrf.mxu2 }
 0x1a7   : > { %1200 = vst.msk [vmem:[%s1841_s21 + $0xa8] sm:$0xff] %vm428_vm0, %v1165_v38  ;;  %v862_v35 = vadd.f32 %v861_v7, %v740_v13  ;;  %v636_v7 = vadd.f32 %v1826_v28, %v1734_v26 }
 0x1a8   : > { %v742_v1 = vpop.f32.mrf.mxu1 }
 0x1a9   : > { %v984_v47 = vadd.f32 %v983_v57, %v862_v35  ;;  %v743_v9 = vadd.f32 %v742_v1, %v621_v4 }
 0x1aa   : > { %v986_v23 = vpop.f32.mrf.mxu3 }
 0x1ab   : > { %v1106_v19 = vadd.f32 %v1105_v0, %v984_v47 }
 0x1ac   : > { %v1108_v5 = vpop.f32.mrf.mxu0 }
 0x1ad   : > { %v1166_v46 = vmax.f32 %v1106_v19, 0.0 }
 0x1ae   : > { %v864_v10 = vpop.f32.mrf.mxu2 }
 0x1af   : > { %1201 = vst.msk [vmem:[%s1841_s21 + $0xb0] sm:$0xff] %vm428_vm0, %v1166_v46  ;;  %v865_v16 = vadd.f32 %v864_v10, %v743_v9  ;;  %v639_v46 = vadd.f32 %v1826_v28, %v1747_v34 }
 0x1b0   : > { %v745_v59 = vpop.f32.mrf.mxu1 }
 0x1b1   : > { %v987_v17 = vadd.f32 %v986_v23, %v865_v16  ;;  %v746_v8 = vadd.f32 %v745_v59, %v624_v24 }
 0x1b2   : > { %v989_v21 = vpop.f32.mrf.mxu3 }
 0x1b3   : > { %v1109_v14 = vadd.f32 %v1108_v5, %v987_v17 }
 0x1b4   : > { %v1111_v25 = vpop.f32.mrf.mxu0 }
 0x1b5   : > { %v1167_v54 = vmax.f32 %v1109_v14, 0.0 }
 0x1b6   : > { %v867_v55 = vpop.f32.mrf.mxu2 }
 0x1b7   : > { %1202 = vst.msk [vmem:[%s1841_s21 + $0xb8] sm:$0xff] %vm428_vm0, %v1167_v54  ;;  %v868_v29 = vadd.f32 %v867_v55, %v746_v8  ;;  %v642_v8 = vadd.f32 %v1826_v28, %v1760_v42 }
 0x1b8   : > { %v748_v31 = vpop.f32.mrf.mxu1 }
 0x1b9   : > { %v990_v32 = vadd.f32 %v989_v21, %v868_v29  ;;  %v749_v40 = vadd.f32 %v748_v31, %v627_v33 }
 0x1ba   : > { %v992_v43 = vpop.f32.mrf.mxu3 }
 0x1bb   : > { %v1112_v36 = vadd.f32 %v1111_v25, %v990_v32 }
 0x1bc   : > { %v1114_v37 = vpop.f32.mrf.mxu0 }
 0x1bd   : > { %v1168_v62 = vmax.f32 %v1112_v36, 0.0 }
 0x1be   : > { %v870_v27 = vpop.f32.mrf.mxu2 }
 0x1bf   : > { %1203 = vst.msk [vmem:[%s1841_s21 + $0xc0] sm:$0xff] %vm428_vm0, %v1168_v62  ;;  %v871_v41 = vadd.f32 %v870_v27, %v749_v40 }
 0x1c0   : > { %v751_v22 = vpop.f32.mrf.mxu1 }
 0x1c1   : > { %v993_v3 = vadd.f32 %v992_v43, %v871_v41  ;;  %v752_v15 = vadd.f32 %v751_v22, %v630_v45 }
 0x1c2   : > { %v995_v44 = vpop.f32.mrf.mxu3 }
 0x1c3   : > { %v1115_v63 = vadd.f32 %v1114_v37, %v993_v3  ;;  %v645_v37 = vadd.f32 %v1826_v28, %v1773_v50 }
 0x1c4   : > { %v1117_v48 = vpop.f32.mrf.mxu0 }
 0x1c5   : > { %v1169_v6 = vmax.f32 %v1115_v63, 0.0  ;;  %v648_v63 = vadd.f32 %v1826_v28, %v1786_v58 }
 0x1c6   : > { %v873_v39 = vpop.f32.mrf.mxu2 }
 0x1c7   : > { %1204 = vst.msk [vmem:[%s1841_s21 + $0xc8] sm:$0xff] %vm428_vm0, %v1169_v6  ;;  %v874_v49 = vadd.f32 %v873_v39, %v752_v15 }
 0x1c8   : > { %v754_v52 = vpop.f32.mrf.mxu1 }
 0x1c9   : > { %v996_v30 = vadd.f32 %v995_v44, %v874_v49  ;;  %v755_v57 = vadd.f32 %v754_v52, %v633_v11 }
 0x1ca   : > { %v998_v53 = vpop.f32.mrf.mxu3 }
 0x1cb   : > { %v1118_v51 = vadd.f32 %v1117_v48, %v996_v30 }
 0x1cc   : > { %v1120_v56 = vpop.f32.mrf.mxu0 }
 0x1cd   : > { %v1170_v20 = vmax.f32 %v1118_v51, 0.0 }
 0x1ce   : > { %v876_v60 = vpop.f32.mrf.mxu2 }
 0x1cf   : > { %1205 = vst.msk [vmem:[%s1841_s21 + $0xd0] sm:$0xff] %vm428_vm0, %v1170_v20  ;;  %v877_v61 = vadd.f32 %v876_v60, %v755_v57 }
 0x1d0   : > { %v757_v0 = vpop.f32.mrf.mxu1 }
 0x1d1   : > { %v999_v13 = vadd.f32 %v998_v53, %v877_v61  ;;  %v758_v47 = vadd.f32 %v757_v0, %v636_v7  ;;  %v651_v53 = vadd.f32 %v1826_v28, %v1799_v2 }
 0x1d2   : > { %v1001_v38 = vpop.f32.mrf.mxu3 }
 0x1d3   : > { %v1121_v35 = vadd.f32 %v1120_v56, %v999_v13  ;;  %v1372_v13 = vld [vmem:[%s2073_s2] ss:$0 sm:$0xff] }
 0x1d4   : > { %v1123_v1 = vpop.f32.mrf.mxu0 }
 0x1d5   : > { %v1171_v18 = vmax.f32 %v1121_v35, 0.0 }
 0x1d6   : > { %v879_v23 = vpop.f32.mrf.mxu2 }
 0x1d7   : > { %1206 = vst.msk [vmem:[%s1841_s21 + $0xd8] sm:$0xff] %vm428_vm0, %v1171_v18  ;;  %v880_v4 = vadd.f32 %v879_v23, %v758_v47 }
 0x1d8   : > { %v760_v19 = vpop.f32.mrf.mxu1 }
 0x1d9   : > { %v1002_v5 = vadd.f32 %v1001_v38, %v880_v4  ;;  %v761_v59 = vadd.f32 %v760_v19, %v639_v46  ;;  %v654_v38 = vadd.f32 %v1372_v13, %v1812_v12 }
 0x1da   : > { %v1004_v9 = vpop.f32.mrf.mxu3 }
 0x1db   : > { %v1124_v10 = vadd.f32 %v1123_v1, %v1002_v5 }
 0x1dc   : > { %v1126_v16 = vpop.f32.mrf.mxu0 }
 0x1dd   : > { %v1172_v26 = vmax.f32 %v1124_v10, 0.0 }
 0x1de   : > { %v882_v17 = vpop.f32.mrf.mxu2 }
 0x1df   : > { %1207 = vst.msk [vmem:[%s1841_s21 + $0xe0] sm:$0xff] %vm428_vm0, %v1172_v26  ;;  %v883_v21 = vadd.f32 %v882_v17, %v761_v59 }
 0x1e0   : > { %v763_v24 = vpop.f32.mrf.mxu1 }
 0x1e1   : > { %v1005_v14 = vadd.f32 %v1004_v9, %v883_v21  ;;  %v764_v29 = vadd.f32 %v763_v24, %v642_v8 }
 0x1e2   : > { %v1007_v25 = vpop.f32.mrf.mxu3 }
 0x1e3   : > { %v1127_v54 = vadd.f32 %v1126_v16, %v1005_v14 }
 0x1e4   : > { %v1129_v55 = vpop.f32.mrf.mxu0 }
 0x1e5   : > { %v1173_v34 = vmax.f32 %v1127_v54, 0.0 }
 0x1e6   : > { %v885_v31 = vpop.f32.mrf.mxu2 }
 0x1e7   : > { %1208 = vst.msk [vmem:[%s1841_s21 + $0xe8] sm:$0xff] %vm428_vm0, %v1173_v34  ;;  %v886_v32 = vadd.f32 %v885_v31, %v764_v29 }
 0x1e8   : > { %v766_v43 = vpop.f32.mrf.mxu1 }
 0x1e9   : > { %v1008_v33 = vadd.f32 %v1007_v25, %v886_v32  ;;  %v767_v27 = vadd.f32 %v766_v43, %v645_v37 }
 0x1ea   : > { %v1010_v36 = vpop.f32.mrf.mxu3 }
 0x1eb   : > { %v1130_v40 = vadd.f32 %v1129_v55, %v1008_v33 }
 0x1ec   : > { %v1132_v62 = vpop.f32.mrf.mxu0 }
 0x1ed   : > { %v1174_v42 = vmax.f32 %v1130_v40, 0.0 }
 0x1ee   : > { %v888_v41 = vpop.f32.mrf.mxu2 }
 0x1ef   : > { %1209 = vst.msk [vmem:[%s1841_s21 + $0xf0] sm:$0xff] %vm428_vm0, %v1174_v42  ;;  %v889_v22 = vadd.f32 %v888_v41, %v767_v27 }
 0x1f0   : > { %v769_v3 = vpop.f32.mrf.mxu1 }
 0x1f1   : > { %v1011_v44 = vadd.f32 %v1010_v36, %v889_v22  ;;  %v770_v6 = vadd.f32 %v769_v3, %v648_v63 }
 0x1f2   : > { %v1013_v45 = vpop.f32.mrf.mxu3 }
 0x1f3   : > { %v1133_v48 = vadd.f32 %v1132_v62, %v1011_v44 }
 0x1f4   : > { %v1135_v15 = vpop.f32.mrf.mxu0 }
 0x1f5   : > { %v1175_v50 = vmax.f32 %v1133_v48, 0.0 }
 0x1f6   : > { %v891_v39 = vpop.f32.mrf.mxu2 }
 0x1f7   : > { %1210 = vst.msk [vmem:[%s1841_s21 + $0xf8] sm:$0xff] %vm428_vm0, %v1175_v50  ;;  %v892_v49 = vadd.f32 %v891_v39, %v770_v6 }
 0x1f8   : > { %v772_v52 = vpop.f32.mrf.mxu1 }
 0x1f9   : > { %v1014_v30 = vadd.f32 %v1013_v45, %v892_v49  ;;  %v773_v56 = vadd.f32 %v772_v52, %v651_v53 }
 0x1fa   : > { %v1016_v51 = vpop.f32.mrf.mxu3 }
 0x1fb   : > { %v1136_v11 = vadd.f32 %v1135_v15, %v1014_v30 }
 0x1fc   : > { %v1138_v20 = vpop.f32.mrf.mxu0 }
 0x1fd   : > { %v1176_v57 = vmax.f32 %v1136_v11, 0.0 }
 0x1fe   : > { %v894_v58 = vpop.f32.mrf.mxu2 }
 0x1ff   : > { %1211 = vst.msk [vmem:[%s1841_s21 + $0x100] sm:$0xff] %vm428_vm0, %v1176_v57  ;;  %v895_v60 = vadd.f32 %v894_v58, %v773_v56 }
 0x200   : > { %v775_v0 = vpop.f32.mrf.mxu1 }
 0x201   : > { %v1017_v61 = vadd.f32 %v1016_v51, %v895_v60  ;;  %v776_v28 = vadd.f32 %v775_v0, %v654_v38 }
 0x202   : > { %v1019_v1 = vpop.f32.mrf.mxu3 }
 0x203   : > { %v1139_v2 = vadd.f32 %v1138_v20, %v1017_v61 }
 0x204   : > { %v1141_v18 = vpop.f32.mrf.mxu0 }
 0x205   : > { %v1177_v7 = vmax.f32 %v1139_v2, 0.0 }
 0x206   : > { %v897_v35 = vpop.f32.mrf.mxu2 }
 0x207   : > { %1212 = vst.msk [vmem:[%s1841_s21 + $0x108] sm:$0xff] %vm428_vm0, %v1177_v7  ;;  %v898_v47 = vadd.f32 %v897_v35, %v776_v28 }
 0x209   : > { %v1020_v23 = vadd.f32 %v1019_v1, %v898_v47 }
 0x20b   : > { %v1142_v4 = vadd.f32 %v1141_v18, %v1020_v23 }
 0x20d   : > { %v1178_v19 = vmax.f32 %v1142_v4, 0.0 }
 0x20f   : > { %1213 = vst.msk [vmem:[%s1841_s21 + $0x110] sm:$0xff] %vm428_vm0, %v1178_v19 }
 0x210 PF: > { %s13_s12 = sadd.s32 1, %s1379_s12  }
 0x211   : > { %p10_p4 = scmp.ge.s32.totalorder %s13_s12, 4  }
 0x213   :  { %12 = sbr.rel (!%p10_p4) target bundleno = 1 (0x1), region = 62 }

// kernel: dqn_forward.7
= control target key start
LH: loop header
LB: loop body
LE: loop exit
PB: predicated region body
PF: predicated region fallthrough
CT: control target
= control target key end

     0   :  { %vm2623_vm0 = vcmask 261120   ;;  %vm2647_vm1 = vcmask 31744   ;;  %s6277_s1 = inlined_call_operand.vmem [shape: f32[8960,32], index: 1, kind: input, shape index: {}]   ;;  %s6278_s0 = inlined_call_operand.vmem [shape: f32[8,8960], index: 0, kind: input, shape index: {}]   ;;  %s6279_s2 = inlined_call_operand.vmem [shape: f32[1,32], index: 2, kind: input, shape index: {}]   ;;  %s6280_s4 = inlined_call_operand.vmem [shape: f32[1,4], index: 4, kind: input, shape index: {}]   ;;  %s6281_s3 = inlined_call_operand.vmem [shape: f32[32,4], index: 3, kind: input, shape index: {}]   ;;  %s6282_s5 = inlined_call_operand.vmem [shape: f32[8,4], index: 5, kind: output, shape index: {}]  }
   0x1   :  { %v105_v0 = vld [vmem:[%s6277_s1 + $0x78] sm:$0xff]  ;;  %v104_v2 = vld [vmem:[%s6277_s1 + $0x70] sm:$0xff]  ;;  %v103_v6 = vld [vmem:[%s6277_s1 + $0x68] sm:$0xff] }
   0x2   :  { %v137_v1 = vld [vmem:[%s6277_s1 + $0x178] sm:$0xff]  ;;  %1214 = vmatpush.msra.mxu0 %v105_v0  ;;  %v136_v4 = vld [vmem:[%s6277_s1 + $0x170] sm:$0xff]  ;;  %v135_v8 = vld [vmem:[%s6277_s1 + $0x168] sm:$0xff] }
   0x3   :  { %1254 = vmatpush.msra.mxu2 %v137_v1  ;;  %v121_v3 = vld [vmem:[%s6277_s1 + $0xf8] sm:$0xff]  ;;  %v120_v7 = vld [vmem:[%s6277_s1 + $0xf0] sm:$0xff]  ;;  %v119_v10 = vld [vmem:[%s6277_s1 + $0xe8] sm:$0xff] }
   0x4   :  { %v153_v5 = vld [vmem:[%s6277_s1 + $0x1f8] sm:$0xff]  ;;  %1234 = vmatpush.msra.mxu1 %v121_v3  ;;  %1215 = vmatpush.msra.mxu0 %v104_v2  ;;  %v152_v9 = vld [vmem:[%s6277_s1 + $0x1f0] sm:$0xff]  ;;  %v102_v11 = vld [vmem:[%s6277_s1 + $0x60] sm:$0xff] }
   0x5   :  { %1274 = vmatpush.msra.mxu3 %v153_v5  ;;  %1255 = vmatpush.msra.mxu2 %v136_v4  ;;  %v134_v12 = vld [vmem:[%s6277_s1 + $0x160] sm:$0xff]  ;;  %v151_v13 = vld [vmem:[%s6277_s1 + $0x1e8] sm:$0xff]  ;;  %v101_v16 = vld [vmem:[%s6277_s1 + $0x58] sm:$0xff] }
   0x6   :  { %1235 = vmatpush.msra.mxu1 %v120_v7  ;;  %1216 = vmatpush.msra.mxu0 %v103_v6  ;;  %v118_v14 = vld [vmem:[%s6277_s1 + $0xe0] sm:$0xff]  ;;  %v133_v17 = vld [vmem:[%s6277_s1 + $0x158] sm:$0xff]  ;;  %v100_v20 = vld [vmem:[%s6277_s1 + $0x50] sm:$0xff] }
   0x7   :  { %1275 = vmatpush.msra.mxu3 %v152_v9  ;;  %1256 = vmatpush.msra.mxu2 %v135_v8  ;;  %v150_v15 = vld [vmem:[%s6277_s1 + $0x1e0] sm:$0xff]  ;;  %v117_v18 = vld [vmem:[%s6277_s1 + $0xd8] sm:$0xff]  ;;  %v132_v21 = vld [vmem:[%s6277_s1 + $0x150] sm:$0xff] }
   0x8   :  { %1236 = vmatpush.msra.mxu1 %v119_v10  ;;  %1217 = vmatpush.msra.mxu0 %v102_v11  ;;  %v149_v19 = vld [vmem:[%s6277_s1 + $0x1d8] sm:$0xff]  ;;  %v116_v22 = vld [vmem:[%s6277_s1 + $0xd0] sm:$0xff]  ;;  %v99_v24 = vld [vmem:[%s6277_s1 + $0x48] sm:$0xff] }
   0x9   :  { %1276 = vmatpush.msra.mxu3 %v151_v13  ;;  %1257 = vmatpush.msra.mxu2 %v134_v12  ;;  %v148_v23 = vld [vmem:[%s6277_s1 + $0x1d0] sm:$0xff]  ;;  %v131_v25 = vld [vmem:[%s6277_s1 + $0x148] sm:$0xff]  ;;  %v98_v28 = vld [vmem:[%s6277_s1 + $0x40] sm:$0xff] }
   0xa   :  { %1237 = vmatpush.msra.mxu1 %v118_v14  ;;  %1218 = vmatpush.msra.mxu0 %v101_v16  ;;  %v115_v26 = vld [vmem:[%s6277_s1 + $0xc8] sm:$0xff]  ;;  %v130_v29 = vld [vmem:[%s6277_s1 + $0x140] sm:$0xff]  ;;  %v97_v32 = vld [vmem:[%s6277_s1 + $0x38] sm:$0xff] }
   0xb   :  { %1277 = vmatpush.msra.mxu3 %v150_v15  ;;  %1258 = vmatpush.msra.mxu2 %v133_v17  ;;  %v147_v27 = vld [vmem:[%s6277_s1 + $0x1c8] sm:$0xff]  ;;  %v114_v30 = vld [vmem:[%s6277_s1 + $0xc0] sm:$0xff]  ;;  %v129_v33 = vld [vmem:[%s6277_s1 + $0x138] sm:$0xff] }
   0xc   :  { %1238 = vmatpush.msra.mxu1 %v117_v18  ;;  %1219 = vmatpush.msra.mxu0 %v100_v20  ;;  %v146_v31 = vld [vmem:[%s6277_s1 + $0x1c0] sm:$0xff]  ;;  %v113_v34 = vld [vmem:[%s6277_s1 + $0xb8] sm:$0xff]  ;;  %v96_v36 = vld [vmem:[%s6277_s1 + $0x30] sm:$0xff] }
   0xd   :  { %1278 = vmatpush.msra.mxu3 %v149_v19  ;;  %1259 = vmatpush.msra.mxu2 %v132_v21  ;;  %v145_v35 = vld [vmem:[%s6277_s1 + $0x1b8] sm:$0xff]  ;;  %v128_v37 = vld [vmem:[%s6277_s1 + $0x130] sm:$0xff]  ;;  %v95_v40 = vld [vmem:[%s6277_s1 + $0x28] sm:$0xff] }
   0xe   :  { %1239 = vmatpush.msra.mxu1 %v116_v22  ;;  %1220 = vmatpush.msra.mxu0 %v99_v24  ;;  %v112_v38 = vld [vmem:[%s6277_s1 + $0xb0] sm:$0xff]  ;;  %v127_v41 = vld [vmem:[%s6277_s1 + $0x128] sm:$0xff]  ;;  %v94_v44 = vld [vmem:[%s6277_s1 + $0x20] sm:$0xff] }
   0xf   :  { %1279 = vmatpush.msra.mxu3 %v148_v23  ;;  %1260 = vmatpush.msra.mxu2 %v131_v25  ;;  %v144_v39 = vld [vmem:[%s6277_s1 + $0x1b0] sm:$0xff]  ;;  %v111_v42 = vld [vmem:[%s6277_s1 + $0xa8] sm:$0xff]  ;;  %v126_v45 = vld [vmem:[%s6277_s1 + $0x120] sm:$0xff] }
  0x10   :  { %1240 = vmatpush.msra.mxu1 %v115_v26  ;;  %1221 = vmatpush.msra.mxu0 %v98_v28  ;;  %v143_v43 = vld [vmem:[%s6277_s1 + $0x1a8] sm:$0xff]  ;;  %v110_v46 = vld [vmem:[%s6277_s1 + $0xa0] sm:$0xff]  ;;  %v93_v48 = vld [vmem:[%s6277_s1 + $0x18] sm:$0xff] }
  0x11   :  { %1280 = vmatpush.msra.mxu3 %v147_v27  ;;  %1261 = vmatpush.msra.mxu2 %v130_v29  ;;  %v142_v47 = vld [vmem:[%s6277_s1 + $0x1a0] sm:$0xff]  ;;  %v125_v49 = vld [vmem:[%s6277_s1 + $0x118] sm:$0xff]  ;;  %v92_v52 = vld [vmem:[%s6277_s1 + $0x10] sm:$0xff] }
  0x12   :  { %1241 = vmatpush.msra.mxu1 %v114_v30  ;;  %1222 = vmatpush.msra.mxu0 %v97_v32  ;;  %v109_v50 = vld [vmem:[%s6277_s1 + $0x98] sm:$0xff]  ;;  %v124_v53 = vld [vmem:[%s6277_s1 + $0x110] sm:$0xff]  ;;  %v91_v56 = vld [vmem:[%s6277_s1 + $0x8] sm:$0xff] }
  0x13   :  { %1281 = vmatpush.msra.mxu3 %v146_v31  ;;  %1262 = vmatpush.msra.mxu2 %v129_v33  ;;  %v141_v51 = vld [vmem:[%s6277_s1 + $0x198] sm:$0xff]  ;;  %v108_v54 = vld [vmem:[%s6277_s1 + $0x90] sm:$0xff]  ;;  %v123_v57 = vld [vmem:[%s6277_s1 + $0x108] sm:$0xff] }
  0x14   :  { %1242 = vmatpush.msra.mxu1 %v113_v34  ;;  %1223 = vmatpush.msra.mxu0 %v96_v36  ;;  %v140_v55 = vld [vmem:[%s6277_s1 + $0x190] sm:$0xff]  ;;  %v107_v58 = vld [vmem:[%s6277_s1 + $0x88] sm:$0xff]  ;;  %v90_v60 = vld [vmem:[%s6277_s1] sm:$0xff] }
  0x15   :  { %1282 = vmatpush.msra.mxu3 %v145_v35  ;;  %1263 = vmatpush.msra.mxu2 %v128_v37  ;;  %v139_v59 = vld [vmem:[%s6277_s1 + $0x188] sm:$0xff]  ;;  %v122_v61 = vld [vmem:[%s6277_s1 + $0x100] sm:$0xff]  ;;  %v169_v62 = vld [vmem:[%s6277_s1 + $0x278] sm:$0xff] }
  0x16   :  { %1243 = vmatpush.msra.mxu1 %v112_v38  ;;  %1224 = vmatpush.msra.mxu0 %v95_v40  ;;  %v201_v63 = vld [vmem:[%s6277_s1 + $0x378] sm:$0xff]  ;;  %v106_v0 = vld [vmem:[%s6277_s1 + $0x80] sm:$0xff]  ;;  %v168_v2 = vld [vmem:[%s6277_s1 + $0x270] sm:$0xff] }
  0x17   :  { %1283 = vmatpush.msra.mxu3 %v144_v39  ;;  %1264 = vmatpush.msra.mxu2 %v127_v41  ;;  %v138_v1 = vld [vmem:[%s6277_s1 + $0x180] sm:$0xff]  ;;  %v185_v3 = vld [vmem:[%s6277_s1 + $0x2f8] sm:$0xff]  ;;  %v200_v4 = vld [vmem:[%s6277_s1 + $0x370] sm:$0xff] }
  0x18   :  { %1244 = vmatpush.msra.mxu1 %v111_v42  ;;  %1225 = vmatpush.msra.mxu0 %v94_v44  ;;  %v217_v5 = vld [vmem:[%s6277_s1 + $0x3f8] sm:$0xff]  ;;  %v167_v6 = vld [vmem:[%s6277_s1 + $0x268] sm:$0xff]  ;;  %v184_v7 = vld [vmem:[%s6277_s1 + $0x2f0] sm:$0xff] }
  0x19   :  { %1284 = vmatpush.msra.mxu3 %v143_v43  ;;  %1265 = vmatpush.msra.mxu2 %v126_v45  ;;  %v199_v8 = vld [vmem:[%s6277_s1 + $0x368] sm:$0xff]  ;;  %v216_v9 = vld [vmem:[%s6277_s1 + $0x3f0] sm:$0xff]  ;;  %v166_v10 = vld [vmem:[%s6277_s1 + $0x260] sm:$0xff] }
  0x1a   :  { %1245 = vmatpush.msra.mxu1 %v110_v46  ;;  %1226 = vmatpush.msra.mxu0 %v93_v48  ;;  %v183_v11 = vld [vmem:[%s6277_s1 + $0x2e8] sm:$0xff]  ;;  %v198_v12 = vld [vmem:[%s6277_s1 + $0x360] sm:$0xff]  ;;  %v165_v14 = vld [vmem:[%s6277_s1 + $0x258] sm:$0xff] }
  0x1b   :  { %1285 = vmatpush.msra.mxu3 %v142_v47  ;;  %1266 = vmatpush.msra.mxu2 %v125_v49  ;;  %v215_v13 = vld [vmem:[%s6277_s1 + $0x3e8] sm:$0xff]  ;;  %v182_v15 = vld [vmem:[%s6277_s1 + $0x2e0] sm:$0xff]  ;;  %v197_v16 = vld [vmem:[%s6277_s1 + $0x358] sm:$0xff] }
  0x1c   :  { %1246 = vmatpush.msra.mxu1 %v109_v50  ;;  %1227 = vmatpush.msra.mxu0 %v92_v52  ;;  %v214_v17 = vld [vmem:[%s6277_s1 + $0x3e0] sm:$0xff]  ;;  %v164_v18 = vld [vmem:[%s6277_s1 + $0x250] sm:$0xff]  ;;  %v181_v19 = vld [vmem:[%s6277_s1 + $0x2d8] sm:$0xff] }
  0x1d   :  { %1286 = vmatpush.msra.mxu3 %v141_v51  ;;  %1267 = vmatpush.msra.mxu2 %v124_v53  ;;  %v196_v20 = vld [vmem:[%s6277_s1 + $0x350] sm:$0xff]  ;;  %v213_v21 = vld [vmem:[%s6277_s1 + $0x3d8] sm:$0xff]  ;;  %v163_v22 = vld [vmem:[%s6277_s1 + $0x248] sm:$0xff] }
  0x1e   :  { %1247 = vmatpush.msra.mxu1 %v108_v54  ;;  %1228 = vmatpush.msra.mxu0 %v91_v56  ;;  %v180_v23 = vld [vmem:[%s6277_s1 + $0x2d0] sm:$0xff]  ;;  %v195_v24 = vld [vmem:[%s6277_s1 + $0x348] sm:$0xff]  ;;  %v162_v26 = vld [vmem:[%s6277_s1 + $0x240] sm:$0xff] }
  0x1f   :  { %1287 = vmatpush.msra.mxu3 %v140_v55  ;;  %1268 = vmatpush.msra.mxu2 %v123_v57  ;;  %v212_v25 = vld [vmem:[%s6277_s1 + $0x3d0] sm:$0xff]  ;;  %v179_v27 = vld [vmem:[%s6277_s1 + $0x2c8] sm:$0xff]  ;;  %v194_v28 = vld [vmem:[%s6277_s1 + $0x340] sm:$0xff] }
  0x20   :  { %1248 = vmatpush.msra.mxu1 %v107_v58  ;;  %1229 = vmatpush.msra.mxu0 %v90_v60  ;;  %v211_v29 = vld [vmem:[%s6277_s1 + $0x3c8] sm:$0xff]  ;;  %v161_v30 = vld [vmem:[%s6277_s1 + $0x238] sm:$0xff]  ;;  %v178_v31 = vld [vmem:[%s6277_s1 + $0x2c0] sm:$0xff] }
  0x21   :  { %1288 = vmatpush.msra.mxu3 %v139_v59  ;;  %1269 = vmatpush.msra.mxu2 %v122_v61  ;;  %v193_v32 = vld [vmem:[%s6277_s1 + $0x338] sm:$0xff]  ;;  %v210_v33 = vld [vmem:[%s6277_s1 + $0x3c0] sm:$0xff]  ;;  %v160_v34 = vld [vmem:[%s6277_s1 + $0x230] sm:$0xff] }
  0x22   :  { %1294 = vmatpush.msrb.mxu0 %v169_v62  ;;  %1249 = vmatpush.msra.mxu1 %v106_v0  ;;  %v177_v35 = vld [vmem:[%s6277_s1 + $0x2b8] sm:$0xff]  ;;  %v192_v36 = vld [vmem:[%s6277_s1 + $0x330] sm:$0xff]  ;;  %v159_v38 = vld [vmem:[%s6277_s1 + $0x228] sm:$0xff] }
  0x23   :  { %1334 = vmatpush.msrb.mxu2 %v201_v63  ;;  %1289 = vmatpush.msra.mxu3 %v138_v1  ;;  %v209_v37 = vld [vmem:[%s6277_s1 + $0x3b8] sm:$0xff]  ;;  %v176_v39 = vld [vmem:[%s6277_s1 + $0x2b0] sm:$0xff]  ;;  %v191_v40 = vld [vmem:[%s6277_s1 + $0x328] sm:$0xff] }
  0x24   :  { %1295 = vmatpush.msrb.mxu0 %v168_v2  ;;  %1314 = vmatpush.msrb.mxu1 %v185_v3  ;;  %v208_v41 = vld [vmem:[%s6277_s1 + $0x3b0] sm:$0xff]  ;;  %v158_v42 = vld [vmem:[%s6277_s1 + $0x220] sm:$0xff]  ;;  %v175_v43 = vld [vmem:[%s6277_s1 + $0x2a8] sm:$0xff] }
  0x25   :  { %1335 = vmatpush.msrb.mxu2 %v200_v4  ;;  %1354 = vmatpush.msrb.mxu3 %v217_v5  ;;  %v190_v44 = vld [vmem:[%s6277_s1 + $0x320] sm:$0xff]  ;;  %v207_v45 = vld [vmem:[%s6277_s1 + $0x3a8] sm:$0xff]  ;;  %v157_v46 = vld [vmem:[%s6277_s1 + $0x218] sm:$0xff] }
  0x26   :  { %1296 = vmatpush.msrb.mxu0 %v167_v6  ;;  %1315 = vmatpush.msrb.mxu1 %v184_v7  ;;  %v174_v47 = vld [vmem:[%s6277_s1 + $0x2a0] sm:$0xff]  ;;  %v189_v48 = vld [vmem:[%s6277_s1 + $0x318] sm:$0xff]  ;;  %v156_v50 = vld [vmem:[%s6277_s1 + $0x210] sm:$0xff] }
  0x27   :  { %1336 = vmatpush.msrb.mxu2 %v199_v8  ;;  %1355 = vmatpush.msrb.mxu3 %v216_v9  ;;  %v206_v49 = vld [vmem:[%s6277_s1 + $0x3a0] sm:$0xff]  ;;  %v173_v51 = vld [vmem:[%s6277_s1 + $0x298] sm:$0xff]  ;;  %v188_v52 = vld [vmem:[%s6277_s1 + $0x310] sm:$0xff] }
  0x28   :  { %1297 = vmatpush.msrb.mxu0 %v166_v10  ;;  %1316 = vmatpush.msrb.mxu1 %v183_v11  ;;  %v205_v53 = vld [vmem:[%s6277_s1 + $0x398] sm:$0xff]  ;;  %v155_v54 = vld [vmem:[%s6277_s1 + $0x208] sm:$0xff]  ;;  %v172_v55 = vld [vmem:[%s6277_s1 + $0x290] sm:$0xff] }
  0x29   :  { %1337 = vmatpush.msrb.mxu2 %v198_v12  ;;  %1356 = vmatpush.msrb.mxu3 %v215_v13  ;;  %v187_v56 = vld [vmem:[%s6277_s1 + $0x308] sm:$0xff]  ;;  %v204_v57 = vld [vmem:[%s6277_s1 + $0x390] sm:$0xff]  ;;  %v154_v59 = vld [vmem:[%s6277_s1 + $0x200] sm:$0xff] }
  0x2a   :  { %1298 = vmatpush.msrb.mxu0 %v165_v14  ;;  %1317 = vmatpush.msrb.mxu1 %v182_v15  ;;  %v22_v58 = vld [vmem:[%s6278_s0 + $0x10] sm:$0xff]  ;;  %v171_v60 = vld [vmem:[%s6277_s1 + $0x288] sm:$0xff]  ;;  %v186_v61 = vld [vmem:[%s6277_s1 + $0x300] sm:$0xff] }
  0x2b   :  { %1338 = vmatpush.msrb.mxu2 %v197_v16  ;;  %1357 = vmatpush.msrb.mxu3 %v214_v17  ;;  %v203_v62 = vld [vmem:[%s6277_s1 + $0x388] sm:$0xff]  ;;  %v20_v63 = vld [vmem:[%s6278_s0] sm:$0xff]  ;;  %v23_v0 = vld [vmem:[%s6278_s0 + $0x18] sm:$0xff] }
  0x2c   :  { %1299 = vmatpush.msrb.mxu0 %v164_v18  ;;  %1318 = vmatpush.msrb.mxu1 %v181_v19  ;;  %v233_v1 = vld [vmem:[%s6277_s1 + $0x478] sm:$0xff]  ;;  %v170_v3 = vld [vmem:[%s6277_s1 + $0x280] sm:$0xff]  ;;  %v21_v5 = vld [vmem:[%s6278_s0 + $0x8] sm:$0xff] }
  0x2d   :  { %1339 = vmatpush.msrb.mxu2 %v196_v20  ;;  %1358 = vmatpush.msrb.mxu3 %v213_v21  ;;  %v265_v2 = vld [vmem:[%s6277_s1 + $0x578] sm:$0xff]  ;;  %v202_v4 = vld [vmem:[%s6277_s1 + $0x380] sm:$0xff]  ;;  %v232_v6 = vld [vmem:[%s6277_s1 + $0x470] sm:$0xff] }
  0x2e   :  { %1300 = vmatpush.msrb.mxu0 %v163_v22  ;;  %1319 = vmatpush.msrb.mxu1 %v180_v23  ;;  %v249_v7 = vld [vmem:[%s6277_s1 + $0x4f8] sm:$0xff]  ;;  %v264_v8 = vld [vmem:[%s6277_s1 + $0x570] sm:$0xff]  ;;  %v231_v10 = vld [vmem:[%s6277_s1 + $0x468] sm:$0xff] }
  0x2f   :  { %1340 = vmatpush.msrb.mxu2 %v195_v24  ;;  %1359 = vmatpush.msrb.mxu3 %v212_v25  ;;  %v281_v9 = vld [vmem:[%s6277_s1 + $0x5f8] sm:$0xff]  ;;  %v248_v11 = vld [vmem:[%s6277_s1 + $0x4f0] sm:$0xff]  ;;  %v263_v12 = vld [vmem:[%s6277_s1 + $0x568] sm:$0xff] }
  0x30   :  { %1301 = vmatpush.msrb.mxu0 %v162_v26  ;;  %1320 = vmatpush.msrb.mxu1 %v179_v27  ;;  %v280_v13 = vld [vmem:[%s6277_s1 + $0x5f0] sm:$0xff]  ;;  %v230_v15 = vld [vmem:[%s6277_s1 + $0x460] sm:$0xff]  ;;  %v247_v16 = vld [vmem:[%s6277_s1 + $0x4e8] sm:$0xff] }
  0x31   :  { %1341 = vmatpush.msrb.mxu2 %v194_v28  ;;  %1360 = vmatpush.msrb.mxu3 %v211_v29  ;;  %v26_v14 = vld [vmem:[%s6278_s0 + $0x30] sm:$0xff]  ;;  %v262_v17 = vld [vmem:[%s6277_s1 + $0x560] sm:$0xff]  ;;  %v279_v18 = vld [vmem:[%s6277_s1 + $0x5e8] sm:$0xff] }
  0x32   :  { %1302 = vmatpush.msrb.mxu0 %v161_v30  ;;  %1321 = vmatpush.msrb.mxu1 %v178_v31  ;;  %v24_v19 = vld [vmem:[%s6278_s0 + $0x20] sm:$0xff]  ;;  %v27_v20 = vld [vmem:[%s6278_s0 + $0x38] sm:$0xff]  ;;  %v25_v25 = vld [vmem:[%s6278_s0 + $0x28] sm:$0xff] }
  0x33   :  { %1342 = vmatpush.msrb.mxu2 %v193_v32  ;;  %1361 = vmatpush.msrb.mxu3 %v210_v33  ;;  %v229_v21 = vld [vmem:[%s6277_s1 + $0x458] sm:$0xff]  ;;  %v246_v22 = vld [vmem:[%s6277_s1 + $0x4e0] sm:$0xff]  ;;  %v228_v26 = vld [vmem:[%s6277_s1 + $0x450] sm:$0xff] }
  0x34   :  { %1303 = vmatpush.msrb.mxu0 %v160_v34  ;;  %1322 = vmatpush.msrb.mxu1 %v177_v35  ;;  %v261_v23 = vld [vmem:[%s6277_s1 + $0x558] sm:$0xff]  ;;  %v278_v24 = vld [vmem:[%s6277_s1 + $0x5e0] sm:$0xff]  ;;  %v260_v28 = vld [vmem:[%s6277_s1 + $0x550] sm:$0xff] }
  0x35   :  { %1343 = vmatpush.msrb.mxu2 %v192_v36  ;;  %1362 = vmatpush.msrb.mxu3 %v209_v37  ;;  %v245_v27 = vld [vmem:[%s6277_s1 + $0x4d8] sm:$0xff]  ;;  %v227_v30 = vld [vmem:[%s6277_s1 + $0x448] sm:$0xff]  ;;  %v244_v31 = vld [vmem:[%s6277_s1 + $0x4d0] sm:$0xff] }
  0x36   :  { %1304 = vmatpush.msrb.mxu0 %v159_v38  ;;  %1323 = vmatpush.msrb.mxu1 %v176_v39  ;;  %v277_v29 = vld [vmem:[%s6277_s1 + $0x5d8] sm:$0xff]  ;;  %v259_v32 = vld [vmem:[%s6277_s1 + $0x548] sm:$0xff]  ;;  %v276_v33 = vld [vmem:[%s6277_s1 + $0x5d0] sm:$0xff] }
  0x37   :  { %1344 = vmatpush.msrb.mxu2 %v191_v40  ;;  %1363 = vmatpush.msrb.mxu3 %v208_v41  ;;  %v226_v34 = vld [vmem:[%s6277_s1 + $0x440] sm:$0xff]  ;;  %v243_v35 = vld [vmem:[%s6277_s1 + $0x4c8] sm:$0xff]  ;;  %v225_v38 = vld [vmem:[%s6277_s1 + $0x438] sm:$0xff] }
  0x38   :  { %1305 = vmatpush.msrb.mxu0 %v158_v42  ;;  %1324 = vmatpush.msrb.mxu1 %v175_v43  ;;  %v258_v36 = vld [vmem:[%s6277_s1 + $0x540] sm:$0xff]  ;;  %v275_v37 = vld [vmem:[%s6277_s1 + $0x5c8] sm:$0xff]  ;;  %v257_v40 = vld [vmem:[%s6277_s1 + $0x538] sm:$0xff] }
  0x39   :  { %1345 = vmatpush.msrb.mxu2 %v190_v44  ;;  %1364 = vmatpush.msrb.mxu3 %v207_v45  ;;  %v242_v39 = vld [vmem:[%s6277_s1 + $0x4c0] sm:$0xff]  ;;  %v224_v42 = vld [vmem:[%s6277_s1 + $0x430] sm:$0xff]  ;;  %v241_v43 = vld [vmem:[%s6277_s1 + $0x4b8] sm:$0xff] }
  0x3a   :  { %1306 = vmatpush.msrb.mxu0 %v157_v46  ;;  %1325 = vmatpush.msrb.mxu1 %v174_v47  ;;  %v274_v41 = vld [vmem:[%s6277_s1 + $0x5c0] sm:$0xff]  ;;  %v256_v44 = vld [vmem:[%s6277_s1 + $0x530] sm:$0xff]  ;;  %v273_v45 = vld [vmem:[%s6277_s1 + $0x5b8] sm:$0xff] }
  0x3b   :  { %1346 = vmatpush.msrb.mxu2 %v189_v48  ;;  %1365 = vmatpush.msrb.mxu3 %v206_v49  ;;  %v223_v46 = vld [vmem:[%s6277_s1 + $0x428] sm:$0xff]  ;;  %v240_v47 = vld [vmem:[%s6277_s1 + $0x4b0] sm:$0xff] }
  0x3c   :  { %1307 = vmatpush.msrb.mxu0 %v156_v50  ;;  %1326 = vmatpush.msrb.mxu1 %v173_v51  ;;  %v255_v48 = vld [vmem:[%s6277_s1 + $0x528] sm:$0xff]  ;;  %v272_v49 = vld [vmem:[%s6277_s1 + $0x5b0] sm:$0xff]  ;;  %v222_v50 = vld [vmem:[%s6277_s1 + $0x420] sm:$0xff] }
  0x3d   :  { %1347 = vmatpush.msrb.mxu2 %v188_v52  ;;  %1366 = vmatpush.msrb.mxu3 %v205_v53  ;;  %v239_v51 = vld [vmem:[%s6277_s1 + $0x4a8] sm:$0xff]  ;;  %v254_v52 = vld [vmem:[%s6277_s1 + $0x520] sm:$0xff] }
  0x3e   :  { %1308 = vmatpush.msrb.mxu0 %v155_v54  ;;  %1327 = vmatpush.msrb.mxu1 %v172_v55  ;;  %v271_v53 = vld [vmem:[%s6277_s1 + $0x5a8] sm:$0xff]  ;;  %v221_v54 = vld [vmem:[%s6277_s1 + $0x418] sm:$0xff]  ;;  %v238_v55 = vld [vmem:[%s6277_s1 + $0x4a0] sm:$0xff] }
  0x3f   :  { %1348 = vmatpush.msrb.mxu2 %v187_v56  ;;  %1367 = vmatpush.msrb.mxu3 %v204_v57  ;;  %v253_v56 = vld [vmem:[%s6277_s1 + $0x518] sm:$0xff]  ;;  %v270_v57 = vld [vmem:[%s6277_s1 + $0x5a0] sm:$0xff] }
  0x40   :  { %1270 = vmatmul.f32.vlgmr.msra.gmra.mxu2 %v22_v58  ;;  %1309 = vmatpush.msrb.mxu0 %v154_v59  ;;  %v220_v58 = vld [vmem:[%s6277_s1 + $0x410] sm:$0xff]  ;;  %v237_v59 = vld [vmem:[%s6277_s1 + $0x498] sm:$0xff] }
  0x41   :  { %1328 = vmatpush.msrb.mxu1 %v171_v60  ;;  %1349 = vmatpush.msrb.mxu2 %v186_v61  ;;  %v252_v60 = vld [vmem:[%s6277_s1 + $0x510] sm:$0xff]  ;;  %v269_v61 = vld [vmem:[%s6277_s1 + $0x598] sm:$0xff] }
  0x42   :  { %1368 = vmatpush.msrb.mxu3 %v203_v62  ;;  %1230 = vmatmul.f32.vlgmr.msra.gmra.mxu0 %v20_v63  ;;  %v219_v62 = vld [vmem:[%s6277_s1 + $0x408] sm:$0xff]  ;;  %v236_v63 = vld [vmem:[%s6277_s1 + $0x490] sm:$0xff] }
  0x43   :  { %1290 = vmatmul.f32.vlgmr.msra.gmra.mxu3 %v23_v0  ;;  %1374 = vmatpush.msra.mxu0 %v233_v1  ;;  %v251_v0 = vld [vmem:[%s6277_s1 + $0x508] sm:$0xff]  ;;  %v268_v1 = vld [vmem:[%s6277_s1 + $0x590] sm:$0xff] }
  0x44   :  { %1414 = vmatpush.msra.mxu2 %v265_v2  ;;  %1329 = vmatpush.msrb.mxu1 %v170_v3  ;;  %v218_v2 = vld [vmem:[%s6277_s1 + $0x400] sm:$0xff]  ;;  %v235_v3 = vld [vmem:[%s6277_s1 + $0x488] sm:$0xff] }
  0x45   :  { %1369 = vmatpush.msrb.mxu3 %v202_v4  ;;  %1250 = vmatmul.f32.vlgmr.msra.gmra.mxu1 %v21_v5  ;;  %v250_v4 = vld [vmem:[%s6277_s1 + $0x500] sm:$0xff]  ;;  %v267_v5 = vld [vmem:[%s6277_s1 + $0x588] sm:$0xff] }
  0x46   :  { %1375 = vmatpush.msra.mxu0 %v232_v6  ;;  %1394 = vmatpush.msra.mxu1 %v249_v7  ;;  %v28_v6 = vld [vmem:[%s6278_s0 + $0x40] sm:$0xff]  ;;  %v30_v7 = vld [vmem:[%s6278_s0 + $0x50] sm:$0xff] }
  0x47   :  { %1415 = vmatpush.msra.mxu2 %v264_v8  ;;  %1434 = vmatpush.msra.mxu3 %v281_v9  ;;  %v297_v8 = vld [vmem:[%s6277_s1 + $0x678] sm:$0xff] }
  0x48   :  { %1376 = vmatpush.msra.mxu0 %v231_v10  ;;  %1395 = vmatpush.msra.mxu1 %v248_v11  ;;  %v329_v9 = vld [vmem:[%s6277_s1 + $0x778] sm:$0xff]  ;;  %v234_v10 = vld [vmem:[%s6277_s1 + $0x480] sm:$0xff] }
  0x49   :  { %1416 = vmatpush.msra.mxu2 %v263_v12  ;;  %1435 = vmatpush.msra.mxu3 %v280_v13  ;;  %v266_v11 = vld [vmem:[%s6277_s1 + $0x580] sm:$0xff]  ;;  %v29_v12 = vld [vmem:[%s6278_s0 + $0x48] sm:$0xff]  ;;  %v31_v13 = vld [vmem:[%s6278_s0 + $0x58] sm:$0xff] }
  0x4a   :  { %1350 = vmatmul.f32.vlgmr.msrb.gmra.mxu2 %v26_v14  ;;  %1377 = vmatpush.msra.mxu0 %v230_v15  ;;  %v296_v14 = vld [vmem:[%s6277_s1 + $0x670] sm:$0xff]  ;;  %v313_v15 = vld [vmem:[%s6277_s1 + $0x6f8] sm:$0xff] }
  0x4b   :  { %1396 = vmatpush.msra.mxu1 %v247_v16  ;;  %1417 = vmatpush.msra.mxu2 %v262_v17  ;;  %v328_v16 = vld [vmem:[%s6277_s1 + $0x770] sm:$0xff]  ;;  %v345_v17 = vld [vmem:[%s6277_s1 + $0x7f8] sm:$0xff] }
  0x4c   :  { %1436 = vmatpush.msra.mxu3 %v279_v18  ;;  %1310 = vmatmul.f32.vlgmr.msrb.gmra.mxu0 %v24_v19  ;;  %v295_v18 = vld [vmem:[%s6277_s1 + $0x668] sm:$0xff]  ;;  %v312_v19 = vld [vmem:[%s6277_s1 + $0x6f0] sm:$0xff] }
  0x4d   :  { %1370 = vmatmul.f32.vlgmr.msrb.gmra.mxu3 %v27_v20  ;;  %1378 = vmatpush.msra.mxu0 %v229_v21  ;;  %v327_v20 = vld [vmem:[%s6277_s1 + $0x768] sm:$0xff]  ;;  %v344_v21 = vld [vmem:[%s6277_s1 + $0x7f0] sm:$0xff] }
  0x4e   :  { %1397 = vmatpush.msra.mxu1 %v246_v22  ;;  %1418 = vmatpush.msra.mxu2 %v261_v23  ;;  %v294_v22 = vld [vmem:[%s6277_s1 + $0x660] sm:$0xff]  ;;  %v311_v23 = vld [vmem:[%s6277_s1 + $0x6e8] sm:$0xff] }
  0x4f   :  { %1437 = vmatpush.msra.mxu3 %v278_v24  ;;  %1330 = vmatmul.f32.vlgmr.msrb.gmra.mxu1 %v25_v25  ;;  %v326_v24 = vld [vmem:[%s6277_s1 + $0x760] sm:$0xff]  ;;  %v343_v25 = vld [vmem:[%s6277_s1 + $0x7e8] sm:$0xff] }
  0x50   :  { %1379 = vmatpush.msra.mxu0 %v228_v26  ;;  %1398 = vmatpush.msra.mxu1 %v245_v27  ;;  %v293_v26 = vld [vmem:[%s6277_s1 + $0x658] sm:$0xff]  ;;  %v310_v27 = vld [vmem:[%s6277_s1 + $0x6e0] sm:$0xff] }
  0x51   :  { %1419 = vmatpush.msra.mxu2 %v260_v28  ;;  %1438 = vmatpush.msra.mxu3 %v277_v29  ;;  %v325_v28 = vld [vmem:[%s6277_s1 + $0x758] sm:$0xff]  ;;  %v342_v29 = vld [vmem:[%s6277_s1 + $0x7e0] sm:$0xff] }
  0x52   :  { %1380 = vmatpush.msra.mxu0 %v227_v30  ;;  %1399 = vmatpush.msra.mxu1 %v244_v31  ;;  %v292_v30 = vld [vmem:[%s6277_s1 + $0x650] sm:$0xff]  ;;  %v309_v31 = vld [vmem:[%s6277_s1 + $0x6d8] sm:$0xff] }
  0x53   :  { %1420 = vmatpush.msra.mxu2 %v259_v32  ;;  %1439 = vmatpush.msra.mxu3 %v276_v33  ;;  %v324_v32 = vld [vmem:[%s6277_s1 + $0x750] sm:$0xff]  ;;  %v341_v33 = vld [vmem:[%s6277_s1 + $0x7d8] sm:$0xff] }
  0x54   :  { %1381 = vmatpush.msra.mxu0 %v226_v34  ;;  %1400 = vmatpush.msra.mxu1 %v243_v35  ;;  %v291_v34 = vld [vmem:[%s6277_s1 + $0x648] sm:$0xff]  ;;  %v308_v35 = vld [vmem:[%s6277_s1 + $0x6d0] sm:$0xff] }
  0x55   :  { %1421 = vmatpush.msra.mxu2 %v258_v36  ;;  %1440 = vmatpush.msra.mxu3 %v275_v37  ;;  %v323_v36 = vld [vmem:[%s6277_s1 + $0x748] sm:$0xff]  ;;  %v340_v37 = vld [vmem:[%s6277_s1 + $0x7d0] sm:$0xff] }
  0x56   :  { %1382 = vmatpush.msra.mxu0 %v225_v38  ;;  %1401 = vmatpush.msra.mxu1 %v242_v39  ;;  %v290_v38 = vld [vmem:[%s6277_s1 + $0x640] sm:$0xff]  ;;  %v307_v39 = vld [vmem:[%s6277_s1 + $0x6c8] sm:$0xff] }
  0x57   :  { %1422 = vmatpush.msra.mxu2 %v257_v40  ;;  %1441 = vmatpush.msra.mxu3 %v274_v41  ;;  %v322_v40 = vld [vmem:[%s6277_s1 + $0x740] sm:$0xff]  ;;  %v339_v41 = vld [vmem:[%s6277_s1 + $0x7c8] sm:$0xff] }
  0x58   :  { %1383 = vmatpush.msra.mxu0 %v224_v42  ;;  %1402 = vmatpush.msra.mxu1 %v241_v43  ;;  %v289_v42 = vld [vmem:[%s6277_s1 + $0x638] sm:$0xff]  ;;  %v306_v43 = vld [vmem:[%s6277_s1 + $0x6c0] sm:$0xff] }
  0x59   :  { %1423 = vmatpush.msra.mxu2 %v256_v44  ;;  %1442 = vmatpush.msra.mxu3 %v273_v45  ;;  %v321_v44 = vld [vmem:[%s6277_s1 + $0x738] sm:$0xff]  ;;  %v338_v45 = vld [vmem:[%s6277_s1 + $0x7c0] sm:$0xff] }
  0x5a   :  { %1384 = vmatpush.msra.mxu0 %v223_v46  ;;  %1403 = vmatpush.msra.mxu1 %v240_v47  ;;  %v288_v46 = vld [vmem:[%s6277_s1 + $0x630] sm:$0xff]  ;;  %v305_v47 = vld [vmem:[%s6277_s1 + $0x6b8] sm:$0xff] }
  0x5b   :  { %1424 = vmatpush.msra.mxu2 %v255_v48  ;;  %1443 = vmatpush.msra.mxu3 %v272_v49  ;;  %v320_v48 = vld [vmem:[%s6277_s1 + $0x730] sm:$0xff]  ;;  %v337_v49 = vld [vmem:[%s6277_s1 + $0x7b8] sm:$0xff] }
  0x5c   :  { %1385 = vmatpush.msra.mxu0 %v222_v50  ;;  %1404 = vmatpush.msra.mxu1 %v239_v51  ;;  %v287_v50 = vld [vmem:[%s6277_s1 + $0x628] sm:$0xff]  ;;  %v304_v51 = vld [vmem:[%s6277_s1 + $0x6b0] sm:$0xff] }
  0x5d   :  { %1425 = vmatpush.msra.mxu2 %v254_v52  ;;  %1444 = vmatpush.msra.mxu3 %v271_v53  ;;  %v319_v52 = vld [vmem:[%s6277_s1 + $0x728] sm:$0xff]  ;;  %v336_v53 = vld [vmem:[%s6277_s1 + $0x7b0] sm:$0xff] }
  0x5e   :  { %1386 = vmatpush.msra.mxu0 %v221_v54  ;;  %1405 = vmatpush.msra.mxu1 %v238_v55  ;;  %v286_v54 = vld [vmem:[%s6277_s1 + $0x620] sm:$0xff]  ;;  %v303_v55 = vld [vmem:[%s6277_s1 + $0x6a8] sm:$0xff] }
  0x5f   :  { %1426 = vmatpush.msra.mxu2 %v253_v56  ;;  %1445 = vmatpush.msra.mxu3 %v270_v57  ;;  %v318_v56 = vld [vmem:[%s6277_s1 + $0x720] sm:$0xff]  ;;  %v335_v57 = vld [vmem:[%s6277_s1 + $0x7a8] sm:$0xff] }
  0x60   :  { %1387 = vmatpush.msra.mxu0 %v220_v58  ;;  %1406 = vmatpush.msra.mxu1 %v237_v59  ;;  %v285_v58 = vld [vmem:[%s6277_s1 + $0x618] sm:$0xff]  ;;  %v302_v59 = vld [vmem:[%s6277_s1 + $0x6a0] sm:$0xff] }
  0x61   :  { %1427 = vmatpush.msra.mxu2 %v252_v60  ;;  %1446 = vmatpush.msra.mxu3 %v269_v61  ;;  %v317_v60 = vld [vmem:[%s6277_s1 + $0x718] sm:$0xff]  ;;  %v334_v61 = vld [vmem:[%s6277_s1 + $0x7a0] sm:$0xff] }
  0x62   :  { %1388 = vmatpush.msra.mxu0 %v219_v62  ;;  %1407 = vmatpush.msra.mxu1 %v236_v63  ;;  %v284_v62 = vld [vmem:[%s6277_s1 + $0x610] sm:$0xff]  ;;  %v301_v63 = vld [vmem:[%s6277_s1 + $0x698] sm:$0xff] }
  0x63   :  { %1428 = vmatpush.msra.mxu2 %v251_v0  ;;  %1447 = vmatpush.msra.mxu3 %v268_v1  ;;  %v316_v0 = vld [vmem:[%s6277_s1 + $0x710] sm:$0xff]  ;;  %v333_v1 = vld [vmem:[%s6277_s1 + $0x798] sm:$0xff] }
  0x64   :  { %1389 = vmatpush.msra.mxu0 %v218_v2  ;;  %1408 = vmatpush.msra.mxu1 %v235_v3  ;;  %v283_v2 = vld [vmem:[%s6277_s1 + $0x608] sm:$0xff]  ;;  %v300_v3 = vld [vmem:[%s6277_s1 + $0x690] sm:$0xff] }
  0x65   :  { %1429 = vmatpush.msra.mxu2 %v250_v4  ;;  %1448 = vmatpush.msra.mxu3 %v267_v5  ;;  %v315_v4 = vld [vmem:[%s6277_s1 + $0x708] sm:$0xff]  ;;  %v332_v5 = vld [vmem:[%s6277_s1 + $0x790] sm:$0xff] }
  0x66   :  { %1390 = vmatmul.f32.vlgmr.msra.gmra.mxu0 %v28_v6  ;;  %1430 = vmatmul.f32.vlgmr.msra.gmra.mxu2 %v30_v7  ;;  %v282_v6 = vld [vmem:[%s6277_s1 + $0x600] sm:$0xff]  ;;  %v299_v7 = vld [vmem:[%s6277_s1 + $0x688] sm:$0xff] }
  0x67   :  { %1454 = vmatpush.msrb.mxu0 %v297_v8  ;;  %1494 = vmatpush.msrb.mxu2 %v329_v9  ;;  %v314_v8 = vld [vmem:[%s6277_s1 + $0x700] sm:$0xff]  ;;  %v331_v9 = vld [vmem:[%s6277_s1 + $0x788] sm:$0xff] }
  0x68   :  { %1409 = vmatpush.msra.mxu1 %v234_v10  ;;  %1449 = vmatpush.msra.mxu3 %v266_v11  ;;  %v32_v10 = vld [vmem:[%s6278_s0 + $0x60] sm:$0xff]  ;;  %v34_v11 = vld [vmem:[%s6278_s0 + $0x70] sm:$0xff] }
  0x69   :  { %1410 = vmatmul.f32.vlgmr.msra.gmra.mxu1 %v29_v12  ;;  %1450 = vmatmul.f32.vlgmr.msra.gmra.mxu3 %v31_v13  ;;  %v361_v12 = vld [vmem:[%s6277_s1 + $0x878] sm:$0xff] }
  0x6a   :  { %1455 = vmatpush.msrb.mxu0 %v296_v14  ;;  %1474 = vmatpush.msrb.mxu1 %v313_v15  ;;  %v393_v13 = vld [vmem:[%s6277_s1 + $0x978] sm:$0xff]  ;;  %v298_v14 = vld [vmem:[%s6277_s1 + $0x680] sm:$0xff] }
  0x6b   :  { %1495 = vmatpush.msrb.mxu2 %v328_v16  ;;  %1514 = vmatpush.msrb.mxu3 %v345_v17  ;;  %v330_v15 = vld [vmem:[%s6277_s1 + $0x780] sm:$0xff]  ;;  %v33_v16 = vld [vmem:[%s6278_s0 + $0x68] sm:$0xff]  ;;  %v35_v17 = vld [vmem:[%s6278_s0 + $0x78] sm:$0xff] }
  0x6c   :  { %1456 = vmatpush.msrb.mxu0 %v295_v18  ;;  %1475 = vmatpush.msrb.mxu1 %v312_v19  ;;  %v360_v18 = vld [vmem:[%s6277_s1 + $0x870] sm:$0xff]  ;;  %v377_v19 = vld [vmem:[%s6277_s1 + $0x8f8] sm:$0xff] }
  0x6d   :  { %1496 = vmatpush.msrb.mxu2 %v327_v20  ;;  %1515 = vmatpush.msrb.mxu3 %v344_v21  ;;  %v392_v20 = vld [vmem:[%s6277_s1 + $0x970] sm:$0xff]  ;;  %v409_v21 = vld [vmem:[%s6277_s1 + $0x9f8] sm:$0xff] }
  0x6e   :  { %1457 = vmatpush.msrb.mxu0 %v294_v22  ;;  %1476 = vmatpush.msrb.mxu1 %v311_v23  ;;  %v359_v22 = vld [vmem:[%s6277_s1 + $0x868] sm:$0xff]  ;;  %v376_v23 = vld [vmem:[%s6277_s1 + $0x8f0] sm:$0xff] }
  0x6f   :  { %1497 = vmatpush.msrb.mxu2 %v326_v24  ;;  %1516 = vmatpush.msrb.mxu3 %v343_v25  ;;  %v391_v24 = vld [vmem:[%s6277_s1 + $0x968] sm:$0xff]  ;;  %v408_v25 = vld [vmem:[%s6277_s1 + $0x9f0] sm:$0xff] }
  0x70   :  { %1458 = vmatpush.msrb.mxu0 %v293_v26  ;;  %1477 = vmatpush.msrb.mxu1 %v310_v27  ;;  %v358_v26 = vld [vmem:[%s6277_s1 + $0x860] sm:$0xff]  ;;  %v375_v27 = vld [vmem:[%s6277_s1 + $0x8e8] sm:$0xff] }
  0x71   :  { %1498 = vmatpush.msrb.mxu2 %v325_v28  ;;  %1517 = vmatpush.msrb.mxu3 %v342_v29  ;;  %v390_v28 = vld [vmem:[%s6277_s1 + $0x960] sm:$0xff]  ;;  %v407_v29 = vld [vmem:[%s6277_s1 + $0x9e8] sm:$0xff] }
  0x72   :  { %1459 = vmatpush.msrb.mxu0 %v292_v30  ;;  %1478 = vmatpush.msrb.mxu1 %v309_v31  ;;  %v357_v30 = vld [vmem:[%s6277_s1 + $0x858] sm:$0xff]  ;;  %v374_v31 = vld [vmem:[%s6277_s1 + $0x8e0] sm:$0xff] }
  0x73   :  { %1499 = vmatpush.msrb.mxu2 %v324_v32  ;;  %1518 = vmatpush.msrb.mxu3 %v341_v33  ;;  %v389_v32 = vld [vmem:[%s6277_s1 + $0x958] sm:$0xff]  ;;  %v406_v33 = vld [vmem:[%s6277_s1 + $0x9e0] sm:$0xff] }
  0x74   :  { %1460 = vmatpush.msrb.mxu0 %v291_v34  ;;  %1479 = vmatpush.msrb.mxu1 %v308_v35  ;;  %v356_v34 = vld [vmem:[%s6277_s1 + $0x850] sm:$0xff]  ;;  %v373_v35 = vld [vmem:[%s6277_s1 + $0x8d8] sm:$0xff] }
  0x75   :  { %1500 = vmatpush.msrb.mxu2 %v323_v36  ;;  %1519 = vmatpush.msrb.mxu3 %v340_v37  ;;  %v388_v36 = vld [vmem:[%s6277_s1 + $0x950] sm:$0xff]  ;;  %v405_v37 = vld [vmem:[%s6277_s1 + $0x9d8] sm:$0xff] }
  0x76   :  { %1461 = vmatpush.msrb.mxu0 %v290_v38  ;;  %1480 = vmatpush.msrb.mxu1 %v307_v39  ;;  %v355_v38 = vld [vmem:[%s6277_s1 + $0x848] sm:$0xff]  ;;  %v372_v39 = vld [vmem:[%s6277_s1 + $0x8d0] sm:$0xff] }
  0x77   :  { %1501 = vmatpush.msrb.mxu2 %v322_v40  ;;  %1520 = vmatpush.msrb.mxu3 %v339_v41  ;;  %v387_v40 = vld [vmem:[%s6277_s1 + $0x948] sm:$0xff]  ;;  %v404_v41 = vld [vmem:[%s6277_s1 + $0x9d0] sm:$0xff] }
  0x78   :  { %1462 = vmatpush.msrb.mxu0 %v289_v42  ;;  %1481 = vmatpush.msrb.mxu1 %v306_v43  ;;  %v354_v42 = vld [vmem:[%s6277_s1 + $0x840] sm:$0xff]  ;;  %v371_v43 = vld [vmem:[%s6277_s1 + $0x8c8] sm:$0xff] }
  0x79   :  { %1502 = vmatpush.msrb.mxu2 %v321_v44  ;;  %1521 = vmatpush.msrb.mxu3 %v338_v45  ;;  %v386_v44 = vld [vmem:[%s6277_s1 + $0x940] sm:$0xff]  ;;  %v403_v45 = vld [vmem:[%s6277_s1 + $0x9c8] sm:$0xff] }
  0x7a   :  { %1463 = vmatpush.msrb.mxu0 %v288_v46  ;;  %1482 = vmatpush.msrb.mxu1 %v305_v47  ;;  %v353_v46 = vld [vmem:[%s6277_s1 + $0x838] sm:$0xff]  ;;  %v370_v47 = vld [vmem:[%s6277_s1 + $0x8c0] sm:$0xff] }
  0x7b   :  { %1503 = vmatpush.msrb.mxu2 %v320_v48  ;;  %1522 = vmatpush.msrb.mxu3 %v337_v49  ;;  %v385_v48 = vld [vmem:[%s6277_s1 + $0x938] sm:$0xff]  ;;  %v402_v49 = vld [vmem:[%s6277_s1 + $0x9c0] sm:$0xff] }
  0x7c   :  { %1464 = vmatpush.msrb.mxu0 %v287_v50  ;;  %1483 = vmatpush.msrb.mxu1 %v304_v51  ;;  %v352_v50 = vld [vmem:[%s6277_s1 + $0x830] sm:$0xff]  ;;  %v369_v51 = vld [vmem:[%s6277_s1 + $0x8b8] sm:$0xff] }
  0x7d   :  { %1504 = vmatpush.msrb.mxu2 %v319_v52  ;;  %1523 = vmatpush.msrb.mxu3 %v336_v53  ;;  %v384_v52 = vld [vmem:[%s6277_s1 + $0x930] sm:$0xff]  ;;  %v401_v53 = vld [vmem:[%s6277_s1 + $0x9b8] sm:$0xff] }
  0x7e   :  { %1465 = vmatpush.msrb.mxu0 %v286_v54  ;;  %1484 = vmatpush.msrb.mxu1 %v303_v55  ;;  %v351_v54 = vld [vmem:[%s6277_s1 + $0x828] sm:$0xff]  ;;  %v368_v55 = vld [vmem:[%s6277_s1 + $0x8b0] sm:$0xff] }
  0x7f   :  { %1505 = vmatpush.msrb.mxu2 %v318_v56  ;;  %1524 = vmatpush.msrb.mxu3 %v335_v57  ;;  %v383_v56 = vld [vmem:[%s6277_s1 + $0x928] sm:$0xff]  ;;  %v400_v57 = vld [vmem:[%s6277_s1 + $0x9b0] sm:$0xff] }
  0x80   :  { %1466 = vmatpush.msrb.mxu0 %v285_v58  ;;  %1485 = vmatpush.msrb.mxu1 %v302_v59  ;;  %v350_v58 = vld [vmem:[%s6277_s1 + $0x820] sm:$0xff]  ;;  %v367_v59 = vld [vmem:[%s6277_s1 + $0x8a8] sm:$0xff] }
  0x81   :  { %1506 = vmatpush.msrb.mxu2 %v317_v60  ;;  %1525 = vmatpush.msrb.mxu3 %v334_v61  ;;  %v382_v60 = vld [vmem:[%s6277_s1 + $0x920] sm:$0xff]  ;;  %v399_v61 = vld [vmem:[%s6277_s1 + $0x9a8] sm:$0xff] }
  0x82   :  { %1467 = vmatpush.msrb.mxu0 %v284_v62  ;;  %1486 = vmatpush.msrb.mxu1 %v301_v63  ;;  %v349_v62 = vld [vmem:[%s6277_s1 + $0x818] sm:$0xff]  ;;  %v366_v63 = vld [vmem:[%s6277_s1 + $0x8a0] sm:$0xff] }
  0x83   :  { %1507 = vmatpush.msrb.mxu2 %v316_v0  ;;  %1526 = vmatpush.msrb.mxu3 %v333_v1  ;;  %v381_v0 = vld [vmem:[%s6277_s1 + $0x918] sm:$0xff]  ;;  %v398_v1 = vld [vmem:[%s6277_s1 + $0x9a0] sm:$0xff] }
  0x84   :  { %1468 = vmatpush.msrb.mxu0 %v283_v2  ;;  %1487 = vmatpush.msrb.mxu1 %v300_v3  ;;  %v348_v2 = vld [vmem:[%s6277_s1 + $0x810] sm:$0xff]  ;;  %v365_v3 = vld [vmem:[%s6277_s1 + $0x898] sm:$0xff] }
  0x85   :  { %1508 = vmatpush.msrb.mxu2 %v315_v4  ;;  %1527 = vmatpush.msrb.mxu3 %v332_v5  ;;  %v380_v4 = vld [vmem:[%s6277_s1 + $0x910] sm:$0xff]  ;;  %v397_v5 = vld [vmem:[%s6277_s1 + $0x998] sm:$0xff] }
  0x86   :  { %1469 = vmatpush.msrb.mxu0 %v282_v6  ;;  %1488 = vmatpush.msrb.mxu1 %v299_v7  ;;  %v347_v6 = vld [vmem:[%s6277_s1 + $0x808] sm:$0xff]  ;;  %v364_v7 = vld [vmem:[%s6277_s1 + $0x890] sm:$0xff] }
  0x87   :  { %1509 = vmatpush.msrb.mxu2 %v314_v8  ;;  %1528 = vmatpush.msrb.mxu3 %v331_v9  ;;  %v379_v8 = vld [vmem:[%s6277_s1 + $0x908] sm:$0xff]  ;;  %v396_v9 = vld [vmem:[%s6277_s1 + $0x990] sm:$0xff] }
  0x88   :  { %1470 = vmatmul.f32.vlgmr.msrb.gmra.mxu0 %v32_v10  ;;  %1510 = vmatmul.f32.vlgmr.msrb.gmra.mxu2 %v34_v11  ;;  %v346_v10 = vld [vmem:[%s6277_s1 + $0x800] sm:$0xff]  ;;  %v363_v11 = vld [vmem:[%s6277_s1 + $0x888] sm:$0xff] }
  0x89   :  { %1534 = vmatpush.msra.mxu0 %v361_v12  ;;  %1574 = vmatpush.msra.mxu2 %v393_v13  ;;  %v378_v12 = vld [vmem:[%s6277_s1 + $0x900] sm:$0xff]  ;;  %v395_v13 = vld [vmem:[%s6277_s1 + $0x988] sm:$0xff] }
  0x8a   :  { %1489 = vmatpush.msrb.mxu1 %v298_v14  ;;  %1529 = vmatpush.msrb.mxu3 %v330_v15  ;;  %v36_v14 = vld [vmem:[%s6278_s0 + $0x80] sm:$0xff]  ;;  %v38_v15 = vld [vmem:[%s6278_s0 + $0x90] sm:$0xff] }
  0x8b   :  { %1490 = vmatmul.f32.vlgmr.msrb.gmra.mxu1 %v33_v16  ;;  %1530 = vmatmul.f32.vlgmr.msrb.gmra.mxu3 %v35_v17  ;;  %v425_v16 = vld [vmem:[%s6277_s1 + $0xa78] sm:$0xff] }
  0x8c   :  { %1535 = vmatpush.msra.mxu0 %v360_v18  ;;  %1554 = vmatpush.msra.mxu1 %v377_v19  ;;  %v457_v17 = vld [vmem:[%s6277_s1 + $0xb78] sm:$0xff]  ;;  %v362_v18 = vld [vmem:[%s6277_s1 + $0x880] sm:$0xff] }
  0x8d   :  { %1575 = vmatpush.msra.mxu2 %v392_v20  ;;  %1594 = vmatpush.msra.mxu3 %v409_v21  ;;  %v394_v19 = vld [vmem:[%s6277_s1 + $0x980] sm:$0xff]  ;;  %v37_v20 = vld [vmem:[%s6278_s0 + $0x88] sm:$0xff]  ;;  %v39_v21 = vld [vmem:[%s6278_s0 + $0x98] sm:$0xff] }
  0x8e   :  { %1536 = vmatpush.msra.mxu0 %v359_v22  ;;  %1555 = vmatpush.msra.mxu1 %v376_v23  ;;  %v424_v22 = vld [vmem:[%s6277_s1 + $0xa70] sm:$0xff]  ;;  %v441_v23 = vld [vmem:[%s6277_s1 + $0xaf8] sm:$0xff] }
  0x8f   :  { %1576 = vmatpush.msra.mxu2 %v391_v24  ;;  %1595 = vmatpush.msra.mxu3 %v408_v25  ;;  %v456_v24 = vld [vmem:[%s6277_s1 + $0xb70] sm:$0xff]  ;;  %v473_v25 = vld [vmem:[%s6277_s1 + $0xbf8] sm:$0xff] }
  0x90   :  { %1537 = vmatpush.msra.mxu0 %v358_v26  ;;  %1556 = vmatpush.msra.mxu1 %v375_v27  ;;  %v423_v26 = vld [vmem:[%s6277_s1 + $0xa68] sm:$0xff]  ;;  %v440_v27 = vld [vmem:[%s6277_s1 + $0xaf0] sm:$0xff] }
  0x91   :  { %1577 = vmatpush.msra.mxu2 %v390_v28  ;;  %1596 = vmatpush.msra.mxu3 %v407_v29  ;;  %v455_v28 = vld [vmem:[%s6277_s1 + $0xb68] sm:$0xff]  ;;  %v472_v29 = vld [vmem:[%s6277_s1 + $0xbf0] sm:$0xff] }
  0x92   :  { %1538 = vmatpush.msra.mxu0 %v357_v30  ;;  %1557 = vmatpush.msra.mxu1 %v374_v31  ;;  %v422_v30 = vld [vmem:[%s6277_s1 + $0xa60] sm:$0xff]  ;;  %v439_v31 = vld [vmem:[%s6277_s1 + $0xae8] sm:$0xff] }
  0x93   :  { %1578 = vmatpush.msra.mxu2 %v389_v32  ;;  %1597 = vmatpush.msra.mxu3 %v406_v33  ;;  %v454_v32 = vld [vmem:[%s6277_s1 + $0xb60] sm:$0xff]  ;;  %v471_v33 = vld [vmem:[%s6277_s1 + $0xbe8] sm:$0xff] }
  0x94   :  { %1539 = vmatpush.msra.mxu0 %v356_v34  ;;  %1558 = vmatpush.msra.mxu1 %v373_v35  ;;  %v421_v34 = vld [vmem:[%s6277_s1 + $0xa58] sm:$0xff]  ;;  %v438_v35 = vld [vmem:[%s6277_s1 + $0xae0] sm:$0xff] }
  0x95   :  { %1579 = vmatpush.msra.mxu2 %v388_v36  ;;  %1598 = vmatpush.msra.mxu3 %v405_v37  ;;  %v453_v36 = vld [vmem:[%s6277_s1 + $0xb58] sm:$0xff]  ;;  %v470_v37 = vld [vmem:[%s6277_s1 + $0xbe0] sm:$0xff] }
  0x96   :  { %1540 = vmatpush.msra.mxu0 %v355_v38  ;;  %1559 = vmatpush.msra.mxu1 %v372_v39  ;;  %v420_v38 = vld [vmem:[%s6277_s1 + $0xa50] sm:$0xff]  ;;  %v437_v39 = vld [vmem:[%s6277_s1 + $0xad8] sm:$0xff] }
  0x97   :  { %1580 = vmatpush.msra.mxu2 %v387_v40  ;;  %1599 = vmatpush.msra.mxu3 %v404_v41  ;;  %v452_v40 = vld [vmem:[%s6277_s1 + $0xb50] sm:$0xff]  ;;  %v469_v41 = vld [vmem:[%s6277_s1 + $0xbd8] sm:$0xff] }
  0x98   :  { %1541 = vmatpush.msra.mxu0 %v354_v42  ;;  %1560 = vmatpush.msra.mxu1 %v371_v43  ;;  %v419_v42 = vld [vmem:[%s6277_s1 + $0xa48] sm:$0xff]  ;;  %v436_v43 = vld [vmem:[%s6277_s1 + $0xad0] sm:$0xff] }
  0x99   :  { %1581 = vmatpush.msra.mxu2 %v386_v44  ;;  %1600 = vmatpush.msra.mxu3 %v403_v45  ;;  %v451_v44 = vld [vmem:[%s6277_s1 + $0xb48] sm:$0xff]  ;;  %v468_v45 = vld [vmem:[%s6277_s1 + $0xbd0] sm:$0xff] }
  0x9a   :  { %1542 = vmatpush.msra.mxu0 %v353_v46  ;;  %1561 = vmatpush.msra.mxu1 %v370_v47  ;;  %v418_v46 = vld [vmem:[%s6277_s1 + $0xa40] sm:$0xff]  ;;  %v435_v47 = vld [vmem:[%s6277_s1 + $0xac8] sm:$0xff] }
  0x9b   :  { %1582 = vmatpush.msra.mxu2 %v385_v48  ;;  %1601 = vmatpush.msra.mxu3 %v402_v49  ;;  %v450_v48 = vld [vmem:[%s6277_s1 + $0xb40] sm:$0xff]  ;;  %v467_v49 = vld [vmem:[%s6277_s1 + $0xbc8] sm:$0xff] }
  0x9c   :  { %1543 = vmatpush.msra.mxu0 %v352_v50  ;;  %1562 = vmatpush.msra.mxu1 %v369_v51  ;;  %v417_v50 = vld [vmem:[%s6277_s1 + $0xa38] sm:$0xff]  ;;  %v434_v51 = vld [vmem:[%s6277_s1 + $0xac0] sm:$0xff] }
  0x9d   :  { %1583 = vmatpush.msra.mxu2 %v384_v52  ;;  %1602 = vmatpush.msra.mxu3 %v401_v53  ;;  %v449_v52 = vld [vmem:[%s6277_s1 + $0xb38] sm:$0xff]  ;;  %v466_v53 = vld [vmem:[%s6277_s1 + $0xbc0] sm:$0xff] }
  0x9e   :  { %1544 = vmatpush.msra.mxu0 %v351_v54  ;;  %1563 = vmatpush.msra.mxu1 %v368_v55  ;;  %v416_v54 = vld [vmem:[%s6277_s1 + $0xa30] sm:$0xff]  ;;  %v433_v55 = vld [vmem:[%s6277_s1 + $0xab8] sm:$0xff] }
  0x9f   :  { %1584 = vmatpush.msra.mxu2 %v383_v56  ;;  %1603 = vmatpush.msra.mxu3 %v400_v57  ;;  %v448_v56 = vld [vmem:[%s6277_s1 + $0xb30] sm:$0xff]  ;;  %v465_v57 = vld [vmem:[%s6277_s1 + $0xbb8] sm:$0xff] }
  0xa0   :  { %1545 = vmatpush.msra.mxu0 %v350_v58  ;;  %1564 = vmatpush.msra.mxu1 %v367_v59  ;;  %v415_v58 = vld [vmem:[%s6277_s1 + $0xa28] sm:$0xff]  ;;  %v432_v59 = vld [vmem:[%s6277_s1 + $0xab0] sm:$0xff] }
  0xa1   :  { %1585 = vmatpush.msra.mxu2 %v382_v60  ;;  %1604 = vmatpush.msra.mxu3 %v399_v61  ;;  %v447_v60 = vld [vmem:[%s6277_s1 + $0xb28] sm:$0xff]  ;;  %v464_v61 = vld [vmem:[%s6277_s1 + $0xbb0] sm:$0xff] }
  0xa2   :  { %1546 = vmatpush.msra.mxu0 %v349_v62  ;;  %1565 = vmatpush.msra.mxu1 %v366_v63  ;;  %v414_v62 = vld [vmem:[%s6277_s1 + $0xa20] sm:$0xff]  ;;  %v431_v63 = vld [vmem:[%s6277_s1 + $0xaa8] sm:$0xff] }
  0xa3   :  { %1586 = vmatpush.msra.mxu2 %v381_v0  ;;  %1605 = vmatpush.msra.mxu3 %v398_v1  ;;  %v446_v0 = vld [vmem:[%s6277_s1 + $0xb20] sm:$0xff]  ;;  %v463_v1 = vld [vmem:[%s6277_s1 + $0xba8] sm:$0xff] }
  0xa4   :  { %1547 = vmatpush.msra.mxu0 %v348_v2  ;;  %1566 = vmatpush.msra.mxu1 %v365_v3  ;;  %v413_v2 = vld [vmem:[%s6277_s1 + $0xa18] sm:$0xff]  ;;  %v430_v3 = vld [vmem:[%s6277_s1 + $0xaa0] sm:$0xff] }
  0xa5   :  { %1587 = vmatpush.msra.mxu2 %v380_v4  ;;  %1606 = vmatpush.msra.mxu3 %v397_v5  ;;  %v445_v4 = vld [vmem:[%s6277_s1 + $0xb18] sm:$0xff]  ;;  %v462_v5 = vld [vmem:[%s6277_s1 + $0xba0] sm:$0xff] }
  0xa6   :  { %1548 = vmatpush.msra.mxu0 %v347_v6  ;;  %1567 = vmatpush.msra.mxu1 %v364_v7  ;;  %v412_v6 = vld [vmem:[%s6277_s1 + $0xa10] sm:$0xff]  ;;  %v429_v7 = vld [vmem:[%s6277_s1 + $0xa98] sm:$0xff] }
  0xa7   :  { %1588 = vmatpush.msra.mxu2 %v379_v8  ;;  %1607 = vmatpush.msra.mxu3 %v396_v9  ;;  %v444_v8 = vld [vmem:[%s6277_s1 + $0xb10] sm:$0xff]  ;;  %v461_v9 = vld [vmem:[%s6277_s1 + $0xb98] sm:$0xff] }
  0xa8   :  { %1549 = vmatpush.msra.mxu0 %v346_v10  ;;  %1568 = vmatpush.msra.mxu1 %v363_v11  ;;  %v411_v10 = vld [vmem:[%s6277_s1 + $0xa08] sm:$0xff]  ;;  %v428_v11 = vld [vmem:[%s6277_s1 + $0xa90] sm:$0xff] }
  0xa9   :  { %1589 = vmatpush.msra.mxu2 %v378_v12  ;;  %1608 = vmatpush.msra.mxu3 %v395_v13  ;;  %v443_v12 = vld [vmem:[%s6277_s1 + $0xb08] sm:$0xff]  ;;  %v460_v13 = vld [vmem:[%s6277_s1 + $0xb90] sm:$0xff] }
  0xaa   :  { %1550 = vmatmul.f32.vlgmr.msra.gmra.mxu0 %v36_v14  ;;  %1590 = vmatmul.f32.vlgmr.msra.gmra.mxu2 %v38_v15  ;;  %v410_v14 = vld [vmem:[%s6277_s1 + $0xa00] sm:$0xff]  ;;  %v427_v15 = vld [vmem:[%s6277_s1 + $0xa88] sm:$0xff] }
  0xab   :  { %1614 = vmatpush.msrb.mxu0 %v425_v16  ;;  %1654 = vmatpush.msrb.mxu2 %v457_v17  ;;  %v442_v16 = vld [vmem:[%s6277_s1 + $0xb00] sm:$0xff]  ;;  %v459_v17 = vld [vmem:[%s6277_s1 + $0xb88] sm:$0xff] }
  0xac   :  { %1569 = vmatpush.msra.mxu1 %v362_v18  ;;  %1609 = vmatpush.msra.mxu3 %v394_v19  ;;  %v40_v18 = vld [vmem:[%s6278_s0 + $0xa0] sm:$0xff]  ;;  %v42_v19 = vld [vmem:[%s6278_s0 + $0xb0] sm:$0xff] }
  0xad   :  { %1570 = vmatmul.f32.vlgmr.msra.gmra.mxu1 %v37_v20  ;;  %1610 = vmatmul.f32.vlgmr.msra.gmra.mxu3 %v39_v21  ;;  %v489_v20 = vld [vmem:[%s6277_s1 + $0xc78] sm:$0xff] }
  0xae   :  { %1615 = vmatpush.msrb.mxu0 %v424_v22  ;;  %1634 = vmatpush.msrb.mxu1 %v441_v23  ;;  %v521_v21 = vld [vmem:[%s6277_s1 + $0xd78] sm:$0xff]  ;;  %v426_v22 = vld [vmem:[%s6277_s1 + $0xa80] sm:$0xff] }
  0xaf   :  { %1655 = vmatpush.msrb.mxu2 %v456_v24  ;;  %1674 = vmatpush.msrb.mxu3 %v473_v25  ;;  %v458_v23 = vld [vmem:[%s6277_s1 + $0xb80] sm:$0xff]  ;;  %v41_v24 = vld [vmem:[%s6278_s0 + $0xa8] sm:$0xff]  ;;  %v43_v25 = vld [vmem:[%s6278_s0 + $0xb8] sm:$0xff] }
  0xb0   :  { %1616 = vmatpush.msrb.mxu0 %v423_v26  ;;  %1635 = vmatpush.msrb.mxu1 %v440_v27  ;;  %v488_v26 = vld [vmem:[%s6277_s1 + $0xc70] sm:$0xff]  ;;  %v505_v27 = vld [vmem:[%s6277_s1 + $0xcf8] sm:$0xff] }
  0xb1   :  { %1656 = vmatpush.msrb.mxu2 %v455_v28  ;;  %1675 = vmatpush.msrb.mxu3 %v472_v29  ;;  %v520_v28 = vld [vmem:[%s6277_s1 + $0xd70] sm:$0xff]  ;;  %v537_v29 = vld [vmem:[%s6277_s1 + $0xdf8] sm:$0xff] }
  0xb2   :  { %1617 = vmatpush.msrb.mxu0 %v422_v30  ;;  %1636 = vmatpush.msrb.mxu1 %v439_v31  ;;  %v487_v30 = vld [vmem:[%s6277_s1 + $0xc68] sm:$0xff]  ;;  %v504_v31 = vld [vmem:[%s6277_s1 + $0xcf0] sm:$0xff] }
  0xb3   :  { %1657 = vmatpush.msrb.mxu2 %v454_v32  ;;  %1676 = vmatpush.msrb.mxu3 %v471_v33  ;;  %v519_v32 = vld [vmem:[%s6277_s1 + $0xd68] sm:$0xff]  ;;  %v536_v33 = vld [vmem:[%s6277_s1 + $0xdf0] sm:$0xff] }
  0xb4   :  { %1618 = vmatpush.msrb.mxu0 %v421_v34  ;;  %1637 = vmatpush.msrb.mxu1 %v438_v35  ;;  %v486_v34 = vld [vmem:[%s6277_s1 + $0xc60] sm:$0xff]  ;;  %v503_v35 = vld [vmem:[%s6277_s1 + $0xce8] sm:$0xff] }
  0xb5   :  { %1658 = vmatpush.msrb.mxu2 %v453_v36  ;;  %1677 = vmatpush.msrb.mxu3 %v470_v37  ;;  %v518_v36 = vld [vmem:[%s6277_s1 + $0xd60] sm:$0xff]  ;;  %v535_v37 = vld [vmem:[%s6277_s1 + $0xde8] sm:$0xff] }
  0xb6   :  { %1619 = vmatpush.msrb.mxu0 %v420_v38  ;;  %1638 = vmatpush.msrb.mxu1 %v437_v39  ;;  %v485_v38 = vld [vmem:[%s6277_s1 + $0xc58] sm:$0xff]  ;;  %v502_v39 = vld [vmem:[%s6277_s1 + $0xce0] sm:$0xff] }
  0xb7   :  { %1659 = vmatpush.msrb.mxu2 %v452_v40  ;;  %1678 = vmatpush.msrb.mxu3 %v469_v41  ;;  %v517_v40 = vld [vmem:[%s6277_s1 + $0xd58] sm:$0xff]  ;;  %v534_v41 = vld [vmem:[%s6277_s1 + $0xde0] sm:$0xff] }
  0xb8   :  { %1620 = vmatpush.msrb.mxu0 %v419_v42  ;;  %1639 = vmatpush.msrb.mxu1 %v436_v43  ;;  %v484_v42 = vld [vmem:[%s6277_s1 + $0xc50] sm:$0xff]  ;;  %v501_v43 = vld [vmem:[%s6277_s1 + $0xcd8] sm:$0xff] }
  0xb9   :  { %1660 = vmatpush.msrb.mxu2 %v451_v44  ;;  %1679 = vmatpush.msrb.mxu3 %v468_v45  ;;  %v516_v44 = vld [vmem:[%s6277_s1 + $0xd50] sm:$0xff]  ;;  %v533_v45 = vld [vmem:[%s6277_s1 + $0xdd8] sm:$0xff] }
  0xba   :  { %1621 = vmatpush.msrb.mxu0 %v418_v46  ;;  %1640 = vmatpush.msrb.mxu1 %v435_v47  ;;  %v483_v46 = vld [vmem:[%s6277_s1 + $0xc48] sm:$0xff]  ;;  %v500_v47 = vld [vmem:[%s6277_s1 + $0xcd0] sm:$0xff] }
  0xbb   :  { %1661 = vmatpush.msrb.mxu2 %v450_v48  ;;  %1680 = vmatpush.msrb.mxu3 %v467_v49  ;;  %v515_v48 = vld [vmem:[%s6277_s1 + $0xd48] sm:$0xff]  ;;  %v532_v49 = vld [vmem:[%s6277_s1 + $0xdd0] sm:$0xff] }
  0xbc   :  { %1622 = vmatpush.msrb.mxu0 %v417_v50  ;;  %1641 = vmatpush.msrb.mxu1 %v434_v51  ;;  %v482_v50 = vld [vmem:[%s6277_s1 + $0xc40] sm:$0xff]  ;;  %v499_v51 = vld [vmem:[%s6277_s1 + $0xcc8] sm:$0xff] }
  0xbd   :  { %1662 = vmatpush.msrb.mxu2 %v449_v52  ;;  %1681 = vmatpush.msrb.mxu3 %v466_v53  ;;  %v514_v52 = vld [vmem:[%s6277_s1 + $0xd40] sm:$0xff]  ;;  %v531_v53 = vld [vmem:[%s6277_s1 + $0xdc8] sm:$0xff] }
  0xbe   :  { %1623 = vmatpush.msrb.mxu0 %v416_v54  ;;  %1642 = vmatpush.msrb.mxu1 %v433_v55  ;;  %v481_v54 = vld [vmem:[%s6277_s1 + $0xc38] sm:$0xff]  ;;  %v498_v55 = vld [vmem:[%s6277_s1 + $0xcc0] sm:$0xff] }
  0xbf   :  { %1663 = vmatpush.msrb.mxu2 %v448_v56  ;;  %1682 = vmatpush.msrb.mxu3 %v465_v57  ;;  %v513_v56 = vld [vmem:[%s6277_s1 + $0xd38] sm:$0xff]  ;;  %v530_v57 = vld [vmem:[%s6277_s1 + $0xdc0] sm:$0xff] }
  0xc0   :  { %1624 = vmatpush.msrb.mxu0 %v415_v58  ;;  %1643 = vmatpush.msrb.mxu1 %v432_v59  ;;  %v480_v58 = vld [vmem:[%s6277_s1 + $0xc30] sm:$0xff]  ;;  %v497_v59 = vld [vmem:[%s6277_s1 + $0xcb8] sm:$0xff] }
  0xc1   :  { %1664 = vmatpush.msrb.mxu2 %v447_v60  ;;  %1683 = vmatpush.msrb.mxu3 %v464_v61  ;;  %v512_v60 = vld [vmem:[%s6277_s1 + $0xd30] sm:$0xff]  ;;  %v529_v61 = vld [vmem:[%s6277_s1 + $0xdb8] sm:$0xff] }
  0xc2   :  { %1625 = vmatpush.msrb.mxu0 %v414_v62  ;;  %1644 = vmatpush.msrb.mxu1 %v431_v63  ;;  %v479_v62 = vld [vmem:[%s6277_s1 + $0xc28] sm:$0xff]  ;;  %v496_v63 = vld [vmem:[%s6277_s1 + $0xcb0] sm:$0xff] }
  0xc3   :  { %1665 = vmatpush.msrb.mxu2 %v446_v0  ;;  %1684 = vmatpush.msrb.mxu3 %v463_v1  ;;  %v511_v0 = vld [vmem:[%s6277_s1 + $0xd28] sm:$0xff]  ;;  %v528_v1 = vld [vmem:[%s6277_s1 + $0xdb0] sm:$0xff] }
  0xc4   :  { %1626 = vmatpush.msrb.mxu0 %v413_v2  ;;  %1645 = vmatpush.msrb.mxu1 %v430_v3  ;;  %v478_v2 = vld [vmem:[%s6277_s1 + $0xc20] sm:$0xff]  ;;  %v495_v3 = vld [vmem:[%s6277_s1 + $0xca8] sm:$0xff] }
  0xc5   :  { %1666 = vmatpush.msrb.mxu2 %v445_v4  ;;  %1685 = vmatpush.msrb.mxu3 %v462_v5  ;;  %v510_v4 = vld [vmem:[%s6277_s1 + $0xd20] sm:$0xff]  ;;  %v527_v5 = vld [vmem:[%s6277_s1 + $0xda8] sm:$0xff] }
  0xc6   :  { %1627 = vmatpush.msrb.mxu0 %v412_v6  ;;  %1646 = vmatpush.msrb.mxu1 %v429_v7  ;;  %v477_v6 = vld [vmem:[%s6277_s1 + $0xc18] sm:$0xff]  ;;  %v494_v7 = vld [vmem:[%s6277_s1 + $0xca0] sm:$0xff] }
  0xc7   :  { %1667 = vmatpush.msrb.mxu2 %v444_v8  ;;  %1686 = vmatpush.msrb.mxu3 %v461_v9  ;;  %v509_v8 = vld [vmem:[%s6277_s1 + $0xd18] sm:$0xff]  ;;  %v526_v9 = vld [vmem:[%s6277_s1 + $0xda0] sm:$0xff] }
  0xc8   :  { %1628 = vmatpush.msrb.mxu0 %v411_v10  ;;  %1647 = vmatpush.msrb.mxu1 %v428_v11  ;;  %v476_v10 = vld [vmem:[%s6277_s1 + $0xc10] sm:$0xff]  ;;  %v493_v11 = vld [vmem:[%s6277_s1 + $0xc98] sm:$0xff] }
  0xc9   :  { %1668 = vmatpush.msrb.mxu2 %v443_v12  ;;  %1687 = vmatpush.msrb.mxu3 %v460_v13  ;;  %v508_v12 = vld [vmem:[%s6277_s1 + $0xd10] sm:$0xff]  ;;  %v525_v13 = vld [vmem:[%s6277_s1 + $0xd98] sm:$0xff] }
  0xca   :  { %1629 = vmatpush.msrb.mxu0 %v410_v14  ;;  %1648 = vmatpush.msrb.mxu1 %v427_v15  ;;  %v475_v14 = vld [vmem:[%s6277_s1 + $0xc08] sm:$0xff]  ;;  %v492_v15 = vld [vmem:[%s6277_s1 + $0xc90] sm:$0xff] }
  0xcb   :  { %1669 = vmatpush.msrb.mxu2 %v442_v16  ;;  %1688 = vmatpush.msrb.mxu3 %v459_v17  ;;  %v507_v16 = vld [vmem:[%s6277_s1 + $0xd08] sm:$0xff]  ;;  %v524_v17 = vld [vmem:[%s6277_s1 + $0xd90] sm:$0xff] }
  0xcc   :  { %1630 = vmatmul.f32.vlgmr.msrb.gmra.mxu0 %v40_v18  ;;  %1670 = vmatmul.f32.vlgmr.msrb.gmra.mxu2 %v42_v19  ;;  %v474_v18 = vld [vmem:[%s6277_s1 + $0xc00] sm:$0xff]  ;;  %v491_v19 = vld [vmem:[%s6277_s1 + $0xc88] sm:$0xff] }
  0xcd   :  { %1694 = vmatpush.msra.mxu0 %v489_v20  ;;  %1734 = vmatpush.msra.mxu2 %v521_v21  ;;  %v506_v20 = vld [vmem:[%s6277_s1 + $0xd00] sm:$0xff]  ;;  %v523_v21 = vld [vmem:[%s6277_s1 + $0xd88] sm:$0xff] }
  0xce   :  { %1649 = vmatpush.msrb.mxu1 %v426_v22  ;;  %1689 = vmatpush.msrb.mxu3 %v458_v23  ;;  %v44_v22 = vld [vmem:[%s6278_s0 + $0xc0] sm:$0xff]  ;;  %v46_v23 = vld [vmem:[%s6278_s0 + $0xd0] sm:$0xff] }
  0xcf   :  { %1650 = vmatmul.f32.vlgmr.msrb.gmra.mxu1 %v41_v24  ;;  %1690 = vmatmul.f32.vlgmr.msrb.gmra.mxu3 %v43_v25  ;;  %v553_v24 = vld [vmem:[%s6277_s1 + $0xe78] sm:$0xff] }
  0xd0   :  { %1695 = vmatpush.msra.mxu0 %v488_v26  ;;  %1714 = vmatpush.msra.mxu1 %v505_v27  ;;  %v585_v25 = vld [vmem:[%s6277_s1 + $0xf78] sm:$0xff]  ;;  %v490_v26 = vld [vmem:[%s6277_s1 + $0xc80] sm:$0xff] }
  0xd1   :  { %1735 = vmatpush.msra.mxu2 %v520_v28  ;;  %1754 = vmatpush.msra.mxu3 %v537_v29  ;;  %v522_v27 = vld [vmem:[%s6277_s1 + $0xd80] sm:$0xff]  ;;  %v45_v28 = vld [vmem:[%s6278_s0 + $0xc8] sm:$0xff]  ;;  %v47_v29 = vld [vmem:[%s6278_s0 + $0xd8] sm:$0xff] }
  0xd2   :  { %1696 = vmatpush.msra.mxu0 %v487_v30  ;;  %1715 = vmatpush.msra.mxu1 %v504_v31  ;;  %v552_v30 = vld [vmem:[%s6277_s1 + $0xe70] sm:$0xff]  ;;  %v569_v31 = vld [vmem:[%s6277_s1 + $0xef8] sm:$0xff] }
  0xd3   :  { %1736 = vmatpush.msra.mxu2 %v519_v32  ;;  %1755 = vmatpush.msra.mxu3 %v536_v33  ;;  %v584_v32 = vld [vmem:[%s6277_s1 + $0xf70] sm:$0xff]  ;;  %v601_v33 = vld [vmem:[%s6277_s1 + $0xff8] sm:$0xff] }
  0xd4   :  { %1697 = vmatpush.msra.mxu0 %v486_v34  ;;  %1716 = vmatpush.msra.mxu1 %v503_v35  ;;  %v551_v34 = vld [vmem:[%s6277_s1 + $0xe68] sm:$0xff]  ;;  %v568_v35 = vld [vmem:[%s6277_s1 + $0xef0] sm:$0xff] }
  0xd5   :  { %1737 = vmatpush.msra.mxu2 %v518_v36  ;;  %1756 = vmatpush.msra.mxu3 %v535_v37  ;;  %v583_v36 = vld [vmem:[%s6277_s1 + $0xf68] sm:$0xff]  ;;  %v600_v37 = vld [vmem:[%s6277_s1 + $0xff0] sm:$0xff] }
  0xd6   :  { %1698 = vmatpush.msra.mxu0 %v485_v38  ;;  %1717 = vmatpush.msra.mxu1 %v502_v39  ;;  %v550_v38 = vld [vmem:[%s6277_s1 + $0xe60] sm:$0xff]  ;;  %v567_v39 = vld [vmem:[%s6277_s1 + $0xee8] sm:$0xff] }
  0xd7   :  { %1738 = vmatpush.msra.mxu2 %v517_v40  ;;  %1757 = vmatpush.msra.mxu3 %v534_v41  ;;  %v582_v40 = vld [vmem:[%s6277_s1 + $0xf60] sm:$0xff]  ;;  %v599_v41 = vld [vmem:[%s6277_s1 + $0xfe8] sm:$0xff] }
  0xd8   :  { %1699 = vmatpush.msra.mxu0 %v484_v42  ;;  %1718 = vmatpush.msra.mxu1 %v501_v43  ;;  %v549_v42 = vld [vmem:[%s6277_s1 + $0xe58] sm:$0xff]  ;;  %v566_v43 = vld [vmem:[%s6277_s1 + $0xee0] sm:$0xff] }
  0xd9   :  { %1739 = vmatpush.msra.mxu2 %v516_v44  ;;  %1758 = vmatpush.msra.mxu3 %v533_v45  ;;  %v581_v44 = vld [vmem:[%s6277_s1 + $0xf58] sm:$0xff]  ;;  %v598_v45 = vld [vmem:[%s6277_s1 + $0xfe0] sm:$0xff] }
  0xda   :  { %1700 = vmatpush.msra.mxu0 %v483_v46  ;;  %1719 = vmatpush.msra.mxu1 %v500_v47  ;;  %v548_v46 = vld [vmem:[%s6277_s1 + $0xe50] sm:$0xff]  ;;  %v565_v47 = vld [vmem:[%s6277_s1 + $0xed8] sm:$0xff] }
  0xdb   :  { %1740 = vmatpush.msra.mxu2 %v515_v48  ;;  %1759 = vmatpush.msra.mxu3 %v532_v49  ;;  %v580_v48 = vld [vmem:[%s6277_s1 + $0xf50] sm:$0xff]  ;;  %v597_v49 = vld [vmem:[%s6277_s1 + $0xfd8] sm:$0xff] }
  0xdc   :  { %1701 = vmatpush.msra.mxu0 %v482_v50  ;;  %1720 = vmatpush.msra.mxu1 %v499_v51  ;;  %v547_v50 = vld [vmem:[%s6277_s1 + $0xe48] sm:$0xff]  ;;  %v564_v51 = vld [vmem:[%s6277_s1 + $0xed0] sm:$0xff] }
  0xdd   :  { %1741 = vmatpush.msra.mxu2 %v514_v52  ;;  %1760 = vmatpush.msra.mxu3 %v531_v53  ;;  %v579_v52 = vld [vmem:[%s6277_s1 + $0xf48] sm:$0xff]  ;;  %v596_v53 = vld [vmem:[%s6277_s1 + $0xfd0] sm:$0xff] }
  0xde   :  { %1702 = vmatpush.msra.mxu0 %v481_v54  ;;  %1721 = vmatpush.msra.mxu1 %v498_v55  ;;  %v546_v54 = vld [vmem:[%s6277_s1 + $0xe40] sm:$0xff]  ;;  %v563_v55 = vld [vmem:[%s6277_s1 + $0xec8] sm:$0xff] }
  0xdf   :  { %1742 = vmatpush.msra.mxu2 %v513_v56  ;;  %1761 = vmatpush.msra.mxu3 %v530_v57  ;;  %v578_v56 = vld [vmem:[%s6277_s1 + $0xf40] sm:$0xff]  ;;  %v595_v57 = vld [vmem:[%s6277_s1 + $0xfc8] sm:$0xff] }
  0xe0   :  { %1703 = vmatpush.msra.mxu0 %v480_v58  ;;  %1722 = vmatpush.msra.mxu1 %v497_v59  ;;  %v545_v58 = vld [vmem:[%s6277_s1 + $0xe38] sm:$0xff]  ;;  %v562_v59 = vld [vmem:[%s6277_s1 + $0xec0] sm:$0xff] }
  0xe1   :  { %1743 = vmatpush.msra.mxu2 %v512_v60  ;;  %1762 = vmatpush.msra.mxu3 %v529_v61  ;;  %v577_v60 = vld [vmem:[%s6277_s1 + $0xf38] sm:$0xff]  ;;  %v594_v61 = vld [vmem:[%s6277_s1 + $0xfc0] sm:$0xff] }
  0xe2   :  { %1704 = vmatpush.msra.mxu0 %v479_v62  ;;  %1723 = vmatpush.msra.mxu1 %v496_v63  ;;  %v544_v62 = vld [vmem:[%s6277_s1 + $0xe30] sm:$0xff]  ;;  %v561_v63 = vld [vmem:[%s6277_s1 + $0xeb8] sm:$0xff] }
  0xe3   :  { %1744 = vmatpush.msra.mxu2 %v511_v0  ;;  %1763 = vmatpush.msra.mxu3 %v528_v1  ;;  %v576_v0 = vld [vmem:[%s6277_s1 + $0xf30] sm:$0xff]  ;;  %v593_v1 = vld [vmem:[%s6277_s1 + $0xfb8] sm:$0xff] }
  0xe4   :  { %1705 = vmatpush.msra.mxu0 %v478_v2  ;;  %1724 = vmatpush.msra.mxu1 %v495_v3  ;;  %v543_v2 = vld [vmem:[%s6277_s1 + $0xe28] sm:$0xff]  ;;  %v560_v3 = vld [vmem:[%s6277_s1 + $0xeb0] sm:$0xff] }
  0xe5   :  { %1745 = vmatpush.msra.mxu2 %v510_v4  ;;  %1764 = vmatpush.msra.mxu3 %v527_v5  ;;  %v575_v4 = vld [vmem:[%s6277_s1 + $0xf28] sm:$0xff]  ;;  %v592_v5 = vld [vmem:[%s6277_s1 + $0xfb0] sm:$0xff] }
  0xe6   :  { %1706 = vmatpush.msra.mxu0 %v477_v6  ;;  %1725 = vmatpush.msra.mxu1 %v494_v7  ;;  %v542_v6 = vld [vmem:[%s6277_s1 + $0xe20] sm:$0xff]  ;;  %v559_v7 = vld [vmem:[%s6277_s1 + $0xea8] sm:$0xff] }
  0xe7   :  { %1746 = vmatpush.msra.mxu2 %v509_v8  ;;  %1765 = vmatpush.msra.mxu3 %v526_v9  ;;  %v574_v8 = vld [vmem:[%s6277_s1 + $0xf20] sm:$0xff]  ;;  %v591_v9 = vld [vmem:[%s6277_s1 + $0xfa8] sm:$0xff] }
  0xe8   :  { %1707 = vmatpush.msra.mxu0 %v476_v10  ;;  %1726 = vmatpush.msra.mxu1 %v493_v11  ;;  %v541_v10 = vld [vmem:[%s6277_s1 + $0xe18] sm:$0xff]  ;;  %v558_v11 = vld [vmem:[%s6277_s1 + $0xea0] sm:$0xff] }
  0xe9   :  { %1747 = vmatpush.msra.mxu2 %v508_v12  ;;  %1766 = vmatpush.msra.mxu3 %v525_v13  ;;  %v573_v12 = vld [vmem:[%s6277_s1 + $0xf18] sm:$0xff]  ;;  %v590_v13 = vld [vmem:[%s6277_s1 + $0xfa0] sm:$0xff] }
  0xea   :  { %1708 = vmatpush.msra.mxu0 %v475_v14  ;;  %1727 = vmatpush.msra.mxu1 %v492_v15  ;;  %v540_v14 = vld [vmem:[%s6277_s1 + $0xe10] sm:$0xff]  ;;  %v557_v15 = vld [vmem:[%s6277_s1 + $0xe98] sm:$0xff] }
  0xeb   :  { %1748 = vmatpush.msra.mxu2 %v507_v16  ;;  %1767 = vmatpush.msra.mxu3 %v524_v17  ;;  %v572_v16 = vld [vmem:[%s6277_s1 + $0xf10] sm:$0xff]  ;;  %v589_v17 = vld [vmem:[%s6277_s1 + $0xf98] sm:$0xff] }
  0xec   :  { %1709 = vmatpush.msra.mxu0 %v474_v18  ;;  %1728 = vmatpush.msra.mxu1 %v491_v19  ;;  %v539_v18 = vld [vmem:[%s6277_s1 + $0xe08] sm:$0xff]  ;;  %v556_v19 = vld [vmem:[%s6277_s1 + $0xe90] sm:$0xff] }
  0xed   :  { %1749 = vmatpush.msra.mxu2 %v506_v20  ;;  %1768 = vmatpush.msra.mxu3 %v523_v21  ;;  %v571_v20 = vld [vmem:[%s6277_s1 + $0xf08] sm:$0xff]  ;;  %v588_v21 = vld [vmem:[%s6277_s1 + $0xf90] sm:$0xff] }
  0xee   :  { %1710 = vmatmul.f32.vlgmr.msra.gmra.mxu0 %v44_v22  ;;  %1750 = vmatmul.f32.vlgmr.msra.gmra.mxu2 %v46_v23  ;;  %v538_v22 = vld [vmem:[%s6277_s1 + $0xe00] sm:$0xff]  ;;  %v555_v23 = vld [vmem:[%s6277_s1 + $0xe88] sm:$0xff] }
  0xef   :  { %1774 = vmatpush.msrb.mxu0 %v553_v24  ;;  %1814 = vmatpush.msrb.mxu2 %v585_v25  ;;  %v570_v24 = vld [vmem:[%s6277_s1 + $0xf00] sm:$0xff]  ;;  %v587_v25 = vld [vmem:[%s6277_s1 + $0xf88] sm:$0xff] }
  0xf0   :  { %1729 = vmatpush.msra.mxu1 %v490_v26  ;;  %1769 = vmatpush.msra.mxu3 %v522_v27  ;;  %v48_v26 = vld [vmem:[%s6278_s0 + $0xe0] sm:$0xff]  ;;  %v50_v27 = vld [vmem:[%s6278_s0 + $0xf0] sm:$0xff] }
  0xf1   :  { %1730 = vmatmul.f32.vlgmr.msra.gmra.mxu1 %v45_v28  ;;  %1770 = vmatmul.f32.vlgmr.msra.gmra.mxu3 %v47_v29  ;;  %v617_v28 = vld [vmem:[%s6277_s1 + $0x1078] sm:$0xff] }
  0xf2   :  { %1775 = vmatpush.msrb.mxu0 %v552_v30  ;;  %1794 = vmatpush.msrb.mxu1 %v569_v31  ;;  %v649_v29 = vld [vmem:[%s6277_s1 + $0x1178] sm:$0xff]  ;;  %v554_v30 = vld [vmem:[%s6277_s1 + $0xe80] sm:$0xff] }
  0xf3   :  { %1815 = vmatpush.msrb.mxu2 %v584_v32  ;;  %1834 = vmatpush.msrb.mxu3 %v601_v33  ;;  %v586_v31 = vld [vmem:[%s6277_s1 + $0xf80] sm:$0xff]  ;;  %v49_v32 = vld [vmem:[%s6278_s0 + $0xe8] sm:$0xff]  ;;  %v51_v33 = vld [vmem:[%s6278_s0 + $0xf8] sm:$0xff] }
  0xf4   :  { %1776 = vmatpush.msrb.mxu0 %v551_v34  ;;  %1795 = vmatpush.msrb.mxu1 %v568_v35  ;;  %v616_v34 = vld [vmem:[%s6277_s1 + $0x1070] sm:$0xff]  ;;  %v633_v35 = vld [vmem:[%s6277_s1 + $0x10f8] sm:$0xff] }
  0xf5   :  { %1816 = vmatpush.msrb.mxu2 %v583_v36  ;;  %1835 = vmatpush.msrb.mxu3 %v600_v37  ;;  %v648_v36 = vld [vmem:[%s6277_s1 + $0x1170] sm:$0xff]  ;;  %v665_v37 = vld [vmem:[%s6277_s1 + $0x11f8] sm:$0xff] }
  0xf6   :  { %1777 = vmatpush.msrb.mxu0 %v550_v38  ;;  %1796 = vmatpush.msrb.mxu1 %v567_v39  ;;  %v615_v38 = vld [vmem:[%s6277_s1 + $0x1068] sm:$0xff]  ;;  %v632_v39 = vld [vmem:[%s6277_s1 + $0x10f0] sm:$0xff] }
  0xf7   :  { %1817 = vmatpush.msrb.mxu2 %v582_v40  ;;  %1836 = vmatpush.msrb.mxu3 %v599_v41  ;;  %v647_v40 = vld [vmem:[%s6277_s1 + $0x1168] sm:$0xff]  ;;  %v664_v41 = vld [vmem:[%s6277_s1 + $0x11f0] sm:$0xff] }
  0xf8   :  { %1778 = vmatpush.msrb.mxu0 %v549_v42  ;;  %1797 = vmatpush.msrb.mxu1 %v566_v43  ;;  %v614_v42 = vld [vmem:[%s6277_s1 + $0x1060] sm:$0xff]  ;;  %v631_v43 = vld [vmem:[%s6277_s1 + $0x10e8] sm:$0xff] }
  0xf9   :  { %1818 = vmatpush.msrb.mxu2 %v581_v44  ;;  %1837 = vmatpush.msrb.mxu3 %v598_v45  ;;  %v646_v44 = vld [vmem:[%s6277_s1 + $0x1160] sm:$0xff]  ;;  %v663_v45 = vld [vmem:[%s6277_s1 + $0x11e8] sm:$0xff] }
  0xfa   :  { %1779 = vmatpush.msrb.mxu0 %v548_v46  ;;  %1798 = vmatpush.msrb.mxu1 %v565_v47  ;;  %v613_v46 = vld [vmem:[%s6277_s1 + $0x1058] sm:$0xff]  ;;  %v630_v47 = vld [vmem:[%s6277_s1 + $0x10e0] sm:$0xff] }
  0xfb   :  { %1819 = vmatpush.msrb.mxu2 %v580_v48  ;;  %1838 = vmatpush.msrb.mxu3 %v597_v49  ;;  %v645_v48 = vld [vmem:[%s6277_s1 + $0x1158] sm:$0xff]  ;;  %v662_v49 = vld [vmem:[%s6277_s1 + $0x11e0] sm:$0xff] }
  0xfc   :  { %1780 = vmatpush.msrb.mxu0 %v547_v50  ;;  %1799 = vmatpush.msrb.mxu1 %v564_v51  ;;  %v612_v50 = vld [vmem:[%s6277_s1 + $0x1050] sm:$0xff]  ;;  %v629_v51 = vld [vmem:[%s6277_s1 + $0x10d8] sm:$0xff] }
  0xfd   :  { %1820 = vmatpush.msrb.mxu2 %v579_v52  ;;  %1839 = vmatpush.msrb.mxu3 %v596_v53  ;;  %v644_v52 = vld [vmem:[%s6277_s1 + $0x1150] sm:$0xff]  ;;  %v661_v53 = vld [vmem:[%s6277_s1 + $0x11d8] sm:$0xff] }
  0xfe   :  { %1781 = vmatpush.msrb.mxu0 %v546_v54  ;;  %1800 = vmatpush.msrb.mxu1 %v563_v55  ;;  %v611_v54 = vld [vmem:[%s6277_s1 + $0x1048] sm:$0xff]  ;;  %v628_v55 = vld [vmem:[%s6277_s1 + $0x10d0] sm:$0xff] }
  0xff   :  { %1821 = vmatpush.msrb.mxu2 %v578_v56  ;;  %1840 = vmatpush.msrb.mxu3 %v595_v57  ;;  %v643_v56 = vld [vmem:[%s6277_s1 + $0x1148] sm:$0xff]  ;;  %v660_v57 = vld [vmem:[%s6277_s1 + $0x11d0] sm:$0xff] }
 0x100   :  { %1782 = vmatpush.msrb.mxu0 %v545_v58  ;;  %1801 = vmatpush.msrb.mxu1 %v562_v59  ;;  %v610_v58 = vld [vmem:[%s6277_s1 + $0x1040] sm:$0xff]  ;;  %v627_v59 = vld [vmem:[%s6277_s1 + $0x10c8] sm:$0xff] }
 0x101   :  { %1822 = vmatpush.msrb.mxu2 %v577_v60  ;;  %1841 = vmatpush.msrb.mxu3 %v594_v61  ;;  %v642_v60 = vld [vmem:[%s6277_s1 + $0x1140] sm:$0xff]  ;;  %v659_v61 = vld [vmem:[%s6277_s1 + $0x11c8] sm:$0xff] }
 0x102   :  { %1783 = vmatpush.msrb.mxu0 %v544_v62  ;;  %1802 = vmatpush.msrb.mxu1 %v561_v63  ;;  %v609_v62 = vld [vmem:[%s6277_s1 + $0x1038] sm:$0xff]  ;;  %v626_v63 = vld [vmem:[%s6277_s1 + $0x10c0] sm:$0xff] }
 0x103   :  { %1823 = vmatpush.msrb.mxu2 %v576_v0  ;;  %1842 = vmatpush.msrb.mxu3 %v593_v1  ;;  %v641_v0 = vld [vmem:[%s6277_s1 + $0x1138] sm:$0xff]  ;;  %v658_v1 = vld [vmem:[%s6277_s1 + $0x11c0] sm:$0xff] }
 0x104   :  { %1784 = vmatpush.msrb.mxu0 %v543_v2  ;;  %1803 = vmatpush.msrb.mxu1 %v560_v3  ;;  %v608_v2 = vld [vmem:[%s6277_s1 + $0x1030] sm:$0xff]  ;;  %v625_v3 = vld [vmem:[%s6277_s1 + $0x10b8] sm:$0xff] }
 0x105   :  { %1824 = vmatpush.msrb.mxu2 %v575_v4  ;;  %1843 = vmatpush.msrb.mxu3 %v592_v5  ;;  %v640_v4 = vld [vmem:[%s6277_s1 + $0x1130] sm:$0xff]  ;;  %v657_v5 = vld [vmem:[%s6277_s1 + $0x11b8] sm:$0xff] }
 0x106   :  { %1785 = vmatpush.msrb.mxu0 %v542_v6  ;;  %1804 = vmatpush.msrb.mxu1 %v559_v7  ;;  %v607_v6 = vld [vmem:[%s6277_s1 + $0x1028] sm:$0xff]  ;;  %v624_v7 = vld [vmem:[%s6277_s1 + $0x10b0] sm:$0xff] }
 0x107   :  { %1825 = vmatpush.msrb.mxu2 %v574_v8  ;;  %1844 = vmatpush.msrb.mxu3 %v591_v9  ;;  %v639_v8 = vld [vmem:[%s6277_s1 + $0x1128] sm:$0xff]  ;;  %v656_v9 = vld [vmem:[%s6277_s1 + $0x11b0] sm:$0xff] }
 0x108   :  { %1786 = vmatpush.msrb.mxu0 %v541_v10  ;;  %1805 = vmatpush.msrb.mxu1 %v558_v11  ;;  %v606_v10 = vld [vmem:[%s6277_s1 + $0x1020] sm:$0xff]  ;;  %v623_v11 = vld [vmem:[%s6277_s1 + $0x10a8] sm:$0xff] }
 0x109   :  { %1826 = vmatpush.msrb.mxu2 %v573_v12  ;;  %1845 = vmatpush.msrb.mxu3 %v590_v13  ;;  %v638_v12 = vld [vmem:[%s6277_s1 + $0x1120] sm:$0xff]  ;;  %v655_v13 = vld [vmem:[%s6277_s1 + $0x11a8] sm:$0xff] }
 0x10a   :  { %1787 = vmatpush.msrb.mxu0 %v540_v14  ;;  %1806 = vmatpush.msrb.mxu1 %v557_v15  ;;  %v605_v14 = vld [vmem:[%s6277_s1 + $0x1018] sm:$0xff]  ;;  %v622_v15 = vld [vmem:[%s6277_s1 + $0x10a0] sm:$0xff] }
 0x10b   :  { %1827 = vmatpush.msrb.mxu2 %v572_v16  ;;  %1846 = vmatpush.msrb.mxu3 %v589_v17  ;;  %v637_v16 = vld [vmem:[%s6277_s1 + $0x1118] sm:$0xff]  ;;  %v654_v17 = vld [vmem:[%s6277_s1 + $0x11a0] sm:$0xff] }
 0x10c   :  { %1788 = vmatpush.msrb.mxu0 %v539_v18  ;;  %1807 = vmatpush.msrb.mxu1 %v556_v19  ;;  %v604_v18 = vld [vmem:[%s6277_s1 + $0x1010] sm:$0xff]  ;;  %v621_v19 = vld [vmem:[%s6277_s1 + $0x1098] sm:$0xff] }
 0x10d   :  { %1828 = vmatpush.msrb.mxu2 %v571_v20  ;;  %1847 = vmatpush.msrb.mxu3 %v588_v21  ;;  %v636_v20 = vld [vmem:[%s6277_s1 + $0x1110] sm:$0xff]  ;;  %v653_v21 = vld [vmem:[%s6277_s1 + $0x1198] sm:$0xff] }
 0x10e   :  { %1789 = vmatpush.msrb.mxu0 %v538_v22  ;;  %1808 = vmatpush.msrb.mxu1 %v555_v23  ;;  %v603_v22 = vld [vmem:[%s6277_s1 + $0x1008] sm:$0xff]  ;;  %v620_v23 = vld [vmem:[%s6277_s1 + $0x1090] sm:$0xff] }
 0x10f   :  { %1829 = vmatpush.msrb.mxu2 %v570_v24  ;;  %1848 = vmatpush.msrb.mxu3 %v587_v25  ;;  %v635_v24 = vld [vmem:[%s6277_s1 + $0x1108] sm:$0xff]  ;;  %v652_v25 = vld [vmem:[%s6277_s1 + $0x1190] sm:$0xff] }
 0x110   :  { %1790 = vmatmul.f32.vlgmr.msrb.gmra.mxu0 %v48_v26  ;;  %1830 = vmatmul.f32.vlgmr.msrb.gmra.mxu2 %v50_v27  ;;  %v602_v26 = vld [vmem:[%s6277_s1 + $0x1000] sm:$0xff]  ;;  %v619_v27 = vld [vmem:[%s6277_s1 + $0x1088] sm:$0xff] }
 0x111   :  { %1854 = vmatpush.msra.mxu0 %v617_v28  ;;  %1894 = vmatpush.msra.mxu2 %v649_v29  ;;  %v634_v28 = vld [vmem:[%s6277_s1 + $0x1100] sm:$0xff]  ;;  %v651_v29 = vld [vmem:[%s6277_s1 + $0x1188] sm:$0xff] }
 0x112   :  { %1809 = vmatpush.msrb.mxu1 %v554_v30  ;;  %1849 = vmatpush.msrb.mxu3 %v586_v31  ;;  %v52_v30 = vld [vmem:[%s6278_s0 + $0x100] sm:$0xff]  ;;  %v54_v31 = vld [vmem:[%s6278_s0 + $0x110] sm:$0xff] }
 0x113   :  { %1810 = vmatmul.f32.vlgmr.msrb.gmra.mxu1 %v49_v32  ;;  %1850 = vmatmul.f32.vlgmr.msrb.gmra.mxu3 %v51_v33  ;;  %v681_v32 = vld [vmem:[%s6277_s1 + $0x1278] sm:$0xff] }
 0x114   :  { %1855 = vmatpush.msra.mxu0 %v616_v34  ;;  %1874 = vmatpush.msra.mxu1 %v633_v35  ;;  %v713_v33 = vld [vmem:[%s6277_s1 + $0x1378] sm:$0xff]  ;;  %v618_v34 = vld [vmem:[%s6277_s1 + $0x1080] sm:$0xff] }
 0x115   :  { %1895 = vmatpush.msra.mxu2 %v648_v36  ;;  %1914 = vmatpush.msra.mxu3 %v665_v37  ;;  %v650_v35 = vld [vmem:[%s6277_s1 + $0x1180] sm:$0xff]  ;;  %v53_v36 = vld [vmem:[%s6278_s0 + $0x108] sm:$0xff]  ;;  %v55_v37 = vld [vmem:[%s6278_s0 + $0x118] sm:$0xff] }
 0x116   :  { %1856 = vmatpush.msra.mxu0 %v615_v38  ;;  %1875 = vmatpush.msra.mxu1 %v632_v39  ;;  %v680_v38 = vld [vmem:[%s6277_s1 + $0x1270] sm:$0xff]  ;;  %v697_v39 = vld [vmem:[%s6277_s1 + $0x12f8] sm:$0xff] }
 0x117   :  { %1896 = vmatpush.msra.mxu2 %v647_v40  ;;  %1915 = vmatpush.msra.mxu3 %v664_v41  ;;  %v712_v40 = vld [vmem:[%s6277_s1 + $0x1370] sm:$0xff]  ;;  %v729_v41 = vld [vmem:[%s6277_s1 + $0x13f8] sm:$0xff] }
 0x118   :  { %1857 = vmatpush.msra.mxu0 %v614_v42  ;;  %1876 = vmatpush.msra.mxu1 %v631_v43  ;;  %v679_v42 = vld [vmem:[%s6277_s1 + $0x1268] sm:$0xff]  ;;  %v696_v43 = vld [vmem:[%s6277_s1 + $0x12f0] sm:$0xff] }
 0x119   :  { %1897 = vmatpush.msra.mxu2 %v646_v44  ;;  %1916 = vmatpush.msra.mxu3 %v663_v45  ;;  %v711_v44 = vld [vmem:[%s6277_s1 + $0x1368] sm:$0xff]  ;;  %v728_v45 = vld [vmem:[%s6277_s1 + $0x13f0] sm:$0xff] }
 0x11a   :  { %1858 = vmatpush.msra.mxu0 %v613_v46  ;;  %1877 = vmatpush.msra.mxu1 %v630_v47  ;;  %v678_v46 = vld [vmem:[%s6277_s1 + $0x1260] sm:$0xff]  ;;  %v695_v47 = vld [vmem:[%s6277_s1 + $0x12e8] sm:$0xff] }
 0x11b   :  { %1898 = vmatpush.msra.mxu2 %v645_v48  ;;  %1917 = vmatpush.msra.mxu3 %v662_v49  ;;  %v710_v48 = vld [vmem:[%s6277_s1 + $0x1360] sm:$0xff]  ;;  %v727_v49 = vld [vmem:[%s6277_s1 + $0x13e8] sm:$0xff] }
 0x11c   :  { %1859 = vmatpush.msra.mxu0 %v612_v50  ;;  %1878 = vmatpush.msra.mxu1 %v629_v51  ;;  %v677_v50 = vld [vmem:[%s6277_s1 + $0x1258] sm:$0xff]  ;;  %v694_v51 = vld [vmem:[%s6277_s1 + $0x12e0] sm:$0xff] }
 0x11d   :  { %1899 = vmatpush.msra.mxu2 %v644_v52  ;;  %1918 = vmatpush.msra.mxu3 %v661_v53  ;;  %v709_v52 = vld [vmem:[%s6277_s1 + $0x1358] sm:$0xff]  ;;  %v726_v53 = vld [vmem:[%s6277_s1 + $0x13e0] sm:$0xff] }
 0x11e   :  { %1860 = vmatpush.msra.mxu0 %v611_v54  ;;  %1879 = vmatpush.msra.mxu1 %v628_v55  ;;  %v676_v54 = vld [vmem:[%s6277_s1 + $0x1250] sm:$0xff]  ;;  %v693_v55 = vld [vmem:[%s6277_s1 + $0x12d8] sm:$0xff] }
 0x11f   :  { %1900 = vmatpush.msra.mxu2 %v643_v56  ;;  %1919 = vmatpush.msra.mxu3 %v660_v57  ;;  %v708_v56 = vld [vmem:[%s6277_s1 + $0x1350] sm:$0xff]  ;;  %v725_v57 = vld [vmem:[%s6277_s1 + $0x13d8] sm:$0xff] }
 0x120   :  { %1861 = vmatpush.msra.mxu0 %v610_v58  ;;  %1880 = vmatpush.msra.mxu1 %v627_v59  ;;  %v675_v58 = vld [vmem:[%s6277_s1 + $0x1248] sm:$0xff]  ;;  %v692_v59 = vld [vmem:[%s6277_s1 + $0x12d0] sm:$0xff] }
 0x121   :  { %1901 = vmatpush.msra.mxu2 %v642_v60  ;;  %1920 = vmatpush.msra.mxu3 %v659_v61  ;;  %v707_v60 = vld [vmem:[%s6277_s1 + $0x1348] sm:$0xff]  ;;  %v724_v61 = vld [vmem:[%s6277_s1 + $0x13d0] sm:$0xff] }
 0x122   :  { %1862 = vmatpush.msra.mxu0 %v609_v62  ;;  %1881 = vmatpush.msra.mxu1 %v626_v63  ;;  %v674_v62 = vld [vmem:[%s6277_s1 + $0x1240] sm:$0xff]  ;;  %v691_v63 = vld [vmem:[%s6277_s1 + $0x12c8] sm:$0xff] }
 0x123   :  { %1902 = vmatpush.msra.mxu2 %v641_v0  ;;  %1921 = vmatpush.msra.mxu3 %v658_v1  ;;  %v706_v0 = vld [vmem:[%s6277_s1 + $0x1340] sm:$0xff]  ;;  %v723_v1 = vld [vmem:[%s6277_s1 + $0x13c8] sm:$0xff] }
 0x124   :  { %1863 = vmatpush.msra.mxu0 %v608_v2  ;;  %1882 = vmatpush.msra.mxu1 %v625_v3  ;;  %v673_v2 = vld [vmem:[%s6277_s1 + $0x1238] sm:$0xff]  ;;  %v690_v3 = vld [vmem:[%s6277_s1 + $0x12c0] sm:$0xff] }
 0x125   :  { %1903 = vmatpush.msra.mxu2 %v640_v4  ;;  %1922 = vmatpush.msra.mxu3 %v657_v5  ;;  %v705_v4 = vld [vmem:[%s6277_s1 + $0x1338] sm:$0xff]  ;;  %v722_v5 = vld [vmem:[%s6277_s1 + $0x13c0] sm:$0xff] }
 0x126   :  { %1864 = vmatpush.msra.mxu0 %v607_v6  ;;  %1883 = vmatpush.msra.mxu1 %v624_v7  ;;  %v672_v6 = vld [vmem:[%s6277_s1 + $0x1230] sm:$0xff]  ;;  %v689_v7 = vld [vmem:[%s6277_s1 + $0x12b8] sm:$0xff] }
 0x127   :  { %1904 = vmatpush.msra.mxu2 %v639_v8  ;;  %1923 = vmatpush.msra.mxu3 %v656_v9  ;;  %v704_v8 = vld [vmem:[%s6277_s1 + $0x1330] sm:$0xff]  ;;  %v721_v9 = vld [vmem:[%s6277_s1 + $0x13b8] sm:$0xff] }
 0x128   :  { %1865 = vmatpush.msra.mxu0 %v606_v10  ;;  %1884 = vmatpush.msra.mxu1 %v623_v11  ;;  %v671_v10 = vld [vmem:[%s6277_s1 + $0x1228] sm:$0xff]  ;;  %v688_v11 = vld [vmem:[%s6277_s1 + $0x12b0] sm:$0xff] }
 0x129   :  { %1905 = vmatpush.msra.mxu2 %v638_v12  ;;  %1924 = vmatpush.msra.mxu3 %v655_v13  ;;  %v703_v12 = vld [vmem:[%s6277_s1 + $0x1328] sm:$0xff]  ;;  %v720_v13 = vld [vmem:[%s6277_s1 + $0x13b0] sm:$0xff] }
 0x12a   :  { %1866 = vmatpush.msra.mxu0 %v605_v14  ;;  %1885 = vmatpush.msra.mxu1 %v622_v15  ;;  %v670_v14 = vld [vmem:[%s6277_s1 + $0x1220] sm:$0xff]  ;;  %v687_v15 = vld [vmem:[%s6277_s1 + $0x12a8] sm:$0xff] }
 0x12b   :  { %1906 = vmatpush.msra.mxu2 %v637_v16  ;;  %1925 = vmatpush.msra.mxu3 %v654_v17  ;;  %v702_v16 = vld [vmem:[%s6277_s1 + $0x1320] sm:$0xff]  ;;  %v719_v17 = vld [vmem:[%s6277_s1 + $0x13a8] sm:$0xff] }
 0x12c   :  { %1867 = vmatpush.msra.mxu0 %v604_v18  ;;  %1886 = vmatpush.msra.mxu1 %v621_v19  ;;  %v669_v18 = vld [vmem:[%s6277_s1 + $0x1218] sm:$0xff]  ;;  %v686_v19 = vld [vmem:[%s6277_s1 + $0x12a0] sm:$0xff] }
 0x12d   :  { %1907 = vmatpush.msra.mxu2 %v636_v20  ;;  %1926 = vmatpush.msra.mxu3 %v653_v21  ;;  %v701_v20 = vld [vmem:[%s6277_s1 + $0x1318] sm:$0xff]  ;;  %v718_v21 = vld [vmem:[%s6277_s1 + $0x13a0] sm:$0xff] }
 0x12e   :  { %1868 = vmatpush.msra.mxu0 %v603_v22  ;;  %1887 = vmatpush.msra.mxu1 %v620_v23  ;;  %v668_v22 = vld [vmem:[%s6277_s1 + $0x1210] sm:$0xff]  ;;  %v685_v23 = vld [vmem:[%s6277_s1 + $0x1298] sm:$0xff] }
 0x12f   :  { %1908 = vmatpush.msra.mxu2 %v635_v24  ;;  %1927 = vmatpush.msra.mxu3 %v652_v25  ;;  %v700_v24 = vld [vmem:[%s6277_s1 + $0x1310] sm:$0xff]  ;;  %v717_v25 = vld [vmem:[%s6277_s1 + $0x1398] sm:$0xff] }
 0x130   :  { %1869 = vmatpush.msra.mxu0 %v602_v26  ;;  %1888 = vmatpush.msra.mxu1 %v619_v27  ;;  %v667_v26 = vld [vmem:[%s6277_s1 + $0x1208] sm:$0xff]  ;;  %v684_v27 = vld [vmem:[%s6277_s1 + $0x1290] sm:$0xff] }
 0x131   :  { %1909 = vmatpush.msra.mxu2 %v634_v28  ;;  %1928 = vmatpush.msra.mxu3 %v651_v29  ;;  %v699_v28 = vld [vmem:[%s6277_s1 + $0x1308] sm:$0xff]  ;;  %v716_v29 = vld [vmem:[%s6277_s1 + $0x1390] sm:$0xff] }
 0x132   :  { %1870 = vmatmul.f32.vlgmr.msra.gmra.mxu0 %v52_v30  ;;  %1910 = vmatmul.f32.vlgmr.msra.gmra.mxu2 %v54_v31  ;;  %v666_v30 = vld [vmem:[%s6277_s1 + $0x1200] sm:$0xff]  ;;  %v683_v31 = vld [vmem:[%s6277_s1 + $0x1288] sm:$0xff] }
 0x133   :  { %1934 = vmatpush.msrb.mxu0 %v681_v32  ;;  %1974 = vmatpush.msrb.mxu2 %v713_v33  ;;  %v698_v32 = vld [vmem:[%s6277_s1 + $0x1300] sm:$0xff]  ;;  %v715_v33 = vld [vmem:[%s6277_s1 + $0x1388] sm:$0xff] }
 0x134   :  { %1889 = vmatpush.msra.mxu1 %v618_v34  ;;  %1929 = vmatpush.msra.mxu3 %v650_v35  ;;  %v56_v34 = vld [vmem:[%s6278_s0 + $0x120] sm:$0xff]  ;;  %v58_v35 = vld [vmem:[%s6278_s0 + $0x130] sm:$0xff] }
 0x135   :  { %1890 = vmatmul.f32.vlgmr.msra.gmra.mxu1 %v53_v36  ;;  %1930 = vmatmul.f32.vlgmr.msra.gmra.mxu3 %v55_v37  ;;  %v745_v36 = vld [vmem:[%s6277_s1 + $0x1478] sm:$0xff] }
 0x136   :  { %1935 = vmatpush.msrb.mxu0 %v680_v38  ;;  %1954 = vmatpush.msrb.mxu1 %v697_v39  ;;  %v777_v37 = vld [vmem:[%s6277_s1 + $0x1578] sm:$0xff]  ;;  %v682_v38 = vld [vmem:[%s6277_s1 + $0x1280] sm:$0xff] }
 0x137   :  { %1975 = vmatpush.msrb.mxu2 %v712_v40  ;;  %1994 = vmatpush.msrb.mxu3 %v729_v41  ;;  %v714_v39 = vld [vmem:[%s6277_s1 + $0x1380] sm:$0xff]  ;;  %v57_v40 = vld [vmem:[%s6278_s0 + $0x128] sm:$0xff]  ;;  %v59_v41 = vld [vmem:[%s6278_s0 + $0x138] sm:$0xff] }
 0x138   :  { %1936 = vmatpush.msrb.mxu0 %v679_v42  ;;  %1955 = vmatpush.msrb.mxu1 %v696_v43  ;;  %v744_v42 = vld [vmem:[%s6277_s1 + $0x1470] sm:$0xff]  ;;  %v761_v43 = vld [vmem:[%s6277_s1 + $0x14f8] sm:$0xff] }
 0x139   :  { %1976 = vmatpush.msrb.mxu2 %v711_v44  ;;  %1995 = vmatpush.msrb.mxu3 %v728_v45  ;;  %v776_v44 = vld [vmem:[%s6277_s1 + $0x1570] sm:$0xff]  ;;  %v793_v45 = vld [vmem:[%s6277_s1 + $0x15f8] sm:$0xff] }
 0x13a   :  { %1937 = vmatpush.msrb.mxu0 %v678_v46  ;;  %1956 = vmatpush.msrb.mxu1 %v695_v47  ;;  %v743_v46 = vld [vmem:[%s6277_s1 + $0x1468] sm:$0xff]  ;;  %v760_v47 = vld [vmem:[%s6277_s1 + $0x14f0] sm:$0xff] }
 0x13b   :  { %1977 = vmatpush.msrb.mxu2 %v710_v48  ;;  %1996 = vmatpush.msrb.mxu3 %v727_v49  ;;  %v775_v48 = vld [vmem:[%s6277_s1 + $0x1568] sm:$0xff]  ;;  %v792_v49 = vld [vmem:[%s6277_s1 + $0x15f0] sm:$0xff] }
 0x13c   :  { %1938 = vmatpush.msrb.mxu0 %v677_v50  ;;  %1957 = vmatpush.msrb.mxu1 %v694_v51  ;;  %v742_v50 = vld [vmem:[%s6277_s1 + $0x1460] sm:$0xff]  ;;  %v759_v51 = vld [vmem:[%s6277_s1 + $0x14e8] sm:$0xff] }
 0x13d   :  { %1978 = vmatpush.msrb.mxu2 %v709_v52  ;;  %1997 = vmatpush.msrb.mxu3 %v726_v53  ;;  %v774_v52 = vld [vmem:[%s6277_s1 + $0x1560] sm:$0xff]  ;;  %v791_v53 = vld [vmem:[%s6277_s1 + $0x15e8] sm:$0xff] }
 0x13e   :  { %1939 = vmatpush.msrb.mxu0 %v676_v54  ;;  %1958 = vmatpush.msrb.mxu1 %v693_v55  ;;  %v741_v54 = vld [vmem:[%s6277_s1 + $0x1458] sm:$0xff]  ;;  %v758_v55 = vld [vmem:[%s6277_s1 + $0x14e0] sm:$0xff] }
 0x13f   :  { %1979 = vmatpush.msrb.mxu2 %v708_v56  ;;  %1998 = vmatpush.msrb.mxu3 %v725_v57  ;;  %v773_v56 = vld [vmem:[%s6277_s1 + $0x1558] sm:$0xff]  ;;  %v790_v57 = vld [vmem:[%s6277_s1 + $0x15e0] sm:$0xff] }
 0x140   :  { %1940 = vmatpush.msrb.mxu0 %v675_v58  ;;  %1959 = vmatpush.msrb.mxu1 %v692_v59  ;;  %v740_v58 = vld [vmem:[%s6277_s1 + $0x1450] sm:$0xff]  ;;  %v757_v59 = vld [vmem:[%s6277_s1 + $0x14d8] sm:$0xff] }
 0x141   :  { %1980 = vmatpush.msrb.mxu2 %v707_v60  ;;  %1999 = vmatpush.msrb.mxu3 %v724_v61  ;;  %v772_v60 = vld [vmem:[%s6277_s1 + $0x1550] sm:$0xff]  ;;  %v789_v61 = vld [vmem:[%s6277_s1 + $0x15d8] sm:$0xff] }
 0x142   :  { %1941 = vmatpush.msrb.mxu0 %v674_v62  ;;  %1960 = vmatpush.msrb.mxu1 %v691_v63  ;;  %v739_v62 = vld [vmem:[%s6277_s1 + $0x1448] sm:$0xff]  ;;  %v756_v63 = vld [vmem:[%s6277_s1 + $0x14d0] sm:$0xff] }
 0x143   :  { %1981 = vmatpush.msrb.mxu2 %v706_v0  ;;  %2000 = vmatpush.msrb.mxu3 %v723_v1  ;;  %v771_v0 = vld [vmem:[%s6277_s1 + $0x1548] sm:$0xff]  ;;  %v788_v1 = vld [vmem:[%s6277_s1 + $0x15d0] sm:$0xff] }
 0x144   :  { %1942 = vmatpush.msrb.mxu0 %v673_v2  ;;  %1961 = vmatpush.msrb.mxu1 %v690_v3  ;;  %v738_v2 = vld [vmem:[%s6277_s1 + $0x1440] sm:$0xff]  ;;  %v755_v3 = vld [vmem:[%s6277_s1 + $0x14c8] sm:$0xff] }
 0x145   :  { %1982 = vmatpush.msrb.mxu2 %v705_v4  ;;  %2001 = vmatpush.msrb.mxu3 %v722_v5  ;;  %v770_v4 = vld [vmem:[%s6277_s1 + $0x1540] sm:$0xff]  ;;  %v787_v5 = vld [vmem:[%s6277_s1 + $0x15c8] sm:$0xff] }
 0x146   :  { %1943 = vmatpush.msrb.mxu0 %v672_v6  ;;  %1962 = vmatpush.msrb.mxu1 %v689_v7  ;;  %v737_v6 = vld [vmem:[%s6277_s1 + $0x1438] sm:$0xff]  ;;  %v754_v7 = vld [vmem:[%s6277_s1 + $0x14c0] sm:$0xff] }
 0x147   :  { %1983 = vmatpush.msrb.mxu2 %v704_v8  ;;  %2002 = vmatpush.msrb.mxu3 %v721_v9  ;;  %v769_v8 = vld [vmem:[%s6277_s1 + $0x1538] sm:$0xff]  ;;  %v786_v9 = vld [vmem:[%s6277_s1 + $0x15c0] sm:$0xff] }
 0x148   :  { %1944 = vmatpush.msrb.mxu0 %v671_v10  ;;  %1963 = vmatpush.msrb.mxu1 %v688_v11  ;;  %v736_v10 = vld [vmem:[%s6277_s1 + $0x1430] sm:$0xff]  ;;  %v753_v11 = vld [vmem:[%s6277_s1 + $0x14b8] sm:$0xff] }
 0x149   :  { %1984 = vmatpush.msrb.mxu2 %v703_v12  ;;  %2003 = vmatpush.msrb.mxu3 %v720_v13  ;;  %v768_v12 = vld [vmem:[%s6277_s1 + $0x1530] sm:$0xff]  ;;  %v785_v13 = vld [vmem:[%s6277_s1 + $0x15b8] sm:$0xff] }
 0x14a   :  { %1945 = vmatpush.msrb.mxu0 %v670_v14  ;;  %1964 = vmatpush.msrb.mxu1 %v687_v15  ;;  %v735_v14 = vld [vmem:[%s6277_s1 + $0x1428] sm:$0xff]  ;;  %v752_v15 = vld [vmem:[%s6277_s1 + $0x14b0] sm:$0xff] }
 0x14b   :  { %1985 = vmatpush.msrb.mxu2 %v702_v16  ;;  %2004 = vmatpush.msrb.mxu3 %v719_v17  ;;  %v767_v16 = vld [vmem:[%s6277_s1 + $0x1528] sm:$0xff]  ;;  %v784_v17 = vld [vmem:[%s6277_s1 + $0x15b0] sm:$0xff] }
 0x14c   :  { %1946 = vmatpush.msrb.mxu0 %v669_v18  ;;  %1965 = vmatpush.msrb.mxu1 %v686_v19  ;;  %v734_v18 = vld [vmem:[%s6277_s1 + $0x1420] sm:$0xff]  ;;  %v751_v19 = vld [vmem:[%s6277_s1 + $0x14a8] sm:$0xff] }
 0x14d   :  { %1986 = vmatpush.msrb.mxu2 %v701_v20  ;;  %2005 = vmatpush.msrb.mxu3 %v718_v21  ;;  %v766_v20 = vld [vmem:[%s6277_s1 + $0x1520] sm:$0xff]  ;;  %v783_v21 = vld [vmem:[%s6277_s1 + $0x15a8] sm:$0xff] }
 0x14e   :  { %1947 = vmatpush.msrb.mxu0 %v668_v22  ;;  %1966 = vmatpush.msrb.mxu1 %v685_v23  ;;  %v733_v22 = vld [vmem:[%s6277_s1 + $0x1418] sm:$0xff]  ;;  %v750_v23 = vld [vmem:[%s6277_s1 + $0x14a0] sm:$0xff] }
 0x14f   :  { %1987 = vmatpush.msrb.mxu2 %v700_v24  ;;  %2006 = vmatpush.msrb.mxu3 %v717_v25  ;;  %v765_v24 = vld [vmem:[%s6277_s1 + $0x1518] sm:$0xff]  ;;  %v782_v25 = vld [vmem:[%s6277_s1 + $0x15a0] sm:$0xff] }
 0x150   :  { %1948 = vmatpush.msrb.mxu0 %v667_v26  ;;  %1967 = vmatpush.msrb.mxu1 %v684_v27  ;;  %v732_v26 = vld [vmem:[%s6277_s1 + $0x1410] sm:$0xff]  ;;  %v749_v27 = vld [vmem:[%s6277_s1 + $0x1498] sm:$0xff] }
 0x151   :  { %1988 = vmatpush.msrb.mxu2 %v699_v28  ;;  %2007 = vmatpush.msrb.mxu3 %v716_v29  ;;  %v764_v28 = vld [vmem:[%s6277_s1 + $0x1510] sm:$0xff]  ;;  %v781_v29 = vld [vmem:[%s6277_s1 + $0x1598] sm:$0xff] }
 0x152   :  { %1949 = vmatpush.msrb.mxu0 %v666_v30  ;;  %1968 = vmatpush.msrb.mxu1 %v683_v31  ;;  %v731_v30 = vld [vmem:[%s6277_s1 + $0x1408] sm:$0xff]  ;;  %v748_v31 = vld [vmem:[%s6277_s1 + $0x1490] sm:$0xff] }
 0x153   :  { %1989 = vmatpush.msrb.mxu2 %v698_v32  ;;  %2008 = vmatpush.msrb.mxu3 %v715_v33  ;;  %v763_v32 = vld [vmem:[%s6277_s1 + $0x1508] sm:$0xff]  ;;  %v780_v33 = vld [vmem:[%s6277_s1 + $0x1590] sm:$0xff] }
 0x154   :  { %1950 = vmatmul.f32.vlgmr.msrb.gmra.mxu0 %v56_v34  ;;  %1990 = vmatmul.f32.vlgmr.msrb.gmra.mxu2 %v58_v35  ;;  %v730_v34 = vld [vmem:[%s6277_s1 + $0x1400] sm:$0xff]  ;;  %v747_v35 = vld [vmem:[%s6277_s1 + $0x1488] sm:$0xff] }
 0x155   :  { %2014 = vmatpush.msra.mxu0 %v745_v36  ;;  %2054 = vmatpush.msra.mxu2 %v777_v37  ;;  %v762_v36 = vld [vmem:[%s6277_s1 + $0x1500] sm:$0xff]  ;;  %v779_v37 = vld [vmem:[%s6277_s1 + $0x1588] sm:$0xff] }
 0x156   :  { %1969 = vmatpush.msrb.mxu1 %v682_v38  ;;  %2009 = vmatpush.msrb.mxu3 %v714_v39  ;;  %v60_v38 = vld [vmem:[%s6278_s0 + $0x140] sm:$0xff]  ;;  %v62_v39 = vld [vmem:[%s6278_s0 + $0x150] sm:$0xff] }
 0x157   :  { %1970 = vmatmul.f32.vlgmr.msrb.gmra.mxu1 %v57_v40  ;;  %2010 = vmatmul.f32.vlgmr.msrb.gmra.mxu3 %v59_v41  ;;  %v809_v40 = vld [vmem:[%s6277_s1 + $0x1678] sm:$0xff] }
 0x158   :  { %2015 = vmatpush.msra.mxu0 %v744_v42  ;;  %2034 = vmatpush.msra.mxu1 %v761_v43  ;;  %v841_v41 = vld [vmem:[%s6277_s1 + $0x1778] sm:$0xff]  ;;  %v746_v42 = vld [vmem:[%s6277_s1 + $0x1480] sm:$0xff] }
 0x159   :  { %2055 = vmatpush.msra.mxu2 %v776_v44  ;;  %2074 = vmatpush.msra.mxu3 %v793_v45  ;;  %v778_v43 = vld [vmem:[%s6277_s1 + $0x1580] sm:$0xff]  ;;  %v61_v44 = vld [vmem:[%s6278_s0 + $0x148] sm:$0xff]  ;;  %v63_v45 = vld [vmem:[%s6278_s0 + $0x158] sm:$0xff] }
 0x15a   :  { %2016 = vmatpush.msra.mxu0 %v743_v46  ;;  %2035 = vmatpush.msra.mxu1 %v760_v47  ;;  %v808_v46 = vld [vmem:[%s6277_s1 + $0x1670] sm:$0xff]  ;;  %v825_v47 = vld [vmem:[%s6277_s1 + $0x16f8] sm:$0xff] }
 0x15b   :  { %2056 = vmatpush.msra.mxu2 %v775_v48  ;;  %2075 = vmatpush.msra.mxu3 %v792_v49  ;;  %v840_v48 = vld [vmem:[%s6277_s1 + $0x1770] sm:$0xff]  ;;  %v857_v49 = vld [vmem:[%s6277_s1 + $0x17f8] sm:$0xff] }
 0x15c   :  { %2017 = vmatpush.msra.mxu0 %v742_v50  ;;  %2036 = vmatpush.msra.mxu1 %v759_v51  ;;  %v807_v50 = vld [vmem:[%s6277_s1 + $0x1668] sm:$0xff]  ;;  %v824_v51 = vld [vmem:[%s6277_s1 + $0x16f0] sm:$0xff] }
 0x15d   :  { %2057 = vmatpush.msra.mxu2 %v774_v52  ;;  %2076 = vmatpush.msra.mxu3 %v791_v53  ;;  %v839_v52 = vld [vmem:[%s6277_s1 + $0x1768] sm:$0xff]  ;;  %v856_v53 = vld [vmem:[%s6277_s1 + $0x17f0] sm:$0xff] }
 0x15e   :  { %2018 = vmatpush.msra.mxu0 %v741_v54  ;;  %2037 = vmatpush.msra.mxu1 %v758_v55  ;;  %v806_v54 = vld [vmem:[%s6277_s1 + $0x1660] sm:$0xff]  ;;  %v823_v55 = vld [vmem:[%s6277_s1 + $0x16e8] sm:$0xff] }
 0x15f   :  { %2058 = vmatpush.msra.mxu2 %v773_v56  ;;  %2077 = vmatpush.msra.mxu3 %v790_v57  ;;  %v838_v56 = vld [vmem:[%s6277_s1 + $0x1760] sm:$0xff]  ;;  %v855_v57 = vld [vmem:[%s6277_s1 + $0x17e8] sm:$0xff] }
 0x160   :  { %2019 = vmatpush.msra.mxu0 %v740_v58  ;;  %2038 = vmatpush.msra.mxu1 %v757_v59  ;;  %v805_v58 = vld [vmem:[%s6277_s1 + $0x1658] sm:$0xff]  ;;  %v822_v59 = vld [vmem:[%s6277_s1 + $0x16e0] sm:$0xff] }
 0x161   :  { %2059 = vmatpush.msra.mxu2 %v772_v60  ;;  %2078 = vmatpush.msra.mxu3 %v789_v61  ;;  %v837_v60 = vld [vmem:[%s6277_s1 + $0x1758] sm:$0xff]  ;;  %v854_v61 = vld [vmem:[%s6277_s1 + $0x17e0] sm:$0xff] }
 0x162   :  { %2020 = vmatpush.msra.mxu0 %v739_v62  ;;  %2039 = vmatpush.msra.mxu1 %v756_v63  ;;  %v804_v62 = vld [vmem:[%s6277_s1 + $0x1650] sm:$0xff]  ;;  %v821_v63 = vld [vmem:[%s6277_s1 + $0x16d8] sm:$0xff] }
 0x163   :  { %2060 = vmatpush.msra.mxu2 %v771_v0  ;;  %2079 = vmatpush.msra.mxu3 %v788_v1  ;;  %v836_v0 = vld [vmem:[%s6277_s1 + $0x1750] sm:$0xff]  ;;  %v853_v1 = vld [vmem:[%s6277_s1 + $0x17d8] sm:$0xff] }
 0x164   :  { %2021 = vmatpush.msra.mxu0 %v738_v2  ;;  %2040 = vmatpush.msra.mxu1 %v755_v3  ;;  %v803_v2 = vld [vmem:[%s6277_s1 + $0x1648] sm:$0xff]  ;;  %v820_v3 = vld [vmem:[%s6277_s1 + $0x16d0] sm:$0xff] }
 0x165   :  { %2061 = vmatpush.msra.mxu2 %v770_v4  ;;  %2080 = vmatpush.msra.mxu3 %v787_v5  ;;  %v835_v4 = vld [vmem:[%s6277_s1 + $0x1748] sm:$0xff]  ;;  %v852_v5 = vld [vmem:[%s6277_s1 + $0x17d0] sm:$0xff] }
 0x166   :  { %2022 = vmatpush.msra.mxu0 %v737_v6  ;;  %2041 = vmatpush.msra.mxu1 %v754_v7  ;;  %v802_v6 = vld [vmem:[%s6277_s1 + $0x1640] sm:$0xff]  ;;  %v819_v7 = vld [vmem:[%s6277_s1 + $0x16c8] sm:$0xff] }
 0x167   :  { %2062 = vmatpush.msra.mxu2 %v769_v8  ;;  %2081 = vmatpush.msra.mxu3 %v786_v9  ;;  %v834_v8 = vld [vmem:[%s6277_s1 + $0x1740] sm:$0xff]  ;;  %v851_v9 = vld [vmem:[%s6277_s1 + $0x17c8] sm:$0xff] }
 0x168   :  { %2023 = vmatpush.msra.mxu0 %v736_v10  ;;  %2042 = vmatpush.msra.mxu1 %v753_v11  ;;  %v801_v10 = vld [vmem:[%s6277_s1 + $0x1638] sm:$0xff]  ;;  %v818_v11 = vld [vmem:[%s6277_s1 + $0x16c0] sm:$0xff] }
 0x169   :  { %2063 = vmatpush.msra.mxu2 %v768_v12  ;;  %2082 = vmatpush.msra.mxu3 %v785_v13  ;;  %v833_v12 = vld [vmem:[%s6277_s1 + $0x1738] sm:$0xff]  ;;  %v850_v13 = vld [vmem:[%s6277_s1 + $0x17c0] sm:$0xff] }
 0x16a   :  { %2024 = vmatpush.msra.mxu0 %v735_v14  ;;  %2043 = vmatpush.msra.mxu1 %v752_v15  ;;  %v800_v14 = vld [vmem:[%s6277_s1 + $0x1630] sm:$0xff]  ;;  %v817_v15 = vld [vmem:[%s6277_s1 + $0x16b8] sm:$0xff] }
 0x16b   :  { %2064 = vmatpush.msra.mxu2 %v767_v16  ;;  %2083 = vmatpush.msra.mxu3 %v784_v17  ;;  %v832_v16 = vld [vmem:[%s6277_s1 + $0x1730] sm:$0xff]  ;;  %v849_v17 = vld [vmem:[%s6277_s1 + $0x17b8] sm:$0xff] }
 0x16c   :  { %2025 = vmatpush.msra.mxu0 %v734_v18  ;;  %2044 = vmatpush.msra.mxu1 %v751_v19  ;;  %v799_v18 = vld [vmem:[%s6277_s1 + $0x1628] sm:$0xff]  ;;  %v816_v19 = vld [vmem:[%s6277_s1 + $0x16b0] sm:$0xff] }
 0x16d   :  { %2065 = vmatpush.msra.mxu2 %v766_v20  ;;  %2084 = vmatpush.msra.mxu3 %v783_v21  ;;  %v831_v20 = vld [vmem:[%s6277_s1 + $0x1728] sm:$0xff]  ;;  %v848_v21 = vld [vmem:[%s6277_s1 + $0x17b0] sm:$0xff] }
 0x16e   :  { %2026 = vmatpush.msra.mxu0 %v733_v22  ;;  %2045 = vmatpush.msra.mxu1 %v750_v23  ;;  %v798_v22 = vld [vmem:[%s6277_s1 + $0x1620] sm:$0xff]  ;;  %v815_v23 = vld [vmem:[%s6277_s1 + $0x16a8] sm:$0xff] }
 0x16f   :  { %2066 = vmatpush.msra.mxu2 %v765_v24  ;;  %2085 = vmatpush.msra.mxu3 %v782_v25  ;;  %v830_v24 = vld [vmem:[%s6277_s1 + $0x1720] sm:$0xff]  ;;  %v847_v25 = vld [vmem:[%s6277_s1 + $0x17a8] sm:$0xff] }
 0x170   :  { %2027 = vmatpush.msra.mxu0 %v732_v26  ;;  %2046 = vmatpush.msra.mxu1 %v749_v27  ;;  %v797_v26 = vld [vmem:[%s6277_s1 + $0x1618] sm:$0xff]  ;;  %v814_v27 = vld [vmem:[%s6277_s1 + $0x16a0] sm:$0xff] }
 0x171   :  { %2067 = vmatpush.msra.mxu2 %v764_v28  ;;  %2086 = vmatpush.msra.mxu3 %v781_v29  ;;  %v829_v28 = vld [vmem:[%s6277_s1 + $0x1718] sm:$0xff]  ;;  %v846_v29 = vld [vmem:[%s6277_s1 + $0x17a0] sm:$0xff] }
 0x172   :  { %2028 = vmatpush.msra.mxu0 %v731_v30  ;;  %2047 = vmatpush.msra.mxu1 %v748_v31  ;;  %v796_v30 = vld [vmem:[%s6277_s1 + $0x1610] sm:$0xff]  ;;  %v813_v31 = vld [vmem:[%s6277_s1 + $0x1698] sm:$0xff] }
 0x173   :  { %2068 = vmatpush.msra.mxu2 %v763_v32  ;;  %2087 = vmatpush.msra.mxu3 %v780_v33  ;;  %v828_v32 = vld [vmem:[%s6277_s1 + $0x1710] sm:$0xff]  ;;  %v845_v33 = vld [vmem:[%s6277_s1 + $0x1798] sm:$0xff] }
 0x174   :  { %2029 = vmatpush.msra.mxu0 %v730_v34  ;;  %2048 = vmatpush.msra.mxu1 %v747_v35  ;;  %v795_v34 = vld [vmem:[%s6277_s1 + $0x1608] sm:$0xff]  ;;  %v812_v35 = vld [vmem:[%s6277_s1 + $0x1690] sm:$0xff] }
 0x175   :  { %2069 = vmatpush.msra.mxu2 %v762_v36  ;;  %2088 = vmatpush.msra.mxu3 %v779_v37  ;;  %v827_v36 = vld [vmem:[%s6277_s1 + $0x1708] sm:$0xff]  ;;  %v844_v37 = vld [vmem:[%s6277_s1 + $0x1790] sm:$0xff] }
 0x176   :  { %2030 = vmatmul.f32.vlgmr.msra.gmra.mxu0 %v60_v38  ;;  %2070 = vmatmul.f32.vlgmr.msra.gmra.mxu2 %v62_v39  ;;  %v794_v38 = vld [vmem:[%s6277_s1 + $0x1600] sm:$0xff]  ;;  %v811_v39 = vld [vmem:[%s6277_s1 + $0x1688] sm:$0xff] }
 0x177   :  { %2094 = vmatpush.msrb.mxu0 %v809_v40  ;;  %2134 = vmatpush.msrb.mxu2 %v841_v41  ;;  %v826_v40 = vld [vmem:[%s6277_s1 + $0x1700] sm:$0xff]  ;;  %v843_v41 = vld [vmem:[%s6277_s1 + $0x1788] sm:$0xff] }
 0x178   :  { %2049 = vmatpush.msra.mxu1 %v746_v42  ;;  %2089 = vmatpush.msra.mxu3 %v778_v43  ;;  %v64_v42 = vld [vmem:[%s6278_s0 + $0x160] sm:$0xff]  ;;  %v66_v43 = vld [vmem:[%s6278_s0 + $0x170] sm:$0xff] }
 0x179   :  { %2050 = vmatmul.f32.vlgmr.msra.gmra.mxu1 %v61_v44  ;;  %2090 = vmatmul.f32.vlgmr.msra.gmra.mxu3 %v63_v45  ;;  %v873_v44 = vld [vmem:[%s6277_s1 + $0x1878] sm:$0xff] }
 0x17a   :  { %2095 = vmatpush.msrb.mxu0 %v808_v46  ;;  %2114 = vmatpush.msrb.mxu1 %v825_v47  ;;  %v905_v45 = vld [vmem:[%s6277_s1 + $0x1978] sm:$0xff]  ;;  %v810_v46 = vld [vmem:[%s6277_s1 + $0x1680] sm:$0xff] }
 0x17b   :  { %2135 = vmatpush.msrb.mxu2 %v840_v48  ;;  %2154 = vmatpush.msrb.mxu3 %v857_v49  ;;  %v842_v47 = vld [vmem:[%s6277_s1 + $0x1780] sm:$0xff]  ;;  %v65_v48 = vld [vmem:[%s6278_s0 + $0x168] sm:$0xff]  ;;  %v67_v49 = vld [vmem:[%s6278_s0 + $0x178] sm:$0xff] }
 0x17c   :  { %2096 = vmatpush.msrb.mxu0 %v807_v50  ;;  %2115 = vmatpush.msrb.mxu1 %v824_v51  ;;  %v872_v50 = vld [vmem:[%s6277_s1 + $0x1870] sm:$0xff]  ;;  %v889_v51 = vld [vmem:[%s6277_s1 + $0x18f8] sm:$0xff] }
 0x17d   :  { %2136 = vmatpush.msrb.mxu2 %v839_v52  ;;  %2155 = vmatpush.msrb.mxu3 %v856_v53  ;;  %v904_v52 = vld [vmem:[%s6277_s1 + $0x1970] sm:$0xff]  ;;  %v921_v53 = vld [vmem:[%s6277_s1 + $0x19f8] sm:$0xff] }
 0x17e   :  { %2097 = vmatpush.msrb.mxu0 %v806_v54  ;;  %2116 = vmatpush.msrb.mxu1 %v823_v55  ;;  %v871_v54 = vld [vmem:[%s6277_s1 + $0x1868] sm:$0xff]  ;;  %v888_v55 = vld [vmem:[%s6277_s1 + $0x18f0] sm:$0xff] }
 0x17f   :  { %2137 = vmatpush.msrb.mxu2 %v838_v56  ;;  %2156 = vmatpush.msrb.mxu3 %v855_v57  ;;  %v903_v56 = vld [vmem:[%s6277_s1 + $0x1968] sm:$0xff]  ;;  %v920_v57 = vld [vmem:[%s6277_s1 + $0x19f0] sm:$0xff] }
 0x180   :  { %2098 = vmatpush.msrb.mxu0 %v805_v58  ;;  %2117 = vmatpush.msrb.mxu1 %v822_v59  ;;  %v870_v58 = vld [vmem:[%s6277_s1 + $0x1860] sm:$0xff]  ;;  %v887_v59 = vld [vmem:[%s6277_s1 + $0x18e8] sm:$0xff] }
 0x181   :  { %2138 = vmatpush.msrb.mxu2 %v837_v60  ;;  %2157 = vmatpush.msrb.mxu3 %v854_v61  ;;  %v902_v60 = vld [vmem:[%s6277_s1 + $0x1960] sm:$0xff]  ;;  %v919_v61 = vld [vmem:[%s6277_s1 + $0x19e8] sm:$0xff] }
 0x182   :  { %2099 = vmatpush.msrb.mxu0 %v804_v62  ;;  %2118 = vmatpush.msrb.mxu1 %v821_v63  ;;  %v869_v62 = vld [vmem:[%s6277_s1 + $0x1858] sm:$0xff]  ;;  %v886_v63 = vld [vmem:[%s6277_s1 + $0x18e0] sm:$0xff] }
 0x183   :  { %2139 = vmatpush.msrb.mxu2 %v836_v0  ;;  %2158 = vmatpush.msrb.mxu3 %v853_v1  ;;  %v901_v0 = vld [vmem:[%s6277_s1 + $0x1958] sm:$0xff]  ;;  %v918_v1 = vld [vmem:[%s6277_s1 + $0x19e0] sm:$0xff] }
 0x184   :  { %2100 = vmatpush.msrb.mxu0 %v803_v2  ;;  %2119 = vmatpush.msrb.mxu1 %v820_v3  ;;  %v868_v2 = vld [vmem:[%s6277_s1 + $0x1850] sm:$0xff]  ;;  %v885_v3 = vld [vmem:[%s6277_s1 + $0x18d8] sm:$0xff] }
 0x185   :  { %2140 = vmatpush.msrb.mxu2 %v835_v4  ;;  %2159 = vmatpush.msrb.mxu3 %v852_v5  ;;  %v900_v4 = vld [vmem:[%s6277_s1 + $0x1950] sm:$0xff]  ;;  %v917_v5 = vld [vmem:[%s6277_s1 + $0x19d8] sm:$0xff] }
 0x186   :  { %2101 = vmatpush.msrb.mxu0 %v802_v6  ;;  %2120 = vmatpush.msrb.mxu1 %v819_v7  ;;  %v867_v6 = vld [vmem:[%s6277_s1 + $0x1848] sm:$0xff]  ;;  %v884_v7 = vld [vmem:[%s6277_s1 + $0x18d0] sm:$0xff] }
 0x187   :  { %2141 = vmatpush.msrb.mxu2 %v834_v8  ;;  %2160 = vmatpush.msrb.mxu3 %v851_v9  ;;  %v899_v8 = vld [vmem:[%s6277_s1 + $0x1948] sm:$0xff]  ;;  %v916_v9 = vld [vmem:[%s6277_s1 + $0x19d0] sm:$0xff] }
 0x188   :  { %2102 = vmatpush.msrb.mxu0 %v801_v10  ;;  %2121 = vmatpush.msrb.mxu1 %v818_v11  ;;  %v866_v10 = vld [vmem:[%s6277_s1 + $0x1840] sm:$0xff]  ;;  %v883_v11 = vld [vmem:[%s6277_s1 + $0x18c8] sm:$0xff] }
 0x189   :  { %2142 = vmatpush.msrb.mxu2 %v833_v12  ;;  %2161 = vmatpush.msrb.mxu3 %v850_v13  ;;  %v898_v12 = vld [vmem:[%s6277_s1 + $0x1940] sm:$0xff]  ;;  %v915_v13 = vld [vmem:[%s6277_s1 + $0x19c8] sm:$0xff] }
 0x18a   :  { %2103 = vmatpush.msrb.mxu0 %v800_v14  ;;  %2122 = vmatpush.msrb.mxu1 %v817_v15  ;;  %v865_v14 = vld [vmem:[%s6277_s1 + $0x1838] sm:$0xff]  ;;  %v882_v15 = vld [vmem:[%s6277_s1 + $0x18c0] sm:$0xff] }
 0x18b   :  { %2143 = vmatpush.msrb.mxu2 %v832_v16  ;;  %2162 = vmatpush.msrb.mxu3 %v849_v17  ;;  %v897_v16 = vld [vmem:[%s6277_s1 + $0x1938] sm:$0xff]  ;;  %v914_v17 = vld [vmem:[%s6277_s1 + $0x19c0] sm:$0xff] }
 0x18c   :  { %2104 = vmatpush.msrb.mxu0 %v799_v18  ;;  %2123 = vmatpush.msrb.mxu1 %v816_v19  ;;  %v864_v18 = vld [vmem:[%s6277_s1 + $0x1830] sm:$0xff]  ;;  %v881_v19 = vld [vmem:[%s6277_s1 + $0x18b8] sm:$0xff] }
 0x18d   :  { %2144 = vmatpush.msrb.mxu2 %v831_v20  ;;  %2163 = vmatpush.msrb.mxu3 %v848_v21  ;;  %v896_v20 = vld [vmem:[%s6277_s1 + $0x1930] sm:$0xff]  ;;  %v913_v21 = vld [vmem:[%s6277_s1 + $0x19b8] sm:$0xff] }
 0x18e   :  { %2105 = vmatpush.msrb.mxu0 %v798_v22  ;;  %2124 = vmatpush.msrb.mxu1 %v815_v23  ;;  %v863_v22 = vld [vmem:[%s6277_s1 + $0x1828] sm:$0xff]  ;;  %v880_v23 = vld [vmem:[%s6277_s1 + $0x18b0] sm:$0xff] }
 0x18f   :  { %2145 = vmatpush.msrb.mxu2 %v830_v24  ;;  %2164 = vmatpush.msrb.mxu3 %v847_v25  ;;  %v895_v24 = vld [vmem:[%s6277_s1 + $0x1928] sm:$0xff]  ;;  %v912_v25 = vld [vmem:[%s6277_s1 + $0x19b0] sm:$0xff] }
 0x190   :  { %2106 = vmatpush.msrb.mxu0 %v797_v26  ;;  %2125 = vmatpush.msrb.mxu1 %v814_v27  ;;  %v862_v26 = vld [vmem:[%s6277_s1 + $0x1820] sm:$0xff]  ;;  %v879_v27 = vld [vmem:[%s6277_s1 + $0x18a8] sm:$0xff] }
 0x191   :  { %2146 = vmatpush.msrb.mxu2 %v829_v28  ;;  %2165 = vmatpush.msrb.mxu3 %v846_v29  ;;  %v894_v28 = vld [vmem:[%s6277_s1 + $0x1920] sm:$0xff]  ;;  %v911_v29 = vld [vmem:[%s6277_s1 + $0x19a8] sm:$0xff] }
 0x192   :  { %2107 = vmatpush.msrb.mxu0 %v796_v30  ;;  %2126 = vmatpush.msrb.mxu1 %v813_v31  ;;  %v861_v30 = vld [vmem:[%s6277_s1 + $0x1818] sm:$0xff]  ;;  %v878_v31 = vld [vmem:[%s6277_s1 + $0x18a0] sm:$0xff] }
 0x193   :  { %2147 = vmatpush.msrb.mxu2 %v828_v32  ;;  %2166 = vmatpush.msrb.mxu3 %v845_v33  ;;  %v893_v32 = vld [vmem:[%s6277_s1 + $0x1918] sm:$0xff]  ;;  %v910_v33 = vld [vmem:[%s6277_s1 + $0x19a0] sm:$0xff] }
 0x194   :  { %2108 = vmatpush.msrb.mxu0 %v795_v34  ;;  %2127 = vmatpush.msrb.mxu1 %v812_v35  ;;  %v860_v34 = vld [vmem:[%s6277_s1 + $0x1810] sm:$0xff]  ;;  %v877_v35 = vld [vmem:[%s6277_s1 + $0x1898] sm:$0xff] }
 0x195   :  { %2148 = vmatpush.msrb.mxu2 %v827_v36  ;;  %2167 = vmatpush.msrb.mxu3 %v844_v37  ;;  %v892_v36 = vld [vmem:[%s6277_s1 + $0x1910] sm:$0xff]  ;;  %v909_v37 = vld [vmem:[%s6277_s1 + $0x1998] sm:$0xff] }
 0x196   :  { %2109 = vmatpush.msrb.mxu0 %v794_v38  ;;  %2128 = vmatpush.msrb.mxu1 %v811_v39  ;;  %v859_v38 = vld [vmem:[%s6277_s1 + $0x1808] sm:$0xff]  ;;  %v876_v39 = vld [vmem:[%s6277_s1 + $0x1890] sm:$0xff] }
 0x197   :  { %2149 = vmatpush.msrb.mxu2 %v826_v40  ;;  %2168 = vmatpush.msrb.mxu3 %v843_v41  ;;  %v891_v40 = vld [vmem:[%s6277_s1 + $0x1908] sm:$0xff]  ;;  %v908_v41 = vld [vmem:[%s6277_s1 + $0x1990] sm:$0xff] }
 0x198   :  { %2110 = vmatmul.f32.vlgmr.msrb.gmra.mxu0 %v64_v42  ;;  %2150 = vmatmul.f32.vlgmr.msrb.gmra.mxu2 %v66_v43  ;;  %v858_v42 = vld [vmem:[%s6277_s1 + $0x1800] sm:$0xff]  ;;  %v875_v43 = vld [vmem:[%s6277_s1 + $0x1888] sm:$0xff] }
 0x199   :  { %2174 = vmatpush.msra.mxu0 %v873_v44  ;;  %2214 = vmatpush.msra.mxu2 %v905_v45  ;;  %v890_v44 = vld [vmem:[%s6277_s1 + $0x1900] sm:$0xff]  ;;  %v907_v45 = vld [vmem:[%s6277_s1 + $0x1988] sm:$0xff] }
 0x19a   :  { %2129 = vmatpush.msrb.mxu1 %v810_v46  ;;  %2169 = vmatpush.msrb.mxu3 %v842_v47  ;;  %v68_v46 = vld [vmem:[%s6278_s0 + $0x180] sm:$0xff]  ;;  %v70_v47 = vld [vmem:[%s6278_s0 + $0x190] sm:$0xff] }
 0x19b   :  { %2130 = vmatmul.f32.vlgmr.msrb.gmra.mxu1 %v65_v48  ;;  %2170 = vmatmul.f32.vlgmr.msrb.gmra.mxu3 %v67_v49  ;;  %v937_v48 = vld [vmem:[%s6277_s1 + $0x1a78] sm:$0xff] }
 0x19c   :  { %2175 = vmatpush.msra.mxu0 %v872_v50  ;;  %2194 = vmatpush.msra.mxu1 %v889_v51  ;;  %v969_v49 = vld [vmem:[%s6277_s1 + $0x1b78] sm:$0xff]  ;;  %v874_v50 = vld [vmem:[%s6277_s1 + $0x1880] sm:$0xff] }
 0x19d   :  { %2215 = vmatpush.msra.mxu2 %v904_v52  ;;  %2234 = vmatpush.msra.mxu3 %v921_v53  ;;  %v906_v51 = vld [vmem:[%s6277_s1 + $0x1980] sm:$0xff]  ;;  %v69_v52 = vld [vmem:[%s6278_s0 + $0x188] sm:$0xff]  ;;  %v71_v53 = vld [vmem:[%s6278_s0 + $0x198] sm:$0xff] }
 0x19e   :  { %2176 = vmatpush.msra.mxu0 %v871_v54  ;;  %2195 = vmatpush.msra.mxu1 %v888_v55  ;;  %v936_v54 = vld [vmem:[%s6277_s1 + $0x1a70] sm:$0xff]  ;;  %v953_v55 = vld [vmem:[%s6277_s1 + $0x1af8] sm:$0xff] }
 0x19f   :  { %2216 = vmatpush.msra.mxu2 %v903_v56  ;;  %2235 = vmatpush.msra.mxu3 %v920_v57  ;;  %v968_v56 = vld [vmem:[%s6277_s1 + $0x1b70] sm:$0xff]  ;;  %v985_v57 = vld [vmem:[%s6277_s1 + $0x1bf8] sm:$0xff] }
 0x1a0   :  { %2177 = vmatpush.msra.mxu0 %v870_v58  ;;  %2196 = vmatpush.msra.mxu1 %v887_v59  ;;  %v935_v58 = vld [vmem:[%s6277_s1 + $0x1a68] sm:$0xff]  ;;  %v952_v59 = vld [vmem:[%s6277_s1 + $0x1af0] sm:$0xff] }
 0x1a1   :  { %2217 = vmatpush.msra.mxu2 %v902_v60  ;;  %2236 = vmatpush.msra.mxu3 %v919_v61  ;;  %v967_v60 = vld [vmem:[%s6277_s1 + $0x1b68] sm:$0xff]  ;;  %v984_v61 = vld [vmem:[%s6277_s1 + $0x1bf0] sm:$0xff] }
 0x1a2   :  { %2178 = vmatpush.msra.mxu0 %v869_v62  ;;  %2197 = vmatpush.msra.mxu1 %v886_v63  ;;  %v934_v62 = vld [vmem:[%s6277_s1 + $0x1a60] sm:$0xff]  ;;  %v951_v63 = vld [vmem:[%s6277_s1 + $0x1ae8] sm:$0xff] }
 0x1a3   :  { %2218 = vmatpush.msra.mxu2 %v901_v0  ;;  %2237 = vmatpush.msra.mxu3 %v918_v1  ;;  %v966_v0 = vld [vmem:[%s6277_s1 + $0x1b60] sm:$0xff]  ;;  %v983_v1 = vld [vmem:[%s6277_s1 + $0x1be8] sm:$0xff] }
 0x1a4   :  { %2179 = vmatpush.msra.mxu0 %v868_v2  ;;  %2198 = vmatpush.msra.mxu1 %v885_v3  ;;  %v933_v2 = vld [vmem:[%s6277_s1 + $0x1a58] sm:$0xff]  ;;  %v950_v3 = vld [vmem:[%s6277_s1 + $0x1ae0] sm:$0xff] }
 0x1a5   :  { %2219 = vmatpush.msra.mxu2 %v900_v4  ;;  %2238 = vmatpush.msra.mxu3 %v917_v5  ;;  %v965_v4 = vld [vmem:[%s6277_s1 + $0x1b58] sm:$0xff]  ;;  %v982_v5 = vld [vmem:[%s6277_s1 + $0x1be0] sm:$0xff] }
 0x1a6   :  { %2180 = vmatpush.msra.mxu0 %v867_v6  ;;  %2199 = vmatpush.msra.mxu1 %v884_v7  ;;  %v932_v6 = vld [vmem:[%s6277_s1 + $0x1a50] sm:$0xff]  ;;  %v949_v7 = vld [vmem:[%s6277_s1 + $0x1ad8] sm:$0xff] }
 0x1a7   :  { %2220 = vmatpush.msra.mxu2 %v899_v8  ;;  %2239 = vmatpush.msra.mxu3 %v916_v9  ;;  %v964_v8 = vld [vmem:[%s6277_s1 + $0x1b50] sm:$0xff]  ;;  %v981_v9 = vld [vmem:[%s6277_s1 + $0x1bd8] sm:$0xff] }
 0x1a8   :  { %2181 = vmatpush.msra.mxu0 %v866_v10  ;;  %2200 = vmatpush.msra.mxu1 %v883_v11  ;;  %v931_v10 = vld [vmem:[%s6277_s1 + $0x1a48] sm:$0xff]  ;;  %v948_v11 = vld [vmem:[%s6277_s1 + $0x1ad0] sm:$0xff] }
 0x1a9   :  { %2221 = vmatpush.msra.mxu2 %v898_v12  ;;  %2240 = vmatpush.msra.mxu3 %v915_v13  ;;  %v963_v12 = vld [vmem:[%s6277_s1 + $0x1b48] sm:$0xff]  ;;  %v980_v13 = vld [vmem:[%s6277_s1 + $0x1bd0] sm:$0xff] }
 0x1aa   :  { %2182 = vmatpush.msra.mxu0 %v865_v14  ;;  %2201 = vmatpush.msra.mxu1 %v882_v15  ;;  %v930_v14 = vld [vmem:[%s6277_s1 + $0x1a40] sm:$0xff]  ;;  %v947_v15 = vld [vmem:[%s6277_s1 + $0x1ac8] sm:$0xff] }
 0x1ab   :  { %2222 = vmatpush.msra.mxu2 %v897_v16  ;;  %2241 = vmatpush.msra.mxu3 %v914_v17  ;;  %v962_v16 = vld [vmem:[%s6277_s1 + $0x1b40] sm:$0xff]  ;;  %v979_v17 = vld [vmem:[%s6277_s1 + $0x1bc8] sm:$0xff] }
 0x1ac   :  { %2183 = vmatpush.msra.mxu0 %v864_v18  ;;  %2202 = vmatpush.msra.mxu1 %v881_v19  ;;  %v929_v18 = vld [vmem:[%s6277_s1 + $0x1a38] sm:$0xff]  ;;  %v946_v19 = vld [vmem:[%s6277_s1 + $0x1ac0] sm:$0xff] }
 0x1ad   :  { %2223 = vmatpush.msra.mxu2 %v896_v20  ;;  %2242 = vmatpush.msra.mxu3 %v913_v21  ;;  %v961_v20 = vld [vmem:[%s6277_s1 + $0x1b38] sm:$0xff]  ;;  %v978_v21 = vld [vmem:[%s6277_s1 + $0x1bc0] sm:$0xff] }
 0x1ae   :  { %2184 = vmatpush.msra.mxu0 %v863_v22  ;;  %2203 = vmatpush.msra.mxu1 %v880_v23  ;;  %v928_v22 = vld [vmem:[%s6277_s1 + $0x1a30] sm:$0xff]  ;;  %v945_v23 = vld [vmem:[%s6277_s1 + $0x1ab8] sm:$0xff] }
 0x1af   :  { %2224 = vmatpush.msra.mxu2 %v895_v24  ;;  %2243 = vmatpush.msra.mxu3 %v912_v25  ;;  %v960_v24 = vld [vmem:[%s6277_s1 + $0x1b30] sm:$0xff]  ;;  %v977_v25 = vld [vmem:[%s6277_s1 + $0x1bb8] sm:$0xff] }
 0x1b0   :  { %2185 = vmatpush.msra.mxu0 %v862_v26  ;;  %2204 = vmatpush.msra.mxu1 %v879_v27  ;;  %v927_v26 = vld [vmem:[%s6277_s1 + $0x1a28] sm:$0xff]  ;;  %v944_v27 = vld [vmem:[%s6277_s1 + $0x1ab0] sm:$0xff] }
 0x1b1   :  { %2225 = vmatpush.msra.mxu2 %v894_v28  ;;  %2244 = vmatpush.msra.mxu3 %v911_v29  ;;  %v959_v28 = vld [vmem:[%s6277_s1 + $0x1b28] sm:$0xff]  ;;  %v976_v29 = vld [vmem:[%s6277_s1 + $0x1bb0] sm:$0xff] }
 0x1b2   :  { %2186 = vmatpush.msra.mxu0 %v861_v30  ;;  %2205 = vmatpush.msra.mxu1 %v878_v31  ;;  %v926_v30 = vld [vmem:[%s6277_s1 + $0x1a20] sm:$0xff]  ;;  %v943_v31 = vld [vmem:[%s6277_s1 + $0x1aa8] sm:$0xff] }
 0x1b3   :  { %2226 = vmatpush.msra.mxu2 %v893_v32  ;;  %2245 = vmatpush.msra.mxu3 %v910_v33  ;;  %v958_v32 = vld [vmem:[%s6277_s1 + $0x1b20] sm:$0xff]  ;;  %v975_v33 = vld [vmem:[%s6277_s1 + $0x1ba8] sm:$0xff] }
 0x1b4   :  { %2187 = vmatpush.msra.mxu0 %v860_v34  ;;  %2206 = vmatpush.msra.mxu1 %v877_v35  ;;  %v925_v34 = vld [vmem:[%s6277_s1 + $0x1a18] sm:$0xff]  ;;  %v942_v35 = vld [vmem:[%s6277_s1 + $0x1aa0] sm:$0xff] }
 0x1b5   :  { %2227 = vmatpush.msra.mxu2 %v892_v36  ;;  %2246 = vmatpush.msra.mxu3 %v909_v37  ;;  %v957_v36 = vld [vmem:[%s6277_s1 + $0x1b18] sm:$0xff]  ;;  %v974_v37 = vld [vmem:[%s6277_s1 + $0x1ba0] sm:$0xff] }
 0x1b6   :  { %2188 = vmatpush.msra.mxu0 %v859_v38  ;;  %2207 = vmatpush.msra.mxu1 %v876_v39  ;;  %v924_v38 = vld [vmem:[%s6277_s1 + $0x1a10] sm:$0xff]  ;;  %v941_v39 = vld [vmem:[%s6277_s1 + $0x1a98] sm:$0xff] }
 0x1b7   :  { %2228 = vmatpush.msra.mxu2 %v891_v40  ;;  %2247 = vmatpush.msra.mxu3 %v908_v41  ;;  %v956_v40 = vld [vmem:[%s6277_s1 + $0x1b10] sm:$0xff]  ;;  %v973_v41 = vld [vmem:[%s6277_s1 + $0x1b98] sm:$0xff] }
 0x1b8   :  { %2189 = vmatpush.msra.mxu0 %v858_v42  ;;  %2208 = vmatpush.msra.mxu1 %v875_v43  ;;  %v923_v42 = vld [vmem:[%s6277_s1 + $0x1a08] sm:$0xff]  ;;  %v940_v43 = vld [vmem:[%s6277_s1 + $0x1a90] sm:$0xff] }
 0x1b9   :  { %2229 = vmatpush.msra.mxu2 %v890_v44  ;;  %2248 = vmatpush.msra.mxu3 %v907_v45  ;;  %v955_v44 = vld [vmem:[%s6277_s1 + $0x1b08] sm:$0xff]  ;;  %v972_v45 = vld [vmem:[%s6277_s1 + $0x1b90] sm:$0xff] }
 0x1ba   :  { %2190 = vmatmul.f32.vlgmr.msra.gmra.mxu0 %v68_v46  ;;  %2230 = vmatmul.f32.vlgmr.msra.gmra.mxu2 %v70_v47  ;;  %v922_v46 = vld [vmem:[%s6277_s1 + $0x1a00] sm:$0xff]  ;;  %v939_v47 = vld [vmem:[%s6277_s1 + $0x1a88] sm:$0xff] }
 0x1bb   :  { %2254 = vmatpush.msrb.mxu0 %v937_v48  ;;  %2294 = vmatpush.msrb.mxu2 %v969_v49  ;;  %v954_v48 = vld [vmem:[%s6277_s1 + $0x1b00] sm:$0xff]  ;;  %v971_v49 = vld [vmem:[%s6277_s1 + $0x1b88] sm:$0xff] }
 0x1bc   :  { %2209 = vmatpush.msra.mxu1 %v874_v50  ;;  %2249 = vmatpush.msra.mxu3 %v906_v51  ;;  %v72_v50 = vld [vmem:[%s6278_s0 + $0x1a0] sm:$0xff]  ;;  %v74_v51 = vld [vmem:[%s6278_s0 + $0x1b0] sm:$0xff] }
 0x1bd   :  { %2210 = vmatmul.f32.vlgmr.msra.gmra.mxu1 %v69_v52  ;;  %2250 = vmatmul.f32.vlgmr.msra.gmra.mxu3 %v71_v53  ;;  %v1001_v52 = vld [vmem:[%s6277_s1 + $0x1c78] sm:$0xff] }
 0x1be   :  { %2255 = vmatpush.msrb.mxu0 %v936_v54  ;;  %2274 = vmatpush.msrb.mxu1 %v953_v55  ;;  %v1033_v53 = vld [vmem:[%s6277_s1 + $0x1d78] sm:$0xff]  ;;  %v938_v54 = vld [vmem:[%s6277_s1 + $0x1a80] sm:$0xff] }
 0x1bf   :  { %2295 = vmatpush.msrb.mxu2 %v968_v56  ;;  %2314 = vmatpush.msrb.mxu3 %v985_v57  ;;  %v970_v55 = vld [vmem:[%s6277_s1 + $0x1b80] sm:$0xff]  ;;  %v73_v56 = vld [vmem:[%s6278_s0 + $0x1a8] sm:$0xff]  ;;  %v75_v57 = vld [vmem:[%s6278_s0 + $0x1b8] sm:$0xff] }
 0x1c0   :  { %2256 = vmatpush.msrb.mxu0 %v935_v58  ;;  %2275 = vmatpush.msrb.mxu1 %v952_v59  ;;  %v1000_v58 = vld [vmem:[%s6277_s1 + $0x1c70] sm:$0xff]  ;;  %v1017_v59 = vld [vmem:[%s6277_s1 + $0x1cf8] sm:$0xff] }
 0x1c1   :  { %2296 = vmatpush.msrb.mxu2 %v967_v60  ;;  %2315 = vmatpush.msrb.mxu3 %v984_v61  ;;  %v1032_v60 = vld [vmem:[%s6277_s1 + $0x1d70] sm:$0xff]  ;;  %v1049_v61 = vld [vmem:[%s6277_s1 + $0x1df8] sm:$0xff] }
 0x1c2   :  { %2257 = vmatpush.msrb.mxu0 %v934_v62  ;;  %2276 = vmatpush.msrb.mxu1 %v951_v63  ;;  %v999_v62 = vld [vmem:[%s6277_s1 + $0x1c68] sm:$0xff]  ;;  %v1016_v63 = vld [vmem:[%s6277_s1 + $0x1cf0] sm:$0xff] }
 0x1c3   :  { %2297 = vmatpush.msrb.mxu2 %v966_v0  ;;  %2316 = vmatpush.msrb.mxu3 %v983_v1  ;;  %v1031_v0 = vld [vmem:[%s6277_s1 + $0x1d68] sm:$0xff]  ;;  %v1048_v1 = vld [vmem:[%s6277_s1 + $0x1df0] sm:$0xff] }
 0x1c4   :  { %2258 = vmatpush.msrb.mxu0 %v933_v2  ;;  %2277 = vmatpush.msrb.mxu1 %v950_v3  ;;  %v998_v2 = vld [vmem:[%s6277_s1 + $0x1c60] sm:$0xff]  ;;  %v1015_v3 = vld [vmem:[%s6277_s1 + $0x1ce8] sm:$0xff] }
 0x1c5   :  { %2298 = vmatpush.msrb.mxu2 %v965_v4  ;;  %2317 = vmatpush.msrb.mxu3 %v982_v5  ;;  %v1030_v4 = vld [vmem:[%s6277_s1 + $0x1d60] sm:$0xff]  ;;  %v1047_v5 = vld [vmem:[%s6277_s1 + $0x1de8] sm:$0xff] }
 0x1c6   :  { %2259 = vmatpush.msrb.mxu0 %v932_v6  ;;  %2278 = vmatpush.msrb.mxu1 %v949_v7  ;;  %v997_v6 = vld [vmem:[%s6277_s1 + $0x1c58] sm:$0xff]  ;;  %v1014_v7 = vld [vmem:[%s6277_s1 + $0x1ce0] sm:$0xff] }
 0x1c7   :  { %2299 = vmatpush.msrb.mxu2 %v964_v8  ;;  %2318 = vmatpush.msrb.mxu3 %v981_v9  ;;  %v1029_v8 = vld [vmem:[%s6277_s1 + $0x1d58] sm:$0xff]  ;;  %v1046_v9 = vld [vmem:[%s6277_s1 + $0x1de0] sm:$0xff] }
 0x1c8   :  { %2260 = vmatpush.msrb.mxu0 %v931_v10  ;;  %2279 = vmatpush.msrb.mxu1 %v948_v11  ;;  %v996_v10 = vld [vmem:[%s6277_s1 + $0x1c50] sm:$0xff]  ;;  %v1013_v11 = vld [vmem:[%s6277_s1 + $0x1cd8] sm:$0xff] }
 0x1c9   :  { %2300 = vmatpush.msrb.mxu2 %v963_v12  ;;  %2319 = vmatpush.msrb.mxu3 %v980_v13  ;;  %v1028_v12 = vld [vmem:[%s6277_s1 + $0x1d50] sm:$0xff]  ;;  %v1045_v13 = vld [vmem:[%s6277_s1 + $0x1dd8] sm:$0xff] }
 0x1ca   :  { %2261 = vmatpush.msrb.mxu0 %v930_v14  ;;  %2280 = vmatpush.msrb.mxu1 %v947_v15  ;;  %v995_v14 = vld [vmem:[%s6277_s1 + $0x1c48] sm:$0xff]  ;;  %v1012_v15 = vld [vmem:[%s6277_s1 + $0x1cd0] sm:$0xff] }
 0x1cb   :  { %2301 = vmatpush.msrb.mxu2 %v962_v16  ;;  %2320 = vmatpush.msrb.mxu3 %v979_v17  ;;  %v1027_v16 = vld [vmem:[%s6277_s1 + $0x1d48] sm:$0xff]  ;;  %v1044_v17 = vld [vmem:[%s6277_s1 + $0x1dd0] sm:$0xff] }
 0x1cc   :  { %2262 = vmatpush.msrb.mxu0 %v929_v18  ;;  %2281 = vmatpush.msrb.mxu1 %v946_v19  ;;  %v994_v18 = vld [vmem:[%s6277_s1 + $0x1c40] sm:$0xff]  ;;  %v1011_v19 = vld [vmem:[%s6277_s1 + $0x1cc8] sm:$0xff] }
 0x1cd   :  { %2302 = vmatpush.msrb.mxu2 %v961_v20  ;;  %2321 = vmatpush.msrb.mxu3 %v978_v21  ;;  %v1026_v20 = vld [vmem:[%s6277_s1 + $0x1d40] sm:$0xff]  ;;  %v1043_v21 = vld [vmem:[%s6277_s1 + $0x1dc8] sm:$0xff] }
 0x1ce   :  { %2263 = vmatpush.msrb.mxu0 %v928_v22  ;;  %2282 = vmatpush.msrb.mxu1 %v945_v23  ;;  %v993_v22 = vld [vmem:[%s6277_s1 + $0x1c38] sm:$0xff]  ;;  %v1010_v23 = vld [vmem:[%s6277_s1 + $0x1cc0] sm:$0xff] }
 0x1cf   :  { %2303 = vmatpush.msrb.mxu2 %v960_v24  ;;  %2322 = vmatpush.msrb.mxu3 %v977_v25  ;;  %v1025_v24 = vld [vmem:[%s6277_s1 + $0x1d38] sm:$0xff]  ;;  %v1042_v25 = vld [vmem:[%s6277_s1 + $0x1dc0] sm:$0xff] }
 0x1d0   :  { %2264 = vmatpush.msrb.mxu0 %v927_v26  ;;  %2283 = vmatpush.msrb.mxu1 %v944_v27  ;;  %v992_v26 = vld [vmem:[%s6277_s1 + $0x1c30] sm:$0xff]  ;;  %v1009_v27 = vld [vmem:[%s6277_s1 + $0x1cb8] sm:$0xff] }
 0x1d1   :  { %2304 = vmatpush.msrb.mxu2 %v959_v28  ;;  %2323 = vmatpush.msrb.mxu3 %v976_v29  ;;  %v1024_v28 = vld [vmem:[%s6277_s1 + $0x1d30] sm:$0xff]  ;;  %v1041_v29 = vld [vmem:[%s6277_s1 + $0x1db8] sm:$0xff] }
 0x1d2   :  { %2265 = vmatpush.msrb.mxu0 %v926_v30  ;;  %2284 = vmatpush.msrb.mxu1 %v943_v31  ;;  %v991_v30 = vld [vmem:[%s6277_s1 + $0x1c28] sm:$0xff]  ;;  %v1008_v31 = vld [vmem:[%s6277_s1 + $0x1cb0] sm:$0xff] }
 0x1d3   :  { %2305 = vmatpush.msrb.mxu2 %v958_v32  ;;  %2324 = vmatpush.msrb.mxu3 %v975_v33  ;;  %v1023_v32 = vld [vmem:[%s6277_s1 + $0x1d28] sm:$0xff]  ;;  %v1040_v33 = vld [vmem:[%s6277_s1 + $0x1db0] sm:$0xff] }
 0x1d4   :  { %2266 = vmatpush.msrb.mxu0 %v925_v34  ;;  %2285 = vmatpush.msrb.mxu1 %v942_v35  ;;  %v990_v34 = vld [vmem:[%s6277_s1 + $0x1c20] sm:$0xff]  ;;  %v1007_v35 = vld [vmem:[%s6277_s1 + $0x1ca8] sm:$0xff] }
 0x1d5   :  { %2306 = vmatpush.msrb.mxu2 %v957_v36  ;;  %2325 = vmatpush.msrb.mxu3 %v974_v37  ;;  %v1022_v36 = vld [vmem:[%s6277_s1 + $0x1d20] sm:$0xff]  ;;  %v1039_v37 = vld [vmem:[%s6277_s1 + $0x1da8] sm:$0xff] }
 0x1d6   :  { %2267 = vmatpush.msrb.mxu0 %v924_v38  ;;  %2286 = vmatpush.msrb.mxu1 %v941_v39  ;;  %v989_v38 = vld [vmem:[%s6277_s1 + $0x1c18] sm:$0xff]  ;;  %v1006_v39 = vld [vmem:[%s6277_s1 + $0x1ca0] sm:$0xff] }
 0x1d7   :  { %2307 = vmatpush.msrb.mxu2 %v956_v40  ;;  %2326 = vmatpush.msrb.mxu3 %v973_v41  ;;  %v1021_v40 = vld [vmem:[%s6277_s1 + $0x1d18] sm:$0xff]  ;;  %v1038_v41 = vld [vmem:[%s6277_s1 + $0x1da0] sm:$0xff] }
 0x1d8   :  { %2268 = vmatpush.msrb.mxu0 %v923_v42  ;;  %2287 = vmatpush.msrb.mxu1 %v940_v43  ;;  %v988_v42 = vld [vmem:[%s6277_s1 + $0x1c10] sm:$0xff]  ;;  %v1005_v43 = vld [vmem:[%s6277_s1 + $0x1c98] sm:$0xff] }
 0x1d9   :  { %2308 = vmatpush.msrb.mxu2 %v955_v44  ;;  %2327 = vmatpush.msrb.mxu3 %v972_v45  ;;  %v1020_v44 = vld [vmem:[%s6277_s1 + $0x1d10] sm:$0xff]  ;;  %v1037_v45 = vld [vmem:[%s6277_s1 + $0x1d98] sm:$0xff] }
 0x1da   :  { %2269 = vmatpush.msrb.mxu0 %v922_v46  ;;  %2288 = vmatpush.msrb.mxu1 %v939_v47  ;;  %v987_v46 = vld [vmem:[%s6277_s1 + $0x1c08] sm:$0xff]  ;;  %v1004_v47 = vld [vmem:[%s6277_s1 + $0x1c90] sm:$0xff] }
 0x1db   :  { %2309 = vmatpush.msrb.mxu2 %v954_v48  ;;  %2328 = vmatpush.msrb.mxu3 %v971_v49  ;;  %v1019_v48 = vld [vmem:[%s6277_s1 + $0x1d08] sm:$0xff]  ;;  %v1036_v49 = vld [vmem:[%s6277_s1 + $0x1d90] sm:$0xff] }
 0x1dc   :  { %2270 = vmatmul.f32.vlgmr.msrb.gmra.mxu0 %v72_v50  ;;  %2310 = vmatmul.f32.vlgmr.msrb.gmra.mxu2 %v74_v51  ;;  %v986_v50 = vld [vmem:[%s6277_s1 + $0x1c00] sm:$0xff]  ;;  %v1003_v51 = vld [vmem:[%s6277_s1 + $0x1c88] sm:$0xff] }
 0x1dd   :  { %2334 = vmatpush.msra.mxu0 %v1001_v52  ;;  %2374 = vmatpush.msra.mxu2 %v1033_v53  ;;  %v1018_v52 = vld [vmem:[%s6277_s1 + $0x1d00] sm:$0xff]  ;;  %v1035_v53 = vld [vmem:[%s6277_s1 + $0x1d88] sm:$0xff] }
 0x1de   :  { %2289 = vmatpush.msrb.mxu1 %v938_v54  ;;  %2329 = vmatpush.msrb.mxu3 %v970_v55  ;;  %v76_v54 = vld [vmem:[%s6278_s0 + $0x1c0] sm:$0xff]  ;;  %v78_v55 = vld [vmem:[%s6278_s0 + $0x1d0] sm:$0xff] }
 0x1df   :  { %2290 = vmatmul.f32.vlgmr.msrb.gmra.mxu1 %v73_v56  ;;  %2330 = vmatmul.f32.vlgmr.msrb.gmra.mxu3 %v75_v57  ;;  %v1065_v56 = vld [vmem:[%s6277_s1 + $0x1e78] sm:$0xff] }
 0x1e0   :  { %2335 = vmatpush.msra.mxu0 %v1000_v58  ;;  %2354 = vmatpush.msra.mxu1 %v1017_v59  ;;  %v1097_v57 = vld [vmem:[%s6277_s1 + $0x1f78] sm:$0xff]  ;;  %v1002_v58 = vld [vmem:[%s6277_s1 + $0x1c80] sm:$0xff] }
 0x1e1   :  { %2375 = vmatpush.msra.mxu2 %v1032_v60  ;;  %2394 = vmatpush.msra.mxu3 %v1049_v61  ;;  %v1034_v59 = vld [vmem:[%s6277_s1 + $0x1d80] sm:$0xff]  ;;  %v77_v60 = vld [vmem:[%s6278_s0 + $0x1c8] sm:$0xff]  ;;  %v79_v61 = vld [vmem:[%s6278_s0 + $0x1d8] sm:$0xff] }
 0x1e2   :  { %2336 = vmatpush.msra.mxu0 %v999_v62  ;;  %2355 = vmatpush.msra.mxu1 %v1016_v63  ;;  %v1064_v62 = vld [vmem:[%s6277_s1 + $0x1e70] sm:$0xff]  ;;  %v1081_v63 = vld [vmem:[%s6277_s1 + $0x1ef8] sm:$0xff] }
 0x1e3   :  { %2376 = vmatpush.msra.mxu2 %v1031_v0  ;;  %2395 = vmatpush.msra.mxu3 %v1048_v1  ;;  %v1096_v0 = vld [vmem:[%s6277_s1 + $0x1f70] sm:$0xff]  ;;  %v1113_v1 = vld [vmem:[%s6277_s1 + $0x1ff8] sm:$0xff] }
 0x1e4   :  { %2337 = vmatpush.msra.mxu0 %v998_v2  ;;  %2356 = vmatpush.msra.mxu1 %v1015_v3  ;;  %v1063_v2 = vld [vmem:[%s6277_s1 + $0x1e68] sm:$0xff]  ;;  %v1080_v3 = vld [vmem:[%s6277_s1 + $0x1ef0] sm:$0xff] }
 0x1e5   :  { %2377 = vmatpush.msra.mxu2 %v1030_v4  ;;  %2396 = vmatpush.msra.mxu3 %v1047_v5  ;;  %v1095_v4 = vld [vmem:[%s6277_s1 + $0x1f68] sm:$0xff]  ;;  %v1112_v5 = vld [vmem:[%s6277_s1 + $0x1ff0] sm:$0xff] }
 0x1e6   :  { %2338 = vmatpush.msra.mxu0 %v997_v6  ;;  %2357 = vmatpush.msra.mxu1 %v1014_v7  ;;  %v1062_v6 = vld [vmem:[%s6277_s1 + $0x1e60] sm:$0xff]  ;;  %v1079_v7 = vld [vmem:[%s6277_s1 + $0x1ee8] sm:$0xff] }
 0x1e7   :  { %2378 = vmatpush.msra.mxu2 %v1029_v8  ;;  %2397 = vmatpush.msra.mxu3 %v1046_v9  ;;  %v1094_v8 = vld [vmem:[%s6277_s1 + $0x1f60] sm:$0xff]  ;;  %v1111_v9 = vld [vmem:[%s6277_s1 + $0x1fe8] sm:$0xff] }
 0x1e8   :  { %2339 = vmatpush.msra.mxu0 %v996_v10  ;;  %2358 = vmatpush.msra.mxu1 %v1013_v11  ;;  %v1061_v10 = vld [vmem:[%s6277_s1 + $0x1e58] sm:$0xff]  ;;  %v1078_v11 = vld [vmem:[%s6277_s1 + $0x1ee0] sm:$0xff] }
 0x1e9   :  { %2379 = vmatpush.msra.mxu2 %v1028_v12  ;;  %2398 = vmatpush.msra.mxu3 %v1045_v13  ;;  %v1093_v12 = vld [vmem:[%s6277_s1 + $0x1f58] sm:$0xff]  ;;  %v1110_v13 = vld [vmem:[%s6277_s1 + $0x1fe0] sm:$0xff] }
 0x1ea   :  { %2340 = vmatpush.msra.mxu0 %v995_v14  ;;  %2359 = vmatpush.msra.mxu1 %v1012_v15  ;;  %v1060_v14 = vld [vmem:[%s6277_s1 + $0x1e50] sm:$0xff]  ;;  %v1077_v15 = vld [vmem:[%s6277_s1 + $0x1ed8] sm:$0xff] }
 0x1eb   :  { %2380 = vmatpush.msra.mxu2 %v1027_v16  ;;  %2399 = vmatpush.msra.mxu3 %v1044_v17  ;;  %v1092_v16 = vld [vmem:[%s6277_s1 + $0x1f50] sm:$0xff]  ;;  %v1109_v17 = vld [vmem:[%s6277_s1 + $0x1fd8] sm:$0xff] }
 0x1ec   :  { %2341 = vmatpush.msra.mxu0 %v994_v18  ;;  %2360 = vmatpush.msra.mxu1 %v1011_v19  ;;  %v1059_v18 = vld [vmem:[%s6277_s1 + $0x1e48] sm:$0xff]  ;;  %v1076_v19 = vld [vmem:[%s6277_s1 + $0x1ed0] sm:$0xff] }
 0x1ed   :  { %2381 = vmatpush.msra.mxu2 %v1026_v20  ;;  %2400 = vmatpush.msra.mxu3 %v1043_v21  ;;  %v2654_v20 = vld [vmem:[%s6279_s2] ss:$0 sm:$0xff]  ;;  %v1091_v21 = vld [vmem:[%s6277_s1 + $0x1f48] sm:$0xff] }
 0x1ee   :  { %2342 = vmatpush.msra.mxu0 %v993_v22  ;;  %2361 = vmatpush.msra.mxu1 %v1010_v23  ;;  %v1108_v22 = vld [vmem:[%s6277_s1 + $0x1fd0] sm:$0xff]  ;;  %v1231_v23 = vpop.f32.mrf.mxu0 }
 0x1ef   :  { %2382 = vmatpush.msra.mxu2 %v1025_v24  ;;  %2401 = vmatpush.msra.mxu3 %v1042_v25  ;;  %v1058_v24 = vld [vmem:[%s6277_s1 + $0x1e40] sm:$0xff]  ;;  %v1075_v25 = vld [vmem:[%s6277_s1 + $0x1ec8] sm:$0xff] }
 0x1f0   :  { %2343 = vmatpush.msra.mxu0 %v992_v26  ;;  %2362 = vmatpush.msra.mxu1 %v1009_v27  ;;  %v1090_v26 = vld [vmem:[%s6277_s1 + $0x1f40] sm:$0xff]  ;;  %v1107_v27 = vld [vmem:[%s6277_s1 + $0x1fc8] sm:$0xff] }
 0x1f1   :  { %2383 = vmatpush.msra.mxu2 %v1024_v28  ;;  %2402 = vmatpush.msra.mxu3 %v1041_v29  ;;  %v1057_v28 = vld [vmem:[%s6277_s1 + $0x1e38] sm:$0xff]  ;;  %v1074_v29 = vld [vmem:[%s6277_s1 + $0x1ec0] sm:$0xff] }
 0x1f2   :  { %2344 = vmatpush.msra.mxu0 %v991_v30  ;;  %2363 = vmatpush.msra.mxu1 %v1008_v31  ;;  %v1232_v30 = vadd.f32 %v2654_v20, %v1231_v23  ;;  %v1089_v31 = vld [vmem:[%s6277_s1 + $0x1f38] sm:$0xff]  ;;  %v1127_v20 = vld [vmem:[%s6277_s1 + $0x2068] sm:$0xff]  ;;  %v1176_v23 = vld [vmem:[%s6277_s1 + $0x21f0] sm:$0xff] }
 0x1f3   :  { %2384 = vmatpush.msra.mxu2 %v1023_v32  ;;  %2403 = vmatpush.msra.mxu3 %v1040_v33  ;;  %v1106_v32 = vld [vmem:[%s6277_s1 + $0x1fc0] sm:$0xff]  ;;  %v1251_v33 = vpop.f32.mrf.mxu1 }
 0x1f4   :  { %2345 = vmatpush.msra.mxu0 %v990_v34  ;;  %2364 = vmatpush.msra.mxu1 %v1007_v35  ;;  %v1056_v34 = vld [vmem:[%s6277_s1 + $0x1e30] sm:$0xff]  ;;  %v1073_v35 = vld [vmem:[%s6277_s1 + $0x1eb8] sm:$0xff] }
 0x1f5   :  { %2385 = vmatpush.msra.mxu2 %v1022_v36  ;;  %2404 = vmatpush.msra.mxu3 %v1039_v37  ;;  %v1088_v36 = vld [vmem:[%s6277_s1 + $0x1f30] sm:$0xff]  ;;  %v1105_v37 = vld [vmem:[%s6277_s1 + $0x1fb8] sm:$0xff] }
 0x1f6   :  { %2346 = vmatpush.msra.mxu0 %v989_v38  ;;  %2365 = vmatpush.msra.mxu1 %v1006_v39  ;;  %v1055_v38 = vld [vmem:[%s6277_s1 + $0x1e28] sm:$0xff]  ;;  %v1072_v39 = vld [vmem:[%s6277_s1 + $0x1eb0] sm:$0xff] }
 0x1f7   :  { %2386 = vmatpush.msra.mxu2 %v1021_v40  ;;  %2405 = vmatpush.msra.mxu3 %v1038_v41  ;;  %v1252_v40 = vadd.f32 %v1251_v33, %v1232_v30  ;;  %v1087_v41 = vld [vmem:[%s6277_s1 + $0x1f28] sm:$0xff]  ;;  %v1125_v30 = vld [vmem:[%s6277_s1 + $0x2058] sm:$0xff]  ;;  %v1174_v33 = vld [vmem:[%s6277_s1 + $0x21e0] sm:$0xff] }
 0x1f8   :  { %2347 = vmatpush.msra.mxu0 %v988_v42  ;;  %2366 = vmatpush.msra.mxu1 %v1005_v43  ;;  %v1104_v42 = vld [vmem:[%s6277_s1 + $0x1fb0] sm:$0xff]  ;;  %v1271_v43 = vpop.f32.mrf.mxu2 }
 0x1f9   :  { %2387 = vmatpush.msra.mxu2 %v1020_v44  ;;  %2406 = vmatpush.msra.mxu3 %v1037_v45  ;;  %v1054_v44 = vld [vmem:[%s6277_s1 + $0x1e20] sm:$0xff]  ;;  %v1071_v45 = vld [vmem:[%s6277_s1 + $0x1ea8] sm:$0xff] }
 0x1fa   :  { %2348 = vmatpush.msra.mxu0 %v987_v46  ;;  %2367 = vmatpush.msra.mxu1 %v1004_v47  ;;  %v1086_v46 = vld [vmem:[%s6277_s1 + $0x1f20] sm:$0xff]  ;;  %v1103_v47 = vld [vmem:[%s6277_s1 + $0x1fa8] sm:$0xff] }
 0x1fb   :  { %2388 = vmatpush.msra.mxu2 %v1019_v48  ;;  %2407 = vmatpush.msra.mxu3 %v1036_v49  ;;  %v1053_v48 = vld [vmem:[%s6277_s1 + $0x1e18] sm:$0xff]  ;;  %v1070_v49 = vld [vmem:[%s6277_s1 + $0x1ea0] sm:$0xff] }
 0x1fc   :  { %2349 = vmatpush.msra.mxu0 %v986_v50  ;;  %2368 = vmatpush.msra.mxu1 %v1003_v51  ;;  %v1272_v50 = vadd.f32 %v1271_v43, %v1252_v40  ;;  %v1085_v51 = vld [vmem:[%s6277_s1 + $0x1f18] sm:$0xff]  ;;  %v1123_v40 = vld [vmem:[%s6277_s1 + $0x2048] sm:$0xff] }
 0x1fd   :  { %2389 = vmatpush.msra.mxu2 %v1018_v52  ;;  %2408 = vmatpush.msra.mxu3 %v1035_v53  ;;  %v1102_v52 = vld [vmem:[%s6277_s1 + $0x1fa0] sm:$0xff]  ;;  %v1291_v53 = vpop.f32.mrf.mxu3  ;;  %v1155_v43 = vld [vmem:[%s6277_s1 + $0x2148] sm:$0xff] }
 0x1fe   :  { %2350 = vmatmul.f32.vlgmr.msra.gmra.mxu0 %v76_v54  ;;  %2390 = vmatmul.f32.vlgmr.msra.gmra.mxu2 %v78_v55  ;;  %v1052_v54 = vld [vmem:[%s6277_s1 + $0x1e10] sm:$0xff]  ;;  %v1069_v55 = vld [vmem:[%s6277_s1 + $0x1e98] sm:$0xff] }
 0x1ff   :  { %2414 = vmatpush.msrb.mxu0 %v1065_v56  ;;  %2454 = vmatpush.msrb.mxu2 %v1097_v57  ;;  %v1084_v56 = vld [vmem:[%s6277_s1 + $0x1f10] sm:$0xff]  ;;  %v1101_v57 = vld [vmem:[%s6277_s1 + $0x1f98] sm:$0xff] }
 0x200   :  { %2369 = vmatpush.msra.mxu1 %v1002_v58  ;;  %2409 = vmatpush.msra.mxu3 %v1034_v59  ;;  %v1051_v58 = vld [vmem:[%s6277_s1 + $0x1e08] sm:$0xff]  ;;  %v1068_v59 = vld [vmem:[%s6277_s1 + $0x1e90] sm:$0xff] }
 0x201   :  { %2370 = vmatmul.f32.vlgmr.msra.gmra.mxu1 %v77_v60  ;;  %2410 = vmatmul.f32.vlgmr.msra.gmra.mxu3 %v79_v61  ;;  %v1292_v60 = vadd.f32 %v1291_v53, %v1272_v50  ;;  %v1083_v61 = vld [vmem:[%s6277_s1 + $0x1f08] sm:$0xff] }
 0x202   :  { %2415 = vmatpush.msrb.mxu0 %v1064_v62  ;;  %2434 = vmatpush.msrb.mxu1 %v1081_v63  ;;  %v1100_v62 = vld [vmem:[%s6277_s1 + $0x1f90] sm:$0xff]  ;;  %v1311_v63 = vpop.f32.mrf.mxu0 }
 0x203   :  { %2455 = vmatpush.msrb.mxu2 %v1096_v0  ;;  %2474 = vmatpush.msrb.mxu3 %v1113_v1  ;;  %v1050_v0 = vld [vmem:[%s6277_s1 + $0x1e00] sm:$0xff]  ;;  %v1067_v1 = vld [vmem:[%s6277_s1 + $0x1e88] sm:$0xff] }
 0x204   :  { %2416 = vmatpush.msrb.mxu0 %v1063_v2  ;;  %2435 = vmatpush.msrb.mxu1 %v1080_v3  ;;  %v1082_v2 = vld [vmem:[%s6277_s1 + $0x1f00] sm:$0xff]  ;;  %v1099_v3 = vld [vmem:[%s6277_s1 + $0x1f88] sm:$0xff] }
 0x205   :  { %2456 = vmatpush.msrb.mxu2 %v1095_v4  ;;  %2475 = vmatpush.msrb.mxu3 %v1112_v5  ;;  %v80_v4 = vld [vmem:[%s6278_s0 + $0x1e0] sm:$0xff]  ;;  %v82_v5 = vld [vmem:[%s6278_s0 + $0x1f0] sm:$0xff] }
 0x206   :  { %2417 = vmatpush.msrb.mxu0 %v1062_v6  ;;  %2436 = vmatpush.msrb.mxu1 %v1079_v7  ;;  %v1312_v6 = vadd.f32 %v1311_v63, %v1292_v60  ;;  %v1129_v7 = vld [vmem:[%s6277_s1 + $0x2078] sm:$0xff]  ;;  %v1136_v63 = vld [vmem:[%s6277_s1 + $0x20b0] sm:$0xff] }
 0x207   :  { %2457 = vmatpush.msrb.mxu2 %v1094_v8  ;;  %2476 = vmatpush.msrb.mxu3 %v1111_v9  ;;  %v1161_v8 = vld [vmem:[%s6277_s1 + $0x2178] sm:$0xff]  ;;  %v1331_v9 = vpop.f32.mrf.mxu1 }
 0x208   :  { %2418 = vmatpush.msrb.mxu0 %v1061_v10  ;;  %2437 = vmatpush.msrb.mxu1 %v1078_v11  ;;  %v1066_v10 = vld [vmem:[%s6277_s1 + $0x1e80] sm:$0xff]  ;;  %v1169_v60 = vld [vmem:[%s6277_s1 + $0x21b8] sm:$0xff] }
 0x209   :  { %2458 = vmatpush.msrb.mxu2 %v1093_v12  ;;  %2477 = vmatpush.msrb.mxu3 %v1110_v13  ;;  %v1098_v11 = vld [vmem:[%s6277_s1 + $0x1f80] sm:$0xff]  ;;  %v81_v12 = vld [vmem:[%s6278_s0 + $0x1e8] sm:$0xff]  ;;  %v83_v13 = vld [vmem:[%s6278_s0 + $0x1f8] sm:$0xff] }
 0x20a   :  { %2419 = vmatpush.msrb.mxu0 %v1060_v14  ;;  %2438 = vmatpush.msrb.mxu1 %v1077_v15  ;;  %v1128_v14 = vld [vmem:[%s6277_s1 + $0x2070] sm:$0xff]  ;;  %v1145_v15 = vld [vmem:[%s6277_s1 + $0x20f8] sm:$0xff] }
 0x20b   :  { %2459 = vmatpush.msrb.mxu2 %v1092_v16  ;;  %2478 = vmatpush.msrb.mxu3 %v1109_v17  ;;  %v1332_v16 = vadd.f32 %v1331_v9, %v1312_v6  ;;  %v1160_v17 = vld [vmem:[%s6277_s1 + $0x2170] sm:$0xff]  ;;  %v1150_v6 = vld [vmem:[%s6277_s1 + $0x2120] sm:$0xff] }
 0x20c   :  { %2420 = vmatpush.msrb.mxu0 %v1059_v18  ;;  %2439 = vmatpush.msrb.mxu1 %v1076_v19  ;;  %v1177_v18 = vld [vmem:[%s6277_s1 + $0x21f8] sm:$0xff]  ;;  %v1351_v19 = vpop.f32.mrf.mxu2  ;;  %v1134_v9 = vld [vmem:[%s6277_s1 + $0x20a0] sm:$0xff] }
 0x20d   :  { %2460 = vmatpush.msrb.mxu2 %v1091_v21  ;;  %2479 = vmatpush.msrb.mxu3 %v1108_v22  ;;  %v1144_v21 = vld [vmem:[%s6277_s1 + $0x20f0] sm:$0xff]  ;;  %v1159_v22 = vld [vmem:[%s6277_s1 + $0x2168] sm:$0xff] }
 0x20e   :  { %2421 = vmatpush.msrb.mxu0 %v1058_v24  ;;  %2440 = vmatpush.msrb.mxu1 %v1075_v25  ;;  %v1126_v24 = vld [vmem:[%s6277_s1 + $0x2060] sm:$0xff]  ;;  %v1143_v25 = vld [vmem:[%s6277_s1 + $0x20e8] sm:$0xff] }
 0x20f   :  { %2461 = vmatpush.msrb.mxu2 %v1090_v26  ;;  %2480 = vmatpush.msrb.mxu3 %v1107_v27  ;;  %v1352_v26 = vadd.f32 %v1351_v19, %v1332_v16  ;;  %v1158_v27 = vld [vmem:[%s6277_s1 + $0x2160] sm:$0xff]  ;;  %v1148_v16 = vld [vmem:[%s6277_s1 + $0x2110] sm:$0xff]  ;;  %v1115_v19 = vld [vmem:[%s6277_s1 + $0x2008] sm:$0xff] }
 0x210   :  { %2422 = vmatpush.msrb.mxu0 %v1057_v28  ;;  %2441 = vmatpush.msrb.mxu1 %v1074_v29  ;;  %v1175_v28 = vld [vmem:[%s6277_s1 + $0x21e8] sm:$0xff]  ;;  %v1371_v29 = vpop.f32.mrf.mxu3 }
 0x211   :  { %2462 = vmatpush.msrb.mxu2 %v1089_v31  ;;  %2481 = vmatpush.msrb.mxu3 %v1106_v32  ;;  %v1142_v31 = vld [vmem:[%s6277_s1 + $0x20e0] sm:$0xff]  ;;  %v1157_v32 = vld [vmem:[%s6277_s1 + $0x2158] sm:$0xff] }
 0x212   :  { %2423 = vmatpush.msrb.mxu0 %v1056_v34  ;;  %2442 = vmatpush.msrb.mxu1 %v1073_v35  ;;  %v1391_v34 = vpop.f32.mrf.mxu0  ;;  %v1124_v35 = vld [vmem:[%s6277_s1 + $0x2050] sm:$0xff] }
 0x213   :  { %2463 = vmatpush.msrb.mxu2 %v1088_v36  ;;  %2482 = vmatpush.msrb.mxu3 %v1105_v37  ;;  %v1141_v36 = vld [vmem:[%s6277_s1 + $0x20d8] sm:$0xff]  ;;  %v1372_v37 = vadd.f32 %v1371_v29, %v1352_v26 }
 0x214   :  { %2424 = vmatpush.msrb.mxu0 %v1055_v38  ;;  %2443 = vmatpush.msrb.mxu1 %v1072_v39  ;;  %v1156_v38 = vld [vmem:[%s6277_s1 + $0x2150] sm:$0xff]  ;;  %v1173_v39 = vld [vmem:[%s6277_s1 + $0x21d8] sm:$0xff]  ;;  %v1431_v50 = vpop.f32.mrf.mxu2 }
 0x215   :  { %2464 = vmatpush.msrb.mxu2 %v1087_v41  ;;  %2483 = vmatpush.msrb.mxu3 %v1104_v42  ;;  %v1140_v41 = vld [vmem:[%s6277_s1 + $0x20d0] sm:$0xff]  ;;  %v1392_v42 = vadd.f32 %v1391_v34, %v1372_v37 }
 0x216   :  { %2425 = vmatpush.msrb.mxu0 %v1054_v44  ;;  %2444 = vmatpush.msrb.mxu1 %v1071_v45  ;;  %v1172_v44 = vld [vmem:[%s6277_s1 + $0x21d0] sm:$0xff]  ;;  %v1411_v45 = vpop.f32.mrf.mxu1 }
 0x217   :  { %2465 = vmatpush.msrb.mxu2 %v1086_v46  ;;  %2484 = vmatpush.msrb.mxu3 %v1103_v47  ;;  %v1122_v46 = vld [vmem:[%s6277_s1 + $0x2040] sm:$0xff]  ;;  %v1139_v47 = vld [vmem:[%s6277_s1 + $0x20c8] sm:$0xff]  ;;  %v1412_v53 = vadd.f32 %v1411_v45, %v1392_v42 }
 0x218   :  { %2426 = vmatpush.msrb.mxu0 %v1053_v48  ;;  %2445 = vmatpush.msrb.mxu1 %v1070_v49  ;;  %v1154_v48 = vld [vmem:[%s6277_s1 + $0x2140] sm:$0xff]  ;;  %v1171_v49 = vld [vmem:[%s6277_s1 + $0x21c8] sm:$0xff] }
 0x219   :  { %2466 = vmatpush.msrb.mxu2 %v1085_v51  ;;  %2485 = vmatpush.msrb.mxu3 %v1102_v52  ;;  %v1121_v51 = vld [vmem:[%s6277_s1 + $0x2038] sm:$0xff]  ;;  %v1138_v52 = vld [vmem:[%s6277_s1 + $0x20c0] sm:$0xff]  ;;  %v1191_v42 = vld [vmem:[%s6277_s1 + $0x2268] sm:$0xff] }
 0x21a   :  { %2427 = vmatpush.msrb.mxu0 %v1052_v54  ;;  %2446 = vmatpush.msrb.mxu1 %v1069_v55  ;;  %v1153_v54 = vld [vmem:[%s6277_s1 + $0x2138] sm:$0xff]  ;;  %v1170_v55 = vld [vmem:[%s6277_s1 + $0x21c0] sm:$0xff] }
 0x21b   :  { %2467 = vmatpush.msrb.mxu2 %v1084_v56  ;;  %2486 = vmatpush.msrb.mxu3 %v1101_v57  ;;  %v1120_v56 = vld [vmem:[%s6277_s1 + $0x2030] sm:$0xff]  ;;  %v1137_v57 = vld [vmem:[%s6277_s1 + $0x20b8] sm:$0xff]  ;;  %v1190_v45 = vld [vmem:[%s6277_s1 + $0x2260] sm:$0xff] }
 0x21c   :  { %2428 = vmatpush.msrb.mxu0 %v1051_v58  ;;  %2447 = vmatpush.msrb.mxu1 %v1068_v59  ;;  %v1432_v58 = vadd.f32 %v1431_v50, %v1412_v53  ;;  %v1152_v59 = vld [vmem:[%s6277_s1 + $0x2130] sm:$0xff]  ;;  %v1206_v50 = vld [vmem:[%s6277_s1 + $0x22e0] sm:$0xff] }
 0x21d   :  { %2468 = vmatpush.msrb.mxu2 %v1083_v61  ;;  %2487 = vmatpush.msrb.mxu3 %v1100_v62  ;;  %v1451_v61 = vpop.f32.mrf.mxu3  ;;  %v1119_v62 = vld [vmem:[%s6277_s1 + $0x2028] sm:$0xff] }
 0x21e   :  { %2429 = vmatpush.msrb.mxu0 %v1050_v0  ;;  %2448 = vmatpush.msrb.mxu1 %v1067_v1  ;;  %v1151_v0 = vld [vmem:[%s6277_s1 + $0x2128] sm:$0xff]  ;;  %v1168_v1 = vld [vmem:[%s6277_s1 + $0x21b0] sm:$0xff] }
 0x21f   :  { %2469 = vmatpush.msrb.mxu2 %v1082_v2  ;;  %2488 = vmatpush.msrb.mxu3 %v1099_v3  ;;  %v1471_v2 = vpop.f32.mrf.mxu0  ;;  %v1118_v3 = vld [vmem:[%s6277_s1 + $0x2020] sm:$0xff] }
 0x220   :  { %2430 = vmatmul.f32.vlgmr.msrb.gmra.mxu0 %v80_v4  ;;  %2470 = vmatmul.f32.vlgmr.msrb.gmra.mxu2 %v82_v5  ;;  %v1135_v4 = vld [vmem:[%s6277_s1 + $0x20a8] sm:$0xff]  ;;  %v1452_v5 = vadd.f32 %v1451_v61, %v1432_v58 }
 0x221   :  { %2494 = vmatpush.msra.mxu0 %v1129_v7  ;;  %2534 = vmatpush.msra.mxu2 %v1161_v8  ;;  %v1167_v7 = vld [vmem:[%s6277_s1 + $0x21a8] sm:$0xff]  ;;  %v1117_v8 = vld [vmem:[%s6277_s1 + $0x2018] sm:$0xff] }
 0x222   :  { %2449 = vmatpush.msrb.mxu1 %v1066_v10  ;;  %2489 = vmatpush.msrb.mxu3 %v1098_v11  ;;  %v1472_v10 = vadd.f32 %v1471_v2, %v1452_v5  ;;  %v1149_v11 = vld [vmem:[%s6277_s1 + $0x2118] sm:$0xff]  ;;  %v1183_v5 = vld [vmem:[%s6277_s1 + $0x2228] sm:$0xff] }
 0x223   :  { %2450 = vmatmul.f32.vlgmr.msrb.gmra.mxu1 %v81_v12  ;;  %2490 = vmatmul.f32.vlgmr.msrb.gmra.mxu3 %v83_v13  ;;  %v1166_v12 = vld [vmem:[%s6277_s1 + $0x21a0] sm:$0xff]  ;;  %v1491_v13 = vpop.f32.mrf.mxu1 }
 0x224   :  { %2495 = vmatpush.msra.mxu0 %v1128_v14  ;;  %2514 = vmatpush.msra.mxu1 %v1145_v15  ;;  %v1116_v14 = vld [vmem:[%s6277_s1 + $0x2010] sm:$0xff]  ;;  %v1133_v15 = vld [vmem:[%s6277_s1 + $0x2098] sm:$0xff] }
 0x225   :  { %2535 = vmatpush.msra.mxu2 %v1160_v17  ;;  %2554 = vmatpush.msra.mxu3 %v1177_v18  ;;  %v1165_v17 = vld [vmem:[%s6277_s1 + $0x2198] sm:$0xff]  ;;  %v1511_v18 = vpop.f32.mrf.mxu2  ;;  %v1531_v29 = vpop.f32.mrf.mxu3 }
 0x226   :  { %2496 = vmatpush.msra.mxu0 %v1127_v20  ;;  %2515 = vmatpush.msra.mxu1 %v1144_v21  ;;  %v1132_v20 = vld [vmem:[%s6277_s1 + $0x2090] sm:$0xff]  ;;  %v1492_v21 = vadd.f32 %v1491_v13, %v1472_v10  ;;  %v1199_v10 = vld [vmem:[%s6277_s1 + $0x22a8] sm:$0xff]  ;;  %v1198_v13 = vld [vmem:[%s6277_s1 + $0x22a0] sm:$0xff] }
 0x227   :  { %2536 = vmatpush.msra.mxu2 %v1159_v22  ;;  %2555 = vmatpush.msra.mxu3 %v1176_v23  ;;  %v1147_v22 = vld [vmem:[%s6277_s1 + $0x2108] sm:$0xff]  ;;  %v1164_v23 = vld [vmem:[%s6277_s1 + $0x2190] sm:$0xff]  ;;  %v1551_v34 = vpop.f32.mrf.mxu0 }
 0x228   :  { %2497 = vmatpush.msra.mxu0 %v1126_v24  ;;  %2516 = vmatpush.msra.mxu1 %v1143_v25  ;;  %v1114_v24 = vld [vmem:[%s6277_s1 + $0x2000] sm:$0xff]  ;;  %v1131_v25 = vld [vmem:[%s6277_s1 + $0x2088] sm:$0xff]  ;;  %v1512_v26 = vadd.f32 %v1511_v18, %v1492_v21 }
 0x229   :  { %2537 = vmatpush.msra.mxu2 %v1158_v27  ;;  %2556 = vmatpush.msra.mxu3 %v1175_v28  ;;  %v1146_v27 = vld [vmem:[%s6277_s1 + $0x2100] sm:$0xff]  ;;  %v1163_v28 = vld [vmem:[%s6277_s1 + $0x2188] sm:$0xff] }
 0x22a   :  { %2498 = vmatpush.msra.mxu0 %v1125_v30  ;;  %2517 = vmatpush.msra.mxu1 %v1142_v31  ;;  %v84_v30 = vld [vmem:[%s6278_s0 + $0x200] sm:$0xff]  ;;  %v86_v31 = vld [vmem:[%s6278_s0 + $0x210] sm:$0xff]  ;;  %v1532_v37 = vadd.f32 %v1531_v29, %v1512_v26  ;;  %v1179_v18 = vld [vmem:[%s6277_s1 + $0x2208] sm:$0xff] }
 0x22b   :  { %2538 = vmatpush.msra.mxu2 %v1157_v32  ;;  %2557 = vmatpush.msra.mxu3 %v1174_v33  ;;  %v1193_v32 = vld [vmem:[%s6277_s1 + $0x2278] sm:$0xff]  ;;  %v1130_v33 = vld [vmem:[%s6277_s1 + $0x2080] sm:$0xff] }
 0x22c   :  { %2499 = vmatpush.msra.mxu0 %v1124_v35  ;;  %2518 = vmatpush.msra.mxu1 %v1141_v36  ;;  %v1162_v35 = vld [vmem:[%s6277_s1 + $0x2180] sm:$0xff]  ;;  %v85_v36 = vld [vmem:[%s6278_s0 + $0x208] sm:$0xff] }
 0x22d   :  { %2539 = vmatpush.msra.mxu2 %v1156_v38  ;;  %2558 = vmatpush.msra.mxu3 %v1173_v39  ;;  %v87_v38 = vld [vmem:[%s6278_s0 + $0x218] sm:$0xff]  ;;  %v1192_v39 = vld [vmem:[%s6277_s1 + $0x2270] sm:$0xff]  ;;  %v1611_v53 = vpop.f32.mrf.mxu3  ;;  %v1178_v21 = vld [vmem:[%s6277_s1 + $0x2200] sm:$0xff] }
 0x22e   :  { %2500 = vmatpush.msra.mxu0 %v1123_v40  ;;  %2519 = vmatpush.msra.mxu1 %v1140_v41  ;;  %v1209_v40 = vld [vmem:[%s6277_s1 + $0x22f8] sm:$0xff]  ;;  %v1552_v41 = vadd.f32 %v1551_v34, %v1532_v37  ;;  %v1194_v26 = vld [vmem:[%s6277_s1 + $0x2280] sm:$0xff] }
 0x22f   :  { %2540 = vmatpush.msra.mxu2 %v1155_v43  ;;  %2559 = vmatpush.msra.mxu3 %v1172_v44  ;;  %v1571_v43 = vpop.f32.mrf.mxu1  ;;  %v1208_v44 = vld [vmem:[%s6277_s1 + $0x22f0] sm:$0xff] }
 0x230   :  { %2501 = vmatpush.msra.mxu0 %v1122_v46  ;;  %2520 = vmatpush.msra.mxu1 %v1139_v47  ;;  %v1591_v46 = vpop.f32.mrf.mxu2  ;;  %v1207_v47 = vld [vmem:[%s6277_s1 + $0x22e8] sm:$0xff] }
 0x231   :  { %2541 = vmatpush.msra.mxu2 %v1154_v48  ;;  %2560 = vmatpush.msra.mxu3 %v1171_v49  ;;  %v1572_v48 = vadd.f32 %v1571_v43, %v1552_v41  ;;  %v1189_v49 = vld [vmem:[%s6277_s1 + $0x2258] sm:$0xff] }
 0x232   :  { %2502 = vmatpush.msra.mxu0 %v1121_v51  ;;  %2521 = vmatpush.msra.mxu1 %v1138_v52  ;;  %v1188_v52 = vld [vmem:[%s6277_s1 + $0x2250] sm:$0xff] }
 0x233   :  { %2542 = vmatpush.msra.mxu2 %v1153_v54  ;;  %2561 = vmatpush.msra.mxu3 %v1170_v55  ;;  %v1592_v51 = vadd.f32 %v1591_v46, %v1572_v48  ;;  %v1205_v54 = vld [vmem:[%s6277_s1 + $0x22d8] sm:$0xff]  ;;  %v1187_v55 = vld [vmem:[%s6277_s1 + $0x2248] sm:$0xff] }
 0x234   :  { %2503 = vmatpush.msra.mxu0 %v1120_v56  ;;  %2522 = vmatpush.msra.mxu1 %v1137_v57  ;;  %v1631_v56 = vpop.f32.mrf.mxu0  ;;  %v1204_v57 = vld [vmem:[%s6277_s1 + $0x22d0] sm:$0xff] }
 0x235   :  { %2543 = vmatpush.msra.mxu2 %v1152_v59  ;;  %2562 = vmatpush.msra.mxu3 %v1169_v60  ;;  %v1612_v58 = vadd.f32 %v1611_v53, %v1592_v51  ;;  %v1186_v59 = vld [vmem:[%s6277_s1 + $0x2240] sm:$0xff]  ;;  %v1203_v60 = vld [vmem:[%s6277_s1 + $0x22c8] sm:$0xff] }
 0x236   :  { %2504 = vmatpush.msra.mxu0 %v1119_v62  ;;  %2523 = vmatpush.msra.mxu1 %v1136_v63  ;;  %v1185_v62 = vld [vmem:[%s6277_s1 + $0x2238] sm:$0xff] }
 0x237   :  { %2544 = vmatpush.msra.mxu2 %v1151_v0  ;;  %2563 = vmatpush.msra.mxu3 %v1168_v1  ;;  %v1632_v61 = vadd.f32 %v1631_v56, %v1612_v58  ;;  %v1651_v63 = vpop.f32.mrf.mxu1  ;;  %v1202_v0 = vld [vmem:[%s6277_s1 + $0x22c0] sm:$0xff]  ;;  %v1184_v1 = vld [vmem:[%s6277_s1 + $0x2230] sm:$0xff] }
 0x238   :  { %2505 = vmatpush.msra.mxu0 %v1118_v3  ;;  %2524 = vmatpush.msra.mxu1 %v1135_v4  ;;  %v1671_v2 = vpop.f32.mrf.mxu2  ;;  %v1201_v3 = vld [vmem:[%s6277_s1 + $0x22b8] sm:$0xff] }
 0x239   :  { %2545 = vmatpush.msra.mxu2 %v1150_v6  ;;  %2564 = vmatpush.msra.mxu3 %v1167_v7  ;;  %v1652_v4 = vadd.f32 %v1651_v63, %v1632_v61  ;;  %v1200_v6 = vld [vmem:[%s6277_s1 + $0x22b0] sm:$0xff] }
 0x23a   :  { %2506 = vmatpush.msra.mxu0 %v1117_v8  ;;  %2525 = vmatpush.msra.mxu1 %v1134_v9  ;;  %v1182_v8 = vld [vmem:[%s6277_s1 + $0x2220] sm:$0xff]  ;;  %v1691_v9 = vpop.f32.mrf.mxu3 }
 0x23b   :  { %2546 = vmatpush.msra.mxu2 %v1149_v11  ;;  %2565 = vmatpush.msra.mxu3 %v1166_v12  ;;  %v1672_v7 = vadd.f32 %v1671_v2, %v1652_v4  ;;  %v1181_v11 = vld [vmem:[%s6277_s1 + $0x2218] sm:$0xff] }
 0x23c   :  { %2507 = vmatpush.msra.mxu0 %v1116_v14  ;;  %2526 = vmatpush.msra.mxu1 %v1133_v15  ;;  %v1711_v12 = vpop.f32.mrf.mxu0  ;;  %v1180_v15 = vld [vmem:[%s6277_s1 + $0x2210] sm:$0xff] }
 0x23d   :  { %2547 = vmatpush.msra.mxu2 %v1148_v16  ;;  %2566 = vmatpush.msra.mxu3 %v1165_v17  ;;  %v1692_v14 = vadd.f32 %v1691_v9, %v1672_v7  ;;  %v1197_v16 = vld [vmem:[%s6277_s1 + $0x2298] sm:$0xff] }
 0x23e   :  { %2508 = vmatpush.msra.mxu0 %v1115_v19  ;;  %2527 = vmatpush.msra.mxu1 %v1132_v20  ;;  %v1196_v20 = vld [vmem:[%s6277_s1 + $0x2290] sm:$0xff] }
 0x23f   :  { %2548 = vmatpush.msra.mxu2 %v1147_v22  ;;  %2567 = vmatpush.msra.mxu3 %v1164_v23  ;;  %v1712_v17 = vadd.f32 %v1711_v12, %v1692_v14  ;;  %v1731_v19 = vpop.f32.mrf.mxu1  ;;  %v1195_v23 = vld [vmem:[%s6277_s1 + $0x2288] sm:$0xff]  ;;  %v2618_v12 = vld [vmem:[%s6281_s3 + $0x18] sm:$0xff] }
 0x240   :  { %2509 = vmatpush.msra.mxu0 %v1114_v24  ;;  %2528 = vmatpush.msra.mxu1 %v1131_v25  ;;  %v1751_v22 = vpop.f32.mrf.mxu2  ;;  %v88_v24 = vld [vmem:[%s6278_s0 + $0x220] sm:$0xff] }
 0x241   :  { %2549 = vmatpush.msra.mxu2 %v1146_v27  ;;  %2568 = vmatpush.msra.mxu3 %v1163_v28  ;;  %v1732_v25 = vadd.f32 %v1731_v19, %v1712_v17  ;;  %v89_v28 = vld [vmem:[%s6278_s0 + $0x228] sm:$0xff] }
 0x242   :  { %2510 = vmatmul.f32.vlgmr.msra.gmra.mxu0 %v84_v30  ;;  %2550 = vmatmul.f32.vlgmr.msra.gmra.mxu2 %v86_v31  ;;  %v1771_v29 = vpop.f32.mrf.mxu3 }
 0x243   :  { %2574 = vmatpush.msrb.mxu0 %v1193_v32  ;;  %2529 = vmatpush.msra.mxu1 %v1130_v33  ;;  %v1752_v27 = vadd.f32 %v1751_v22, %v1732_v25 }
 0x244   :  { %2569 = vmatpush.msra.mxu3 %v1162_v35  ;;  %2530 = vmatmul.f32.vlgmr.msra.gmra.mxu1 %v85_v36  ;;  %v1791_v30 = vpop.f32.mrf.mxu0 }
 0x245   :  { %2570 = vmatmul.f32.vlgmr.msra.gmra.mxu3 %v87_v38  ;;  %2575 = vmatpush.msrb.mxu0 %v1192_v39  ;;  %v1772_v31 = vadd.f32 %v1771_v29, %v1752_v27  ;;  %v2617_v29 = vld [vmem:[%s6281_s3 + $0x10] sm:$0xff] }
 0x246   :  { %2594 = vmatpush.msrb.mxu1 %v1209_v40  ;;  %2639 = vmatpush.msrb.mxu2 %v2618_v12 }
 0x247   :  { %2576 = vmatpush.msrb.mxu0 %v1191_v42  ;;  %v1792_v32 = vadd.f32 %v1791_v30, %v1772_v31  ;;  %v1811_v33 = vpop.f32.mrf.mxu1 }
 0x248   :  { %2595 = vmatpush.msrb.mxu1 %v1208_v44  ;;  %v1831_v34 = vpop.f32.mrf.mxu2  ;;  %2640 = vmatpush.msrb.mxu2 %v2617_v29 }
 0x249   :  { %2577 = vmatpush.msrb.mxu0 %v1190_v45  ;;  %v1812_v35 = vadd.f32 %v1811_v33, %v1792_v32  ;;  %v2616_v32 = vld [vmem:[%s6281_s3 + $0x8] sm:$0xff] }
 0x24a   :  { %2596 = vmatpush.msrb.mxu1 %v1207_v47  ;;  %v1851_v37 = vpop.f32.mrf.mxu3  ;;  %2641 = vmatpush.msrb.mxu2 %v2616_v32 }
 0x24b   :  { %2578 = vmatpush.msrb.mxu0 %v1189_v49  ;;  %v1832_v36 = vadd.f32 %v1831_v34, %v1812_v35  ;;  %v2615_v34 = vld [vmem:[%s6281_s3] sm:$0xff] }
 0x24c   :  { %2597 = vmatpush.msrb.mxu1 %v1206_v50  ;;  %v1871_v38 = vpop.f32.mrf.mxu0  ;;  %2642 = vmatpush.msrb.mxu2 %v2615_v34 }
 0x24d   :  { %2579 = vmatpush.msrb.mxu0 %v1188_v52  ;;  %v1852_v39 = vadd.f32 %v1851_v37, %v1832_v36 }
 0x24e   :  { %2598 = vmatpush.msrb.mxu1 %v1205_v54 }
 0x24f   :  { %2580 = vmatpush.msrb.mxu0 %v1187_v55  ;;  %v1872_v40 = vadd.f32 %v1871_v38, %v1852_v39  ;;  %v1891_v41 = vpop.f32.mrf.mxu1 }
 0x250   :  { %2599 = vmatpush.msrb.mxu1 %v1204_v57  ;;  %v1911_v42 = vpop.f32.mrf.mxu2 }
 0x251   :  { %2581 = vmatpush.msrb.mxu0 %v1186_v59  ;;  %v1892_v43 = vadd.f32 %v1891_v41, %v1872_v40 }
 0x252   :  { %2600 = vmatpush.msrb.mxu1 %v1203_v60  ;;  %v1931_v45 = vpop.f32.mrf.mxu3 }
 0x253   :  { %2582 = vmatpush.msrb.mxu0 %v1185_v62  ;;  %v1912_v44 = vadd.f32 %v1911_v42, %v1892_v43 }
 0x254   :  { %2601 = vmatpush.msrb.mxu1 %v1202_v0  ;;  %v1951_v46 = vpop.f32.mrf.mxu0 }
 0x255   :  { %2583 = vmatpush.msrb.mxu0 %v1184_v1  ;;  %v1932_v47 = vadd.f32 %v1931_v45, %v1912_v44 }
 0x256   :  { %2602 = vmatpush.msrb.mxu1 %v1201_v3 }
 0x257   :  { %2584 = vmatpush.msrb.mxu0 %v1183_v5  ;;  %v1952_v48 = vadd.f32 %v1951_v46, %v1932_v47  ;;  %v1971_v49 = vpop.f32.mrf.mxu1 }
 0x258   :  { %2603 = vmatpush.msrb.mxu1 %v1200_v6  ;;  %v1991_v50 = vpop.f32.mrf.mxu2 }
 0x259   :  { %2585 = vmatpush.msrb.mxu0 %v1182_v8  ;;  %v1972_v51 = vadd.f32 %v1971_v49, %v1952_v48 }
 0x25a   :  { %2604 = vmatpush.msrb.mxu1 %v1199_v10  ;;  %v2011_v53 = vpop.f32.mrf.mxu3 }
 0x25b   :  { %2586 = vmatpush.msrb.mxu0 %v1181_v11  ;;  %v1992_v52 = vadd.f32 %v1991_v50, %v1972_v51 }
 0x25c   :  { %2605 = vmatpush.msrb.mxu1 %v1198_v13  ;;  %v2031_v54 = vpop.f32.mrf.mxu0 }
 0x25d   :  { %2587 = vmatpush.msrb.mxu0 %v1180_v15  ;;  %v2012_v55 = vadd.f32 %v2011_v53, %v1992_v52 }
 0x25e   :  { %2606 = vmatpush.msrb.mxu1 %v1197_v16 }
 0x25f   :  { %2588 = vmatpush.msrb.mxu0 %v1179_v18  ;;  %v2032_v56 = vadd.f32 %v2031_v54, %v2012_v55  ;;  %v2051_v57 = vpop.f32.mrf.mxu1 }
 0x260   :  { %2607 = vmatpush.msrb.mxu1 %v1196_v20  ;;  %v2071_v58 = vpop.f32.mrf.mxu2 }
 0x261   :  { %2589 = vmatpush.msrb.mxu0 %v1178_v21  ;;  %v2052_v59 = vadd.f32 %v2051_v57, %v2032_v56  ;;  %v2655_v56 = vld [vmem:[%s6280_s4] ss:$0 sm:$0xff] }
 0x262   :  { %2608 = vmatpush.msrb.mxu1 %v1195_v23  ;;  %2590 = vmatmul.f32.vlgmr.msrb.gmra.mxu0 %v88_v24  ;;  %v2091_v61 = vpop.f32.mrf.mxu3 }
 0x263   :  { %v2072_v60 = vadd.f32 %v2071_v58, %v2052_v59 }
 0x264   :  { %2609 = vmatpush.msrb.mxu1 %v1194_v26  ;;  %v2111_v62 = vpop.f32.mrf.mxu0 }
 0x265   :  { %2610 = vmatmul.f32.vlgmr.msrb.gmra.mxu1 %v89_v28  ;;  %v2092_v63 = vadd.f32 %v2091_v61, %v2072_v60 }
 0x267   :  { %v2112_v0 = vadd.f32 %v2111_v62, %v2092_v63  ;;  %v2131_v1 = vpop.f32.mrf.mxu1 }
 0x268   :  { %v2151_v2 = vpop.f32.mrf.mxu2 }
 0x269   :  { %v2132_v3 = vadd.f32 %v2131_v1, %v2112_v0 }
 0x26a   :  { %v2171_v5 = vpop.f32.mrf.mxu3 }
 0x26b   :  { %v2152_v4 = vadd.f32 %v2151_v2, %v2132_v3 }
 0x26c   :  { %v2191_v6 = vpop.f32.mrf.mxu0 }
 0x26d   :  { %v2172_v7 = vadd.f32 %v2171_v5, %v2152_v4 }
 0x26f   :  { %v2192_v8 = vadd.f32 %v2191_v6, %v2172_v7  ;;  %v2211_v9 = vpop.f32.mrf.mxu1 }
 0x270   :  { %v2231_v10 = vpop.f32.mrf.mxu2 }
 0x271   :  { %v2212_v11 = vadd.f32 %v2211_v9, %v2192_v8 }
 0x272   :  { %v2251_v14 = vpop.f32.mrf.mxu3 }
 0x273   :  { %v2232_v13 = vadd.f32 %v2231_v10, %v2212_v11 }
 0x274   :  { %v2271_v15 = vpop.f32.mrf.mxu0 }
 0x275   :  { %v2252_v16 = vadd.f32 %v2251_v14, %v2232_v13 }
 0x277   :  { %v2272_v17 = vadd.f32 %v2271_v15, %v2252_v16  ;;  %v2291_v18 = vpop.f32.mrf.mxu1 }
 0x278   :  { %v2311_v19 = vpop.f32.mrf.mxu2 }
 0x279   :  { %v2292_v20 = vadd.f32 %v2291_v18, %v2272_v17 }
 0x27a   :  { %v2331_v22 = vpop.f32.mrf.mxu3 }
 0x27b   :  { %v2312_v21 = vadd.f32 %v2311_v19, %v2292_v20 }
 0x27c   :  { %v2351_v23 = vpop.f32.mrf.mxu0 }
 0x27d   :  { %v2332_v24 = vadd.f32 %v2331_v22, %v2312_v21 }
 0x27f   :  { %v2352_v25 = vadd.f32 %v2351_v23, %v2332_v24  ;;  %v2371_v26 = vpop.f32.mrf.mxu1 }
 0x281   :  { %v2391_v27 = vpop.f32.mrf.mxu2  ;;  %v2372_v28 = vadd.f32 %v2371_v26, %v2352_v25 }
 0x283   :  { %v2392_v30 = vadd.f32 %v2391_v27, %v2372_v28 }
 0x284   :  { %v2411_v31 = vpop.f32.mrf.mxu3 }
 0x285   :  { %v2412_v35 = vadd.f32 %v2411_v31, %v2392_v30 }
 0x29d   :  { %v2431_v33 = vpop.f32.mrf.mxu0 }
 0x29e   :  { %v2432_v36 = vadd.f32 %v2431_v33, %v2412_v35 }
 0x2a0   :  { %v2451_v37 = vpop.f32.mrf.mxu1 }
 0x2a1   :  { %v2452_v39 = vadd.f32 %v2451_v37, %v2432_v36 }
 0x2a3   :  { %v2471_v38 = vpop.f32.mrf.mxu2 }
 0x2a4   :  { %v2472_v40 = vadd.f32 %v2471_v38, %v2452_v39 }
 0x2a6   :  { %v2491_v41 = vpop.f32.mrf.mxu3 }
 0x2a7   :  { %v2492_v43 = vadd.f32 %v2491_v41, %v2472_v40 }
 0x2bf   :  { %v2511_v42 = vpop.f32.mrf.mxu0 }
 0x2c0   :  { %v2512_v44 = vadd.f32 %v2511_v42, %v2492_v43 }
 0x2c1   :  { %v2531_v45 = vpop.f32.mrf.mxu1 }
 0x2c2   :  { %v2532_v47 = vadd.f32 %v2531_v45, %v2512_v44 }
 0x2c5   :  { %v2551_v46 = vpop.f32.mrf.mxu2 }
 0x2c6   :  { %v2552_v48 = vadd.f32 %v2551_v46, %v2532_v47 }
 0x2c8   :  { %v2571_v49 = vpop.f32.mrf.mxu3 }
 0x2c9   :  { %v2572_v50 = vadd.f32 %v2571_v49, %v2552_v48 }
 0x2df   :  { %v2591_v51 = vpop.f32.mrf.mxu0 }
 0x2e0   :  { %v2592_v52 = vadd.f32 %v2591_v51, %v2572_v50 }
 0x2e2   :  { %v2611_v53 = vpop.f32.mrf.mxu1 }
 0x2e3   :  { %v2612_v54 = vadd.f32 %v2611_v53, %v2592_v52 }
 0x2e5   :  { %v2614_v55 = vmax.f32 %v2612_v54, 0.0 }
 0x2e7   :  { %2653 = vmatmul.msk.f32.vlgmr.msrb.gmra.mxu2 %vm2623_vm0, %v2614_v55 }
 0x36a   :  { %v2644_v57 = vpop.f32.mrf.mxu2 }
 0x36b   :  { %v2645_v58 = vadd.f32 %v2655_v56, %v2644_v57 }
 0x36d   :  { %2648 = vst.msk [vmem:[%s6282_s5] sm:$0xff] %vm2647_vm1, %v2645_v58 }

</bundles_post_ra>
